<compile_context>
chip_gen: v7x
topology: tpu7x:2x2x1
jax: 0.10.0
libtpu: 0.0.40
codegen_flags: <defaults>
</compile_context>

<pallas_src>
import functools
import math

import jax
import jax.numpy as jnp
from jax.experimental import pallas as pl
from jax.experimental.pallas import tpu as pltpu


# ---------------------------------------------------------------------------
# Fused forward kernel
# ---------------------------------------------------------------------------
# Activation layout: 2-D (rows, lanes) arrays with rows r = h*NB + b
# (NB = padded 2*batch: data1 rows, then data2 rows, then zero-pad rows, per h).
# conv1/conv2 activations keep one 128-lane block per spatial output column.

def _siamese_fused_kernel(x_ref, w1_ref, b1_ref, w2_ref, b2_ref, w3_ref, b3_ref,
                          wl1_ref, bl1_ref, wl2_ref, bl2_ref, o_ref, *,
                          batch, nb):
    f32 = jnp.float32
    x = x_ref[...]                                   # (20*nb, 8), row r = h*nb + b

    # conv1 (1 -> 64, k=4) + ReLU.  w1_ref[i] is (8, 640): lane block wo*128..+63
    # holds conv1_w[:, 0, i, :] shifted to input columns wo..wo+3.  One dot per
    # vertical tap i produces ALL five output columns at once.
    R1 = 17 * nb
    acc = jnp.dot(x[0:R1, :], w1_ref[0], preferred_element_type=f32)
    for i in range(1, 4):
        acc = acc + jnp.dot(x[i * nb:i * nb + R1, :], w1_ref[i],
                            preferred_element_type=f32)
    a1 = jnp.maximum(acc + b1_ref[...], 0.0)          # (R1, 640)

    # conv2 (64 -> 128, k=3) + ReLU: per output column wo, 3 dots (one per
    # vertical tap) of (R2, 384) @ (384, 128); the 3 horizontal taps live in the
    # 128-lane-aligned K blocks of w2_ref[i].
    R2 = 15 * nb
    a2 = []
    for wo in range(3):
        c0 = wo * 128
        acc = jnp.dot(a1[0:R2, c0:c0 + 384], w2_ref[0],
                      preferred_element_type=f32)
        for i in range(1, 3):
            acc = acc + jnp.dot(a1[i * nb:i * nb + R2, c0:c0 + 384], w2_ref[i],
                                preferred_element_type=f32)
        a2.append(jnp.maximum(acc + b2_ref[...], 0.0))  # (R2, 128)

    # conv3 (128 -> 128, k=2) + ReLU: per output column, 4 dots (R3,128)@(128,128).
    R3 = 14 * nb
    a3 = []
    for wo in range(2):
        acc = None
        for i in range(2):
            for j in range(2):
                d = jnp.dot(a2[wo + j][i * nb:i * nb + R3, :], w3_ref[i * 2 + j],
                            preferred_element_type=f32)
                acc = d if acc is None else acc + d
        a3.append(jnp.maximum(acc + b3_ref[...], 0.0))  # (R3, 128)

    # MaxPool2d(2): width 2 -> 1 (max of the two columns), height 14 -> 7
    # (max of row blocks 2h and 2h+1; each block is the nb batch rows).
    m = jnp.maximum(a3[0], a3[1])                      # (R3, 128)

    # linear1 (896 -> 512) + ReLU.  PyTorch's NCHW view(B,-1) order (idx = c*7+h)
    # is baked into wl1_ref offline -> 7 dots of (nb, 128) @ (128, 512).
    acc = None
    for h in range(7):
        top = m[(2 * h) * nb:(2 * h) * nb + nb, :]
        bot = m[(2 * h + 1) * nb:(2 * h + 1) * nb + nb, :]
        d = jnp.dot(jnp.maximum(top, bot), wl1_ref[h],
                    preferred_element_type=f32)
        acc = d if acc is None else acc + d
    feat = jnp.maximum(acc + bl1_ref[...], 0.0)        # (nb, 512)

    # classify: sigmoid(|f2 - f1| @ linear2_w.T + b) as a lane-dense VPU reduce
    # (avoids an N=1 MXU matmul).  Numerically stable sigmoid via exp(-|x|).
    diff = jnp.abs(feat[batch:2 * batch, :] - feat[0:batch, :])   # (batch, 512)
    logits = jnp.sum(diff * wl2_ref[...], axis=-1, keepdims=True) + bl2_ref[...]
    e = jnp.exp(-jnp.abs(logits))
    o_ref[...] = jnp.where(logits >= 0.0, 1.0 / (1.0 + e), e / (1.0 + e))


# TODO(synk): for large batches, tile the (padded) batch over a "parallel" grid
# axis so v7x's two TensorCores split the work; at batch=2 one step is optimal.
def _fused_forward(x_rows, p, batch, nb):
    def full(arr):
        shape = arr.shape
        return pl.BlockSpec(shape, lambda *_: (0,) * len(shape))

    operands = (x_rows, p["w1"], p["b1"], p["w2"], p["b2"], p["w3"], p["b3"],
                p["wl1"], p["bl1"], p["wl2"], p["bl2"])
    return pl.pallas_call(
        functools.partial(_siamese_fused_kernel, batch=batch, nb=nb),
        out_shape=jax.ShapeDtypeStruct((batch, 1), jnp.float32),
        grid=(1,),
        in_specs=[full(a) for a in operands],
        out_specs=pl.BlockSpec((batch, 1), lambda *_: (0, 0)),
        compiler_params=pltpu.CompilerParams(
            dimension_semantics=("arbitrary",)),
    )(*operands)


# ---------------------------------------------------------------------------
# Parameters: PyTorch-layout init + one-time re-layout for the fused kernel
# ---------------------------------------------------------------------------

def init_params(key):
    def uni(k, shape, fan_in):
        bound = 1.0 / math.sqrt(fan_in)
        return jax.random.uniform(k, shape, jnp.float32, -bound, bound)

    ks = jax.random.split(key, 10)
    return {
        "conv1_w": uni(ks[0], (64, 1, 4, 4), 1 * 4 * 4),
        "conv1_b": uni(ks[1], (64,), 1 * 4 * 4),
        "conv2_w": uni(ks[2], (128, 64, 3, 3), 64 * 3 * 3),
        "conv2_b": uni(ks[3], (128,), 64 * 3 * 3),
        "conv3_w": uni(ks[4], (128, 128, 2, 2), 128 * 2 * 2),
        "conv3_b": uni(ks[5], (128,), 128 * 2 * 2),
        "linear1_w": uni(ks[6], (512, 896), 896),
        "linear1_b": uni(ks[7], (512,), 896),
        "linear2_w": uni(ks[8], (1, 512), 512),
        "linear2_b": uni(ks[9], (1,), 512),
    }


def prepare_params(p):
    """One-time weight re-layout (hoisted out of the per-forward path)."""
    # conv1: (Cout=64, 1, 4, 4) -> per vertical tap i, an (8, 640) matrix whose
    # 128-lane block wo holds conv1_w[:, 0, i, j] at input column wo+j (channels
    # padded 64->128 so lane blocks are 128-aligned); zero elsewhere.
    w1_t = jnp.transpose(p["conv1_w"], (2, 3, 1, 0)).reshape(4, 4, 64)   # (i, j, co)
    w1 = jnp.concatenate(
        [jnp.pad(w1_t, ((0, 0), (wo, 4 - wo), (0, 64))) for wo in range(5)],
        axis=-1)                                                          # (4, 8, 640)
    b1 = jnp.tile(jnp.pad(p["conv1_b"].reshape(1, 64), ((0, 0), (0, 64))),
                  (1, 5))                                                 # (1, 640)
    # conv2: (128, 64, 3, 3) -> per vertical tap i, a (384, 128) matrix whose
    # 128-row block j holds conv2_w[:, :, i, j] (input channels padded 64->128).
    w2_t = jnp.transpose(p["conv2_w"], (2, 3, 1, 0))                      # (3,3,64,128)
    w2 = jnp.pad(w2_t, ((0, 0), (0, 0), (0, 64), (0, 0))).reshape(3, 384, 128)
    # conv3: (Cout, Cin, kh, kw) -> (kh*kw, Cin, Cout)
    w3 = jnp.transpose(p["conv3_w"], (2, 3, 1, 0)).reshape(4, 128, 128)
    # linear1: fold PyTorch's NCHW flatten (feature index = c*7 + h) into the
    # weight: wl1[h, c, o] = linear1_w[o, c*7 + h]
    wl1 = jnp.transpose(p["linear1_w"].reshape(512, 128, 7), (2, 1, 0))   # (7,128,512)
    return {
        "w1": w1, "b1": b1,
        "w2": w2, "b2": p["conv2_b"].reshape(1, 128),
        "w3": w3, "b3": p["conv3_b"].reshape(1, 128),
        "wl1": wl1, "bl1": p["linear1_b"].reshape(1, 512),
        "wl2": p["linear2_w"].reshape(1, 512),
        "bl2": p["linear2_b"].reshape(1, 1),
    }


# ---------------------------------------------------------------------------
# Forward (both branches in one fused kernel call)
# ---------------------------------------------------------------------------

def siamese_forward(prepped, data1, data2):
    """data1, data2: (B, 1, 20, 8) NCHW.  Returns (B, 1) match probabilities."""
    B = data1.shape[0]
    nb = 2 * B
    nbp = ((nb + 7) // 8) * 8       # pad combined batch to a sublane multiple
    x = jnp.concatenate([data1, data2], axis=0).reshape(nb, 20, 8)
    if nbp != nb:
        x = jnp.pad(x, ((0, nbp - nb), (0, 0), (0, 0)))
    # batch-fastest rows: row r = h*nbp + b, columns = w (tiny one-time glue)
    x_rows = jnp.transpose(x, (1, 0, 2)).reshape(nbp * 20, 8)
    return _fused_forward(x_rows, prepped, B, nbp)

# TODO(synk): 'inference'/'validate' modes (torch.load of weights_path, cached
# refs_dict feature list) are state-loading paths with no Pallas equivalent;
# only the two-input forward is implemented.


if __name__ == "__main__":
    key = jax.random.PRNGKey(0)
    kp, k1, k2 = jax.random.split(key, 3)
    params = init_params(kp)
    prepped = prepare_params(params)     # weight re-layout done once, not per forward

    # input spatial 20x8 -> conv stack -> 128*7*1 = 896 flat features (Linear(896,512))
    data1 = jax.random.normal(k1, (2, 1, 20, 8), jnp.float32)
    data2 = jax.random.normal(k2, (2, 1, 20, 8), jnp.float32)

    fwd = jax.jit(siamese_forward)
    prob = jax.block_until_ready(fwd(prepped, data1, data2))

    assert prob.shape == (2, 1)
    assert bool(jnp.all((prob >= 0.0) & (prob <= 1.0)))
    print("KERNEL_OK")
</pallas_src>

<mosaic_0001>
module attributes {stable_mosaic.version = 11 : i64} {
  func.func @_siamese_fused_kernel(%arg0: i32, %arg1: memref<160x8xf32, #tpu.memory_space<vmem>>, %arg2: memref<4x8x640xf32, #tpu.memory_space<vmem>>, %arg3: memref<1x640xf32, #tpu.memory_space<vmem>>, %arg4: memref<3x384x128xf32, #tpu.memory_space<vmem>>, %arg5: memref<1x128xf32, #tpu.memory_space<vmem>>, %arg6: memref<4x128x128xf32, #tpu.memory_space<vmem>>, %arg7: memref<1x128xf32, #tpu.memory_space<vmem>>, %arg8: memref<7x128x512xf32, #tpu.memory_space<vmem>>, %arg9: memref<1x512xf32, #tpu.memory_space<vmem>>, %arg10: memref<1x512xf32, #tpu.memory_space<vmem>>, %arg11: memref<1x1xf32, #tpu.memory_space<vmem>>, %arg12: memref<2x1xf32, #tpu.memory_space<vmem>>) attributes {dimension_semantics = [#tpu.dimension_semantics<arbitrary>], iteration_bounds = array<i64: 1>, scalar_prefetch = 0 : i64, scratch_operands = 0 : i64, tpu.core_type = #tpu.core_type<tc>, window_params = [{pipeline_mode = #tpu.pipeline_mode<synchronous>, transform_indices = @transform_0, window_bounds = array<i64: 160, 8>}, {pipeline_mode = #tpu.pipeline_mode<synchronous>, transform_indices = @transform_1, window_bounds = array<i64: 4, 8, 640>}, {pipeline_mode = #tpu.pipeline_mode<synchronous>, transform_indices = @transform_2, window_bounds = array<i64: 1, 640>}, {pipeline_mode = #tpu.pipeline_mode<synchronous>, transform_indices = @transform_3, window_bounds = array<i64: 3, 384, 128>}, {pipeline_mode = #tpu.pipeline_mode<synchronous>, transform_indices = @transform_4, window_bounds = array<i64: 1, 128>}, {pipeline_mode = #tpu.pipeline_mode<synchronous>, transform_indices = @transform_5, window_bounds = array<i64: 4, 128, 128>}, {pipeline_mode = #tpu.pipeline_mode<synchronous>, transform_indices = @transform_6, window_bounds = array<i64: 1, 128>}, {pipeline_mode = #tpu.pipeline_mode<synchronous>, transform_indices = @transform_7, window_bounds = array<i64: 7, 128, 512>}, {pipeline_mode = #tpu.pipeline_mode<synchronous>, transform_indices = @transform_8, window_bounds = array<i64: 1, 512>}, {pipeline_mode = #tpu.pipeline_mode<synchronous>, transform_indices = @transform_9, window_bounds = array<i64: 1, 512>}, {pipeline_mode = #tpu.pipeline_mode<synchronous>, transform_indices = @transform_10, window_bounds = array<i64: 1, 1>}, {pipeline_mode = #tpu.pipeline_mode<synchronous>, transform_indices = @transform_11, window_bounds = array<i64: 2, 1>}]} {
    %c0 = arith.constant 0 : index
    %c0_0 = arith.constant 0 : index
    %0 = vector.load %arg1[%c0, %c0_0] : memref<160x8xf32, #tpu.memory_space<vmem>>, vector<160x8xf32>
    %1 = vector.extract_strided_slice %0 {offsets = [0, 0], sizes = [136, 8], strides = [1, 1]} : vector<160x8xf32> to vector<136x8xf32>
    %c0_1 = arith.constant 0 : index
    %c0_2 = arith.constant 0 : index
    %c0_3 = arith.constant 0 : index
    %2 = vector.load %arg2[%c0_1, %c0_2, %c0_3] : memref<4x8x640xf32, #tpu.memory_space<vmem>>, vector<1x8x640xf32>
    %3 = vector.shape_cast %2 : vector<1x8x640xf32> to vector<8x640xf32>
    %cst = arith.constant dense<0.000000e+00> : vector<136x640xf32>
    %4 = tpu.matmul %1, %3, %cst {dimension_numbers = #tpu.dot_dimension_numbers<[1], [0], [0], [1], [0, 0, 1, 1], [], []>} : vector<136x8xf32>, vector<8x640xf32>, vector<136x640xf32> -> vector<136x640xf32>
    %5 = vector.extract_strided_slice %0 {offsets = [8, 0], sizes = [136, 8], strides = [1, 1]} : vector<160x8xf32> to vector<136x8xf32>
    %c1 = arith.constant 1 : index
    %c0_4 = arith.constant 0 : index
    %c0_5 = arith.constant 0 : index
    %6 = vector.load %arg2[%c1, %c0_4, %c0_5] : memref<4x8x640xf32, #tpu.memory_space<vmem>>, vector<1x8x640xf32>
    %7 = vector.shape_cast %6 : vector<1x8x640xf32> to vector<8x640xf32>
    %cst_6 = arith.constant dense<0.000000e+00> : vector<136x640xf32>
    %8 = tpu.matmul %5, %7, %cst_6 {dimension_numbers = #tpu.dot_dimension_numbers<[1], [0], [0], [1], [0, 0, 1, 1], [], []>} : vector<136x8xf32>, vector<8x640xf32>, vector<136x640xf32> -> vector<136x640xf32>
    %9 = arith.addf %4, %8 : vector<136x640xf32>
    %10 = vector.extract_strided_slice %0 {offsets = [16, 0], sizes = [136, 8], strides = [1, 1]} : vector<160x8xf32> to vector<136x8xf32>
    %c2 = arith.constant 2 : index
    %c0_7 = arith.constant 0 : index
    %c0_8 = arith.constant 0 : index
    %11 = vector.load %arg2[%c2, %c0_7, %c0_8] : memref<4x8x640xf32, #tpu.memory_space<vmem>>, vector<1x8x640xf32>
    %12 = vector.shape_cast %11 : vector<1x8x640xf32> to vector<8x640xf32>
    %cst_9 = arith.constant dense<0.000000e+00> : vector<136x640xf32>
    %13 = tpu.matmul %10, %12, %cst_9 {dimension_numbers = #tpu.dot_dimension_numbers<[1], [0], [0], [1], [0, 0, 1, 1], [], []>} : vector<136x8xf32>, vector<8x640xf32>, vector<136x640xf32> -> vector<136x640xf32>
    %14 = arith.addf %9, %13 : vector<136x640xf32>
    %15 = vector.extract_strided_slice %0 {offsets = [24, 0], sizes = [136, 8], strides = [1, 1]} : vector<160x8xf32> to vector<136x8xf32>
    %c3 = arith.constant 3 : index
    %c0_10 = arith.constant 0 : index
    %c0_11 = arith.constant 0 : index
    %16 = vector.load %arg2[%c3, %c0_10, %c0_11] : memref<4x8x640xf32, #tpu.memory_space<vmem>>, vector<1x8x640xf32>
    %17 = vector.shape_cast %16 : vector<1x8x640xf32> to vector<8x640xf32>
    %cst_12 = arith.constant dense<0.000000e+00> : vector<136x640xf32>
    %18 = tpu.matmul %15, %17, %cst_12 {dimension_numbers = #tpu.dot_dimension_numbers<[1], [0], [0], [1], [0, 0, 1, 1], [], []>} : vector<136x8xf32>, vector<8x640xf32>, vector<136x640xf32> -> vector<136x640xf32>
    %19 = arith.addf %14, %18 : vector<136x640xf32>
    %c0_13 = arith.constant 0 : index
    %c0_14 = arith.constant 0 : index
    %20 = vector.load %arg3[%c0_13, %c0_14] : memref<1x640xf32, #tpu.memory_space<vmem>>, vector<1x640xf32>
    %21 = vector.broadcast %20 : vector<1x640xf32> to vector<136x640xf32>
    %22 = arith.addf %19, %21 : vector<136x640xf32>
    %cst_15 = arith.constant 0.000000e+00 : f32
    %23 = vector.broadcast %cst_15 : f32 to vector<136x640xf32>
    %24 = arith.maximumf %22, %23 : vector<136x640xf32>
    %25 = vector.extract_strided_slice %24 {offsets = [0, 0], sizes = [120, 384], strides = [1, 1]} : vector<136x640xf32> to vector<120x384xf32>
    %c0_16 = arith.constant 0 : index
    %c0_17 = arith.constant 0 : index
    %c0_18 = arith.constant 0 : index
    %26 = vector.load %arg4[%c0_16, %c0_17, %c0_18] : memref<3x384x128xf32, #tpu.memory_space<vmem>>, vector<1x384x128xf32>
    %27 = vector.shape_cast %26 : vector<1x384x128xf32> to vector<384x128xf32>
    %cst_19 = arith.constant dense<0.000000e+00> : vector<120x128xf32>
    %28 = tpu.matmul %25, %27, %cst_19 {dimension_numbers = #tpu.dot_dimension_numbers<[1], [0], [0], [1], [0, 0, 1, 1], [], []>} : vector<120x384xf32>, vector<384x128xf32>, vector<120x128xf32> -> vector<120x128xf32>
    %29 = vector.extract_strided_slice %24 {offsets = [8, 0], sizes = [120, 384], strides = [1, 1]} : vector<136x640xf32> to vector<120x384xf32>
    %c1_20 = arith.constant 1 : index
    %c0_21 = arith.constant 0 : index
    %c0_22 = arith.constant 0 : index
    %30 = vector.load %arg4[%c1_20, %c0_21, %c0_22] : memref<3x384x128xf32, #tpu.memory_space<vmem>>, vector<1x384x128xf32>
    %31 = vector.shape_cast %30 : vector<1x384x128xf32> to vector<384x128xf32>
    %cst_23 = arith.constant dense<0.000000e+00> : vector<120x128xf32>
    %32 = tpu.matmul %29, %31, %cst_23 {dimension_numbers = #tpu.dot_dimension_numbers<[1], [0], [0], [1], [0, 0, 1, 1], [], []>} : vector<120x384xf32>, vector<384x128xf32>, vector<120x128xf32> -> vector<120x128xf32>
    %33 = arith.addf %28, %32 : vector<120x128xf32>
    %34 = vector.extract_strided_slice %24 {offsets = [16, 0], sizes = [120, 384], strides = [1, 1]} : vector<136x640xf32> to vector<120x384xf32>
    %c2_24 = arith.constant 2 : index
    %c0_25 = arith.constant 0 : index
    %c0_26 = arith.constant 0 : index
    %35 = vector.load %arg4[%c2_24, %c0_25, %c0_26] : memref<3x384x128xf32, #tpu.memory_space<vmem>>, vector<1x384x128xf32>
    %36 = vector.shape_cast %35 : vector<1x384x128xf32> to vector<384x128xf32>
    %cst_27 = arith.constant dense<0.000000e+00> : vector<120x128xf32>
    %37 = tpu.matmul %34, %36, %cst_27 {dimension_numbers = #tpu.dot_dimension_numbers<[1], [0], [0], [1], [0, 0, 1, 1], [], []>} : vector<120x384xf32>, vector<384x128xf32>, vector<120x128xf32> -> vector<120x128xf32>
    %38 = arith.addf %33, %37 : vector<120x128xf32>
    %c0_28 = arith.constant 0 : index
    %c0_29 = arith.constant 0 : index
    %39 = vector.load %arg5[%c0_28, %c0_29] : memref<1x128xf32, #tpu.memory_space<vmem>>, vector<1x128xf32>
    %40 = vector.broadcast %39 : vector<1x128xf32> to vector<120x128xf32>
    %41 = arith.addf %38, %40 : vector<120x128xf32>
    %cst_30 = arith.constant 0.000000e+00 : f32
    %42 = vector.broadcast %cst_30 : f32 to vector<120x128xf32>
    %43 = arith.maximumf %41, %42 : vector<120x128xf32>
    %44 = vector.extract_strided_slice %24 {offsets = [0, 128], sizes = [120, 384], strides = [1, 1]} : vector<136x640xf32> to vector<120x384xf32>
    %c0_31 = arith.constant 0 : index
    %c0_32 = arith.constant 0 : index
    %c0_33 = arith.constant 0 : index
    %45 = vector.load %arg4[%c0_31, %c0_32, %c0_33] : memref<3x384x128xf32, #tpu.memory_space<vmem>>, vector<1x384x128xf32>
    %46 = vector.shape_cast %45 : vector<1x384x128xf32> to vector<384x128xf32>
    %cst_34 = arith.constant dense<0.000000e+00> : vector<120x128xf32>
    %47 = tpu.matmul %44, %46, %cst_34 {dimension_numbers = #tpu.dot_dimension_numbers<[1], [0], [0], [1], [0, 0, 1, 1], [], []>} : vector<120x384xf32>, vector<384x128xf32>, vector<120x128xf32> -> vector<120x128xf32>
    %48 = vector.extract_strided_slice %24 {offsets = [8, 128], sizes = [120, 384], strides = [1, 1]} : vector<136x640xf32> to vector<120x384xf32>
    %c1_35 = arith.constant 1 : index
    %c0_36 = arith.constant 0 : index
    %c0_37 = arith.constant 0 : index
    %49 = vector.load %arg4[%c1_35, %c0_36, %c0_37] : memref<3x384x128xf32, #tpu.memory_space<vmem>>, vector<1x384x128xf32>
    %50 = vector.shape_cast %49 : vector<1x384x128xf32> to vector<384x128xf32>
    %cst_38 = arith.constant dense<0.000000e+00> : vector<120x128xf32>
    %51 = tpu.matmul %48, %50, %cst_38 {dimension_numbers = #tpu.dot_dimension_numbers<[1], [0], [0], [1], [0, 0, 1, 1], [], []>} : vector<120x384xf32>, vector<384x128xf32>, vector<120x128xf32> -> vector<120x128xf32>
    %52 = arith.addf %47, %51 : vector<120x128xf32>
    %53 = vector.extract_strided_slice %24 {offsets = [16, 128], sizes = [120, 384], strides = [1, 1]} : vector<136x640xf32> to vector<120x384xf32>
    %c2_39 = arith.constant 2 : index
    %c0_40 = arith.constant 0 : index
    %c0_41 = arith.constant 0 : index
    %54 = vector.load %arg4[%c2_39, %c0_40, %c0_41] : memref<3x384x128xf32, #tpu.memory_space<vmem>>, vector<1x384x128xf32>
    %55 = vector.shape_cast %54 : vector<1x384x128xf32> to vector<384x128xf32>
    %cst_42 = arith.constant dense<0.000000e+00> : vector<120x128xf32>
    %56 = tpu.matmul %53, %55, %cst_42 {dimension_numbers = #tpu.dot_dimension_numbers<[1], [0], [0], [1], [0, 0, 1, 1], [], []>} : vector<120x384xf32>, vector<384x128xf32>, vector<120x128xf32> -> vector<120x128xf32>
    %57 = arith.addf %52, %56 : vector<120x128xf32>
    %c0_43 = arith.constant 0 : index
    %c0_44 = arith.constant 0 : index
    %58 = vector.load %arg5[%c0_43, %c0_44] : memref<1x128xf32, #tpu.memory_space<vmem>>, vector<1x128xf32>
    %59 = vector.broadcast %58 : vector<1x128xf32> to vector<120x128xf32>
    %60 = arith.addf %57, %59 : vector<120x128xf32>
    %cst_45 = arith.constant 0.000000e+00 : f32
    %61 = vector.broadcast %cst_45 : f32 to vector<120x128xf32>
    %62 = arith.maximumf %60, %61 : vector<120x128xf32>
    %63 = vector.extract_strided_slice %24 {offsets = [0, 256], sizes = [120, 384], strides = [1, 1]} : vector<136x640xf32> to vector<120x384xf32>
    %c0_46 = arith.constant 0 : index
    %c0_47 = arith.constant 0 : index
    %c0_48 = arith.constant 0 : index
    %64 = vector.load %arg4[%c0_46, %c0_47, %c0_48] : memref<3x384x128xf32, #tpu.memory_space<vmem>>, vector<1x384x128xf32>
    %65 = vector.shape_cast %64 : vector<1x384x128xf32> to vector<384x128xf32>
    %cst_49 = arith.constant dense<0.000000e+00> : vector<120x128xf32>
    %66 = tpu.matmul %63, %65, %cst_49 {dimension_numbers = #tpu.dot_dimension_numbers<[1], [0], [0], [1], [0, 0, 1, 1], [], []>} : vector<120x384xf32>, vector<384x128xf32>, vector<120x128xf32> -> vector<120x128xf32>
    %67 = vector.extract_strided_slice %24 {offsets = [8, 256], sizes = [120, 384], strides = [1, 1]} : vector<136x640xf32> to vector<120x384xf32>
    %c1_50 = arith.constant 1 : index
    %c0_51 = arith.constant 0 : index
    %c0_52 = arith.constant 0 : index
    %68 = vector.load %arg4[%c1_50, %c0_51, %c0_52] : memref<3x384x128xf32, #tpu.memory_space<vmem>>, vector<1x384x128xf32>
    %69 = vector.shape_cast %68 : vector<1x384x128xf32> to vector<384x128xf32>
    %cst_53 = arith.constant dense<0.000000e+00> : vector<120x128xf32>
    %70 = tpu.matmul %67, %69, %cst_53 {dimension_numbers = #tpu.dot_dimension_numbers<[1], [0], [0], [1], [0, 0, 1, 1], [], []>} : vector<120x384xf32>, vector<384x128xf32>, vector<120x128xf32> -> vector<120x128xf32>
    %71 = arith.addf %66, %70 : vector<120x128xf32>
    %72 = vector.extract_strided_slice %24 {offsets = [16, 256], sizes = [120, 384], strides = [1, 1]} : vector<136x640xf32> to vector<120x384xf32>
    %c2_54 = arith.constant 2 : index
    %c0_55 = arith.constant 0 : index
    %c0_56 = arith.constant 0 : index
    %73 = vector.load %arg4[%c2_54, %c0_55, %c0_56] : memref<3x384x128xf32, #tpu.memory_space<vmem>>, vector<1x384x128xf32>
    %74 = vector.shape_cast %73 : vector<1x384x128xf32> to vector<384x128xf32>
    %cst_57 = arith.constant dense<0.000000e+00> : vector<120x128xf32>
    %75 = tpu.matmul %72, %74, %cst_57 {dimension_numbers = #tpu.dot_dimension_numbers<[1], [0], [0], [1], [0, 0, 1, 1], [], []>} : vector<120x384xf32>, vector<384x128xf32>, vector<120x128xf32> -> vector<120x128xf32>
    %76 = arith.addf %71, %75 : vector<120x128xf32>
    %c0_58 = arith.constant 0 : index
    %c0_59 = arith.constant 0 : index
    %77 = vector.load %arg5[%c0_58, %c0_59] : memref<1x128xf32, #tpu.memory_space<vmem>>, vector<1x128xf32>
    %78 = vector.broadcast %77 : vector<1x128xf32> to vector<120x128xf32>
    %79 = arith.addf %76, %78 : vector<120x128xf32>
    %cst_60 = arith.constant 0.000000e+00 : f32
    %80 = vector.broadcast %cst_60 : f32 to vector<120x128xf32>
    %81 = arith.maximumf %79, %80 : vector<120x128xf32>
    %82 = vector.extract_strided_slice %43 {offsets = [0, 0], sizes = [112, 128], strides = [1, 1]} : vector<120x128xf32> to vector<112x128xf32>
    %c0_61 = arith.constant 0 : index
    %c0_62 = arith.constant 0 : index
    %c0_63 = arith.constant 0 : index
    %83 = vector.load %arg6[%c0_61, %c0_62, %c0_63] : memref<4x128x128xf32, #tpu.memory_space<vmem>>, vector<1x128x128xf32>
    %84 = vector.shape_cast %83 : vector<1x128x128xf32> to vector<128x128xf32>
    %cst_64 = arith.constant dense<0.000000e+00> : vector<112x128xf32>
    %85 = tpu.matmul %82, %84, %cst_64 {dimension_numbers = #tpu.dot_dimension_numbers<[1], [0], [0], [1], [0, 0, 1, 1], [], []>} : vector<112x128xf32>, vector<128x128xf32>, vector<112x128xf32> -> vector<112x128xf32>
    %86 = vector.extract_strided_slice %62 {offsets = [0, 0], sizes = [112, 128], strides = [1, 1]} : vector<120x128xf32> to vector<112x128xf32>
    %c1_65 = arith.constant 1 : index
    %c0_66 = arith.constant 0 : index
    %c0_67 = arith.constant 0 : index
    %87 = vector.load %arg6[%c1_65, %c0_66, %c0_67] : memref<4x128x128xf32, #tpu.memory_space<vmem>>, vector<1x128x128xf32>
    %88 = vector.shape_cast %87 : vector<1x128x128xf32> to vector<128x128xf32>
    %cst_68 = arith.constant dense<0.000000e+00> : vector<112x128xf32>
    %89 = tpu.matmul %86, %88, %cst_68 {dimension_numbers = #tpu.dot_dimension_numbers<[1], [0], [0], [1], [0, 0, 1, 1], [], []>} : vector<112x128xf32>, vector<128x128xf32>, vector<112x128xf32> -> vector<112x128xf32>
    %90 = arith.addf %85, %89 : vector<112x128xf32>
    %91 = vector.extract_strided_slice %43 {offsets = [8, 0], sizes = [112, 128], strides = [1, 1]} : vector<120x128xf32> to vector<112x128xf32>
    %c2_69 = arith.constant 2 : index
    %c0_70 = arith.constant 0 : index
    %c0_71 = arith.constant 0 : index
    %92 = vector.load %arg6[%c2_69, %c0_70, %c0_71] : memref<4x128x128xf32, #tpu.memory_space<vmem>>, vector<1x128x128xf32>
    %93 = vector.shape_cast %92 : vector<1x128x128xf32> to vector<128x128xf32>
    %cst_72 = arith.constant dense<0.000000e+00> : vector<112x128xf32>
    %94 = tpu.matmul %91, %93, %cst_72 {dimension_numbers = #tpu.dot_dimension_numbers<[1], [0], [0], [1], [0, 0, 1, 1], [], []>} : vector<112x128xf32>, vector<128x128xf32>, vector<112x128xf32> -> vector<112x128xf32>
    %95 = arith.addf %90, %94 : vector<112x128xf32>
    %96 = vector.extract_strided_slice %62 {offsets = [8, 0], sizes = [112, 128], strides = [1, 1]} : vector<120x128xf32> to vector<112x128xf32>
    %c3_73 = arith.constant 3 : index
    %c0_74 = arith.constant 0 : index
    %c0_75 = arith.constant 0 : index
    %97 = vector.load %arg6[%c3_73, %c0_74, %c0_75] : memref<4x128x128xf32, #tpu.memory_space<vmem>>, vector<1x128x128xf32>
    %98 = vector.shape_cast %97 : vector<1x128x128xf32> to vector<128x128xf32>
    %cst_76 = arith.constant dense<0.000000e+00> : vector<112x128xf32>
    %99 = tpu.matmul %96, %98, %cst_76 {dimension_numbers = #tpu.dot_dimension_numbers<[1], [0], [0], [1], [0, 0, 1, 1], [], []>} : vector<112x128xf32>, vector<128x128xf32>, vector<112x128xf32> -> vector<112x128xf32>
    %100 = arith.addf %95, %99 : vector<112x128xf32>
    %c0_77 = arith.constant 0 : index
    %c0_78 = arith.constant 0 : index
    %101 = vector.load %arg7[%c0_77, %c0_78] : memref<1x128xf32, #tpu.memory_space<vmem>>, vector<1x128xf32>
    %102 = vector.broadcast %101 : vector<1x128xf32> to vector<112x128xf32>
    %103 = arith.addf %100, %102 : vector<112x128xf32>
    %cst_79 = arith.constant 0.000000e+00 : f32
    %104 = vector.broadcast %cst_79 : f32 to vector<112x128xf32>
    %105 = arith.maximumf %103, %104 : vector<112x128xf32>
    %106 = vector.extract_strided_slice %62 {offsets = [0, 0], sizes = [112, 128], strides = [1, 1]} : vector<120x128xf32> to vector<112x128xf32>
    %c0_80 = arith.constant 0 : index
    %c0_81 = arith.constant 0 : index
    %c0_82 = arith.constant 0 : index
    %107 = vector.load %arg6[%c0_80, %c0_81, %c0_82] : memref<4x128x128xf32, #tpu.memory_space<vmem>>, vector<1x128x128xf32>
    %108 = vector.shape_cast %107 : vector<1x128x128xf32> to vector<128x128xf32>
    %cst_83 = arith.constant dense<0.000000e+00> : vector<112x128xf32>
    %109 = tpu.matmul %106, %108, %cst_83 {dimension_numbers = #tpu.dot_dimension_numbers<[1], [0], [0], [1], [0, 0, 1, 1], [], []>} : vector<112x128xf32>, vector<128x128xf32>, vector<112x128xf32> -> vector<112x128xf32>
    %110 = vector.extract_strided_slice %81 {offsets = [0, 0], sizes = [112, 128], strides = [1, 1]} : vector<120x128xf32> to vector<112x128xf32>
    %c1_84 = arith.constant 1 : index
    %c0_85 = arith.constant 0 : index
    %c0_86 = arith.constant 0 : index
    %111 = vector.load %arg6[%c1_84, %c0_85, %c0_86] : memref<4x128x128xf32, #tpu.memory_space<vmem>>, vector<1x128x128xf32>
    %112 = vector.shape_cast %111 : vector<1x128x128xf32> to vector<128x128xf32>
    %cst_87 = arith.constant dense<0.000000e+00> : vector<112x128xf32>
    %113 = tpu.matmul %110, %112, %cst_87 {dimension_numbers = #tpu.dot_dimension_numbers<[1], [0], [0], [1], [0, 0, 1, 1], [], []>} : vector<112x128xf32>, vector<128x128xf32>, vector<112x128xf32> -> vector<112x128xf32>
    %114 = arith.addf %109, %113 : vector<112x128xf32>
    %115 = vector.extract_strided_slice %62 {offsets = [8, 0], sizes = [112, 128], strides = [1, 1]} : vector<120x128xf32> to vector<112x128xf32>
    %c2_88 = arith.constant 2 : index
    %c0_89 = arith.constant 0 : index
    %c0_90 = arith.constant 0 : index
    %116 = vector.load %arg6[%c2_88, %c0_89, %c0_90] : memref<4x128x128xf32, #tpu.memory_space<vmem>>, vector<1x128x128xf32>
    %117 = vector.shape_cast %116 : vector<1x128x128xf32> to vector<128x128xf32>
    %cst_91 = arith.constant dense<0.000000e+00> : vector<112x128xf32>
    %118 = tpu.matmul %115, %117, %cst_91 {dimension_numbers = #tpu.dot_dimension_numbers<[1], [0], [0], [1], [0, 0, 1, 1], [], []>} : vector<112x128xf32>, vector<128x128xf32>, vector<112x128xf32> -> vector<112x128xf32>
    %119 = arith.addf %114, %118 : vector<112x128xf32>
    %120 = vector.extract_strided_slice %81 {offsets = [8, 0], sizes = [112, 128], strides = [1, 1]} : vector<120x128xf32> to vector<112x128xf32>
    %c3_92 = arith.constant 3 : index
    %c0_93 = arith.constant 0 : index
    %c0_94 = arith.constant 0 : index
    %121 = vector.load %arg6[%c3_92, %c0_93, %c0_94] : memref<4x128x128xf32, #tpu.memory_space<vmem>>, vector<1x128x128xf32>
    %122 = vector.shape_cast %121 : vector<1x128x128xf32> to vector<128x128xf32>
    %cst_95 = arith.constant dense<0.000000e+00> : vector<112x128xf32>
    %123 = tpu.matmul %120, %122, %cst_95 {dimension_numbers = #tpu.dot_dimension_numbers<[1], [0], [0], [1], [0, 0, 1, 1], [], []>} : vector<112x128xf32>, vector<128x128xf32>, vector<112x128xf32> -> vector<112x128xf32>
    %124 = arith.addf %119, %123 : vector<112x128xf32>
    %c0_96 = arith.constant 0 : index
    %c0_97 = arith.constant 0 : index
    %125 = vector.load %arg7[%c0_96, %c0_97] : memref<1x128xf32, #tpu.memory_space<vmem>>, vector<1x128xf32>
    %126 = vector.broadcast %125 : vector<1x128xf32> to vector<112x128xf32>
    %127 = arith.addf %124, %126 : vector<112x128xf32>
    %cst_98 = arith.constant 0.000000e+00 : f32
    %128 = vector.broadcast %cst_98 : f32 to vector<112x128xf32>
    %129 = arith.maximumf %127, %128 : vector<112x128xf32>
    %130 = arith.maximumf %105, %129 : vector<112x128xf32>
    %131 = vector.extract_strided_slice %130 {offsets = [0, 0], sizes = [8, 128], strides = [1, 1]} : vector<112x128xf32> to vector<8x128xf32>
    %132 = vector.extract_strided_slice %130 {offsets = [8, 0], sizes = [8, 128], strides = [1, 1]} : vector<112x128xf32> to vector<8x128xf32>
    %133 = arith.maximumf %131, %132 : vector<8x128xf32>
    %c0_99 = arith.constant 0 : index
    %c0_100 = arith.constant 0 : index
    %c0_101 = arith.constant 0 : index
    %134 = vector.load %arg8[%c0_99, %c0_100, %c0_101] : memref<7x128x512xf32, #tpu.memory_space<vmem>>, vector<1x128x512xf32>
    %135 = vector.shape_cast %134 : vector<1x128x512xf32> to vector<128x512xf32>
    %cst_102 = arith.constant dense<0.000000e+00> : vector<8x512xf32>
    %136 = tpu.matmul %133, %135, %cst_102 {dimension_numbers = #tpu.dot_dimension_numbers<[1], [0], [0], [1], [0, 0, 1, 1], [], []>} : vector<8x128xf32>, vector<128x512xf32>, vector<8x512xf32> -> vector<8x512xf32>
    %137 = vector.extract_strided_slice %130 {offsets = [16, 0], sizes = [8, 128], strides = [1, 1]} : vector<112x128xf32> to vector<8x128xf32>
    %138 = vector.extract_strided_slice %130 {offsets = [24, 0], sizes = [8, 128], strides = [1, 1]} : vector<112x128xf32> to vector<8x128xf32>
    %139 = arith.maximumf %137, %138 : vector<8x128xf32>
    %c1_103 = arith.constant 1 : index
    %c0_104 = arith.constant 0 : index
    %c0_105 = arith.constant 0 : index
    %140 = vector.load %arg8[%c1_103, %c0_104, %c0_105] : memref<7x128x512xf32, #tpu.memory_space<vmem>>, vector<1x128x512xf32>
    %141 = vector.shape_cast %140 : vector<1x128x512xf32> to vector<128x512xf32>
    %cst_106 = arith.constant dense<0.000000e+00> : vector<8x512xf32>
    %142 = tpu.matmul %139, %141, %cst_106 {dimension_numbers = #tpu.dot_dimension_numbers<[1], [0], [0], [1], [0, 0, 1, 1], [], []>} : vector<8x128xf32>, vector<128x512xf32>, vector<8x512xf32> -> vector<8x512xf32>
    %143 = arith.addf %136, %142 : vector<8x512xf32>
    %144 = vector.extract_strided_slice %130 {offsets = [32, 0], sizes = [8, 128], strides = [1, 1]} : vector<112x128xf32> to vector<8x128xf32>
    %145 = vector.extract_strided_slice %130 {offsets = [40, 0], sizes = [8, 128], strides = [1, 1]} : vector<112x128xf32> to vector<8x128xf32>
    %146 = arith.maximumf %144, %145 : vector<8x128xf32>
    %c2_107 = arith.constant 2 : index
    %c0_108 = arith.constant 0 : index
    %c0_109 = arith.constant 0 : index
    %147 = vector.load %arg8[%c2_107, %c0_108, %c0_109] : memref<7x128x512xf32, #tpu.memory_space<vmem>>, vector<1x128x512xf32>
    %148 = vector.shape_cast %147 : vector<1x128x512xf32> to vector<128x512xf32>
    %cst_110 = arith.constant dense<0.000000e+00> : vector<8x512xf32>
    %149 = tpu.matmul %146, %148, %cst_110 {dimension_numbers = #tpu.dot_dimension_numbers<[1], [0], [0], [1], [0, 0, 1, 1], [], []>} : vector<8x128xf32>, vector<128x512xf32>, vector<8x512xf32> -> vector<8x512xf32>
    %150 = arith.addf %143, %149 : vector<8x512xf32>
    %151 = vector.extract_strided_slice %130 {offsets = [48, 0], sizes = [8, 128], strides = [1, 1]} : vector<112x128xf32> to vector<8x128xf32>
    %152 = vector.extract_strided_slice %130 {offsets = [56, 0], sizes = [8, 128], strides = [1, 1]} : vector<112x128xf32> to vector<8x128xf32>
    %153 = arith.maximumf %151, %152 : vector<8x128xf32>
    %c3_111 = arith.constant 3 : index
    %c0_112 = arith.constant 0 : index
    %c0_113 = arith.constant 0 : index
    %154 = vector.load %arg8[%c3_111, %c0_112, %c0_113] : memref<7x128x512xf32, #tpu.memory_space<vmem>>, vector<1x128x512xf32>
    %155 = vector.shape_cast %154 : vector<1x128x512xf32> to vector<128x512xf32>
    %cst_114 = arith.constant dense<0.000000e+00> : vector<8x512xf32>
    %156 = tpu.matmul %153, %155, %cst_114 {dimension_numbers = #tpu.dot_dimension_numbers<[1], [0], [0], [1], [0, 0, 1, 1], [], []>} : vector<8x128xf32>, vector<128x512xf32>, vector<8x512xf32> -> vector<8x512xf32>
    %157 = arith.addf %150, %156 : vector<8x512xf32>
    %158 = vector.extract_strided_slice %130 {offsets = [64, 0], sizes = [8, 128], strides = [1, 1]} : vector<112x128xf32> to vector<8x128xf32>
    %159 = vector.extract_strided_slice %130 {offsets = [72, 0], sizes = [8, 128], strides = [1, 1]} : vector<112x128xf32> to vector<8x128xf32>
    %160 = arith.maximumf %158, %159 : vector<8x128xf32>
    %c4 = arith.constant 4 : index
    %c0_115 = arith.constant 0 : index
    %c0_116 = arith.constant 0 : index
    %161 = vector.load %arg8[%c4, %c0_115, %c0_116] : memref<7x128x512xf32, #tpu.memory_space<vmem>>, vector<1x128x512xf32>
    %162 = vector.shape_cast %161 : vector<1x128x512xf32> to vector<128x512xf32>
    %cst_117 = arith.constant dense<0.000000e+00> : vector<8x512xf32>
    %163 = tpu.matmul %160, %162, %cst_117 {dimension_numbers = #tpu.dot_dimension_numbers<[1], [0], [0], [1], [0, 0, 1, 1], [], []>} : vector<8x128xf32>, vector<128x512xf32>, vector<8x512xf32> -> vector<8x512xf32>
    %164 = arith.addf %157, %163 : vector<8x512xf32>
    %165 = vector.extract_strided_slice %130 {offsets = [80, 0], sizes = [8, 128], strides = [1, 1]} : vector<112x128xf32> to vector<8x128xf32>
    %166 = vector.extract_strided_slice %130 {offsets = [88, 0], sizes = [8, 128], strides = [1, 1]} : vector<112x128xf32> to vector<8x128xf32>
    %167 = arith.maximumf %165, %166 : vector<8x128xf32>
    %c5 = arith.constant 5 : index
    %c0_118 = arith.constant 0 : index
    %c0_119 = arith.constant 0 : index
    %168 = vector.load %arg8[%c5, %c0_118, %c0_119] : memref<7x128x512xf32, #tpu.memory_space<vmem>>, vector<1x128x512xf32>
    %169 = vector.shape_cast %168 : vector<1x128x512xf32> to vector<128x512xf32>
    %cst_120 = arith.constant dense<0.000000e+00> : vector<8x512xf32>
    %170 = tpu.matmul %167, %169, %cst_120 {dimension_numbers = #tpu.dot_dimension_numbers<[1], [0], [0], [1], [0, 0, 1, 1], [], []>} : vector<8x128xf32>, vector<128x512xf32>, vector<8x512xf32> -> vector<8x512xf32>
    %171 = arith.addf %164, %170 : vector<8x512xf32>
    %172 = vector.extract_strided_slice %130 {offsets = [96, 0], sizes = [8, 128], strides = [1, 1]} : vector<112x128xf32> to vector<8x128xf32>
    %173 = vector.extract_strided_slice %130 {offsets = [104, 0], sizes = [8, 128], strides = [1, 1]} : vector<112x128xf32> to vector<8x128xf32>
    %174 = arith.maximumf %172, %173 : vector<8x128xf32>
    %c6 = arith.constant 6 : index
    %c0_121 = arith.constant 0 : index
    %c0_122 = arith.constant 0 : index
    %175 = vector.load %arg8[%c6, %c0_121, %c0_122] : memref<7x128x512xf32, #tpu.memory_space<vmem>>, vector<1x128x512xf32>
    %176 = vector.shape_cast %175 : vector<1x128x512xf32> to vector<128x512xf32>
    %cst_123 = arith.constant dense<0.000000e+00> : vector<8x512xf32>
    %177 = tpu.matmul %174, %176, %cst_123 {dimension_numbers = #tpu.dot_dimension_numbers<[1], [0], [0], [1], [0, 0, 1, 1], [], []>} : vector<8x128xf32>, vector<128x512xf32>, vector<8x512xf32> -> vector<8x512xf32>
    %178 = arith.addf %171, %177 : vector<8x512xf32>
    %c0_124 = arith.constant 0 : index
    %c0_125 = arith.constant 0 : index
    %179 = vector.load %arg9[%c0_124, %c0_125] : memref<1x512xf32, #tpu.memory_space<vmem>>, vector<1x512xf32>
    %180 = vector.broadcast %179 : vector<1x512xf32> to vector<8x512xf32>
    %181 = arith.addf %178, %180 : vector<8x512xf32>
    %cst_126 = arith.constant 0.000000e+00 : f32
    %182 = vector.broadcast %cst_126 : f32 to vector<8x512xf32>
    %183 = arith.maximumf %181, %182 : vector<8x512xf32>
    %184 = vector.extract_strided_slice %183 {offsets = [2, 0], sizes = [2, 512], strides = [1, 1]} : vector<8x512xf32> to vector<2x512xf32>
    %185 = vector.extract_strided_slice %183 {offsets = [0, 0], sizes = [2, 512], strides = [1, 1]} : vector<8x512xf32> to vector<2x512xf32>
    %186 = arith.subf %184, %185 : vector<2x512xf32>
    %187 = math.absf %186 : vector<2x512xf32>
    %c0_127 = arith.constant 0 : index
    %c0_128 = arith.constant 0 : index
    %188 = vector.load %arg10[%c0_127, %c0_128] : memref<1x512xf32, #tpu.memory_space<vmem>>, vector<1x512xf32>
    %189 = vector.broadcast %188 : vector<1x512xf32> to vector<2x512xf32>
    %190 = arith.mulf %187, %189 : vector<2x512xf32>
    %cst_129 = arith.constant dense<0.000000e+00> : vector<2xf32>
    %191 = vector.multi_reduction <add>, %190, %cst_129 [1] : vector<2x512xf32> to vector<2xf32>
    %192 = vector.shape_cast %191 : vector<2xf32> to vector<2x1xf32>
    %c0_130 = arith.constant 0 : index
    %c0_131 = arith.constant 0 : index
    %193 = vector.load %arg11[%c0_130, %c0_131] : memref<1x1xf32, #tpu.memory_space<vmem>>, vector<1x1xf32>
    %194 = vector.broadcast %193 : vector<1x1xf32> to vector<2x1xf32>
    %195 = arith.addf %192, %194 : vector<2x1xf32>
    %196 = math.absf %195 : vector<2x1xf32>
    %cst_132 = arith.constant 0.000000e+00 : f32
    %197 = vector.broadcast %cst_132 : f32 to vector<2x1xf32>
    %198 = arith.subf %197, %196 : vector<2x1xf32>
    %199 = math.exp %198 : vector<2x1xf32>
    %cst_133 = arith.constant 0.000000e+00 : f32
    %200 = vector.broadcast %cst_133 : f32 to vector<2x1xf32>
    %201 = arith.cmpf oge, %195, %200 : vector<2x1xf32>
    %cst_134 = arith.constant 1.000000e+00 : f32
    %202 = vector.broadcast %cst_134 : f32 to vector<2x1xf32>
    %203 = arith.addf %202, %199 : vector<2x1xf32>
    %cst_135 = arith.constant 1.000000e+00 : f32
    %204 = vector.broadcast %cst_135 : f32 to vector<2x1xf32>
    %205 = arith.divf %204, %203 : vector<2x1xf32>
    %cst_136 = arith.constant 1.000000e+00 : f32
    %206 = vector.broadcast %cst_136 : f32 to vector<2x1xf32>
    %207 = arith.addf %206, %199 : vector<2x1xf32>
    %208 = arith.divf %199, %207 : vector<2x1xf32>
    %209 = arith.select %201, %205, %208 : vector<2x1xi1>, vector<2x1xf32>
    %c0_137 = arith.constant 0 : index
    %c0_138 = arith.constant 0 : index
    %210 = vector.load %arg12[%c0_137, %c0_138] : memref<2x1xf32, #tpu.memory_space<vmem>>, vector<2x1xf32>
    tpu.vector_store %arg12[%c0_137, %c0_138], %209 {strides = array<i32>} : memref<2x1xf32, #tpu.memory_space<vmem>>, vector<2x1xf32>,
    return
  }
  func.func @transform_0(%arg0: i32) -> (i32, i32) {
    %c0_i32 = arith.constant 0 : i32
    %c0_i32_0 = arith.constant 0 : i32
    %c0_i32_1 = arith.constant 0 : i32
    return %c0_i32, %c0_i32_0 : i32, i32
  }
  func.func @transform_1(%arg0: i32) -> (i32, i32, i32) {
    %c0_i32 = arith.constant 0 : i32
    %c0_i32_0 = arith.constant 0 : i32
    %c0_i32_1 = arith.constant 0 : i32
    %c0_i32_2 = arith.constant 0 : i32
    return %c0_i32, %c0_i32_0, %c0_i32_1 : i32, i32, i32
  }
  func.func @transform_2(%arg0: i32) -> (i32, i32) {
    %c0_i32 = arith.constant 0 : i32
    %c0_i32_0 = arith.constant 0 : i32
    %c0_i32_1 = arith.constant 0 : i32
    return %c0_i32, %c0_i32_0 : i32, i32
  }
  func.func @transform_3(%arg0: i32) -> (i32, i32, i32) {
    %c0_i32 = arith.constant 0 : i32
    %c0_i32_0 = arith.constant 0 : i32
    %c0_i32_1 = arith.constant 0 : i32
    %c0_i32_2 = arith.constant 0 : i32
    return %c0_i32, %c0_i32_0, %c0_i32_1 : i32, i32, i32
  }
  func.func @transform_4(%arg0: i32) -> (i32, i32) {
    %c0_i32 = arith.constant 0 : i32
    %c0_i32_0 = arith.constant 0 : i32
    %c0_i32_1 = arith.constant 0 : i32
    return %c0_i32, %c0_i32_0 : i32, i32
  }
  func.func @transform_5(%arg0: i32) -> (i32, i32, i32) {
    %c0_i32 = arith.constant 0 : i32
    %c0_i32_0 = arith.constant 0 : i32
    %c0_i32_1 = arith.constant 0 : i32
    %c0_i32_2 = arith.constant 0 : i32
    return %c0_i32, %c0_i32_0, %c0_i32_1 : i32, i32, i32
  }
  func.func @transform_6(%arg0: i32) -> (i32, i32) {
    %c0_i32 = arith.constant 0 : i32
    %c0_i32_0 = arith.constant 0 : i32
    %c0_i32_1 = arith.constant 0 : i32
    return %c0_i32, %c0_i32_0 : i32, i32
  }
  func.func @transform_7(%arg0: i32) -> (i32, i32, i32) {
    %c0_i32 = arith.constant 0 : i32
    %c0_i32_0 = arith.constant 0 : i32
    %c0_i32_1 = arith.constant 0 : i32
    %c0_i32_2 = arith.constant 0 : i32
    return %c0_i32, %c0_i32_0, %c0_i32_1 : i32, i32, i32
  }
  func.func @transform_8(%arg0: i32) -> (i32, i32) {
    %c0_i32 = arith.constant 0 : i32
    %c0_i32_0 = arith.constant 0 : i32
    %c0_i32_1 = arith.constant 0 : i32
    return %c0_i32, %c0_i32_0 : i32, i32
  }
  func.func @transform_9(%arg0: i32) -> (i32, i32) {
    %c0_i32 = arith.constant 0 : i32
    %c0_i32_0 = arith.constant 0 : i32
    %c0_i32_1 = arith.constant 0 : i32
    return %c0_i32, %c0_i32_0 : i32, i32
  }
  func.func @transform_10(%arg0: i32) -> (i32, i32) {
    %c0_i32 = arith.constant 0 : i32
    %c0_i32_0 = arith.constant 0 : i32
    %c0_i32_1 = arith.constant 0 : i32
    return %c0_i32, %c0_i32_0 : i32, i32
  }
  func.func @transform_11(%arg0: i32) -> (i32, i32) {
    %c0_i32 = arith.constant 0 : i32
    %c0_i32_0 = arith.constant 0 : i32
    %c0_i32_1 = arith.constant 0 : i32
    return %c0_i32, %c0_i32_0 : i32, i32
  }
}

</mosaic_0001>

<bundles_post_ra>
// kernel: siamese_forward.1
= control target key start
LH: loop header
LB: loop body
LE: loop exit
PB: predicated region body
PF: predicated region fallthrough
CT: control target
= control target key end

     0   :  { %s16827_s0 = inlined_call_operand.vmem [shape: f32[160,8], index: 0, kind: input, shape index: {}]   ;;  %s16828_s1 = inlined_call_operand.hbm [shape: f32[4,8,640], index: 1, kind: input, shape index: {}]   ;;  %s16829_s2 = inlined_call_operand.hbm [shape: f32[1,640], index: 2, kind: input, shape index: {}]   ;;  %s16830_s3 = inlined_call_operand.hbm [shape: f32[3,384,128], index: 3, kind: input, shape index: {}]   ;;  %s16831_s4 = inlined_call_operand.hbm [shape: f32[1,128], index: 4, kind: input, shape index: {}]   ;;  %s16832_s5 = inlined_call_operand.hbm [shape: f32[4,128,128], index: 5, kind: input, shape index: {}]   ;;  %s16833_s6 = inlined_call_operand.hbm [shape: f32[1,128], index: 6, kind: input, shape index: {}]   ;;  %s16834_s7 = inlined_call_operand.hbm [shape: f32[7,128,512], index: 7, kind: input, shape index: {}]   ;;  %s16835_s8 = inlined_call_operand.hbm [shape: f32[1,512], index: 8, kind: input, shape index: {}]   ;;  %s16836_s9 = inlined_call_operand.hbm [shape: f32[1,512], index: 9, kind: input, shape index: {}]   ;;  %s16837_s10 = inlined_call_operand.<no memory space> [shape: f32[1,1], index: 10, kind: input, shape index: {}]   ;;  %s16838_s11 = inlined_call_operand.vmem [shape: f32[2,1], index: 11, kind: output, shape index: {}]  }
   0x1   :  { %v16_v0 = vstv %s16837_s10 }
   0x2   :  { %17 = vst [vmem:[#allocation2] sm:$0x1] %v16_v0 }
   0x3   :  { %18 = vsyncpa [#allocation4], 0 }
   0x4   :  { %19 = vsyncpa [#allocation6], 0 }
   0x5   :  { %20 = vsyncpa [#allocation9], 0 }
   0x6   :  { %21 = vsyncpa [#allocation12], 0 }
   0x7   :  { %22 = vsyncpa [#allocation15], 0  ;;  %s12808_s19 = smov [#allocation5]   ;;  %s12809_s21 = smov [#allocation8]  }
   0x8   :  { %s43_s20 = sshll.u32 %s12808_s19, 4  ;;  %s65_s22 = sshll.u32 %s12809_s21, 4  ;;  %s44_s20 = int_to_ptr.vmem [resolvable:$true] %s43_s20  ;;  %s66_s22 = int_to_ptr.vmem [resolvable:$true] %s65_s22 }
   0x9   :  { %s12600_s25 = scalar_lea.hbm %s16829_s2, 80 }
   0xa   :  { %p12601_p0 = scmp.ne.s32.totalorder %s16829_s2, %s12600_s25  ;;  %p12604_p1 = scmp.lt.u32.totalorder %s12600_s25, %s16829_s2 }
   0xc   :  { %p12606_p2 = pnand %p12604_p1, %p12601_p0 }
   0xe   :  { %12609 = shalt.err (!%p12606_p2)
}
   0xf   :  { %s12610_s29 = scalar_lea.vmem %s44_s20, 80  ;;  %s12614_s30 = scalar_lea.vmem %s44_s20, 96 }
  0x10   :  { %p12611_p3 = scmp.ne.s32.totalorder %s44_s20, %s12610_s29  ;;  %p12615_p4 = scmp.lt.s32.totalorder %s44_s20, %s44_s20 }
  0x11   :  { %p12616_p5 = scmp.lt.s32.totalorder %s12614_s30, %s12610_s29 }
  0x13   :  { %p12617_p6 = por %p12616_p5, %p12615_p4 }
  0x15   :  { %p12618_p7 = pnand %p12617_p6, %p12611_p3 }
  0x17   :  { %12621 = shalt.err (!%p12618_p7)
}
  0x18   :  { %46 = dma.hbm_to_vmem [thread:$0]  %s16829_s2, 80, %s44_s20, [#allocation6]  }
  0x19   :  { %s12622_s16 = scalar_lea.hbm %s16831_s4, 16 }
  0x1a   :  { %p12623_p8 = scmp.ne.s32.totalorder %s16831_s4, %s12622_s16  ;;  %p12626_p9 = scmp.lt.u32.totalorder %s12622_s16, %s16831_s4 }
  0x1c   :  { %p12628_p10 = pnand %p12626_p9, %p12623_p8 }
  0x1e   :  { %12631 = shalt.err (!%p12628_p10)
}
  0x1f   :  { %s12632_s23 = scalar_lea.vmem %s66_s22, 16  ;;  %s12636_s24 = scalar_lea.vmem %s66_s22, 32 }
  0x20   :  { %p12633_p11 = scmp.ne.s32.totalorder %s66_s22, %s12632_s23  ;;  %p12637_p12 = scmp.lt.s32.totalorder %s66_s22, %s66_s22 }
  0x21   :  { %p12638_p13 = scmp.lt.s32.totalorder %s12636_s24, %s12632_s23 }
  0x23   :  { %p12639_p0 = por %p12638_p13, %p12637_p12 }
  0x25   :  { %p12640_p1 = pnand %p12639_p0, %p12633_p11 }
  0x27   :  { %12643 = shalt.err (!%p12640_p1)
}
  0x28   :  { %68 = dma.hbm_to_vmem [thread:$0]  %s16831_s4, 16, %s66_s22, [#allocation9]  }
  0x29   :  { %s12810_s25 = smov [#allocation11]   ;;  %s12811_s27 = smov [#allocation14]  }
  0x2a   :  { %s87_s26 = sshll.u32 %s12810_s25, 4  ;;  %s109_s10 = sshll.u32 %s12811_s27, 4  ;;  %s88_s26 = int_to_ptr.vmem [resolvable:$true] %s87_s26  ;;  %s110_s10 = int_to_ptr.vmem [resolvable:$true] %s109_s10 }
  0x2b   :  { %s12644_s30 = scalar_lea.hbm %s16833_s6, 16 }
  0x2c   :  { %p12645_p2 = scmp.ne.s32.totalorder %s16833_s6, %s12644_s30  ;;  %p12648_p3 = scmp.lt.u32.totalorder %s12644_s30, %s16833_s6 }
  0x2e   :  { %p12650_p4 = pnand %p12648_p3, %p12645_p2 }
  0x30   :  { %12653 = shalt.err (!%p12650_p4)
}
  0x31   :  { %s12654_s4 = scalar_lea.vmem %s88_s26, 16  ;;  %s12658_s22 = scalar_lea.vmem %s88_s26, 32 }
  0x32   :  { %p12655_p5 = scmp.ne.s32.totalorder %s88_s26, %s12654_s4  ;;  %p12659_p6 = scmp.lt.s32.totalorder %s88_s26, %s88_s26 }
  0x33   :  { %p12660_p7 = scmp.lt.s32.totalorder %s12658_s22, %s12654_s4 }
  0x35   :  { %p12661_p8 = por %p12660_p7, %p12659_p6 }
  0x37   :  { %p12662_p9 = pnand %p12661_p8, %p12655_p5 }
  0x39   :  { %12665 = shalt.err (!%p12662_p9)
}
  0x3a   :  { %90 = dma.hbm_to_vmem [thread:$0]  %s16833_s6, 16, %s88_s26, [#allocation12]  }
  0x3b   :  { %s12666_s21 = scalar_lea.hbm %s16835_s8, 64 }
  0x3c   :  { %p12667_p10 = scmp.ne.s32.totalorder %s16835_s8, %s12666_s21  ;;  %p12670_p11 = scmp.lt.u32.totalorder %s12666_s21, %s16835_s8 }
  0x3e   :  { %p12672_p12 = pnand %p12670_p11, %p12667_p10 }
  0x40   :  { %12675 = shalt.err (!%p12672_p12)
}
  0x41   :  { %s12676_s25 = scalar_lea.vmem %s110_s10, 64  ;;  %p12681_p0 = scmp.lt.s32.totalorder %s110_s10, %s110_s10 }
  0x42   :  { %p12677_p13 = scmp.ne.s32.totalorder %s110_s10, %s12676_s25  ;;  %p12682_p1 = scmp.lt.s32.totalorder %s12676_s25, %s12676_s25 }
  0x44   :  { %p12683_p2 = por %p12682_p1, %p12681_p0 }
  0x46   :  { %p12684_p3 = pnand %p12683_p2, %p12677_p13 }
  0x48   :  { %12687 = shalt.err (!%p12684_p3)
}
  0x49   :  { %112 = dma.hbm_to_vmem [thread:$0]  %s16835_s8, 64, %s110_s10, [#allocation15]  }
  0x4a   :  { %s12812_s27 = smov [#allocation3]   ;;  %s12688_s12 = scalar_lea.hbm %s16828_s1, 2560 }
  0x4b   :  { %s30_s28 = sshll.u32 %s12812_s27, 4  ;;  %p12689_p4 = scmp.ne.s32.totalorder %s16828_s1, %s12688_s12  ;;  %s31_s28 = int_to_ptr.vmem [resolvable:$true] %s30_s28 }
  0x4c   :  { %p12692_p5 = scmp.lt.u32.totalorder %s12688_s12, %s16828_s1 }
  0x4e   :  { %p12694_p6 = pnand %p12692_p5, %p12689_p4 }
  0x50   :  { %12697 = shalt.err (!%p12694_p6)
}
  0x51   :  { %s12698_s22 = scalar_lea.vmem %s31_s28, 2560  ;;  %p12703_p8 = scmp.lt.s32.totalorder %s31_s28, %s31_s28 }
  0x52   :  { %p12699_p7 = scmp.ne.s32.totalorder %s31_s28, %s12698_s22  ;;  %p12704_p9 = scmp.lt.s32.totalorder %s12698_s22, %s12698_s22 }
  0x54   :  { %p12705_p10 = por %p12704_p9, %p12703_p8 }
  0x56   :  { %p12706_p11 = pnand %p12705_p10, %p12699_p7 }
  0x58   :  { %12709 = shalt.err (!%p12706_p11)
}
  0x59   :  { %s12813_s8 = smov 640   ;;  %s12814_s10 = smov 40  }
  0x5a   :  { %36 = dma.hbm_to_vmem [thread:$0]  %s16828_s1, 2560, %s31_s28, [#allocation4], %s12813_s8, %s12813_s8, %s12814_s10  }
  0x5b   :  { %s12815_s18 = smov [#allocation7]   ;;  %s12710_s24 = scalar_lea.hbm %s16830_s3, 18432 }
  0x5c   :  { %s52_s19 = sshll.u32 %s12815_s18, 4  ;;  %p12711_p12 = scmp.ne.s32.totalorder %s16830_s3, %s12710_s24  ;;  %s53_s19 = int_to_ptr.vmem [resolvable:$true] %s52_s19 }
  0x5d   :  { %p12714_p13 = scmp.lt.u32.totalorder %s12710_s24, %s16830_s3 }
  0x5f   :  { %p12716_p0 = pnand %p12714_p13, %p12711_p12 }
  0x61   :  { %12719 = shalt.err (!%p12716_p0)
}
  0x62   :  { %s12720_s26 = scalar_lea.vmem %s53_s19, 18432  ;;  %p12725_p2 = scmp.lt.s32.totalorder %s53_s19, %s53_s19 }
  0x63   :  { %p12721_p1 = scmp.ne.s32.totalorder %s53_s19, %s12720_s26  ;;  %p12726_p3 = scmp.lt.s32.totalorder %s12720_s26, %s12720_s26 }
  0x65   :  { %p12727_p4 = por %p12726_p3, %p12725_p2 }
  0x67   :  { %p12728_p5 = pnand %p12727_p4, %p12721_p1 }
  0x69   :  { %12731 = shalt.err (!%p12728_p5)
}
  0x6a   :  { %s12816_s1 = smov 128   ;;  %s12817_s27 = smov 8  }
  0x6b   :  { %58 = dma.hbm_to_vmem [thread:$0]  %s16830_s3, 18432, %s53_s19, [#allocation6], %s12816_s1, %s12816_s1, %s12817_s27  }
  0x6c   :  { %s12818_s30 = smov [#allocation10]   ;;  %s12819_s13 = smov [#allocation13]  }
  0x6d   :  { %s74_s12 = sshll.u32 %s12818_s30, 4  ;;  %s96_s14 = sshll.u32 %s12819_s13, 4  ;;  %s75_s12 = int_to_ptr.vmem [resolvable:$true] %s74_s12  ;;  %s12961_s14 = int_to_ptr.vmem [resolvable:$true] %s96_s14 }
  0x6e   :  { %s12732_s22 = scalar_lea.hbm %s16832_s5, 8192 }
  0x6f   :  { %p12733_p6 = scmp.ne.s32.totalorder %s16832_s5, %s12732_s22  ;;  %p12736_p7 = scmp.lt.u32.totalorder %s12732_s22, %s16832_s5 }
  0x71   :  { %p12738_p8 = pnand %p12736_p7, %p12733_p6 }
  0x73   :  { %12741 = shalt.err (!%p12738_p8)
}
  0x74   :  { %s12742_s3 = scalar_lea.vmem %s75_s12, 8192  ;;  %p12747_p10 = scmp.lt.s32.totalorder %s75_s12, %s75_s12 }
  0x75   :  { %p12743_p9 = scmp.ne.s32.totalorder %s75_s12, %s12742_s3  ;;  %p12748_p11 = scmp.lt.s32.totalorder %s12742_s3, %s12742_s3 }
  0x77   :  { %p12749_p12 = por %p12748_p11, %p12747_p10 }
  0x79   :  { %p12750_p13 = pnand %p12749_p12, %p12743_p9 }
  0x7b   :  { %12753 = shalt.err (!%p12750_p13)
}
  0x7c   :  { %80 = dma.hbm_to_vmem [thread:$0]  %s16832_s5, 8192, %s75_s12, [#allocation9], %s12816_s1, %s12816_s1, %s12817_s27  }
  0x7d   :  { %s12754_s24 = scalar_lea.hbm %s16834_s7, 57344 }
  0x7e   :  { %p12755_p0 = scmp.ne.s32.totalorder %s16834_s7, %s12754_s24  ;;  %p12758_p1 = scmp.lt.u32.totalorder %s12754_s24, %s16834_s7 }
  0x80   :  { %p12760_p2 = pnand %p12758_p1, %p12755_p0 }
  0x82   :  { %12763 = shalt.err (!%p12760_p2)
}
  0x83   :  { %s12764_s26 = scalar_lea.vmem %s12961_s14, 57344  ;;  %p12769_p4 = scmp.lt.s32.totalorder %s12961_s14, %s12961_s14 }
  0x84   :  { %p12765_p3 = scmp.ne.s32.totalorder %s12961_s14, %s12764_s26  ;;  %p12770_p5 = scmp.lt.s32.totalorder %s12764_s26, %s12764_s26 }
  0x86   :  { %p12771_p6 = por %p12770_p5, %p12769_p4 }
  0x88   :  { %p12772_p7 = pnand %p12771_p6, %p12765_p3 }
  0x8a   :  { %12775 = shalt.err (!%p12772_p7)
}
  0x8b   :  { %s12820_s5 = smov 512   ;;  %s12821_s1 = smov 32  }
  0x8c   :  { %102 = dma.hbm_to_vmem [thread:$0]  %s16834_s7, 57344, %s12961_s14, [#allocation12], %s12820_s5, %s12820_s5, %s12821_s1  }
  0x8d   :  { %s12822_s29 = smov [#allocation16]   ;;  %s12776_s15 = scalar_lea.hbm %s16836_s9, 64 }
  0x8e   :  { %s119_s30 = sshll.u32 %s12822_s29, 4  ;;  %p12777_p8 = scmp.ne.s32.totalorder %s16836_s9, %s12776_s15  ;;  %s120_s30 = int_to_ptr.vmem [resolvable:$true] %s119_s30 }
  0x8f   :  { %p12780_p9 = scmp.lt.u32.totalorder %s12776_s15, %s16836_s9 }
  0x91   :  { %p12782_p10 = pnand %p12780_p9, %p12777_p8 }
  0x93   :  { %12785 = shalt.err (!%p12782_p10)
}
  0x94   :  { %s12786_s16 = scalar_lea.vmem %s120_s30, 64  ;;  %p12791_p12 = scmp.lt.s32.totalorder %s120_s30, %s120_s30 }
  0x95   :  { %p12787_p11 = scmp.ne.s32.totalorder %s120_s30, %s12786_s16  ;;  %p12792_p13 = scmp.lt.s32.totalorder %s12786_s16, %s12786_s16 }
  0x97   :  { %p12793_p0 = por %p12792_p13, %p12791_p12 }
  0x99   :  { %p12794_p1 = pnand %p12793_p0, %p12787_p11 }
  0x9b   :  { %12797 = shalt.err (!%p12794_p1)
}
  0x9c   :  { %122 = dma.hbm_to_vmem [thread:$0]  %s16836_s9, 64, %s120_s30, [#allocation15]  }
  0x9d   :  { %12798 = dma.done.wait [#allocation4], 2560  }
  0x9e   :  { %12799 = vsyncadd [#allocation4], 4294964736 }
  0x9f   :  { %12800 = dma.done.wait [#allocation6], 18512  }
  0xa0   :  { %12801 = vsyncadd [#allocation6], 4294948784 }
  0xa1   :  { %12802 = dma.done.wait [#allocation9], 8208  }
  0xa2   :  { %12803 = vsyncadd [#allocation9], 4294959088 }
  0xa3   :  { %12804 = dma.done.wait [#allocation12], 57360  }
  0xa4   :  { %12805 = vsyncadd [#allocation12], 4294909936 }
  0xa5   :  { %12806 = dma.done.wait [#allocation15], 128  }
  0xa6   :  { %12807 = vsyncadd [#allocation15], 4294967168  ;;  %v16841_v1 = vmov 0.0   ;;  %v179_v2 = vld [vmem:[#allocation3 + $0x30] sm:$0xff]  ;;  %v181_v3 = vld [vmem:[#allocation3 + $0x40] sm:$0xff]  ;;  %vm183_vm0 = vcmask 64512  }
  0xa7   :  { %299 = vmatprep.mubr.f32.mxu0 %v16841_v1  ;;  %466 = vmatprep.mubr.f32.mxu1 %v16841_v1  ;;  %v178_v4 = vld [vmem:[#allocation3 + $0x28] sm:$0xff]  ;;  %v180_v5 = vld [vmem:[#allocation3 + $0x38] sm:$0xff]  ;;  %v174_v10 = vld [vmem:[#allocation3 + $0x10] sm:$0xff]  ;;  %vm12824_vm1 = vmmov 0   ;;  %v16839_v45 = vmov 0.0|0.0   ;;  %vm8198_vm2 = vcmask 1043458  }
  0xa8   :  { %235 = vmatprep.subr.mxu0 %v179_v2  ;;  %402 = vmatprep.subr.mxu1 %v181_v3  ;;  %v13009_v6 = vld [vmem:[%s16827_s0 + $0x8] sm:$0xff]  ;;  %v13020_v8 = vld [vmem:[%s16827_s0 + $0x10] sm:$0xff]  ;;  %v175_v9 = vld [vmem:[#allocation3 + $0x18] sm:$0xff]  ;;  %vm8226_vm3 = vcmask 3074  }
  0xa9   :  { %236 = vmatpush1.msra.mxu0 %v178_v4  ;;  %403 = vmatpush1.msra.mxu1 %v180_v5  ;;  %v182_v7 = vld [vmem:[#allocation3 + $0x48] sm:$0xff]  ;;  %v13032_v11 = vld [vmem:[%s16827_s0 + $0x18] sm:$0xff]  ;;  %v13043_v13 = vld [vmem:[%s16827_s0 + $0x20] sm:$0xff] }
  0xaa   :  { %8237 = vmatmul.mubr.msk.f32.vlgmr.msra.gmra.mrb[0].mxu0 %vm183_vm0, %v13009_v6  ;;  %8254 = vmatmul.mubr.msk.f32.vlgmr.msra.gmra.mrb[0].mxu1 %vm183_vm0, %v13009_v6  ;;  %v173_v12 = vld [vmem:[#allocation3 + $0x8] sm:$0xff]  ;;  %v13077_v16 = vld [vmem:[%s16827_s0 + $0x38] sm:$0xff]  ;;  %v13088_v17 = vld [vmem:[%s16827_s0 + $0x40] sm:$0xff] }
  0xab   :  { %9728 = vmatprep.subr.mxu0 %v16841_v1  ;;  %305 = vmatprep.mubr.f32.mxu0 %v16841_v1  ;;  %v13055_v14 = vld [vmem:[%s16827_s0 + $0x28] sm:$0xff]  ;;  %v13066_v15 = vld [vmem:[%s16827_s0 + $0x30] sm:$0xff]  ;;  %v13121_v20 = vld [vmem:[%s16827_s0 + $0x58] sm:$0xff] }
  0xac   :  { %9729 = vmatpush3.msra.mxu0 %v182_v7  ;;  %472 = vmatprep.mubr.f32.mxu1 %v16841_v1  ;;  %v13099_v18 = vld [vmem:[%s16827_s0 + $0x48] sm:$0xff]  ;;  %v13110_v19 = vld [vmem:[%s16827_s0 + $0x50] sm:$0xff]  ;;  %v13132_v21 = vld [vmem:[%s16827_s0 + $0x60] sm:$0xff] }
  0xad   :  { %889 = vmatprep.subr.mxu1 %v175_v9  ;;  %722 = vmatprep.subr.mxu0 %v173_v12  ;;  %v13143_v22 = vld [vmem:[%s16827_s0 + $0x68] sm:$0xff]  ;;  %v13154_v23 = vld [vmem:[%s16827_s0 + $0x70] sm:$0xff]  ;;  %v13165_v24 = vld [vmem:[%s16827_s0 + $0x78] sm:$0xff] }
  0xae   :  { %8238 = vmatmul.mubr.msk.f32.gmra.mrb[2].mxu0 %vm183_vm0, %v13020_v8  ;;  %8255 = vmatmul.mubr.msk.f32.gmra.mrb[2].mxu1 %vm183_vm0, %v13020_v8  ;;  %v13176_v25 = vld [vmem:[%s16827_s0 + $0x80] sm:$0xff]  ;;  %v13187_v26 = vld [vmem:[%s16827_s0 + $0x88] sm:$0xff]  ;;  %v1207_v32 = vld [vmem:[#allocation3 + $0x50] sm:$0xff] }
  0xaf   :  { %311 = vmatprep.mubr.f32.mxu0 %v16841_v1  ;;  %478 = vmatprep.mubr.f32.mxu1 %v16841_v1  ;;  %v13199_v27 = vld [vmem:[%s16827_s0] sm:$0xff]  ;;  %v1210_v31 = vld [vmem:[#allocation3 + $0x68] sm:$0xff]  ;;  %v1788_v34 = vld [vmem:[#allocation3 + $0x90] sm:$0xff] }
  0xb0   :  { %890 = vmatpush1.msra.mxu1 %v174_v10  ;;  %v172_v28 = vld [vmem:[#allocation3] sm:$0xff]  ;;  %v1208_v30 = vld [vmem:[#allocation3 + $0x58] sm:$0xff]  ;;  %v1211_v35 = vld [vmem:[#allocation3 + $0x70] sm:$0xff] }
  0xb1   :  { %9781 = vmatprep.subr.mxu1 %v16841_v1  ;;  %v176_v29 = vld [vmem:[#allocation3 + $0x20] sm:$0xff]  ;;  %v1787_v36 = vld [vmem:[#allocation3 + $0x88] sm:$0xff]  ;;  %v1785_v39 = vld [vmem:[#allocation3 + $0x78] sm:$0xff] }
  0xb2   :  { %8239 = vmatmul.mubr.msk.f32.gmra.mrb[4].mxu0 %vm183_vm0, %v13032_v11  ;;  %8256 = vmatmul.mubr.msk.f32.gmra.mrb[4].mxu1 %vm183_vm0, %v13032_v11  ;;  %v1209_v33 = vld [vmem:[#allocation3 + $0x60] sm:$0xff]  ;;  %v13539_v38 = vld [vmem:[%s16827_s0 + $0x90] sm:$0xff]  ;;  %v1789_v40 = vld [vmem:[#allocation3 + $0x98] sm:$0xff] }
  0xb3   :  { %317 = vmatprep.mubr.f32.mxu0 %v16841_v1  ;;  %484 = vmatprep.mubr.f32.mxu1 %v16841_v1  ;;  %v1786_v37 = vld [vmem:[#allocation3 + $0x80] sm:$0xff]  ;;  %v13692_v7 = vld [vmem:[%s16827_s0 + $0x98] sm:$0xff]  ;;  %v2641_v10 = vld [vmem:[#allocation7 + $0x288] sm:$0xff] }
  0xb4   :  { %v2640_v9 = vld [vmem:[#allocation7 + $0x280] sm:$0xff] }
  0xb6   :  { %8240 = vmatmul.mubr.msk.f32.gmra.mrb[6].mxu0 %vm183_vm0, %v13043_v13  ;;  %8257 = vmatmul.mubr.msk.f32.gmra.mrb[6].mxu1 %vm183_vm0, %v13043_v13 }
  0xb7   :  { %323 = vmatprep.mubr.f32.mxu0 %v16841_v1  ;;  %490 = vmatprep.mubr.f32.mxu1 %v16841_v1 }
  0xba   :  { %8241 = vmatmul.mubr.msk.f32.gmra.mrb[8].mxu0 %vm183_vm0, %v13055_v14  ;;  %8258 = vmatmul.mubr.msk.f32.gmra.mrb[8].mxu1 %vm183_vm0, %v13055_v14 }
  0xbb   :  { %329 = vmatprep.mubr.f32.mxu0 %v16841_v1  ;;  %496 = vmatprep.mubr.f32.mxu1 %v16841_v1 }
  0xbe   :  { %8242 = vmatmul.mubr.msk.f32.gmra.mrb[10].mxu0 %vm183_vm0, %v13066_v15  ;;  %8259 = vmatmul.mubr.msk.f32.gmra.mrb[10].mxu1 %vm183_vm0, %v13066_v15 }
  0xbf   :  { %335 = vmatprep.mubr.f32.mxu0 %v16841_v1  ;;  %502 = vmatprep.mubr.f32.mxu1 %v16841_v1 }
  0xc2   :  { %8243 = vmatmul.mubr.msk.f32.gmra.mrb[12].mxu0 %vm183_vm0, %v13077_v16  ;;  %8260 = vmatmul.mubr.msk.f32.gmra.mrb[12].mxu1 %vm183_vm0, %v13077_v16 }
  0xc3   :  { %341 = vmatprep.mubr.f32.mxu0 %v16841_v1  ;;  %508 = vmatprep.mubr.f32.mxu1 %v16841_v1 }
  0xc6   :  { %8244 = vmatmul.mubr.msk.f32.gmra.mrb[14].mxu0 %vm183_vm0, %v13088_v17  ;;  %8261 = vmatmul.mubr.msk.f32.gmra.mrb[14].mxu1 %vm183_vm0, %v13088_v17 }
  0xc7   :  { %347 = vmatprep.mubr.f32.mxu0 %v16841_v1  ;;  %514 = vmatprep.mubr.f32.mxu1 %v16841_v1 }
  0xca   :  { %8245 = vmatmul.mubr.msk.f32.gmra.mrb[16].mxu0 %vm183_vm0, %v13099_v18  ;;  %8262 = vmatmul.mubr.msk.f32.gmra.mrb[16].mxu1 %vm183_vm0, %v13099_v18 }
  0xcb   :  { %353 = vmatprep.mubr.f32.mxu0 %v16841_v1  ;;  %520 = vmatprep.mubr.f32.mxu1 %v16841_v1 }
  0xce   :  { %8246 = vmatmul.mubr.msk.f32.gmra.mrb[18].mxu0 %vm183_vm0, %v13110_v19  ;;  %8263 = vmatmul.mubr.msk.f32.gmra.mrb[18].mxu1 %vm183_vm0, %v13110_v19 }
  0xcf   :  { %359 = vmatprep.mubr.f32.mxu0 %v16841_v1  ;;  %526 = vmatprep.mubr.f32.mxu1 %v16841_v1 }
  0xd2   :  { %8247 = vmatmul.mubr.msk.f32.gmra.mrb[20].mxu0 %vm183_vm0, %v13121_v20  ;;  %8264 = vmatmul.mubr.msk.f32.gmra.mrb[20].mxu1 %vm183_vm0, %v13121_v20 }
  0xd3   :  { %365 = vmatprep.mubr.f32.mxu0 %v16841_v1  ;;  %532 = vmatprep.mubr.f32.mxu1 %v16841_v1 }
  0xd6   :  { %8248 = vmatmul.mubr.msk.f32.gmra.mrb[22].mxu0 %vm183_vm0, %v13132_v21  ;;  %8265 = vmatmul.mubr.msk.f32.gmra.mrb[22].mxu1 %vm183_vm0, %v13132_v21 }
  0xd7   :  { %371 = vmatprep.mubr.f32.mxu0 %v16841_v1  ;;  %538 = vmatprep.mubr.f32.mxu1 %v16841_v1 }
  0xda   :  { %8249 = vmatmul.mubr.msk.f32.gmra.mrb[24].mxu0 %vm183_vm0, %v13143_v22  ;;  %8266 = vmatmul.mubr.msk.f32.gmra.mrb[24].mxu1 %vm183_vm0, %v13143_v22 }
  0xdb   :  { %377 = vmatprep.mubr.f32.mxu0 %v16841_v1  ;;  %544 = vmatprep.mubr.f32.mxu1 %v16841_v1 }
  0xde   :  { %8250 = vmatmul.mubr.msk.f32.gmra.mrb[26].mxu0 %vm183_vm0, %v13154_v23  ;;  %8267 = vmatmul.mubr.msk.f32.gmra.mrb[26].mxu1 %vm183_vm0, %v13154_v23 }
  0xdf   :  { %383 = vmatprep.mubr.f32.mxu0 %v16841_v1  ;;  %550 = vmatprep.mubr.f32.mxu1 %v16841_v1 }
  0xe2   :  { %8251 = vmatmul.mubr.msk.f32.gmra.mrb[28].mxu0 %vm183_vm0, %v13165_v24  ;;  %8268 = vmatmul.mubr.msk.f32.gmra.mrb[28].mxu1 %vm183_vm0, %v13165_v24 }
  0xe3   :  { %389 = vmatprep.mubr.f32.mxu0 %v16841_v1  ;;  %556 = vmatprep.mubr.f32.mxu1 %v16841_v1 }
  0xe6   :  { %8252 = vmatmul.mubr.msk.f32.gmra.mrb[30].mxu0 %vm183_vm0, %v13176_v25  ;;  %8269 = vmatmul.mubr.msk.f32.gmra.mrb[30].mxu1 %vm183_vm0, %v13176_v25 }
  0xe7   :  { %395 = vmatprep.mubr.f32.mxu0 %v16841_v1  ;;  %562 = vmatprep.mubr.f32.mxu1 %v16841_v1 }
  0xea   :  { %8253 = vmatmul.mubr.msk.f32.gmra.mrb[32].mxu0 %vm183_vm0, %v13187_v26  ;;  %8270 = vmatmul.mubr.msk.f32.gmra.mrb[32].mxu1 %vm183_vm0, %v13187_v26 }
  0xeb   :  { %9730 = vmatprep.mubr.msk.f32.mxu0 %vm12824_vm1, %v16841_v1  ;;  %953 = vmatprep.mubr.f32.mxu1 %v16841_v1 }
  0xee   :  { %9731 = vmatmul.mubr.msk.f32.vlgmr.msra.gmra.mrb[34].mxu0 %vm183_vm0, %v13009_v6  ;;  %8305 = vmatmul.mubr.msk.f32.vlgmr.msra.gmra.mrb[0].mxu1 %vm183_vm0, %v13199_v27 }
  0xef   :  { %723 = vmatpush1.msra.mxu0 %v172_v28  ;;  %9733 = vmatprep.mubr.msk.f32.mxu0 %vm12824_vm1, %v16841_v1 }
  0xf0   :  { %959 = vmatprep.mubr.f32.mxu1 %v16841_v1  ;;  %9782 = vmatpush3.msra.mxu1 %v176_v29  ;;  %v2642_v29 = vld [vmem:[#allocation7 + $0x290] sm:$0xff] }
  0xf1   :  { %1215 = vmatprep.subr.mxu0 %v1208_v30  ;;  %1382 = vmatprep.subr.mxu1 %v1210_v31  ;;  %v2643_v30 = vld [vmem:[#allocation7 + $0x298] sm:$0xff] }
  0xf2   :  { %9734 = vmatmul.mubr.msk.f32.gmra.mrb[36].mxu0 %vm183_vm0, %v13020_v8  ;;  %8306 = vmatmul.mubr.msk.f32.gmra.mrb[2].mxu1 %vm183_vm0, %v13009_v6 }
  0xf3   :  { %9736 = vmatprep.mubr.msk.f32.mxu0 %vm12824_vm1, %v16841_v1  ;;  %965 = vmatprep.mubr.f32.mxu1 %v16841_v1 }
  0xf6   :  { %9737 = vmatmul.mubr.msk.f32.gmra.mrb[38].mxu0 %vm183_vm0, %v13032_v11  ;;  %8307 = vmatmul.mubr.msk.f32.gmra.mrb[4].mxu1 %vm183_vm0, %v13020_v8 }
  0xf7   :  { %9739 = vmatprep.mubr.msk.f32.mxu0 %vm12824_vm1, %v16841_v1  ;;  %971 = vmatprep.mubr.f32.mxu1 %v16841_v1 }
  0xfa   :  { %9740 = vmatmul.mubr.msk.f32.gmra.mrb[40].mxu0 %vm183_vm0, %v13043_v13  ;;  %8308 = vmatmul.mubr.msk.f32.gmra.mrb[6].mxu1 %vm183_vm0, %v13032_v11 }
  0xfb   :  { %9742 = vmatprep.mubr.msk.f32.mxu0 %vm12824_vm1, %v16841_v1  ;;  %977 = vmatprep.mubr.f32.mxu1 %v16841_v1 }
  0xfe   :  { %9743 = vmatmul.mubr.msk.f32.gmra.mrb[42].mxu0 %vm183_vm0, %v13055_v14  ;;  %8309 = vmatmul.mubr.msk.f32.gmra.mrb[8].mxu1 %vm183_vm0, %v13043_v13 }
  0xff   :  { %9745 = vmatprep.mubr.msk.f32.mxu0 %vm12824_vm1, %v16841_v1  ;;  %983 = vmatprep.mubr.f32.mxu1 %v16841_v1 }
 0x102   :  { %9746 = vmatmul.mubr.msk.f32.gmra.mrb[44].mxu0 %vm183_vm0, %v13066_v15  ;;  %8310 = vmatmul.mubr.msk.f32.gmra.mrb[10].mxu1 %vm183_vm0, %v13055_v14 }
 0x103   :  { %9748 = vmatprep.mubr.msk.f32.mxu0 %vm12824_vm1, %v16841_v1  ;;  %989 = vmatprep.mubr.f32.mxu1 %v16841_v1 }
 0x106   :  { %9749 = vmatmul.mubr.msk.f32.gmra.mrb[46].mxu0 %vm183_vm0, %v13077_v16  ;;  %8311 = vmatmul.mubr.msk.f32.gmra.mrb[12].mxu1 %vm183_vm0, %v13066_v15 }
 0x107   :  { %9751 = vmatprep.mubr.msk.f32.mxu0 %vm12824_vm1, %v16841_v1  ;;  %995 = vmatprep.mubr.f32.mxu1 %v16841_v1 }
 0x10a   :  { %9752 = vmatmul.mubr.msk.f32.gmra.mrb[48].mxu0 %vm183_vm0, %v13088_v17  ;;  %8312 = vmatmul.mubr.msk.f32.gmra.mrb[14].mxu1 %vm183_vm0, %v13077_v16 }
 0x10b   :  { %9754 = vmatprep.mubr.msk.f32.mxu0 %vm12824_vm1, %v16841_v1  ;;  %1001 = vmatprep.mubr.f32.mxu1 %v16841_v1 }
 0x10e   :  { %9755 = vmatmul.mubr.msk.f32.gmra.mrb[50].mxu0 %vm183_vm0, %v13099_v18  ;;  %8313 = vmatmul.mubr.msk.f32.gmra.mrb[16].mxu1 %vm183_vm0, %v13088_v17 }
 0x10f   :  { %9757 = vmatprep.mubr.msk.f32.mxu0 %vm12824_vm1, %v16841_v1  ;;  %1007 = vmatprep.mubr.f32.mxu1 %v16841_v1 }
 0x112   :  { %9758 = vmatmul.mubr.msk.f32.gmra.mrb[52].mxu0 %vm183_vm0, %v13110_v19  ;;  %8314 = vmatmul.mubr.msk.f32.gmra.mrb[18].mxu1 %vm183_vm0, %v13099_v18 }
 0x113   :  { %9760 = vmatprep.mubr.msk.f32.mxu0 %vm12824_vm1, %v16841_v1  ;;  %1013 = vmatprep.mubr.f32.mxu1 %v16841_v1 }
 0x116   :  { %9761 = vmatmul.mubr.msk.f32.gmra.mrb[54].mxu0 %vm183_vm0, %v13121_v20  ;;  %8315 = vmatmul.mubr.msk.f32.gmra.mrb[20].mxu1 %vm183_vm0, %v13110_v19 }
 0x117   :  { %9763 = vmatprep.mubr.msk.f32.mxu0 %vm12824_vm1, %v16841_v1  ;;  %1019 = vmatprep.mubr.f32.mxu1 %v16841_v1 }
 0x11a   :  { %9764 = vmatmul.mubr.msk.f32.gmra.mrb[56].mxu0 %vm183_vm0, %v13132_v21  ;;  %8316 = vmatmul.mubr.msk.f32.gmra.mrb[22].mxu1 %vm183_vm0, %v13121_v20 }
 0x11b   :  { %9766 = vmatprep.mubr.msk.f32.mxu0 %vm12824_vm1, %v16841_v1  ;;  %1025 = vmatprep.mubr.f32.mxu1 %v16841_v1 }
 0x11e   :  { %9767 = vmatmul.mubr.msk.f32.gmra.mrb[58].mxu0 %vm183_vm0, %v13143_v22  ;;  %8317 = vmatmul.mubr.msk.f32.gmra.mrb[24].mxu1 %vm183_vm0, %v13132_v21 }
 0x11f   :  { %9769 = vmatprep.mubr.msk.f32.mxu0 %vm12824_vm1, %v16841_v1  ;;  %1031 = vmatprep.mubr.f32.mxu1 %v16841_v1 }
 0x122   :  { %9770 = vmatmul.mubr.msk.f32.gmra.mrb[60].mxu0 %vm183_vm0, %v13154_v23  ;;  %8318 = vmatmul.mubr.msk.f32.gmra.mrb[26].mxu1 %vm183_vm0, %v13143_v22 }
 0x123   :  { %9772 = vmatprep.mubr.msk.f32.mxu0 %vm12824_vm1, %v16841_v1  ;;  %1037 = vmatprep.mubr.f32.mxu1 %v16841_v1 }
 0x126   :  { %9773 = vmatmul.mubr.msk.f32.gmra.mrb[62].mxu0 %vm183_vm0, %v13165_v24  ;;  %8319 = vmatmul.mubr.msk.f32.gmra.mrb[28].mxu1 %vm183_vm0, %v13154_v23 }
 0x127   :  { %9775 = vmatprep.mubr.msk.f32.mxu0 %vm12824_vm1, %v16841_v1  ;;  %1043 = vmatprep.mubr.f32.mxu1 %v16841_v1 }
 0x12a   :  { %9776 = vmatmul.mubr.msk.f32.gmra.mrb[64].mxu0 %vm183_vm0, %v13176_v25  ;;  %8320 = vmatmul.mubr.msk.f32.gmra.mrb[30].mxu1 %vm183_vm0, %v13165_v24 }
 0x12b   :  { %9778 = vmatprep.mubr.msk.f32.mxu0 %vm12824_vm1, %v16841_v1  ;;  %1049 = vmatprep.mubr.f32.mxu1 %v16841_v1 }
 0x12e   :  { %9779 = vmatmul.mubr.msk.f32.gmra.mrb[66].mxu0 %vm183_vm0, %v13187_v26  ;;  %8321 = vmatmul.mubr.msk.f32.gmra.mrb[32].mxu1 %vm183_vm0, %v13176_v25 }
 0x12f   :  { %786 = vmatprep.mubr.f32.mxu0 %v16841_v1  ;;  %9783 = vmatprep.mubr.msk.f32.mxu1 %vm12824_vm1, %v16841_v1 }
 0x132   :  { %8288 = vmatmul.mubr.msk.f32.vlgmr.msra.gmra.mrb[0].mxu0 %vm183_vm0, %v13199_v27  ;;  %9784 = vmatmul.mubr.msk.f32.vlgmr.msra.gmra.mrb[34].mxu1 %vm183_vm0, %v13199_v27  ;;  %v13703_v27 = vpack.c.bf16 %v2641_v10, %v2640_v9  ;;  %v2655_v10 = vld [vmem:[#allocation7 + $0x2f8] sm:$0xff] }
 0x133   :  { %1216 = vmatpush1.msra.mxu0 %v1207_v32  ;;  %792 = vmatprep.mubr.f32.mxu0 %v16841_v1  ;;  %v13715_v32 = vpack.c.bf16 %v2643_v30, %v2642_v29 }
 0x134   :  { %9786 = vmatprep.mubr.msk.f32.mxu1 %vm12824_vm1, %v16841_v1  ;;  %1383 = vmatpush1.msra.mxu1 %v1209_v33  ;;  %17132 = vst [vmem:[#allocation22_spill] sm:$0xff] %v13703_v27 }
 0x135   :  { %9834 = vmatprep.subr.mxu0 %v16841_v1  ;;  %1960 = vmatprep.subr.mxu1 %v1788_v34  ;;  %17133 = vst [vmem:[#allocation23_spill] sm:$0xff] %v13715_v32  ;;  %v2644_v34 = vld [vmem:[#allocation7 + $0x2a0] sm:$0xff] }
 0x136   :  { %8289 = vmatmul.mubr.msk.f32.gmra.mrb[2].mxu0 %vm183_vm0, %v13009_v6  ;;  %9787 = vmatmul.mubr.msk.f32.gmra.mrb[36].mxu1 %vm183_vm0, %v13009_v6 }
 0x137   :  { %798 = vmatprep.mubr.f32.mxu0 %v16841_v1  ;;  %9789 = vmatprep.mubr.msk.f32.mxu1 %vm12824_vm1, %v16841_v1 }
 0x13a   :  { %8290 = vmatmul.mubr.msk.f32.gmra.mrb[4].mxu0 %vm183_vm0, %v13020_v8  ;;  %9790 = vmatmul.mubr.msk.f32.gmra.mrb[38].mxu1 %vm183_vm0, %v13020_v8 }
 0x13b   :  { %804 = vmatprep.mubr.f32.mxu0 %v16841_v1  ;;  %9792 = vmatprep.mubr.msk.f32.mxu1 %vm12824_vm1, %v16841_v1 }
 0x13e   :  { %8291 = vmatmul.mubr.msk.f32.gmra.mrb[6].mxu0 %vm183_vm0, %v13032_v11  ;;  %9793 = vmatmul.mubr.msk.f32.gmra.mrb[40].mxu1 %vm183_vm0, %v13032_v11 }
 0x13f   :  { %810 = vmatprep.mubr.f32.mxu0 %v16841_v1  ;;  %9795 = vmatprep.mubr.msk.f32.mxu1 %vm12824_vm1, %v16841_v1 }
 0x142   :  { %8292 = vmatmul.mubr.msk.f32.gmra.mrb[8].mxu0 %vm183_vm0, %v13043_v13  ;;  %9796 = vmatmul.mubr.msk.f32.gmra.mrb[42].mxu1 %vm183_vm0, %v13043_v13 }
 0x143   :  { %816 = vmatprep.mubr.f32.mxu0 %v16841_v1  ;;  %9798 = vmatprep.mubr.msk.f32.mxu1 %vm12824_vm1, %v16841_v1 }
 0x146   :  { %8293 = vmatmul.mubr.msk.f32.gmra.mrb[10].mxu0 %vm183_vm0, %v13055_v14  ;;  %9799 = vmatmul.mubr.msk.f32.gmra.mrb[44].mxu1 %vm183_vm0, %v13055_v14 }
 0x147   :  { %822 = vmatprep.mubr.f32.mxu0 %v16841_v1  ;;  %9801 = vmatprep.mubr.msk.f32.mxu1 %vm12824_vm1, %v16841_v1 }
 0x14a   :  { %8294 = vmatmul.mubr.msk.f32.gmra.mrb[12].mxu0 %vm183_vm0, %v13066_v15  ;;  %9802 = vmatmul.mubr.msk.f32.gmra.mrb[46].mxu1 %vm183_vm0, %v13066_v15 }
 0x14b   :  { %828 = vmatprep.mubr.f32.mxu0 %v16841_v1  ;;  %9804 = vmatprep.mubr.msk.f32.mxu1 %vm12824_vm1, %v16841_v1 }
 0x14e   :  { %8295 = vmatmul.mubr.msk.f32.gmra.mrb[14].mxu0 %vm183_vm0, %v13077_v16  ;;  %9805 = vmatmul.mubr.msk.f32.gmra.mrb[48].mxu1 %vm183_vm0, %v13077_v16 }
 0x14f   :  { %834 = vmatprep.mubr.f32.mxu0 %v16841_v1  ;;  %9807 = vmatprep.mubr.msk.f32.mxu1 %vm12824_vm1, %v16841_v1 }
 0x152   :  { %8296 = vmatmul.mubr.msk.f32.gmra.mrb[16].mxu0 %vm183_vm0, %v13088_v17  ;;  %9808 = vmatmul.mubr.msk.f32.gmra.mrb[50].mxu1 %vm183_vm0, %v13088_v17 }
 0x153   :  { %840 = vmatprep.mubr.f32.mxu0 %v16841_v1  ;;  %9810 = vmatprep.mubr.msk.f32.mxu1 %vm12824_vm1, %v16841_v1 }
 0x156   :  { %8297 = vmatmul.mubr.msk.f32.gmra.mrb[18].mxu0 %vm183_vm0, %v13099_v18  ;;  %9811 = vmatmul.mubr.msk.f32.gmra.mrb[52].mxu1 %vm183_vm0, %v13099_v18 }
 0x157   :  { %846 = vmatprep.mubr.f32.mxu0 %v16841_v1  ;;  %9813 = vmatprep.mubr.msk.f32.mxu1 %vm12824_vm1, %v16841_v1 }
 0x15a   :  { %8298 = vmatmul.mubr.msk.f32.gmra.mrb[20].mxu0 %vm183_vm0, %v13110_v19  ;;  %9814 = vmatmul.mubr.msk.f32.gmra.mrb[54].mxu1 %vm183_vm0, %v13110_v19 }
 0x15b   :  { %852 = vmatprep.mubr.f32.mxu0 %v16841_v1  ;;  %9816 = vmatprep.mubr.msk.f32.mxu1 %vm12824_vm1, %v16841_v1 }
 0x15e   :  { %8299 = vmatmul.mubr.msk.f32.gmra.mrb[22].mxu0 %vm183_vm0, %v13121_v20  ;;  %9817 = vmatmul.mubr.msk.f32.gmra.mrb[56].mxu1 %vm183_vm0, %v13121_v20 }
 0x15f   :  { %858 = vmatprep.mubr.f32.mxu0 %v16841_v1  ;;  %9819 = vmatprep.mubr.msk.f32.mxu1 %vm12824_vm1, %v16841_v1 }
 0x162   :  { %8300 = vmatmul.mubr.msk.f32.gmra.mrb[24].mxu0 %vm183_vm0, %v13132_v21  ;;  %9820 = vmatmul.mubr.msk.f32.gmra.mrb[58].mxu1 %vm183_vm0, %v13132_v21 }
 0x163   :  { %864 = vmatprep.mubr.f32.mxu0 %v16841_v1  ;;  %9822 = vmatprep.mubr.msk.f32.mxu1 %vm12824_vm1, %v16841_v1 }
 0x166   :  { %8301 = vmatmul.mubr.msk.f32.gmra.mrb[26].mxu0 %vm183_vm0, %v13143_v22  ;;  %9823 = vmatmul.mubr.msk.f32.gmra.mrb[60].mxu1 %vm183_vm0, %v13143_v22 }
 0x167   :  { %870 = vmatprep.mubr.f32.mxu0 %v16841_v1  ;;  %9825 = vmatprep.mubr.msk.f32.mxu1 %vm12824_vm1, %v16841_v1 }
 0x16a   :  { %8302 = vmatmul.mubr.msk.f32.gmra.mrb[28].mxu0 %vm183_vm0, %v13154_v23  ;;  %9826 = vmatmul.mubr.msk.f32.gmra.mrb[62].mxu1 %vm183_vm0, %v13154_v23 }
 0x16b   :  { %876 = vmatprep.mubr.f32.mxu0 %v16841_v1  ;;  %9828 = vmatprep.mubr.msk.f32.mxu1 %vm12824_vm1, %v16841_v1 }
 0x16e   :  { %8303 = vmatmul.mubr.msk.f32.gmra.mrb[30].mxu0 %vm183_vm0, %v13165_v24  ;;  %9829 = vmatmul.mubr.msk.f32.gmra.mrb[64].mxu1 %vm183_vm0, %v13165_v24 }
 0x16f   :  { %882 = vmatprep.mubr.f32.mxu0 %v16841_v1  ;;  %9831 = vmatprep.mubr.msk.f32.mxu1 %vm12824_vm1, %v16841_v1 }
 0x172   :  { %8304 = vmatmul.mubr.msk.f32.gmra.mrb[32].mxu0 %vm183_vm0, %v13176_v25  ;;  %9832 = vmatmul.mubr.msk.f32.gmra.mrb[66].mxu1 %vm183_vm0, %v13176_v25 }
 0x173   :  { %1279 = vmatprep.mubr.f32.mxu0 %v16841_v1  ;;  %1446 = vmatprep.mubr.f32.mxu1 %v16841_v1 }
 0x176   :  { %8339 = vmatmul.mubr.msk.f32.vlgmr.msra.gmra.mrb[0].mxu0 %vm183_vm0, %v13020_v8  ;;  %8356 = vmatmul.mubr.msk.f32.vlgmr.msra.gmra.mrb[0].mxu1 %vm183_vm0, %v13020_v8 }
 0x177   :  { %9835 = vmatpush3.msra.mxu0 %v1211_v35  ;;  %1285 = vmatprep.mubr.f32.mxu0 %v16841_v1  ;;  %v2645_v35 = vld [vmem:[#allocation7 + $0x2a8] sm:$0xff] }
 0x178   :  { %1452 = vmatprep.mubr.f32.mxu1 %v16841_v1  ;;  %1961 = vmatpush1.msra.mxu1 %v1787_v36 }
 0x179   :  { %1793 = vmatprep.subr.mxu0 %v1786_v37  ;;  %9887 = vmatprep.subr.mxu1 %v16841_v1 }
 0x17a   :  { %8340 = vmatmul.mubr.msk.f32.gmra.mrb[2].mxu0 %vm183_vm0, %v13032_v11  ;;  %8357 = vmatmul.mubr.msk.f32.gmra.mrb[2].mxu1 %vm183_vm0, %v13032_v11 }
 0x17b   :  { %1291 = vmatprep.mubr.f32.mxu0 %v16841_v1  ;;  %1458 = vmatprep.mubr.f32.mxu1 %v16841_v1 }
 0x17e   :  { %8341 = vmatmul.mubr.msk.f32.gmra.mrb[4].mxu0 %vm183_vm0, %v13043_v13  ;;  %8358 = vmatmul.mubr.msk.f32.gmra.mrb[4].mxu1 %vm183_vm0, %v13043_v13 }
 0x17f   :  { %1297 = vmatprep.mubr.f32.mxu0 %v16841_v1  ;;  %1464 = vmatprep.mubr.f32.mxu1 %v16841_v1 }
 0x182   :  { %8342 = vmatmul.mubr.msk.f32.gmra.mrb[6].mxu0 %vm183_vm0, %v13055_v14  ;;  %8359 = vmatmul.mubr.msk.f32.gmra.mrb[6].mxu1 %vm183_vm0, %v13055_v14 }
 0x183   :  { %1303 = vmatprep.mubr.f32.mxu0 %v16841_v1  ;;  %1470 = vmatprep.mubr.f32.mxu1 %v16841_v1 }
 0x186   :  { %8343 = vmatmul.mubr.msk.f32.gmra.mrb[8].mxu0 %vm183_vm0, %v13066_v15  ;;  %8360 = vmatmul.mubr.msk.f32.gmra.mrb[8].mxu1 %vm183_vm0, %v13066_v15 }
 0x187   :  { %1309 = vmatprep.mubr.f32.mxu0 %v16841_v1  ;;  %1476 = vmatprep.mubr.f32.mxu1 %v16841_v1 }
 0x18a   :  { %8344 = vmatmul.mubr.msk.f32.gmra.mrb[10].mxu0 %vm183_vm0, %v13077_v16  ;;  %8361 = vmatmul.mubr.msk.f32.gmra.mrb[10].mxu1 %vm183_vm0, %v13077_v16 }
 0x18b   :  { %1315 = vmatprep.mubr.f32.mxu0 %v16841_v1  ;;  %1482 = vmatprep.mubr.f32.mxu1 %v16841_v1 }
 0x18e   :  { %8345 = vmatmul.mubr.msk.f32.gmra.mrb[12].mxu0 %vm183_vm0, %v13088_v17  ;;  %8362 = vmatmul.mubr.msk.f32.gmra.mrb[12].mxu1 %vm183_vm0, %v13088_v17 }
 0x18f   :  { %1321 = vmatprep.mubr.f32.mxu0 %v16841_v1  ;;  %1488 = vmatprep.mubr.f32.mxu1 %v16841_v1 }
 0x192   :  { %8346 = vmatmul.mubr.msk.f32.gmra.mrb[14].mxu0 %vm183_vm0, %v13099_v18  ;;  %8363 = vmatmul.mubr.msk.f32.gmra.mrb[14].mxu1 %vm183_vm0, %v13099_v18 }
 0x193   :  { %1327 = vmatprep.mubr.f32.mxu0 %v16841_v1  ;;  %1494 = vmatprep.mubr.f32.mxu1 %v16841_v1 }
 0x196   :  { %8347 = vmatmul.mubr.msk.f32.gmra.mrb[16].mxu0 %vm183_vm0, %v13110_v19  ;;  %8364 = vmatmul.mubr.msk.f32.gmra.mrb[16].mxu1 %vm183_vm0, %v13110_v19 }
 0x197   :  { %1333 = vmatprep.mubr.f32.mxu0 %v16841_v1  ;;  %1500 = vmatprep.mubr.f32.mxu1 %v16841_v1 }
 0x19a   :  { %8348 = vmatmul.mubr.msk.f32.gmra.mrb[18].mxu0 %vm183_vm0, %v13121_v20  ;;  %8365 = vmatmul.mubr.msk.f32.gmra.mrb[18].mxu1 %vm183_vm0, %v13121_v20 }
 0x19b   :  { %1339 = vmatprep.mubr.f32.mxu0 %v16841_v1  ;;  %1506 = vmatprep.mubr.f32.mxu1 %v16841_v1 }
 0x19e   :  { %8349 = vmatmul.mubr.msk.f32.gmra.mrb[20].mxu0 %vm183_vm0, %v13132_v21  ;;  %8366 = vmatmul.mubr.msk.f32.gmra.mrb[20].mxu1 %vm183_vm0, %v13132_v21 }
 0x19f   :  { %1345 = vmatprep.mubr.f32.mxu0 %v16841_v1  ;;  %1512 = vmatprep.mubr.f32.mxu1 %v16841_v1 }
 0x1a2   :  { %8350 = vmatmul.mubr.msk.f32.gmra.mrb[22].mxu0 %vm183_vm0, %v13143_v22  ;;  %8367 = vmatmul.mubr.msk.f32.gmra.mrb[22].mxu1 %vm183_vm0, %v13143_v22 }
 0x1a3   :  { %1351 = vmatprep.mubr.f32.mxu0 %v16841_v1  ;;  %1518 = vmatprep.mubr.f32.mxu1 %v16841_v1 }
 0x1a6   :  { %8351 = vmatmul.mubr.msk.f32.gmra.mrb[24].mxu0 %vm183_vm0, %v13154_v23  ;;  %8368 = vmatmul.mubr.msk.f32.gmra.mrb[24].mxu1 %vm183_vm0, %v13154_v23 }
 0x1a7   :  { %1357 = vmatprep.mubr.f32.mxu0 %v16841_v1  ;;  %1524 = vmatprep.mubr.f32.mxu1 %v16841_v1 }
 0x1aa   :  { %8352 = vmatmul.mubr.msk.f32.gmra.mrb[26].mxu0 %vm183_vm0, %v13165_v24  ;;  %8369 = vmatmul.mubr.msk.f32.gmra.mrb[26].mxu1 %vm183_vm0, %v13165_v24 }
 0x1ab   :  { %1363 = vmatprep.mubr.f32.mxu0 %v16841_v1  ;;  %1530 = vmatprep.mubr.f32.mxu1 %v16841_v1 }
 0x1ae   :  { %8353 = vmatmul.mubr.msk.f32.gmra.mrb[28].mxu0 %vm183_vm0, %v13176_v25  ;;  %8370 = vmatmul.mubr.msk.f32.gmra.mrb[28].mxu1 %vm183_vm0, %v13176_v25 }
 0x1af   :  { %1369 = vmatprep.mubr.f32.mxu0 %v16841_v1  ;;  %1536 = vmatprep.mubr.f32.mxu1 %v16841_v1 }
 0x1b2   :  { %8354 = vmatmul.mubr.msk.f32.gmra.mrb[30].mxu0 %vm183_vm0, %v13187_v26  ;;  %8371 = vmatmul.mubr.msk.f32.gmra.mrb[30].mxu1 %vm183_vm0, %v13187_v26 }
 0x1b3   :  { %1375 = vmatprep.mubr.f32.mxu0 %v16841_v1  ;;  %1542 = vmatprep.mubr.f32.mxu1 %v16841_v1 }
 0x1b6   :  { %8355 = vmatmul.mubr.msk.f32.gmra.mrb[32].mxu0 %vm183_vm0, %v13539_v38  ;;  %8372 = vmatmul.mubr.msk.f32.gmra.mrb[32].mxu1 %vm183_vm0, %v13539_v38 }
 0x1b7   :  { %9836 = vmatprep.mubr.msk.f32.mxu0 %vm12824_vm1, %v16841_v1  ;;  %2024 = vmatprep.mubr.f32.mxu1 %v16841_v1 }
 0x1ba   :  { %9837 = vmatmul.mubr.msk.f32.vlgmr.msra.gmra.mrb[68].mxu0 %vm183_vm0, %v13020_v8  ;;  %8407 = vmatmul.mubr.msk.f32.vlgmr.msra.gmra.mrb[0].mxu1 %vm183_vm0, %v13032_v11 }
 0x1bb   :  { %1794 = vmatpush1.msra.mxu0 %v1785_v39  ;;  %9839 = vmatprep.mubr.msk.f32.mxu0 %vm12824_vm1, %v16841_v1  ;;  %v2646_v39 = vld [vmem:[#allocation7 + $0x2b0] sm:$0xff] }
 0x1bc   :  { %2030 = vmatprep.mubr.f32.mxu1 %v16841_v1  ;;  %9888 = vmatpush3.msra.mxu1 %v1789_v40  ;;  %v2647_v40 = vld [vmem:[#allocation7 + $0x2b8] sm:$0xff] }
 0x1bd   :  { %11089 = vmatprep.subr.bf16.mxu1 %v16839_v45 }
 0x1be   :  { %9840 = vmatmul.mubr.msk.f32.gmra.mrb[70].mxu0 %vm183_vm0, %v13032_v11  ;;  %8408 = vmatmul.mubr.msk.f32.gmra.mrb[2].mxu1 %vm183_vm0, %v13043_v13 }
 0x1bf   :  { %9842 = vmatprep.mubr.msk.f32.mxu0 %vm12824_vm1, %v16841_v1  ;;  %2036 = vmatprep.mubr.f32.mxu1 %v16841_v1 }
 0x1c1   :  { %v13562_v41 = vpop.f32.mrb[34].mxu0 }
 0x1c2   :  { %v9732_v42 = vpop.f32.mrb[35].mxu0  ;;  %9843 = vmatmul.mubr.msk.f32.gmra.mrb[72].mxu0 %vm183_vm0, %v13043_v13  ;;  %8409 = vmatmul.mubr.msk.f32.gmra.mrb[4].mxu1 %vm183_vm0, %v13055_v14 }
 0x1c3   :  { %9845 = vmatprep.mubr.msk.f32.mxu0 %vm12824_vm1, %v16841_v1  ;;  %2042 = vmatprep.mubr.f32.mxu1 %v16841_v1 }
 0x1c5   :  { %v13571_v43 = vpop.f32.mrb[36].mxu0 }
 0x1c6   :  { %v9735_v44 = vpop.f32.mrb[37].mxu0  ;;  %9846 = vmatmul.mubr.msk.f32.gmra.mrb[74].mxu0 %vm183_vm0, %v13055_v14  ;;  %8410 = vmatmul.mubr.msk.f32.gmra.mrb[6].mxu1 %vm183_vm0, %v13066_v15 }
 0x1c7   :  { %9848 = vmatprep.mubr.msk.f32.mxu0 %vm12824_vm1, %v16841_v1  ;;  %2048 = vmatprep.mubr.f32.mxu1 %v16841_v1  ;;  %v13742_v44 = vpack.c.bf16 %v2647_v40, %v2646_v39 }
 0x1c9   :  { %v13581_v46 = vpop.f32.mrb[38].mxu0  ;;  %17135 = vst [vmem:[#allocation25_spill] sm:$0xff] %v13742_v44 }
 0x1ca   :  { %v9738_v47 = vpop.f32.mrb[39].mxu0  ;;  %9849 = vmatmul.mubr.msk.f32.gmra.mrb[76].mxu0 %vm183_vm0, %v13066_v15  ;;  %8411 = vmatmul.mubr.msk.f32.gmra.mrb[8].mxu1 %vm183_vm0, %v13077_v16 }
 0x1cb   :  { %9851 = vmatprep.mubr.msk.f32.mxu0 %vm12824_vm1, %v16841_v1  ;;  %2054 = vmatprep.mubr.f32.mxu1 %v16841_v1 }
 0x1cd   :  { %v13590_v48 = vpop.f32.mrb[40].mxu0 }
 0x1ce   :  { %v9741_v49 = vpop.f32.mrb[41].mxu0  ;;  %9852 = vmatmul.mubr.msk.f32.gmra.mrb[78].mxu0 %vm183_vm0, %v13077_v16  ;;  %8412 = vmatmul.mubr.msk.f32.gmra.mrb[10].mxu1 %vm183_vm0, %v13088_v17 }
 0x1cf   :  { %9854 = vmatprep.mubr.msk.f32.mxu0 %vm12824_vm1, %v16841_v1  ;;  %2060 = vmatprep.mubr.f32.mxu1 %v16841_v1  ;;  %v2649_v49 = vld [vmem:[#allocation7 + $0x2c8] sm:$0xff] }
 0x1d1   :  { %v13599_v50 = vpop.f32.mrb[42].mxu0 }
 0x1d2   :  { %v9744_v51 = vpop.f32.mrb[43].mxu0  ;;  %9855 = vmatmul.mubr.msk.f32.gmra.mrb[80].mxu0 %vm183_vm0, %v13088_v17  ;;  %8413 = vmatmul.mubr.msk.f32.gmra.mrb[12].mxu1 %vm183_vm0, %v13099_v18 }
 0x1d3   :  { %9857 = vmatprep.mubr.msk.f32.mxu0 %vm12824_vm1, %v16841_v1  ;;  %2066 = vmatprep.mubr.f32.mxu1 %v16841_v1 }
 0x1d5   :  { %v13608_v52 = vpop.f32.mrb[44].mxu0 }
 0x1d6   :  { %v9747_v53 = vpop.f32.mrb[45].mxu0  ;;  %9858 = vmatmul.mubr.msk.f32.gmra.mrb[82].mxu0 %vm183_vm0, %v13099_v18  ;;  %8414 = vmatmul.mubr.msk.f32.gmra.mrb[14].mxu1 %vm183_vm0, %v13110_v19 }
 0x1d7   :  { %9860 = vmatprep.mubr.msk.f32.mxu0 %vm12824_vm1, %v16841_v1  ;;  %2072 = vmatprep.mubr.f32.mxu1 %v16841_v1 }
 0x1d9   :  { %v13617_v54 = vpop.f32.mrb[46].mxu0 }
 0x1da   :  { %v9750_v55 = vpop.f32.mrb[47].mxu0  ;;  %9861 = vmatmul.mubr.msk.f32.gmra.mrb[84].mxu0 %vm183_vm0, %v13110_v19  ;;  %8415 = vmatmul.mubr.msk.f32.gmra.mrb[16].mxu1 %vm183_vm0, %v13121_v20 }
 0x1db   :  { %9863 = vmatprep.mubr.msk.f32.mxu0 %vm12824_vm1, %v16841_v1  ;;  %2078 = vmatprep.mubr.f32.mxu1 %v16841_v1 }
 0x1dd   :  { %v13626_v56 = vpop.f32.mrb[48].mxu0 }
 0x1de   :  { %v9753_v57 = vpop.f32.mrb[49].mxu0  ;;  %9864 = vmatmul.mubr.msk.f32.gmra.mrb[86].mxu0 %vm183_vm0, %v13121_v20  ;;  %8416 = vmatmul.mubr.msk.f32.gmra.mrb[18].mxu1 %vm183_vm0, %v13132_v21 }
 0x1df   :  { %9866 = vmatprep.mubr.msk.f32.mxu0 %vm12824_vm1, %v16841_v1  ;;  %2084 = vmatprep.mubr.f32.mxu1 %v16841_v1  ;;  %v2651_v57 = vld [vmem:[#allocation7 + $0x2d8] sm:$0xff] }
 0x1e1   :  { %v13635_v58 = vpop.f32.mrb[50].mxu0 }
 0x1e2   :  { %v9756_v59 = vpop.f32.mrb[51].mxu0  ;;  %9867 = vmatmul.mubr.msk.f32.gmra.mrb[88].mxu0 %vm183_vm0, %v13132_v21  ;;  %8417 = vmatmul.mubr.msk.f32.gmra.mrb[20].mxu1 %vm183_vm0, %v13143_v22 }
 0x1e3   :  { %9869 = vmatprep.mubr.msk.f32.mxu0 %vm12824_vm1, %v16841_v1  ;;  %2090 = vmatprep.mubr.f32.mxu1 %v16841_v1 }
 0x1e5   :  { %v13644_v60 = vpop.f32.mrb[52].mxu0 }
 0x1e6   :  { %v9759_v61 = vpop.f32.mrb[53].mxu0  ;;  %9870 = vmatmul.mubr.msk.f32.gmra.mrb[90].mxu0 %vm183_vm0, %v13143_v22  ;;  %8418 = vmatmul.mubr.msk.f32.gmra.mrb[22].mxu1 %vm183_vm0, %v13154_v23 }
 0x1e7   :  { %9872 = vmatprep.mubr.msk.f32.mxu0 %vm12824_vm1, %v16841_v1  ;;  %2096 = vmatprep.mubr.f32.mxu1 %v16841_v1 }
 0x1e9   :  { %v13653_v62 = vpop.f32.mrb[54].mxu0 }
 0x1ea   :  { %v9762_v63 = vpop.f32.mrb[55].mxu0  ;;  %9873 = vmatmul.mubr.msk.f32.gmra.mrb[92].mxu0 %vm183_vm0, %v13154_v23  ;;  %8419 = vmatmul.mubr.msk.f32.gmra.mrb[24].mxu1 %vm183_vm0, %v13165_v24 }
 0x1eb   :  { %9875 = vmatprep.mubr.msk.f32.mxu0 %vm12824_vm1, %v16841_v1  ;;  %2102 = vmatprep.mubr.f32.mxu1 %v16841_v1 }
 0x1ed   :  { %v13662_v0 = vpop.f32.mrb[56].mxu0 }
 0x1ee   :  { %v9765_v2 = vpop.f32.mrb[57].mxu0  ;;  %9876 = vmatmul.mubr.msk.f32.gmra.mrb[94].mxu0 %vm183_vm0, %v13165_v24  ;;  %8420 = vmatmul.mubr.msk.f32.gmra.mrb[26].mxu1 %vm183_vm0, %v13176_v25 }
 0x1ef   :  { %9878 = vmatprep.mubr.msk.f32.mxu0 %vm12824_vm1, %v16841_v1  ;;  %2108 = vmatprep.mubr.f32.mxu1 %v16841_v1  ;;  %v2653_v2 = vld [vmem:[#allocation7 + $0x2e8] sm:$0xff] }
 0x1f1   :  { %v13671_v3 = vpop.f32.mrb[58].mxu0 }
 0x1f2   :  { %v9768_v4 = vpop.f32.mrb[59].mxu0  ;;  %9879 = vmatmul.mubr.msk.f32.gmra.mrb[96].mxu0 %vm183_vm0, %v13176_v25  ;;  %8421 = vmatmul.mubr.msk.f32.gmra.mrb[28].mxu1 %vm183_vm0, %v13187_v26 }
 0x1f3   :  { %9881 = vmatprep.mubr.msk.f32.mxu0 %vm12824_vm1, %v16841_v1  ;;  %2114 = vmatprep.mubr.f32.mxu1 %v16841_v1 }
 0x1f5   :  { %v13680_v5 = vpop.f32.mrb[60].mxu0 }
 0x1f6   :  { %v9771_v6 = vpop.f32.mrb[61].mxu0  ;;  %9882 = vmatmul.mubr.msk.f32.gmra.mrb[98].mxu0 %vm183_vm0, %v13187_v26  ;;  %8422 = vmatmul.mubr.msk.f32.gmra.mrb[30].mxu1 %vm183_vm0, %v13539_v38 }
 0x1f7   :  { %9884 = vmatprep.mubr.msk.f32.mxu0 %vm12824_vm1, %v16841_v1  ;;  %2120 = vmatprep.mubr.f32.mxu1 %v16841_v1 }
 0x1f9   :  { %v13694_v8 = vpop.f32.mrb[62].mxu0 }
 0x1fa   :  { %v9774_v12 = vpop.f32.mrb[63].mxu0  ;;  %9885 = vmatmul.mubr.msk.f32.gmra.mrb[100].mxu0 %vm183_vm0, %v13539_v38  ;;  %8423 = vmatmul.mubr.msk.f32.gmra.mrb[32].mxu1 %vm183_vm0, %v13692_v7 }
 0x1fb   :  { %1857 = vmatprep.mubr.f32.mxu0 %v16841_v1  ;;  %9889 = vmatprep.mubr.msk.f32.mxu1 %vm12824_vm1, %v16841_v1 }
 0x1fd   :  { %v13705_v28 = vpop.f32.mrb[64].mxu0 }
 0x1fe   :  { %v9777_v31 = vpop.f32.mrb[65].mxu0  ;;  %8390 = vmatmul.mubr.msk.f32.vlgmr.msra.gmra.mrb[0].mxu0 %vm183_vm0, %v13032_v11  ;;  %9890 = vmatmul.mubr.msk.f32.vlgmr.msra.gmra.mrb[68].mxu1 %vm183_vm0, %v13032_v11  ;;  %v13728_v11 = vpack.c.bf16 %v2645_v35, %v2644_v34 }
 0x1ff   :  { %1863 = vmatprep.mubr.f32.mxu0 %v16841_v1  ;;  %9892 = vmatprep.mubr.msk.f32.mxu1 %vm12824_vm1, %v16841_v1  ;;  %v2625_v31 = vld [vmem:[#allocation7 + $0x208] sm:$0xff] }
 0x200   :  { %11091 = vmatpush3.bf16.msra.mxu1 %v13703_v27  ;;  %17134 = vst [vmem:[#allocation24_spill] sm:$0xff] %v13728_v11 }
 0x201   :  { %v13717_v33 = vpop.f32.mrb[66].mxu0  ;;  %11092 = vmatprep.subr.bf16.mxu1 %v16839_v45 }
 0x202   :  { %v9780_v36 = vpop.f32.mrb[67].mxu0  ;;  %8391 = vmatmul.mubr.msk.f32.gmra.mrb[2].mxu0 %vm183_vm0, %v13043_v13  ;;  %9893 = vmatmul.mubr.msk.f32.gmra.mrb[70].mxu1 %vm183_vm0, %v13043_v13 }
 0x203   :  { %1869 = vmatprep.mubr.f32.mxu0 %v16841_v1  ;;  %9895 = vmatprep.mubr.msk.f32.mxu1 %vm12824_vm1, %v16841_v1  ;;  %v2609_v36 = vld [vmem:[#allocation7 + $0x188] sm:$0xff] }
 0x204   :  { %11094 = vmatpush3.bf16.msra.mxu1 %v13715_v32 }
 0x205   :  { %v1122_v37 = vpop.f32.mrb[34].mxu1  ;;  %11095 = vmatprep.subr.bf16.mxu1 %v16839_v45 }
 0x206   :  { %v13732_v42 = vadd.f32 %v1122_v37, %v13562_v41  ;;  %8392 = vmatmul.mubr.msk.f32.gmra.mrb[4].mxu0 %vm183_vm0, %v13055_v14  ;;  %9896 = vmatmul.mubr.msk.f32.gmra.mrb[72].mxu1 %vm183_vm0, %v13055_v14  ;;  %v9785_v13 = vpop.f32.mrb[35].mxu1  ;;  %v2648_v41 = vld [vmem:[#allocation7 + $0x2c0] sm:$0xff] }
 0x207   :  { %1875 = vmatprep.mubr.f32.mxu0 %v16841_v1  ;;  %9898 = vmatprep.mubr.msk.f32.mxu1 %vm12824_vm1, %v16841_v1  ;;  %v13756_v53 = vpack.c.bf16 %v2649_v49, %v2648_v41  ;;  %v2627_v41 = vld [vmem:[#allocation7 + $0x218] sm:$0xff] }
 0x208   :  { %11097 = vmatpush3.bf16.msra.mxu1 %v13728_v11 }
 0x209   :  { %v1127_v47 = vpop.f32.mrb[36].mxu1  ;;  %11098 = vmatprep.subr.bf16.mxu1 %v16839_v45  ;;  %17136 = vst [vmem:[#allocation26_spill] sm:$0xff] %v13756_v53 }
 0x20a   :  { %v13746_v51 = vadd.f32 %v1127_v47, %v13571_v43  ;;  %8393 = vmatmul.mubr.msk.f32.gmra.mrb[6].mxu0 %vm183_vm0, %v13066_v15  ;;  %9899 = vmatmul.mubr.msk.f32.gmra.mrb[74].mxu1 %vm183_vm0, %v13066_v15  ;;  %v9788_v14 = vpop.f32.mrb[37].mxu1  ;;  %v2650_v43 = vld [vmem:[#allocation7 + $0x2d0] sm:$0xff] }
 0x20b   :  { %1881 = vmatprep.mubr.f32.mxu0 %v16841_v1  ;;  %9901 = vmatprep.mubr.msk.f32.mxu1 %vm12824_vm1, %v16841_v1  ;;  %v13770_v61 = vpack.c.bf16 %v2651_v57, %v2650_v43 }
 0x20c   :  { %11100 = vmatpush3.bf16.msra.mxu1 %v13742_v44 }
 0x20d   :  { %v1132_v55 = vpop.f32.mrb[38].mxu1  ;;  %11101 = vmatprep.subr.bf16.mxu1 %v16839_v45  ;;  %17137 = vst [vmem:[#allocation27_spill] sm:$0xff] %v13770_v61 }
 0x20e   :  { %v13760_v59 = vadd.f32 %v1132_v55, %v13581_v46  ;;  %8394 = vmatmul.mubr.msk.f32.gmra.mrb[8].mxu0 %vm183_vm0, %v13077_v16  ;;  %9902 = vmatmul.mubr.msk.f32.gmra.mrb[76].mxu1 %vm183_vm0, %v13077_v16  ;;  %v9791_v15 = vpop.f32.mrb[39].mxu1  ;;  %v2652_v46 = vld [vmem:[#allocation7 + $0x2e0] sm:$0xff]  ;;  %v2610_v55 = vld [vmem:[#allocation7 + $0x190] sm:$0xff] }
 0x20f   :  { %1887 = vmatprep.mubr.f32.mxu0 %v16841_v1  ;;  %9904 = vmatprep.mubr.msk.f32.mxu1 %vm12824_vm1, %v16841_v1  ;;  %v13784_v6 = vpack.c.bf16 %v2653_v2, %v2652_v46  ;;  %v2629_v46 = vld [vmem:[#allocation7 + $0x228] sm:$0xff] }
 0x210   :  { %11103 = vmatpush3.bf16.msra.mxu1 %v13756_v53 }
 0x211   :  { %v1137_v63 = vpop.f32.mrb[40].mxu1  ;;  %11104 = vmatprep.subr.bf16.mxu1 %v16839_v45  ;;  %17138 = vst [vmem:[#allocation28_spill] sm:$0xff] %v13784_v6 }
 0x212   :  { %v13774_v4 = vadd.f32 %v1137_v63, %v13590_v48  ;;  %8395 = vmatmul.mubr.msk.f32.gmra.mrb[10].mxu0 %vm183_vm0, %v13088_v17  ;;  %9905 = vmatmul.mubr.msk.f32.gmra.mrb[78].mxu1 %vm183_vm0, %v13088_v17  ;;  %v9794_v16 = vpop.f32.mrb[41].mxu1  ;;  %v2654_v48 = vld [vmem:[#allocation7 + $0x2f0] sm:$0xff]  ;;  %v2628_v63 = vld [vmem:[#allocation7 + $0x220] sm:$0xff] }
 0x213   :  { %1893 = vmatprep.mubr.f32.mxu0 %v16841_v1  ;;  %9907 = vmatprep.mubr.msk.f32.mxu1 %vm12824_vm1, %v16841_v1  ;;  %v13798_v29 = vpack.c.bf16 %v2655_v10, %v2654_v48  ;;  %v13865_v16 = vpack.c.bf16 %v2629_v46, %v2628_v63  ;;  %v2635_v63 = vld [vmem:[#allocation7 + $0x258] sm:$0xff]  ;;  %v2618_v46 = vld [vmem:[#allocation7 + $0x1d0] sm:$0xff] }
 0x214   :  { %11106 = vmatpush3.bf16.msra.mxu1 %v13770_v61 }
 0x215   :  { %v1142_v9 = vpop.f32.mrb[42].mxu1  ;;  %11107 = vmatprep.subr.bf16.mxu1 %v16839_v45  ;;  %17139 = vst [vmem:[#allocation29_spill] sm:$0xff] %v13798_v29  ;;  %17144 = vst [vmem:[#allocation34_spill] sm:$0xff] %v13865_v16 }
 0x216   :  { %v13788_v12 = vadd.f32 %v1142_v9, %v13599_v50  ;;  %8396 = vmatmul.mubr.msk.f32.gmra.mrb[12].mxu0 %vm183_vm0, %v13099_v18  ;;  %9908 = vmatmul.mubr.msk.f32.gmra.mrb[80].mxu1 %vm183_vm0, %v13099_v18  ;;  %v9797_v17 = vpop.f32.mrb[43].mxu1  ;;  %v2624_v50 = vld [vmem:[#allocation7 + $0x200] sm:$0xff] }
 0x217   :  { %1899 = vmatprep.mubr.f32.mxu0 %v16841_v1  ;;  %9910 = vmatprep.mubr.msk.f32.mxu1 %vm12824_vm1, %v16841_v1  ;;  %v13808_v35 = vpack.c.bf16 %v2625_v31, %v2624_v50  ;;  %v2612_v9 = vld [vmem:[#allocation7 + $0x1a0] sm:$0xff]  ;;  %v2630_v50 = vld [vmem:[#allocation7 + $0x230] sm:$0xff]  ;;  %v2631_v31 = vld [vmem:[#allocation7 + $0x238] sm:$0xff] }
 0x218   :  { %11109 = vmatpush3.bf16.msra.mxu1 %v13784_v6 }
 0x219   :  { %v1147_v30 = vpop.f32.mrb[44].mxu1  ;;  %11110 = vmatprep.subr.bf16.mxu1 %v16839_v45  ;;  %17140 = vst [vmem:[#allocation30_spill] sm:$0xff] %v13808_v35  ;;  %11058 = vmatprep.subr.bf16.mxu0 %v13808_v35  ;;  %v2562_v35 = vld [vmem:[#allocation7 + $0x18] sm:$0xff] }
 0x21a   :  { %v13802_v34 = vadd.f32 %v1147_v30, %v13608_v52  ;;  %8397 = vmatmul.mubr.msk.f32.gmra.mrb[14].mxu0 %vm183_vm0, %v13110_v19  ;;  %9911 = vmatmul.mubr.msk.f32.gmra.mrb[82].mxu1 %vm183_vm0, %v13110_v19  ;;  %v9800_v18 = vpop.f32.mrb[45].mxu1  ;;  %v2608_v52 = vld [vmem:[#allocation7 + $0x180] sm:$0xff] }
 0x21b   :  { %1905 = vmatprep.mubr.f32.mxu0 %v16841_v1  ;;  %9913 = vmatprep.mubr.msk.f32.mxu1 %vm12824_vm1, %v16841_v1  ;;  %v13815_v39 = vpack.c.bf16 %v2609_v36, %v2608_v52  ;;  %v2614_v18 = vld [vmem:[#allocation7 + $0x1b0] sm:$0xff]  ;;  %v2615_v36 = vld [vmem:[#allocation7 + $0x1b8] sm:$0xff] }
 0x21c   :  { %11112 = vmatpush3.bf16.msra.mxu1 %v13798_v29 }
 0x21d   :  { %v1152_v37 = vpop.f32.mrb[46].mxu1  ;;  %17141 = vst [vmem:[#allocation31_spill] sm:$0xff] %v13815_v39  ;;  %11145 = vmatprep.subr.bf16.mxu1 %v16839_v45  ;;  %11060 = vmatpush3.bf16.msra.mxu0 %v13815_v39  ;;  %v3249_v39 = vld [vmem:[#allocation7 + $0x400] sm:$0xff] }
 0x21e   :  { %v13819_v19 = vadd.f32 %v1152_v37, %v13617_v54  ;;  %8398 = vmatmul.mubr.msk.f32.gmra.mrb[16].mxu0 %vm183_vm0, %v13121_v20  ;;  %9914 = vmatmul.mubr.msk.f32.gmra.mrb[84].mxu1 %vm183_vm0, %v13121_v20  ;;  %v9803_v40 = vpop.f32.mrb[47].mxu1  ;;  %v2626_v20 = vld [vmem:[#allocation7 + $0x210] sm:$0xff]  ;;  %v13903_v37 = vpack.c.bf16 %v2615_v36, %v2614_v18 }
 0x21f   :  { %1911 = vmatprep.mubr.f32.mxu0 %v16841_v1  ;;  %9916 = vmatprep.mubr.msk.f32.mxu1 %vm12824_vm1, %v16841_v1  ;;  %v13839_v14 = vpack.c.bf16 %v2627_v41, %v2626_v20  ;;  %v2633_v20 = vld [vmem:[#allocation7 + $0x248] sm:$0xff]  ;;  %v2616_v41 = vld [vmem:[#allocation7 + $0x1c0] sm:$0xff] }
 0x220   :  { %17147 = vst [vmem:[#allocation37_spill] sm:$0xff] %v13903_v37 }
 0x221   :  { %v1157_v13 = vpop.f32.mrb[48].mxu1  ;;  %17142 = vst [vmem:[#allocation32_spill] sm:$0xff] %v13839_v14  ;;  %11062 = vmatprep.subr.bf16.mxu0 %v13839_v14 }
 0x222   :  { %v13830_v47 = vadd.f32 %v1157_v13, %v13626_v56  ;;  %8399 = vmatmul.mubr.msk.f32.gmra.mrb[18].mxu0 %vm183_vm0, %v13132_v21  ;;  %9917 = vmatmul.mubr.msk.f32.gmra.mrb[86].mxu1 %vm183_vm0, %v13132_v21  ;;  %v9806_v54 = vpop.f32.mrb[49].mxu1  ;;  %v2611_v56 = vld [vmem:[#allocation7 + $0x198] sm:$0xff] }
 0x223   :  { %1917 = vmatprep.mubr.f32.mxu0 %v16841_v1  ;;  %9919 = vmatprep.mubr.msk.f32.mxu1 %vm12824_vm1, %v16841_v1  ;;  %v13848_v57 = vpack.c.bf16 %v2611_v56, %v2610_v55  ;;  %v2632_v54 = vld [vmem:[#allocation7 + $0x240] sm:$0xff]  ;;  %v2617_v55 = vld [vmem:[#allocation7 + $0x1c8] sm:$0xff] }
 0x224   :  { %v13928_v56 = vpack.c.bf16 %v2617_v55, %v2616_v41 }
 0x225   :  { %v1162_v49 = vpop.f32.mrb[50].mxu1  ;;  %17143 = vst [vmem:[#allocation33_spill] sm:$0xff] %v13848_v57  ;;  %11064 = vmatpush3.bf16.msra.mxu0 %v13848_v57 }
 0x226   :  { %v13842_v43 = vadd.f32 %v1162_v49, %v13635_v58  ;;  %8400 = vmatmul.mubr.msk.f32.gmra.mrb[20].mxu0 %vm183_vm0, %v13143_v22  ;;  %9920 = vmatmul.mubr.msk.f32.gmra.mrb[88].mxu1 %vm183_vm0, %v13143_v22  ;;  %v9809_v21 = vpop.f32.mrb[51].mxu1  ;;  %17149 = vst [vmem:[#allocation39_spill] sm:$0xff] %v13928_v56 }
 0x227   :  { %1923 = vmatprep.mubr.f32.mxu0 %v16841_v1  ;;  %9922 = vmatprep.mubr.msk.f32.mxu1 %vm12824_vm1, %v16841_v1 }
 0x228   :  { %11066 = vmatprep.subr.bf16.mxu0 %v13865_v16 }
 0x229   :  { %v1167_v15 = vpop.f32.mrb[52].mxu1 }
 0x22a   :  { %v13856_v58 = vadd.f32 %v1167_v15, %v13644_v60  ;;  %8401 = vmatmul.mubr.msk.f32.gmra.mrb[22].mxu0 %vm183_vm0, %v13154_v23  ;;  %9923 = vmatmul.mubr.msk.f32.gmra.mrb[90].mxu1 %vm183_vm0, %v13154_v23  ;;  %v9812_v22 = vpop.f32.mrb[53].mxu1  ;;  %v2613_v60 = vld [vmem:[#allocation7 + $0x1a8] sm:$0xff] }
 0x22b   :  { %1929 = vmatprep.mubr.f32.mxu0 %v16841_v1  ;;  %9925 = vmatprep.mubr.msk.f32.mxu1 %vm12824_vm1, %v16841_v1  ;;  %v13874_v10 = vpack.c.bf16 %v2613_v60, %v2612_v9 }
 0x22d   :  { %v1172_v2 = vpop.f32.mrb[54].mxu1  ;;  %17145 = vst [vmem:[#allocation35_spill] sm:$0xff] %v13874_v10  ;;  %11068 = vmatpush3.bf16.msra.mxu0 %v13874_v10 }
 0x22e   :  { %v13868_v48 = vadd.f32 %v1172_v2, %v13653_v62  ;;  %8402 = vmatmul.mubr.msk.f32.gmra.mrb[24].mxu0 %vm183_vm0, %v13165_v24  ;;  %9926 = vmatmul.mubr.msk.f32.gmra.mrb[92].mxu1 %vm183_vm0, %v13165_v24  ;;  %v9815_v23 = vpop.f32.mrb[55].mxu1 }
 0x22f   :  { %1935 = vmatprep.mubr.f32.mxu0 %v16841_v1  ;;  %9928 = vmatprep.mubr.msk.f32.mxu1 %vm12824_vm1, %v16841_v1  ;;  %v2619_v23 = vld [vmem:[#allocation7 + $0x1d8] sm:$0xff] }
 0x231   :  { %v1177_v17 = vpop.f32.mrb[56].mxu1 }
 0x232   :  { %v13882_v62 = vadd.f32 %v1177_v17, %v13662_v0  ;;  %8403 = vmatmul.mubr.msk.f32.gmra.mrb[26].mxu0 %vm183_vm0, %v13176_v25  ;;  %9929 = vmatmul.mubr.msk.f32.gmra.mrb[94].mxu1 %vm183_vm0, %v13176_v25  ;;  %v9818_v24 = vpop.f32.mrb[57].mxu1  ;;  %v13898_v0 = vpack.c.bf16 %v2631_v31, %v2630_v50  ;;  %v13940_v17 = vpack.c.bf16 %v2619_v23, %v2618_v46  ;;  %v2621_v31 = vld [vmem:[#allocation7 + $0x1e8] sm:$0xff] }
 0x233   :  { %1941 = vmatprep.mubr.f32.mxu0 %v16841_v1  ;;  %9931 = vmatprep.mubr.msk.f32.mxu1 %vm12824_vm1, %v16841_v1  ;;  %v2637_v24 = vld [vmem:[#allocation7 + $0x268] sm:$0xff] }
 0x234   :  { %17146 = vst [vmem:[#allocation36_spill] sm:$0xff] %v13898_v0  ;;  %11070 = vmatprep.subr.bf16.mxu0 %v13898_v0  ;;  %17151 = vst [vmem:[#allocation41_spill] sm:$0xff] %v13940_v17 }
 0x235   :  { %v1182_v30 = vpop.f32.mrb[58].mxu1  ;;  %11072 = vmatpush3.bf16.msra.mxu0 %v13903_v37 }
 0x236   :  { %v13892_v52 = vadd.f32 %v1182_v30, %v13671_v3  ;;  %8404 = vmatmul.mubr.msk.f32.gmra.mrb[28].mxu0 %vm183_vm0, %v13187_v26  ;;  %9932 = vmatmul.mubr.msk.f32.gmra.mrb[96].mxu1 %vm183_vm0, %v13187_v26  ;;  %v9821_v25 = vpop.f32.mrb[59].mxu1  ;;  %v2620_v30 = vld [vmem:[#allocation7 + $0x1e0] sm:$0xff] }
 0x237   :  { %1947 = vmatprep.mubr.f32.mxu0 %v16841_v1  ;;  %9934 = vmatprep.mubr.msk.f32.mxu1 %vm12824_vm1, %v16841_v1  ;;  %v13946_v18 = vpack.c.bf16 %v2621_v31, %v2620_v30  ;;  %v2639_v25 = vld [vmem:[#allocation7 + $0x278] sm:$0xff] }
 0x239   :  { %v1187_v3 = vpop.f32.mrb[60].mxu1  ;;  %17153 = vst [vmem:[#allocation43_spill] sm:$0xff] %v13946_v18 }
 0x23a   :  { %v13908_v40 = vadd.f32 %v1187_v3, %v13680_v5  ;;  %8405 = vmatmul.mubr.msk.f32.gmra.mrb[30].mxu0 %vm183_vm0, %v13539_v38  ;;  %9935 = vmatmul.mubr.msk.f32.gmra.mrb[98].mxu1 %vm183_vm0, %v13539_v38  ;;  %v9824_v26 = vpop.f32.mrb[61].mxu1  ;;  %v13924_v5 = vpack.c.bf16 %v2633_v20, %v2632_v54  ;;  %v2622_v3 = vld [vmem:[#allocation7 + $0x1f0] sm:$0xff]  ;;  %v2575_v54 = vld [vmem:[#allocation7 + $0x80] sm:$0xff]  ;;  %v2576_v20 = vld [vmem:[#allocation7 + $0x88] sm:$0xff] }
 0x23b   :  { %1953 = vmatprep.mubr.f32.mxu0 %v16841_v1  ;;  %9937 = vmatprep.mubr.msk.f32.mxu1 %vm12824_vm1, %v16841_v1  ;;  %v2623_v26 = vld [vmem:[#allocation7 + $0x1f8] sm:$0xff]  ;;  %v13956_v41 = vpack.c.bf16 %v2576_v20, %v2575_v54  ;;  %v2593_v20 = vld [vmem:[#allocation7 + $0x110] sm:$0xff] }
 0x23c   :  { %17148 = vst [vmem:[#allocation38_spill] sm:$0xff] %v13924_v5  ;;  %11074 = vmatprep.subr.bf16.mxu0 %v13924_v5 }
 0x23d   :  { %v1192_v13 = vpop.f32.mrb[62].mxu1  ;;  %11076 = vmatpush3.bf16.msra.mxu0 %v13928_v56  ;;  %17156 = vst [vmem:[#allocation46_spill] sm:$0xff] %v13956_v41 }
 0x23e   :  { %v13918_v49 = vadd.f32 %v1192_v13, %v13694_v8  ;;  %8406 = vmatmul.mubr.msk.f32.gmra.mrb[32].mxu0 %vm183_vm0, %v13692_v7  ;;  %9938 = vmatmul.mubr.msk.f32.gmra.mrb[100].mxu1 %vm183_vm0, %v13692_v7  ;;  %v9827_v38 = vpop.f32.mrb[63].mxu1  ;;  %v2634_v7 = vld [vmem:[#allocation7 + $0x250] sm:$0xff]  ;;  %v13952_v13 = vpack.c.bf16 %v2623_v26, %v2622_v3 }
 0x23f   :  { %9972 = vmatprep.mubr.msk.f32.mxu1 %vm12824_vm1, %v16841_v1  ;;  %v13938_v60 = vpack.c.bf16 %v2635_v63, %v2634_v7  ;;  %v2364_v38 = vlaneseq  ;;  %v13966_v7 = vld [vmem:[#allocation5] sm:$0x1f] }
 0x240   :  { %17155 = vst [vmem:[#allocation45_spill] sm:$0xff] %v13952_v13 }
 0x241   :  { %v1197_v21 = vpop.f32.mrb[64].mxu1  ;;  %17150 = vst [vmem:[#allocation40_spill] sm:$0xff] %v13938_v60  ;;  %11078 = vmatprep.subr.bf16.mxu0 %v13938_v60  ;;  %v13959_v55 = vshrl.u32 %v2364_v38, 7  ;;  %v2594_v38 = vld [vmem:[#allocation7 + $0x118] sm:$0xff] }
 0x242   :  { %v13933_v8 = vadd.f32 %v1197_v21, %v13705_v28  ;;  %v9830_v15 = vpop.f32.mrb[65].mxu1  ;;  %11080 = vmatpush3.bf16.msra.mxu0 %v13940_v17  ;;  %v2636_v28 = vld [vmem:[#allocation7 + $0x260] sm:$0xff] }
 0x243   :  { %v13944_v50 = vpack.c.bf16 %v2637_v24, %v2636_v28  ;;  %v13962_v21 = vsub.s32 2, %v13959_v55  ;;  %v2591_v28 = vld [vmem:[#allocation7 + $0x100] sm:$0xff]  ;;  %v2592_v24 = vld [vmem:[#allocation7 + $0x108] sm:$0xff] }
 0x245   :  { %v1202_v22 = vpop.f32.mrb[66].mxu1  ;;  %17152 = vst [vmem:[#allocation42_spill] sm:$0xff] %v13944_v50  ;;  %11082 = vmatprep.subr.bf16.mxu0 %v13944_v50  ;;  %17157 = vst [vmem:[#allocation47_spill] sm:$0xff] %v13962_v21  ;;  %v13975_v23 = vrot.slane %v13966_v7, %v13962_v21 }
 0x246   :  { %v13936_v2 = vadd.f32 %v1202_v22, %v13717_v33  ;;  %v9833_v9 = vpop.f32.mrb[67].mxu1  ;;  %11084 = vmatpush3.bf16.msra.mxu0 %v13946_v18  ;;  %v2638_v33 = vld [vmem:[#allocation7 + $0x270] sm:$0xff] }
 0x247   :  { %v13950_v36 = vpack.c.bf16 %v2639_v25, %v2638_v33 }
 0x249   :  { %17154 = vst [vmem:[#allocation44_spill] sm:$0xff] %v13950_v36  ;;  %11086 = vmatprep.subr.bf16.mxu0 %v13950_v36 }
 0x24a   :  { %11088 = vmatpush3.bf16.msra.mxu0 %v13952_v13 }
 0x24b   :  { %11114 = vmatprep.subr.bf16.mxu0 %v13956_v41 }
 0x28d   :  { %v1615_v15 = vpop.f32.mrb[68].mxu0  ;;  %v13964_v22 = vpop.f32.mrb[0].mxu1 }
 0x28e   :  { %v13969_v63 = vadd.f32 %v1615_v15, %v13732_v42  ;;  %v9838_v46 = vpop.f32.mrb[69].mxu0  ;;  %v13971_v9 = vpop.f32.mrb[1].mxu1  ;;  %v13983_v42 = vpack.c.bf16 %v2592_v24, %v2591_v28  ;;  %v13997_v28 = vpack.c.bf16 %v2594_v38, %v2593_v20  ;;  %v2598_v38 = vld [vmem:[#allocation7 + $0x138] sm:$0xff] }
 0x28f   :  { %17158 = vst [vmem:[#allocation48_spill] sm:$0xff] %v13971_v9 }
 0x290   :  { %17160 = vst [vmem:[#allocation50_spill] sm:$0xff] %v13983_v42  ;;  %17164 = vst [vmem:[#allocation53_spill] sm:$0xff] %v13997_v28 }
 0x291   :  { %v1620_v30 = vpop.f32.mrb[70].mxu0  ;;  %v2032_v31 = vpop.f32.mrb[2].mxu1 }
 0x292   :  { %v13978_v33 = vadd.f32 %v1620_v30, %v13746_v51  ;;  %v2396_v25 = vadd.f32 %v13975_v23, %v2032_v31  ;;  %v9841_v3 = vpop.f32.mrb[71].mxu0  ;;  %v13981_v26 = vpop.f32.mrb[3].mxu1  ;;  %v17163_v31 = vmov 0.0  }
 0x293   :  { %17159 = vst [vmem:[#allocation49_spill] sm:$0xff] %v13981_v26  ;;  %v2596_v3 = vld [vmem:[#allocation7 + $0x128] sm:$0xff] }
 0x294   :  { %v13985_v54 = vmax.f32 %v2396_v25, 0.0  ;;  %v17165_v25 = vmov 0.0|0.0  }
 0x295   :  { %v1625_v15 = vpop.f32.mrb[72].mxu0  ;;  %v2038_v46 = vpop.f32.mrb[4].mxu1 }
 0x296   :  { %17161 = vst [vmem:[#allocation51_spill] sm:$0xff] %v13985_v54  ;;  %v13988_v45 = vadd.f32 %v1625_v15, %v13760_v59  ;;  %v2401_v1 = vadd.f32 %v13975_v23, %v2038_v46  ;;  %v9844_v51 = vpop.f32.mrb[73].mxu0  ;;  %v13991_v30 = vpop.f32.mrb[5].mxu1  ;;  %9973 = vmatmul.mubr.f32.vlgmr.msra.gmra.mrb[102].mxu1 %v13985_v54  ;;  %v2595_v59 = vld [vmem:[#allocation7 + $0x120] sm:$0xff] }
 0x297   :  { %17162 = vst [vmem:[#allocation52_spill] sm:$0xff] %v13991_v30  ;;  %9975 = vmatprep.mubr.msk.f32.mxu1 %vm12824_vm1, %v17163_v31  ;;  %11147 = vmatpush3.bf16.msra.mxu1 %v13983_v42  ;;  %v2560_v42 = vld [vmem:[#allocation7 + $0x8] sm:$0xff] }
 0x298   :  { %v13999_v24 = vmax.f32 %v2401_v1, 0.0  ;;  %11148 = vmatprep.subr.bf16.mxu1 %v17165_v25  ;;  %v14012_v1 = vpack.c.bf16 %v2596_v3, %v2595_v59  ;;  %v2600_v3 = vld [vmem:[#allocation7 + $0x148] sm:$0xff] }
 0x299   :  { %v1630_v15 = vpop.f32.mrb[74].mxu0  ;;  %v2044_v46 = vpop.f32.mrb[6].mxu1 }
 0x29a   :  { %v14003_v51 = vadd.f32 %v1630_v15, %v13774_v4  ;;  %v2406_v21 = vadd.f32 %v13975_v23, %v2044_v46  ;;  %v9847_v9 = vpop.f32.mrb[75].mxu0  ;;  %v14006_v41 = vpop.f32.mrb[7].mxu1  ;;  %9976 = vmatmul.mubr.f32.gmra.mrb[104].mxu1 %v13999_v24  ;;  %17167 = vst [vmem:[#allocation55_spill] sm:$0xff] %v14012_v1  ;;  %v2597_v4 = vld [vmem:[#allocation7 + $0x130] sm:$0xff] }
 0x29b   :  { %17166 = vst [vmem:[#allocation54_spill] sm:$0xff] %v14006_v41  ;;  %9978 = vmatprep.mubr.msk.f32.mxu1 %vm12824_vm1, %v17163_v31  ;;  %11150 = vmatpush3.bf16.msra.mxu1 %v13997_v28  ;;  %v14202_v28 = vsub.s32 1, %v13959_v55 }
 0x29c   :  { %v14014_v20 = vmax.f32 %v2406_v21, 0.0  ;;  %11151 = vmatprep.subr.bf16.mxu1 %v17165_v25  ;;  %v14027_v21 = vpack.c.bf16 %v2598_v38, %v2597_v4  ;;  %v2602_v38 = vld [vmem:[#allocation7 + $0x158] sm:$0xff] }
 0x29d   :  { %v1635_v15 = vpop.f32.mrb[76].mxu0  ;;  %v2050_v46 = vpop.f32.mrb[8].mxu1  ;;  %17198 = vst [vmem:[#allocation86_spill] sm:$0xff] %v14202_v28 }
 0x29e   :  { %v14018_v9 = vadd.f32 %v1635_v15, %v13788_v12  ;;  %v2411_v13 = vadd.f32 %v13975_v23, %v2050_v46  ;;  %v9850_v36 = vpop.f32.mrb[77].mxu0  ;;  %v14021_v18 = vpop.f32.mrb[9].mxu1  ;;  %9979 = vmatmul.mubr.f32.gmra.mrb[106].mxu1 %v14014_v20  ;;  %17169 = vst [vmem:[#allocation57_spill] sm:$0xff] %v14027_v21  ;;  %v2599_v12 = vld [vmem:[#allocation7 + $0x140] sm:$0xff] }
 0x29f   :  { %17168 = vst [vmem:[#allocation56_spill] sm:$0xff] %v14021_v18  ;;  %9981 = vmatprep.mubr.msk.f32.mxu1 %vm12824_vm1, %v17163_v31  ;;  %11153 = vmatpush3.bf16.msra.mxu1 %v14012_v1 }
 0x2a0   :  { %v14029_v59 = vmax.f32 %v2411_v13, 0.0  ;;  %11154 = vmatprep.subr.bf16.mxu1 %v17165_v25  ;;  %v14042_v13 = vpack.c.bf16 %v2600_v3, %v2599_v12  ;;  %v2604_v3 = vld [vmem:[#allocation7 + $0x168] sm:$0xff] }
 0x2a1   :  { %v1640_v15 = vpop.f32.mrb[78].mxu0  ;;  %v2056_v46 = vpop.f32.mrb[10].mxu1 }
 0x2a2   :  { %v14033_v36 = vadd.f32 %v1640_v15, %v13802_v34  ;;  %v2416_v50 = vadd.f32 %v13975_v23, %v2056_v46  ;;  %v9853_v17 = vpop.f32.mrb[79].mxu0  ;;  %v14036_v60 = vpop.f32.mrb[11].mxu1  ;;  %9982 = vmatmul.mubr.f32.gmra.mrb[108].mxu1 %v14029_v59  ;;  %17171 = vst [vmem:[#allocation59_spill] sm:$0xff] %v14042_v13  ;;  %v2601_v34 = vld [vmem:[#allocation7 + $0x150] sm:$0xff] }
 0x2a3   :  { %17170 = vst [vmem:[#allocation58_spill] sm:$0xff] %v14036_v60  ;;  %9984 = vmatprep.mubr.msk.f32.mxu1 %vm12824_vm1, %v17163_v31  ;;  %11156 = vmatpush3.bf16.msra.mxu1 %v14027_v21  ;;  %v3250_v60 = vld [vmem:[#allocation7 + $0x408] sm:$0xff] }
 0x2a4   :  { %v14044_v4 = vmax.f32 %v2416_v50, 0.0  ;;  %11157 = vmatprep.subr.bf16.mxu1 %v17165_v25  ;;  %v14057_v50 = vpack.c.bf16 %v2602_v38, %v2601_v34  ;;  %v2606_v38 = vld [vmem:[#allocation7 + $0x178] sm:$0xff] }
 0x2a5   :  { %v1645_v15 = vpop.f32.mrb[80].mxu0  ;;  %v2062_v46 = vpop.f32.mrb[12].mxu1 }
 0x2a6   :  { %v14048_v17 = vadd.f32 %v1645_v15, %v13819_v19  ;;  %v2421_v56 = vadd.f32 %v13975_v23, %v2062_v46  ;;  %v9856_v5 = vpop.f32.mrb[81].mxu0  ;;  %v14051_v37 = vpop.f32.mrb[13].mxu1  ;;  %9985 = vmatmul.mubr.f32.gmra.mrb[110].mxu1 %v14044_v4  ;;  %17173 = vst [vmem:[#allocation61_spill] sm:$0xff] %v14057_v50  ;;  %v2603_v19 = vld [vmem:[#allocation7 + $0x160] sm:$0xff] }
 0x2a7   :  { %17172 = vst [vmem:[#allocation60_spill] sm:$0xff] %v14051_v37  ;;  %9987 = vmatprep.mubr.msk.f32.mxu1 %vm12824_vm1, %v17163_v31  ;;  %11159 = vmatpush3.bf16.msra.mxu1 %v14042_v13 }
 0x2a8   :  { %v14059_v12 = vmax.f32 %v2421_v56, 0.0  ;;  %11160 = vmatprep.subr.bf16.mxu1 %v17165_v25  ;;  %v14072_v56 = vpack.c.bf16 %v2604_v3, %v2603_v19 }
 0x2a9   :  { %v1650_v15 = vpop.f32.mrb[82].mxu0  ;;  %v2068_v46 = vpop.f32.mrb[14].mxu1 }
 0x2aa   :  { %v14063_v5 = vadd.f32 %v1650_v15, %v13830_v47  ;;  %v2426_v0 = vadd.f32 %v13975_v23, %v2068_v46  ;;  %v9859_v10 = vpop.f32.mrb[83].mxu0  ;;  %v14066_v16 = vpop.f32.mrb[15].mxu1  ;;  %9988 = vmatmul.mubr.f32.gmra.mrb[112].mxu1 %v14059_v12  ;;  %17175 = vst [vmem:[#allocation63_spill] sm:$0xff] %v14072_v56  ;;  %v2605_v47 = vld [vmem:[#allocation7 + $0x170] sm:$0xff] }
 0x2ab   :  { %17174 = vst [vmem:[#allocation62_spill] sm:$0xff] %v14066_v16  ;;  %9990 = vmatprep.mubr.msk.f32.mxu1 %vm12824_vm1, %v17163_v31  ;;  %11162 = vmatpush3.bf16.msra.mxu1 %v14057_v50 }
 0x2ac   :  { %v14074_v34 = vmax.f32 %v2426_v0, 0.0  ;;  %11163 = vmatprep.subr.bf16.mxu1 %v17165_v25  ;;  %v14087_v0 = vpack.c.bf16 %v2606_v38, %v2605_v47 }
 0x2ad   :  { %v1655_v15 = vpop.f32.mrb[84].mxu0  ;;  %v2074_v46 = vpop.f32.mrb[16].mxu1 }
 0x2ae   :  { %v14078_v10 = vadd.f32 %v1655_v15, %v13842_v43  ;;  %v2431_v16 = vadd.f32 %v13975_v23, %v2074_v46  ;;  %v9862_v13 = vpop.f32.mrb[85].mxu0  ;;  %v14081_v57 = vpop.f32.mrb[17].mxu1  ;;  %9991 = vmatmul.mubr.f32.gmra.mrb[114].mxu1 %v14074_v34  ;;  %17177 = vst [vmem:[#allocation65_spill] sm:$0xff] %v14087_v0 }
 0x2af   :  { %17176 = vst [vmem:[#allocation64_spill] sm:$0xff] %v14081_v57  ;;  %9993 = vmatprep.mubr.msk.f32.mxu1 %vm12824_vm1, %v17163_v31  ;;  %11165 = vmatpush3.bf16.msra.mxu1 %v14072_v56 }
 0x2b0   :  { %v14089_v19 = vmax.f32 %v2431_v16, 0.0  ;;  %11166 = vmatprep.subr.bf16.mxu1 %v17165_v25 }
 0x2b1   :  { %v1660_v43 = vpop.f32.mrb[86].mxu0  ;;  %v2080_v3 = vpop.f32.mrb[18].mxu1 }
 0x2b2   :  { %17178 = vst [vmem:[#allocation66_spill] sm:$0xff] %v14089_v19  ;;  %v14093_v15 = vadd.f32 %v1660_v43, %v13856_v58  ;;  %v2436_v13 = vadd.f32 %v13975_v23, %v2080_v3  ;;  %v9865_v46 = vpop.f32.mrb[87].mxu0  ;;  %v14096_v57 = vpop.f32.mrb[19].mxu1  ;;  %9994 = vmatmul.mubr.f32.gmra.mrb[116].mxu1 %v14089_v19 }
 0x2b3   :  { %17179 = vst [vmem:[#allocation67_spill] sm:$0xff] %v14096_v57  ;;  %9996 = vmatprep.mubr.msk.f32.mxu1 %vm12824_vm1, %v17163_v31  ;;  %11168 = vmatpush3.bf16.msra.mxu1 %v14087_v0 }
 0x2b4   :  { %v14102_v16 = vmax.f32 %v2436_v13, 0.0  ;;  %11201 = vmatprep.subr.bf16.mxu1 %v17165_v25 }
 0x2b5   :  { %v1665_v47 = vpop.f32.mrb[88].mxu0  ;;  %v2086_v38 = vpop.f32.mrb[20].mxu1 }
 0x2b6   :  { %17180 = vst [vmem:[#allocation68_spill] sm:$0xff] %v14102_v16  ;;  %v14106_v58 = vadd.f32 %v1665_v47, %v13868_v48  ;;  %v2441_v43 = vadd.f32 %v13975_v23, %v2086_v38  ;;  %v9868_v3 = vpop.f32.mrb[89].mxu0  ;;  %v14109_v46 = vpop.f32.mrb[21].mxu1  ;;  %9997 = vmatmul.mubr.f32.gmra.mrb[118].mxu1 %v14102_v16 }
 0x2b7   :  { %17181 = vst [vmem:[#allocation69_spill] sm:$0xff] %v14109_v46  ;;  %9999 = vmatprep.mubr.msk.f32.mxu1 %vm12824_vm1, %v17163_v31 }
 0x2b8   :  { %v14114_v0 = vmax.f32 %v2441_v43, 0.0 }
 0x2b9   :  { %v1670_v13 = vpop.f32.mrb[90].mxu0  ;;  %v2092_v57 = vpop.f32.mrb[22].mxu1 }
 0x2ba   :  { %v14117_v56 = vadd.f32 %v1670_v13, %v13882_v62  ;;  %v2446_v48 = vadd.f32 %v13975_v23, %v2092_v57  ;;  %v9871_v47 = vpop.f32.mrb[91].mxu0  ;;  %v14120_v50 = vpop.f32.mrb[23].mxu1  ;;  %10000 = vmatmul.mubr.f32.gmra.mrb[120].mxu1 %v14114_v0 }
 0x2bb   :  { %17182 = vst [vmem:[#allocation70_spill] sm:$0xff] %v14120_v50  ;;  %10002 = vmatprep.mubr.msk.f32.mxu1 %vm12824_vm1, %v17163_v31 }
 0x2bc   :  { %v14125_v38 = vmax.f32 %v2446_v48, 0.0 }
 0x2bd   :  { %v1675_v3 = vpop.f32.mrb[92].mxu0  ;;  %v2098_v43 = vpop.f32.mrb[24].mxu1 }
 0x2be   :  { %17183 = vst [vmem:[#allocation71_spill] sm:$0xff] %v14125_v38  ;;  %v14128_v46 = vadd.f32 %v1675_v3, %v13892_v52  ;;  %v2451_v62 = vadd.f32 %v13975_v23, %v2098_v43  ;;  %v9874_v13 = vpop.f32.mrb[93].mxu0  ;;  %v14131_v37 = vpop.f32.mrb[25].mxu1  ;;  %10003 = vmatmul.mubr.f32.gmra.mrb[122].mxu1 %v14125_v38 }
 0x2bf   :  { %17184 = vst [vmem:[#allocation72_spill] sm:$0xff] %v14131_v37  ;;  %10005 = vmatprep.mubr.msk.f32.mxu1 %vm12824_vm1, %v17163_v31 }
 0x2c0   :  { %v14136_v57 = vmax.f32 %v2451_v62, 0.0 }
 0x2c1   :  { %v1680_v47 = vpop.f32.mrb[94].mxu0  ;;  %v2104_v48 = vpop.f32.mrb[26].mxu1 }
 0x2c2   :  { %17185 = vst [vmem:[#allocation73_spill] sm:$0xff] %v14136_v57  ;;  %v14139_v50 = vadd.f32 %v1680_v47, %v13908_v40  ;;  %v2456_v52 = vadd.f32 %v13975_v23, %v2104_v48  ;;  %v9877_v3 = vpop.f32.mrb[95].mxu0  ;;  %v14142_v21 = vpop.f32.mrb[27].mxu1  ;;  %10006 = vmatmul.mubr.f32.gmra.mrb[124].mxu1 %v14136_v57 }
 0x2c3   :  { %17186 = vst [vmem:[#allocation74_spill] sm:$0xff] %v14142_v21  ;;  %10008 = vmatprep.mubr.msk.f32.mxu1 %vm12824_vm1, %v17163_v31 }
 0x2c4   :  { %v14147_v43 = vmax.f32 %v2456_v52, 0.0  ;;  %v14161_v52 = vsub.s32 3, %v13959_v55 }
 0x2c5   :  { %v1685_v13 = vpop.f32.mrb[96].mxu0  ;;  %v2110_v62 = vpop.f32.mrb[28].mxu1 }
 0x2c6   :  { %v14150_v37 = vadd.f32 %v1685_v13, %v13918_v49  ;;  %v2461_v40 = vadd.f32 %v13975_v23, %v2110_v62  ;;  %v9880_v47 = vpop.f32.mrb[97].mxu0  ;;  %v14153_v14 = vpop.f32.mrb[29].mxu1  ;;  %10009 = vmatmul.mubr.f32.gmra.mrb[126].mxu1 %v14147_v43  ;;  %17189 = vst [vmem:[#allocation77_spill] sm:$0xff] %v14161_v52 }
 0x2c7   :  { %17187 = vst [vmem:[#allocation75_spill] sm:$0xff] %v14153_v14  ;;  %10011 = vmatprep.mubr.msk.f32.mxu1 %vm12824_vm1, %v17163_v31 }
 0x2c8   :  { %v14158_v48 = vmax.f32 %v2461_v40, 0.0  ;;  %v2391_v40 = vadd.f32 %v13975_v23, %v13964_v22 }
 0x2c9   :  { %v1690_v3 = vpop.f32.mrb[98].mxu0  ;;  %v2116_v21 = vpop.f32.mrb[30].mxu1 }
 0x2ca   :  { %17188 = vst [vmem:[#allocation76_spill] sm:$0xff] %v14158_v48  ;;  %v14164_v49 = vadd.f32 %v1690_v3, %v13933_v8  ;;  %v2466_v13 = vadd.f32 %v13975_v23, %v2116_v21  ;;  %v9883_v62 = vpop.f32.mrb[99].mxu0  ;;  %v14167_v47 = vpop.f32.mrb[31].mxu1  ;;  %10012 = vmatmul.mubr.f32.gmra.mrb[128].mxu1 %v14158_v48  ;;  %v14178_v8 = vrot.slane %v13966_v7, %v14161_v52  ;;  %v14194_v52 = vmax.f32 %v2391_v40, 0.0 }
 0x2cb   :  { %17190 = vst [vmem:[#allocation78_spill] sm:$0xff] %v14167_v47  ;;  %10014 = vmatprep.mubr.msk.f32.mxu1 %vm12824_vm1, %v17163_v31 }
 0x2cc   :  { %v14174_v14 = vmax.f32 %v2466_v13, 0.0  ;;  %17192 = vst [vmem:[#allocation80_spill] sm:$0xff] %v14178_v8  ;;  %v14192_v13 = vpack.c.bf16 %v3250_v60, %v3249_v39  ;;  %17196 = vst [vmem:[#allocation84_spill] sm:$0xff] %v14194_v52 }
 0x2cd   :  { %v1695_v21 = vpop.f32.mrb[100].mxu0  ;;  %v2122_v3 = vpop.f32.mrb[32].mxu1 }
 0x2ce   :  { %17191 = vst [vmem:[#allocation79_spill] sm:$0xff] %v14174_v14  ;;  %v14181_v62 = vadd.f32 %v1695_v21, %v13936_v2  ;;  %v14184_v47 = vadd.f32 %v13975_v23, %v2122_v3  ;;  %v9886_v1 = vpop.f32.mrb[101].mxu0  ;;  %v2124_v18 = vpop.f32.mrb[33].mxu1  ;;  %10015 = vmatmul.mubr.f32.gmra.mrb[130].mxu1 %v14174_v14  ;;  %17195 = vst [vmem:[#allocation83_spill] sm:$0xff] %v14192_v13  ;;  %v14197_v2 = vsub.s32 0, %v13959_v55  ;;  %v3251_v21 = vld [vmem:[#allocation7 + $0x410] sm:$0xff] }
 0x2cf   :  { %v14188_v22 = vadd.f32 %v14178_v8, %v2124_v18  ;;  %10049 = vmatprep.mubr.msk.f32.mxu1 %vm12824_vm1, %v17163_v31  ;;  %v3252_v23 = vld [vmem:[#allocation7 + $0x418] sm:$0xff] }
 0x2d0   :  { %17193 = vst [vmem:[#allocation81_spill] sm:$0xff] %v14184_v47  ;;  %17197 = vst [vmem:[#allocation85_spill] sm:$0xff] %v14197_v2  ;;  %v14213_v60 = vpack.c.bf16 %v3252_v23, %v3251_v21  ;;  %v14217_v40 = vrot.slane %v13966_v7, %v14197_v2  ;;  %v2578_v47 = vld [vmem:[#allocation7 + $0x98] sm:$0xff] }
 0x2d1   :  { %17194 = vst [vmem:[#allocation82_spill] sm:$0xff] %v14188_v22  ;;  %v14199_v3 = vpop.f32.mrb[0].mxu0  ;;  %v2193_v1 = vpop.f32.mrb[68].mxu1  ;;  %v3256_v8 = vld [vmem:[#allocation7 + $0x438] sm:$0xff] }
 0x2d2   :  { %v14205_v18 = vadd.f32 %v2193_v1, %v13969_v63  ;;  %v14207_v22 = vpop.f32.mrb[1].mxu0  ;;  %10050 = vmatmul.mubr.f32.vlgmr.msra.gmra.mrb[132].mxu1 %v14194_v52  ;;  %v9891_v39 = vpop.f32.mrb[69].mxu1  ;;  %17200 = vst [vmem:[#allocation88_spill] sm:$0xff] %v14213_v60  ;;  %v14222_v63 = vrot.slane %v13966_v7, %v14202_v28  ;;  %v3254_v52 = vld [vmem:[#allocation7 + $0x428] sm:$0xff]  ;;  %v2577_v28 = vld [vmem:[#allocation7 + $0x90] sm:$0xff] }
 0x2d3   :  { %10052 = vmatprep.mubr.msk.f32.mxu1 %vm12824_vm1, %v17163_v31  ;;  %11203 = vmatpush3.bf16.msra.mxu1 %v14192_v13  ;;  %v3253_v39 = vld [vmem:[#allocation7 + $0x420] sm:$0xff] }
 0x2d4   :  { %17199 = vst [vmem:[#allocation87_spill] sm:$0xff] %v14205_v18  ;;  %11204 = vmatprep.subr.bf16.mxu1 %v17165_v25  ;;  %v2559_v13 = vld [vmem:[#allocation7] sm:$0xff] }
 0x2d5   :  { %v1865_v1 = vpop.f32.mrb[2].mxu0  ;;  %v2198_v18 = vpop.f32.mrb[70].mxu1 }
 0x2d6   :  { %v14225_v41 = vadd.f32 %v14217_v40, %v1865_v1  ;;  %v14228_v21 = vadd.f32 %v2198_v18, %v13978_v33  ;;  %v1867_v23 = vpop.f32.mrb[3].mxu0  ;;  %10053 = vmatmul.mubr.f32.gmra.mrb[134].mxu1 %v13985_v54  ;;  %v9894_v2 = vpop.f32.mrb[71].mxu1  ;;  %v14236_v1 = vpack.c.bf16 %v3254_v52, %v3253_v39  ;;  %v3255_v54 = vld [vmem:[#allocation7 + $0x430] sm:$0xff]  ;;  %v14248_v39 = vpack.c.bf16 %v2578_v47, %v2577_v28 }
 0x2d7   :  { %v2395_v30 = vadd.f32 %v14222_v63, %v1867_v23  ;;  %10055 = vmatprep.mubr.msk.f32.mxu1 %vm12824_vm1, %v17163_v31  ;;  %11206 = vmatpush3.bf16.msra.mxu1 %v14213_v60  ;;  %v14240_v2 = vpack.c.bf16 %v2560_v42, %v2559_v13  ;;  %v2579_v13 = vld [vmem:[#allocation7 + $0xa0] sm:$0xff] }
 0x2d8   :  { %17201 = vst [vmem:[#allocation89_spill] sm:$0xff] %v14228_v21  ;;  %11207 = vmatprep.subr.bf16.mxu1 %v17165_v25  ;;  %17202 = vst [vmem:[#allocation90_spill] sm:$0xff] %v14236_v1  ;;  %v16916_v23 = vmax.f32 %v14225_v41, 0.0 }
 0x2d9   :  { %v14238_v33 = vmax.f32 %v2395_v30, 0.0  ;;  %v1871_v18 = vpop.f32.mrb[4].mxu0  ;;  %v2203_v21 = vpop.f32.mrb[72].mxu1  ;;  %17203 = vst [vmem:[#allocation91_spill] sm:$0xff] %v14240_v2  ;;  %17205 = vst [vmem:[#allocation93_spill] sm:$0xff] %v14248_v39  ;;  %v2561_v30 = vld [vmem:[#allocation7 + $0x10] sm:$0xff] }
 0x2da   :  { %v2399_v26 = vadd.f32 %v14217_v40, %v1871_v18  ;;  %v14245_v14 = vadd.f32 %v2203_v21, %v13988_v45  ;;  %v1873_v60 = vpop.f32.mrb[5].mxu0  ;;  %10056 = vmatmul.mubr.f32.gmra.mrb[136].mxu1 %v13999_v24  ;;  %v9897_v52 = vpop.f32.mrb[73].mxu1  ;;  %v2580_v18 = vld [vmem:[#allocation7 + $0xa8] sm:$0xff]  ;;  %v14257_v45 = vpack.c.bf16 %v3256_v8, %v3255_v54 }
 0x2db   :  { %v2400_v42 = vadd.f32 %v14222_v63, %v1873_v60  ;;  %2720 = vmatprep.mubr.f32.mxu0 %v14238_v33  ;;  %10058 = vmatprep.mubr.msk.f32.mxu1 %vm12824_vm1, %v17163_v31  ;;  %v14262_v60 = vpack.c.bf16 %v2562_v35, %v2561_v30  ;;  %v3257_v52 = vld [vmem:[#allocation7 + $0x440] sm:$0xff]  ;;  %v2564_v30 = vld [vmem:[#allocation7 + $0x28] sm:$0xff] }
 0x2dc   :  { %17204 = vst [vmem:[#allocation92_spill] sm:$0xff] %v14245_v14  ;;  %2721 = vmatmul.mubr.f32.vlgmr.msra.gmra.mrb[102].mxu0 %v16916_v23  ;;  %11209 = vmatpush3.bf16.msra.mxu1 %v14236_v1  ;;  %17206 = vst [vmem:[#allocation94_spill] sm:$0xff] %v14257_v45  ;;  %v3258_v14 = vld [vmem:[#allocation7 + $0x448] sm:$0xff]  ;;  %v14270_v8 = vmax.f32 %v2399_v26, 0.0  ;;  %v2563_v35 = vld [vmem:[#allocation7 + $0x20] sm:$0xff] }
 0x2dd   :  { %v14259_v28 = vmax.f32 %v2400_v42, 0.0  ;;  %v1877_v47 = vpop.f32.mrb[6].mxu0  ;;  %v2208_v21 = vpop.f32.mrb[74].mxu1  ;;  %11116 = vmatpush3.bf16.msra.mxu0 %v14240_v2  ;;  %17207 = vst [vmem:[#allocation95_spill] sm:$0xff] %v14262_v60  ;;  %11210 = vmatprep.subr.bf16.mxu1 %v17165_v25  ;;  %v14273_v42 = vpack.c.bf16 %v2580_v18, %v2579_v13  ;;  %v14281_v26 = vpack.c.bf16 %v3258_v14, %v3257_v52 }
 0x2de   :  { %v2404_v29 = vadd.f32 %v14217_v40, %v1877_v47  ;;  %v14267_v23 = vadd.f32 %v2208_v21, %v14003_v51  ;;  %v1879_v1 = vpop.f32.mrb[7].mxu0  ;;  %10059 = vmatmul.mubr.f32.gmra.mrb[138].mxu1 %v14014_v20  ;;  %v9900_v54 = vpop.f32.mrb[75].mxu1  ;;  %11118 = vmatprep.subr.bf16.mxu0 %v14248_v39  ;;  %v2581_v51 = vld [vmem:[#allocation7 + $0xb0] sm:$0xff]  ;;  %v2582_v47 = vld [vmem:[#allocation7 + $0xb8] sm:$0xff] }
 0x2df   :  { %17209 = vst [vmem:[#allocation97_spill] sm:$0xff] %v14273_v42  ;;  %v2405_v2 = vadd.f32 %v14222_v63, %v1879_v1  ;;  %2725 = vmatprep.mubr.f32.mxu0 %v14259_v28  ;;  %10061 = vmatprep.mubr.msk.f32.mxu1 %vm12824_vm1, %v17163_v31  ;;  %17210 = vst [vmem:[#allocation98_spill] sm:$0xff] %v14281_v26  ;;  %v14286_v1 = vpack.c.bf16 %v2564_v30, %v2563_v35  ;;  %v3259_v54 = vld [vmem:[#allocation7 + $0x450] sm:$0xff]  ;;  %v2566_v30 = vld [vmem:[#allocation7 + $0x38] sm:$0xff] }
 0x2e0   :  { %17208 = vst [vmem:[#allocation96_spill] sm:$0xff] %v14267_v23  ;;  %2726 = vmatmul.mubr.f32.gmra.mrb[104].mxu0 %v14270_v8  ;;  %11212 = vmatpush3.bf16.msra.mxu1 %v14257_v45  ;;  %v3260_v23 = vld [vmem:[#allocation7 + $0x458] sm:$0xff]  ;;  %v14297_v52 = vpack.c.bf16 %v2582_v47, %v2581_v51  ;;  %v2565_v35 = vld [vmem:[#allocation7 + $0x30] sm:$0xff] }
 0x2e1   :  { %v14283_v21 = vmax.f32 %v2405_v2, 0.0  ;;  %v1883_v13 = vpop.f32.mrb[8].mxu0  ;;  %v2213_v18 = vpop.f32.mrb[76].mxu1  ;;  %11120 = vmatpush3.bf16.msra.mxu0 %v14262_v60  ;;  %17211 = vst [vmem:[#allocation99_spill] sm:$0xff] %v14286_v1  ;;  %11213 = vmatprep.subr.bf16.mxu1 %v17165_v25  ;;  %v14294_v2 = vmax.f32 %v2404_v29, 0.0  ;;  %v14305_v29 = vpack.c.bf16 %v3260_v23, %v3259_v54 }
 0x2e2   :  { %v2409_v39 = vadd.f32 %v14217_v40, %v1883_v13  ;;  %v14291_v6 = vadd.f32 %v2213_v18, %v14018_v9  ;;  %v1885_v45 = vpop.f32.mrb[9].mxu0  ;;  %10062 = vmatmul.mubr.f32.gmra.mrb[140].mxu1 %v14029_v59  ;;  %v9903_v14 = vpop.f32.mrb[77].mxu1  ;;  %11122 = vmatprep.subr.bf16.mxu0 %v14273_v42  ;;  %17213 = vst [vmem:[#allocation101_spill] sm:$0xff] %v14297_v52  ;;  %v2583_v9 = vld [vmem:[#allocation7 + $0xc0] sm:$0xff]  ;;  %v2584_v13 = vld [vmem:[#allocation7 + $0xc8] sm:$0xff] }
 0x2e3   :  { %v2410_v60 = vadd.f32 %v14222_v63, %v1885_v45  ;;  %2730 = vmatprep.mubr.f32.mxu0 %v14283_v21  ;;  %10064 = vmatprep.mubr.msk.f32.mxu1 %vm12824_vm1, %v17163_v31  ;;  %17214 = vst [vmem:[#allocation102_spill] sm:$0xff] %v14305_v29  ;;  %v14310_v45 = vpack.c.bf16 %v2566_v30, %v2565_v35  ;;  %v3261_v14 = vld [vmem:[#allocation7 + $0x460] sm:$0xff]  ;;  %v2568_v30 = vld [vmem:[#allocation7 + $0x48] sm:$0xff] }
 0x2e4   :  { %17212 = vst [vmem:[#allocation100_spill] sm:$0xff] %v14291_v6  ;;  %2731 = vmatmul.mubr.f32.gmra.mrb[106].mxu0 %v14294_v2  ;;  %11215 = vmatpush3.bf16.msra.mxu1 %v14281_v26  ;;  %v3262_v6 = vld [vmem:[#allocation7 + $0x468] sm:$0xff]  ;;  %v14321_v54 = vpack.c.bf16 %v2584_v13, %v2583_v9  ;;  %v2567_v35 = vld [vmem:[#allocation7 + $0x40] sm:$0xff] }
 0x2e5   :  { %v14307_v18 = vmax.f32 %v2410_v60, 0.0  ;;  %v1889_v51 = vpop.f32.mrb[10].mxu0  ;;  %v2218_v47 = vpop.f32.mrb[78].mxu1  ;;  %11124 = vmatpush3.bf16.msra.mxu0 %v14286_v1  ;;  %17215 = vst [vmem:[#allocation103_spill] sm:$0xff] %v14310_v45  ;;  %11216 = vmatprep.subr.bf16.mxu1 %v17165_v25  ;;  %v14318_v60 = vmax.f32 %v2409_v39, 0.0  ;;  %v14329_v39 = vpack.c.bf16 %v3262_v6, %v3261_v14 }
 0x2e6   :  { %v2414_v42 = vadd.f32 %v14217_v40, %v1889_v51  ;;  %v14315_v61 = vadd.f32 %v2218_v47, %v14033_v36  ;;  %v1891_v26 = vpop.f32.mrb[11].mxu0  ;;  %10065 = vmatmul.mubr.f32.gmra.mrb[142].mxu1 %v14044_v4  ;;  %v9906_v23 = vpop.f32.mrb[79].mxu1  ;;  %11126 = vmatprep.subr.bf16.mxu0 %v14297_v52  ;;  %17218 = vst [vmem:[#allocation106_spill] sm:$0xff] %v14321_v54  ;;  %v2585_v36 = vld [vmem:[#allocation7 + $0xd0] sm:$0xff]  ;;  %v2586_v51 = vld [vmem:[#allocation7 + $0xd8] sm:$0xff] }
 0x2e7   :  { %17217 = vst [vmem:[#allocation105_spill] sm:$0xff] %v14318_v60  ;;  %v2415_v1 = vadd.f32 %v14222_v63, %v1891_v26  ;;  %2735 = vmatprep.mubr.f32.mxu0 %v14307_v18  ;;  %10067 = vmatprep.mubr.msk.f32.mxu1 %vm12824_vm1, %v17163_v31  ;;  %17219 = vst [vmem:[#allocation107_spill] sm:$0xff] %v14329_v39  ;;  %v14334_v26 = vpack.c.bf16 %v2568_v30, %v2567_v35  ;;  %v3263_v23 = vld [vmem:[#allocation7 + $0x470] sm:$0xff]  ;;  %v2570_v30 = vld [vmem:[#allocation7 + $0x58] sm:$0xff] }
 0x2e8   :  { %17216 = vst [vmem:[#allocation104_spill] sm:$0xff] %v14315_v61  ;;  %2736 = vmatmul.mubr.f32.gmra.mrb[108].mxu0 %v14318_v60  ;;  %11218 = vmatpush3.bf16.msra.mxu1 %v14305_v29  ;;  %v3264_v61 = vld [vmem:[#allocation7 + $0x478] sm:$0xff]  ;;  %v14345_v14 = vpack.c.bf16 %v2586_v51, %v2585_v36  ;;  %v2569_v35 = vld [vmem:[#allocation7 + $0x50] sm:$0xff] }
 0x2e9   :  { %v14331_v47 = vmax.f32 %v2415_v1, 0.0  ;;  %v1895_v9 = vpop.f32.mrb[12].mxu0  ;;  %v2223_v13 = vpop.f32.mrb[80].mxu1  ;;  %11128 = vmatpush3.bf16.msra.mxu0 %v14310_v45  ;;  %17220 = vst [vmem:[#allocation108_spill] sm:$0xff] %v14334_v26  ;;  %11219 = vmatprep.subr.bf16.mxu1 %v17165_v25  ;;  %v14342_v1 = vmax.f32 %v2414_v42, 0.0  ;;  %v14353_v42 = vpack.c.bf16 %v3264_v61, %v3263_v23 }
 0x2ea   :  { %v2419_v52 = vadd.f32 %v14217_v40, %v1895_v9  ;;  %v14339_v60 = vadd.f32 %v2223_v13, %v14048_v17  ;;  %v1897_v29 = vpop.f32.mrb[13].mxu0  ;;  %10068 = vmatmul.mubr.f32.gmra.mrb[144].mxu1 %v14059_v12  ;;  %v9909_v6 = vpop.f32.mrb[81].mxu1  ;;  %11130 = vmatprep.subr.bf16.mxu0 %v14321_v54  ;;  %17222 = vst [vmem:[#allocation110_spill] sm:$0xff] %v14345_v14  ;;  %v2587_v17 = vld [vmem:[#allocation7 + $0xe0] sm:$0xff]  ;;  %v2588_v9 = vld [vmem:[#allocation7 + $0xe8] sm:$0xff] }
 0x2eb   :  { %v2420_v45 = vadd.f32 %v14222_v63, %v1897_v29  ;;  %2740 = vmatprep.mubr.f32.mxu0 %v14331_v47  ;;  %10070 = vmatprep.mubr.msk.f32.mxu1 %vm12824_vm1, %v17163_v31  ;;  %17223 = vst [vmem:[#allocation111_spill] sm:$0xff] %v14353_v42  ;;  %v14358_v29 = vpack.c.bf16 %v2570_v30, %v2569_v35  ;;  %v2572_v35 = vld [vmem:[#allocation7 + $0x68] sm:$0xff] }
 0x2ec   :  { %17221 = vst [vmem:[#allocation109_spill] sm:$0xff] %v14339_v60  ;;  %2741 = vmatmul.mubr.f32.gmra.mrb[110].mxu0 %v14342_v1  ;;  %11221 = vmatpush3.bf16.msra.mxu1 %v14329_v39  ;;  %v14366_v23 = vmax.f32 %v2419_v52, 0.0 }
 0x2ed   :  { %v14355_v13 = vmax.f32 %v2420_v45, 0.0  ;;  %v1901_v36 = vpop.f32.mrb[14].mxu0  ;;  %v2228_v51 = vpop.f32.mrb[82].mxu1  ;;  %11132 = vmatpush3.bf16.msra.mxu0 %v14334_v26  ;;  %17224 = vst [vmem:[#allocation112_spill] sm:$0xff] %v14358_v29  ;;  %11222 = vmatprep.subr.bf16.mxu1 %v17165_v25  ;;  %v14369_v45 = vpack.c.bf16 %v2588_v9, %v2587_v17  ;;  %v2571_v26 = vld [vmem:[#allocation7 + $0x60] sm:$0xff] }
 0x2ee   :  { %v2424_v6 = vadd.f32 %v14217_v40, %v1901_v36  ;;  %v14363_v60 = vadd.f32 %v2228_v51, %v14063_v5  ;;  %v1903_v54 = vpop.f32.mrb[15].mxu0  ;;  %10071 = vmatmul.mubr.f32.gmra.mrb[146].mxu1 %v14074_v34  ;;  %v9912_v61 = vpop.f32.mrb[83].mxu1  ;;  %11134 = vmatprep.subr.bf16.mxu0 %v14345_v14  ;;  %v2589_v5 = vld [vmem:[#allocation7 + $0xf0] sm:$0xff]  ;;  %v2590_v36 = vld [vmem:[#allocation7 + $0xf8] sm:$0xff]  ;;  %v14380_v9 = vpack.c.bf16 %v2572_v35, %v2571_v26 }
 0x2ef   :  { %17226 = vst [vmem:[#allocation114_spill] sm:$0xff] %v14369_v45  ;;  %v2425_v30 = vadd.f32 %v14222_v63, %v1903_v54  ;;  %2745 = vmatprep.mubr.f32.mxu0 %v14355_v13  ;;  %10073 = vmatprep.mubr.msk.f32.mxu1 %vm12824_vm1, %v17163_v31  ;;  %v2574_v26 = vld [vmem:[#allocation7 + $0x78] sm:$0xff] }
 0x2f0   :  { %17225 = vst [vmem:[#allocation113_spill] sm:$0xff] %v14363_v60  ;;  %2746 = vmatmul.mubr.f32.gmra.mrb[112].mxu0 %v14366_v23  ;;  %11224 = vmatpush3.bf16.msra.mxu1 %v14353_v42  ;;  %17227 = vst [vmem:[#allocation115_spill] sm:$0xff] %v14380_v9  ;;  %v14388_v42 = vmax.f32 %v2424_v6, 0.0 }
 0x2f1   :  { %v14377_v52 = vmax.f32 %v2425_v30, 0.0  ;;  %v1907_v51 = vpop.f32.mrb[16].mxu0  ;;  %v2233_v17 = vpop.f32.mrb[84].mxu1  ;;  %11136 = vmatpush3.bf16.msra.mxu0 %v14358_v29  ;;  %11257 = vmatprep.subr.bf16.mxu1 %v17165_v25  ;;  %v14391_v30 = vpack.c.bf16 %v2590_v36, %v2589_v5  ;;  %v2573_v29 = vld [vmem:[#allocation7 + $0x70] sm:$0xff] }
 0x2f2   :  { %v2429_v54 = vadd.f32 %v14217_v40, %v1907_v51  ;;  %v14385_v61 = vadd.f32 %v2233_v17, %v14078_v10  ;;  %v1909_v60 = vpop.f32.mrb[17].mxu0  ;;  %10074 = vmatmul.mubr.f32.gmra.mrb[148].mxu1 %v14089_v19  ;;  %v9915_v14 = vpop.f32.mrb[85].mxu1  ;;  %17229 = vst [vmem:[#allocation117_spill] sm:$0xff] %v14388_v42  ;;  %11138 = vmatprep.subr.bf16.mxu0 %v14369_v45  ;;  %v3233_v10 = vld [vmem:[#allocation7 + $0x380] sm:$0xff]  ;;  %v3234_v51 = vld [vmem:[#allocation7 + $0x388] sm:$0xff] }
 0x2f3   :  { %17230 = vst [vmem:[#allocation118_spill] sm:$0xff] %v14391_v30  ;;  %v2430_v35 = vadd.f32 %v14222_v63, %v1909_v60  ;;  %2750 = vmatprep.mubr.f32.mxu0 %v14377_v52  ;;  %10076 = vmatprep.mubr.msk.f32.mxu1 %vm12824_vm1, %v17163_v31  ;;  %v14401_v5 = vpack.c.bf16 %v2574_v26, %v2573_v29 }
 0x2f4   :  { %17228 = vst [vmem:[#allocation116_spill] sm:$0xff] %v14385_v61  ;;  %2751 = vmatmul.mubr.f32.gmra.mrb[114].mxu0 %v14388_v42  ;;  %v14408_v39 = vmax.f32 %v2429_v54, 0.0 }
 0x2f5   :  { %v14398_v14 = vmax.f32 %v2430_v35, 0.0  ;;  %v1913_v6 = vpop.f32.mrb[18].mxu0  ;;  %v2238_v17 = vpop.f32.mrb[86].mxu1  ;;  %11140 = vmatpush3.bf16.msra.mxu0 %v14380_v9  ;;  %17232 = vst [vmem:[#allocation120_spill] sm:$0xff] %v14401_v5  ;;  %v14411_v35 = vpack.c.bf16 %v3234_v51, %v3233_v10  ;;  %v14504_v9 = vadd.f32 %v14222_v63, %v14207_v22  ;;  %v2389_v22 = vadd.f32 %v14217_v40, %v14199_v3 }
 0x2f6   :  { %v2434_v36 = vadd.f32 %v14217_v40, %v1913_v6  ;;  %v14405_v60 = vadd.f32 %v2238_v17, %v14093_v15  ;;  %v1915_v61 = vpop.f32.mrb[19].mxu0  ;;  %10077 = vmatmul.mubr.f32.gmra.mrb[150].mxu1 %v14102_v16  ;;  %v9918_v45 = vpop.f32.mrb[87].mxu1  ;;  %11142 = vmatprep.subr.bf16.mxu0 %v14391_v30 }
 0x2f7   :  { %17231 = vst [vmem:[#allocation119_spill] sm:$0xff] %v14398_v14  ;;  %17234 = vst [vmem:[#allocation122_spill] sm:$0xff] %v14411_v35  ;;  %v2435_v42 = vadd.f32 %v14222_v63, %v1915_v61  ;;  %2755 = vmatprep.mubr.f32.mxu0 %v14398_v14  ;;  %10079 = vmatprep.mubr.msk.f32.mxu1 %vm12824_vm1, %v17163_v31  ;;  %v16971_v3 = vmax.f32 %v14504_v9, 0.0 }
 0x2f8   :  { %17233 = vst [vmem:[#allocation121_spill] sm:$0xff] %v14405_v60  ;;  %2756 = vmatmul.mubr.f32.gmra.mrb[116].mxu0 %v14408_v39  ;;  %v14426_v51 = vmax.f32 %v2434_v36, 0.0  ;;  %17242 = vst [vmem:[#allocation130_spill] sm:$0xff] %v14504_v9  ;;  %v17321_v9 = vld [vmem:[#allocation74_spill] sm:$0xff] }
 0x2f9   :  { %v14418_v15 = vmax.f32 %v2435_v42, 0.0  ;;  %v1919_v29 = vpop.f32.mrb[20].mxu0  ;;  %v2243_v26 = vpop.f32.mrb[88].mxu1  ;;  %11144 = vmatpush3.bf16.msra.mxu0 %v14401_v5 }
 0x2fa   :  { %v2439_v45 = vadd.f32 %v14217_v40, %v1919_v29  ;;  %v14423_v54 = vadd.f32 %v2243_v26, %v14106_v58  ;;  %v1921_v10 = vpop.f32.mrb[21].mxu0  ;;  %10080 = vmatmul.mubr.f32.gmra.mrb[152].mxu1 %v14114_v0  ;;  %v9921_v61 = vpop.f32.mrb[89].mxu1  ;;  %11170 = vmatprep.subr.bf16.mxu0 %v14411_v35 }
 0x2fb   :  { %17235 = vst [vmem:[#allocation123_spill] sm:$0xff] %v14418_v15  ;;  %v2440_v42 = vadd.f32 %v14222_v63, %v1921_v10  ;;  %2760 = vmatprep.mubr.f32.mxu0 %v14418_v15  ;;  %10082 = vmatprep.mubr.msk.f32.mxu1 %vm12824_vm1, %v17163_v31 }
 0x2fc   :  { %17236 = vst [vmem:[#allocation124_spill] sm:$0xff] %v14423_v54  ;;  %2761 = vmatmul.mubr.f32.gmra.mrb[118].mxu0 %v14426_v51  ;;  %v14441_v61 = vmax.f32 %v2439_v45, 0.0 }
 0x2fd   :  { %v14434_v6 = vmax.f32 %v2440_v42, 0.0  ;;  %v1925_v58 = vpop.f32.mrb[22].mxu0  ;;  %v2248_v17 = vpop.f32.mrb[90].mxu1 }
 0x2fe   :  { %v2444_v29 = vadd.f32 %v14217_v40, %v1925_v58  ;;  %v14438_v36 = vadd.f32 %v2248_v17, %v14117_v56  ;;  %v1927_v26 = vpop.f32.mrb[23].mxu0  ;;  %10083 = vmatmul.mubr.f32.gmra.mrb[154].mxu1 %v14125_v38  ;;  %v9924_v10 = vpop.f32.mrb[91].mxu1 }
 0x2ff   :  { %v2445_v54 = vadd.f32 %v14222_v63, %v1927_v26  ;;  %2765 = vmatprep.mubr.f32.mxu0 %v14434_v6  ;;  %10085 = vmatprep.mubr.msk.f32.mxu1 %vm12824_vm1, %v17163_v31 }
 0x300   :  { %17237 = vst [vmem:[#allocation125_spill] sm:$0xff] %v14438_v36  ;;  %2766 = vmatmul.mubr.f32.gmra.mrb[120].mxu0 %v14441_v61  ;;  %v14455_v10 = vmax.f32 %v2444_v29, 0.0 }
 0x301   :  { %v14448_v42 = vmax.f32 %v2445_v54, 0.0  ;;  %v1931_v58 = vpop.f32.mrb[24].mxu0  ;;  %v2253_v56 = vpop.f32.mrb[92].mxu1 }
 0x302   :  { %v2449_v17 = vadd.f32 %v14217_v40, %v1931_v58  ;;  %v14452_v36 = vadd.f32 %v2253_v56, %v14128_v46  ;;  %v1933_v45 = vpop.f32.mrb[25].mxu0  ;;  %10086 = vmatmul.mubr.f32.gmra.mrb[156].mxu1 %v14136_v57  ;;  %v9927_v26 = vpop.f32.mrb[93].mxu1 }
 0x303   :  { %v2450_v60 = vadd.f32 %v14222_v63, %v1933_v45  ;;  %2770 = vmatprep.mubr.f32.mxu0 %v14448_v42  ;;  %10088 = vmatprep.mubr.msk.f32.mxu1 %vm12824_vm1, %v17163_v31 }
 0x304   :  { %17238 = vst [vmem:[#allocation126_spill] sm:$0xff] %v14452_v36  ;;  %2771 = vmatmul.mubr.f32.gmra.mrb[122].mxu0 %v14455_v10  ;;  %v14469_v26 = vmax.f32 %v2449_v17, 0.0 }
 0x305   :  { %v14462_v54 = vmax.f32 %v2450_v60, 0.0  ;;  %v1937_v58 = vpop.f32.mrb[26].mxu0  ;;  %v2258_v46 = vpop.f32.mrb[94].mxu1 }
 0x306   :  { %v2454_v56 = vadd.f32 %v14217_v40, %v1937_v58  ;;  %v14466_v36 = vadd.f32 %v2258_v46, %v14139_v50  ;;  %v1939_v29 = vpop.f32.mrb[27].mxu0  ;;  %10089 = vmatmul.mubr.f32.gmra.mrb[158].mxu1 %v14147_v43  ;;  %v9930_v45 = vpop.f32.mrb[95].mxu1 }
 0x307   :  { %v2455_v35 = vadd.f32 %v14222_v63, %v1939_v29  ;;  %2775 = vmatprep.mubr.f32.mxu0 %v14462_v54  ;;  %10091 = vmatprep.mubr.msk.f32.mxu1 %vm12824_vm1, %v17163_v31 }
 0x308   :  { %17239 = vst [vmem:[#allocation127_spill] sm:$0xff] %v14466_v36  ;;  %2776 = vmatmul.mubr.f32.gmra.mrb[124].mxu0 %v14469_v26  ;;  %v14483_v45 = vmax.f32 %v2454_v56, 0.0 }
 0x309   :  { %v14476_v60 = vmax.f32 %v2455_v35, 0.0  ;;  %v1943_v58 = vpop.f32.mrb[28].mxu0  ;;  %v2263_v50 = vpop.f32.mrb[96].mxu1  ;;  %v2382_v35 = vsub.s32 4, %v13959_v55 }
 0x30a   :  { %v2459_v46 = vadd.f32 %v14217_v40, %v1943_v58  ;;  %v14480_v36 = vadd.f32 %v2263_v50, %v14150_v37  ;;  %v1945_v17 = vpop.f32.mrb[29].mxu0  ;;  %10092 = vmatmul.mubr.f32.gmra.mrb[160].mxu1 %v14158_v48  ;;  %v9933_v29 = vpop.f32.mrb[97].mxu1 }
 0x30b   :  { %v2460_v5 = vadd.f32 %v14222_v63, %v1945_v17  ;;  %2780 = vmatprep.mubr.f32.mxu0 %v14476_v60  ;;  %10126 = vmatprep.mubr.msk.f32.mxu1 %vm12824_vm1, %v17163_v31 }
 0x30c   :  { %17240 = vst [vmem:[#allocation128_spill] sm:$0xff] %v14480_v36  ;;  %2781 = vmatmul.mubr.f32.gmra.mrb[126].mxu0 %v14483_v45  ;;  %v14500_v30 = vmax.f32 %v2459_v46, 0.0 }
 0x30d   :  { %v14491_v58 = vmax.f32 %v2460_v5, 0.0  ;;  %v1949_v37 = vpop.f32.mrb[30].mxu0  ;;  %v2268_v50 = vpop.f32.mrb[98].mxu1 }
 0x30e   :  { %v14494_v36 = vadd.f32 %v14217_v40, %v1949_v37  ;;  %v14497_v56 = vadd.f32 %v2268_v50, %v14164_v49  ;;  %v1951_v17 = vpop.f32.mrb[31].mxu0  ;;  %10127 = vmatmul.mubr.f32.vlgmr.msra.gmra.mrb[162].mxu1 %v13999_v24  ;;  %v9936_v29 = vpop.f32.mrb[99].mxu1  ;;  %v14513_v49 = vrot.slane %v13966_v7, %v2382_v35  ;;  %v3217_v35 = vld [vmem:[#allocation7 + $0x300] sm:$0xff] }
 0x30f   :  { %v2465_v55 = vadd.f32 %v14222_v63, %v1951_v17  ;;  %2785 = vmatprep.mubr.f32.mxu0 %v14491_v58  ;;  %10129 = vmatprep.mubr.msk.f32.mxu1 %vm12824_vm1, %v17163_v31 }
 0x310   :  { %17241 = vst [vmem:[#allocation129_spill] sm:$0xff] %v14497_v56  ;;  %2786 = vmatmul.mubr.f32.gmra.mrb[128].mxu0 %v14500_v30  ;;  %11259 = vmatpush3.bf16.msra.mxu1 %v13703_v27  ;;  %17243 = vst [vmem:[#allocation131_spill] sm:$0xff] %v14513_v49  ;;  %v16970_v7 = vmax.f32 %v14494_v36, 0.0 }
 0x311   :  { %v14515_v5 = vmax.f32 %v2465_v55, 0.0  ;;  %v1955_v46 = vpop.f32.mrb[32].mxu0  ;;  %v2273_v37 = vpop.f32.mrb[100].mxu1  ;;  %11260 = vmatprep.subr.bf16.mxu1 %v17165_v25  ;;  %v3218_v55 = vld [vmem:[#allocation7 + $0x308] sm:$0xff] }
 0x312   :  { %v14521_v50 = vadd.f32 %v14217_v40, %v1955_v46  ;;  %v2361_v17 = vadd.f32 %v2273_v37, %v14181_v62  ;;  %v1957_v29 = vpop.f32.mrb[33].mxu0  ;;  %10130 = vmatmul.mubr.f32.gmra.mrb[164].mxu1 %v14014_v20  ;;  %v9939_v56 = vpop.f32.mrb[101].mxu1  ;;  %v3235_v40 = vld [vmem:[#allocation7 + $0x390] sm:$0xff]  ;;  %v3236_v62 = vld [vmem:[#allocation7 + $0x398] sm:$0xff] }
 0x313   :  { %17244 = vst [vmem:[#allocation132_spill] sm:$0xff] %v14515_v5  ;;  %v14527_v27 = vadd.f32 %v14222_v63, %v1957_v29  ;;  %2790 = vmatprep.mubr.f32.mxu0 %v14515_v5  ;;  %10132 = vmatprep.mubr.msk.f32.mxu1 %vm12824_vm1, %v17163_v31  ;;  %v14541_v63 = vpack.c.bf16 %v3218_v55, %v3217_v35  ;;  %v2474_v56 = vmax.f32 %v2389_v22, 0.0  ;;  %v3219_v29 = vld [vmem:[#allocation7 + $0x310] sm:$0xff]  ;;  %v3221_v55 = vld [vmem:[#allocation7 + $0x320] sm:$0xff] }
 0x314   :  { %v14534_v46 = vadd.f32 %v14513_v49, %v2361_v17  ;;  %2791 = vmatmul.mubr.f32.gmra.mrb[130].mxu0 %v16970_v7  ;;  %11262 = vmatpush3.bf16.msra.mxu1 %v13715_v32  ;;  %v14545_v37 = vpack.c.bf16 %v3236_v62, %v3235_v40  ;;  %v3220_v17 = vld [vmem:[#allocation7 + $0x318] sm:$0xff]  ;;  %v3237_v7 = vld [vmem:[#allocation7 + $0x3a0] sm:$0xff]  ;;  %v3222_v40 = vld [vmem:[#allocation7 + $0x328] sm:$0xff] }
 0x315   :  { %17245 = vst [vmem:[#allocation133_spill] sm:$0xff] %v14527_v27  ;;  %3000 = vmatprep.mubr.f32.mxu0 %v16971_v3  ;;  %17247 = vst [vmem:[#allocation135_spill] sm:$0xff] %v14541_v63  ;;  %11263 = vmatprep.subr.bf16.mxu1 %v17165_v25  ;;  %v14552_v35 = vpack.c.bf16 %v3220_v17, %v3219_v29  ;;  %v3239_v62 = vld [vmem:[#allocation7 + $0x3b0] sm:$0xff]  ;;  %v17251_v3 = vmax.f32 %v14225_v41, 0.0  ;;  %v3224_v17 = vld [vmem:[#allocation7 + $0x338] sm:$0xff] }
 0x316   :  { %17246 = vst [vmem:[#allocation134_spill] sm:$0xff] %v14534_v46  ;;  %10133 = vmatmul.mubr.f32.gmra.mrb[166].mxu1 %v14029_v59  ;;  %17248 = vst [vmem:[#allocation136_spill] sm:$0xff] %v14545_v37  ;;  %v3238_v46 = vld [vmem:[#allocation7 + $0x3a8] sm:$0xff]  ;;  %v3223_v29 = vld [vmem:[#allocation7 + $0x330] sm:$0xff] }
 0x317   :  { %10135 = vmatprep.mubr.msk.f32.mxu1 %vm12824_vm1, %v17163_v31  ;;  %17249 = vst [vmem:[#allocation137_spill] sm:$0xff] %v14552_v35  ;;  %v14556_v22 = vpack.c.bf16 %v3238_v46, %v3237_v7  ;;  %v14566_v7 = vpack.c.bf16 %v3222_v40, %v3221_v55  ;;  %v3241_v41 = vld [vmem:[#allocation7 + $0x3c0] sm:$0xff]  ;;  %v14579_v55 = vpack.c.bf16 %v3224_v17, %v3223_v29  ;;  %v3243_v49 = vld [vmem:[#allocation7 + $0x3d0] sm:$0xff] }
 0x318   :  { %3001 = vmatmul.mubr.f32.vlgmr.msra.gmra.mrb[132].mxu0 %v2474_v56  ;;  %11265 = vmatpush3.bf16.msra.mxu1 %v13728_v11  ;;  %v3240_v56 = vld [vmem:[#allocation7 + $0x3b8] sm:$0xff]  ;;  %v17325_v11 = vld [vmem:[#allocation78_spill] sm:$0xff] }
 0x319   :  { %3005 = vmatprep.mubr.f32.mxu0 %v14238_v33  ;;  %11172 = vmatpush3.bf16.msra.mxu0 %v14541_v63  ;;  %17250 = vst [vmem:[#allocation138_spill] sm:$0xff] %v14556_v22  ;;  %17252 = vst [vmem:[#allocation139_spill] sm:$0xff] %v14566_v7  ;;  %v14570_v46 = vpack.c.bf16 %v3240_v56, %v3239_v62  ;;  %v3225_v62 = vld [vmem:[#allocation7 + $0x340] sm:$0xff]  ;;  %v3226_v56 = vld [vmem:[#allocation7 + $0x348] sm:$0xff] }
 0x31a   :  { %10136 = vmatmul.mubr.f32.gmra.mrb[168].mxu1 %v14044_v4  ;;  %11174 = vmatprep.subr.bf16.mxu0 %v14545_v37  ;;  %17254 = vst [vmem:[#allocation141_spill] sm:$0xff] %v14579_v55  ;;  %v14592_v29 = vpack.c.bf16 %v3226_v56, %v3225_v62  ;;  %v3230_v56 = vld [vmem:[#allocation7 + $0x368] sm:$0xff]  ;;  %v17317_v63 = vld [vmem:[#allocation72_spill] sm:$0xff] }
 0x31b   :  { %10138 = vmatprep.mubr.msk.f32.mxu1 %vm12824_vm1, %v17163_v31  ;;  %11266 = vmatprep.subr.bf16.mxu1 %v17165_v25  ;;  %17253 = vst [vmem:[#allocation140_spill] sm:$0xff] %v14570_v46  ;;  %v17311_v37 = vld [vmem:[#allocation42_spill] sm:$0xff] }
 0x31c   :  { %3006 = vmatmul.mubr.f32.gmra.mrb[134].mxu0 %v17251_v3  ;;  %11268 = vmatpush3.bf16.msra.mxu1 %v13742_v44  ;;  %v3242_v3 = vld [vmem:[#allocation7 + $0x3c8] sm:$0xff]  ;;  %17257 = vst [vmem:[#allocation143_spill] sm:$0xff] %v14592_v29 }
 0x31d   :  { %3010 = vmatprep.mubr.f32.mxu0 %v14259_v28  ;;  %11176 = vmatpush3.bf16.msra.mxu0 %v14552_v35  ;;  %v14583_v40 = vpack.c.bf16 %v3242_v3, %v3241_v41  ;;  %v3227_v41 = vld [vmem:[#allocation7 + $0x350] sm:$0xff]  ;;  %v3228_v3 = vld [vmem:[#allocation7 + $0x358] sm:$0xff] }
 0x31e   :  { %10139 = vmatmul.mubr.f32.gmra.mrb[170].mxu1 %v14059_v12  ;;  %11178 = vmatprep.subr.bf16.mxu0 %v14556_v22  ;;  %v3244_v22 = vld [vmem:[#allocation7 + $0x3d8] sm:$0xff]  ;;  %v14605_v62 = vpack.c.bf16 %v3228_v3, %v3227_v41 }
 0x31f   :  { %10141 = vmatprep.mubr.msk.f32.mxu1 %vm12824_vm1, %v17163_v31  ;;  %11269 = vmatprep.subr.bf16.mxu1 %v17165_v25  ;;  %17255 = vst [vmem:[#allocation142_spill] sm:$0xff] %v14583_v40  ;;  %v14596_v17 = vpack.c.bf16 %v3244_v22, %v3243_v49  ;;  %v3229_v22 = vld [vmem:[#allocation7 + $0x360] sm:$0xff]  ;;  %v3232_v3 = vld [vmem:[#allocation7 + $0x378] sm:$0xff] }
 0x320   :  { %3011 = vmatmul.mubr.f32.gmra.mrb[136].mxu0 %v14270_v8  ;;  %11271 = vmatpush3.bf16.msra.mxu1 %v13756_v53  ;;  %v17259_v53 = vld [vmem:[#allocation105_spill] sm:$0xff]  ;;  %v14618_v41 = vpack.c.bf16 %v3230_v56, %v3229_v22  ;;  %v17269_v56 = vld [vmem:[#allocation79_spill] sm:$0xff]  ;;  %v17286_v35 = vld [vmem:[#allocation32_spill] sm:$0xff] }
 0x321   :  { %3015 = vmatprep.mubr.f32.mxu0 %v14283_v21  ;;  %11180 = vmatpush3.bf16.msra.mxu0 %v14566_v7  ;;  %v17256_v7 = vld [vmem:[#allocation27_spill] sm:$0xff]  ;;  %17258 = vst [vmem:[#allocation144_spill] sm:$0xff] %v14596_v17  ;;  %17261 = vst [vmem:[#allocation105_spill] sm:$0xff] %v14605_v62 }
 0x322   :  { %10142 = vmatmul.mubr.f32.gmra.mrb[172].mxu1 %v14074_v34  ;;  %11182 = vmatprep.subr.bf16.mxu0 %v14570_v46  ;;  %v3246_v46 = vld [vmem:[#allocation7 + $0x3e8] sm:$0xff]  ;;  %17264 = vst [vmem:[#allocation146_spill] sm:$0xff] %v14618_v41 }
 0x323   :  { %10144 = vmatprep.mubr.msk.f32.mxu1 %vm12824_vm1, %v17163_v31  ;;  %11272 = vmatprep.subr.bf16.mxu1 %v17165_v25 }
 0x324   :  { %3016 = vmatmul.mubr.f32.gmra.mrb[138].mxu0 %v14294_v2  ;;  %11274 = vmatpush3.bf16.msra.mxu1 %v17256_v7  ;;  %v3245_v7 = vld [vmem:[#allocation7 + $0x3e0] sm:$0xff] }
 0x325   :  { %3020 = vmatprep.mubr.f32.mxu0 %v14307_v18  ;;  %11184 = vmatpush3.bf16.msra.mxu0 %v14579_v55  ;;  %v17260_v55 = vld [vmem:[#allocation28_spill] sm:$0xff]  ;;  %v14609_v49 = vpack.c.bf16 %v3246_v46, %v3245_v7  ;;  %v3231_v46 = vld [vmem:[#allocation7 + $0x370] sm:$0xff] }
 0x326   :  { %10145 = vmatmul.mubr.f32.gmra.mrb[174].mxu1 %v14089_v19  ;;  %11186 = vmatprep.subr.bf16.mxu0 %v14583_v40  ;;  %v3248_v40 = vld [vmem:[#allocation7 + $0x3f8] sm:$0xff]  ;;  %v14630_v22 = vpack.c.bf16 %v3232_v3, %v3231_v46  ;;  %v17270_v46 = vld [vmem:[#allocation49_spill] sm:$0xff] }
 0x327   :  { %10147 = vmatprep.mubr.msk.f32.mxu1 %vm12824_vm1, %v17163_v31  ;;  %11275 = vmatprep.subr.bf16.mxu1 %v17165_v25  ;;  %17262 = vst [vmem:[#allocation145_spill] sm:$0xff] %v14609_v49  ;;  %v17271_v3 = vld [vmem:[#allocation80_spill] sm:$0xff] }
 0x328   :  { %3021 = vmatmul.mubr.f32.gmra.mrb[140].mxu0 %v17259_v53  ;;  %11277 = vmatpush3.bf16.msra.mxu1 %v17260_v55  ;;  %v3247_v55 = vld [vmem:[#allocation7 + $0x3f0] sm:$0xff]  ;;  %17266 = vst [vmem:[#allocation148_spill] sm:$0xff] %v14630_v22 }
 0x329   :  { %3025 = vmatprep.mubr.f32.mxu0 %v14331_v47  ;;  %11188 = vmatpush3.bf16.msra.mxu0 %v14592_v29  ;;  %v17263_v29 = vld [vmem:[#allocation29_spill] sm:$0xff]  ;;  %v14622_v7 = vpack.c.bf16 %v3248_v40, %v3247_v55  ;;  %v17268_v40 = vld [vmem:[#allocation30_spill] sm:$0xff] }
 0x32a   :  { %10148 = vmatmul.mubr.f32.gmra.mrb[176].mxu1 %v14102_v16  ;;  %11190 = vmatprep.subr.bf16.mxu0 %v14596_v17  ;;  %v17267_v55 = vld [vmem:[#allocation117_spill] sm:$0xff] }
 0x32b   :  { %10150 = vmatprep.mubr.msk.f32.mxu1 %vm12824_vm1, %v17163_v31  ;;  %11278 = vmatprep.subr.bf16.mxu1 %v17165_v25  ;;  %17265 = vst [vmem:[#allocation147_spill] sm:$0xff] %v14622_v7 }
 0x32c   :  { %3026 = vmatmul.mubr.f32.gmra.mrb[142].mxu0 %v14342_v1  ;;  %11280 = vmatpush3.bf16.msra.mxu1 %v17263_v29 }
 0x32d   :  { %3030 = vmatprep.mubr.f32.mxu0 %v14355_v13  ;;  %11192 = vmatpush3.bf16.msra.mxu0 %v14605_v62 }
 0x32e   :  { %10151 = vmatmul.mubr.f32.gmra.mrb[178].mxu1 %v14114_v0  ;;  %11194 = vmatprep.subr.bf16.mxu0 %v14609_v49  ;;  %v17275_v49 = vld [vmem:[#allocation52_spill] sm:$0xff] }
 0x32f   :  { %10153 = vmatprep.mubr.msk.f32.mxu1 %vm12824_vm1, %v17163_v31  ;;  %11313 = vmatprep.subr.bf16.mxu1 %v17165_v25  ;;  %v2402_v62 = vadd.f32 %v17271_v3, %v17275_v49  ;;  %v17279_v49 = vld [vmem:[#allocation53_spill] sm:$0xff] }
 0x330   :  { %3031 = vmatmul.mubr.f32.gmra.mrb[144].mxu0 %v14366_v23 }
 0x331   :  { %3035 = vmatprep.mubr.f32.mxu0 %v14377_v52  ;;  %11196 = vmatpush3.bf16.msra.mxu0 %v14618_v41 }
 0x332   :  { %10154 = vmatmul.mubr.f32.gmra.mrb[180].mxu1 %v14125_v38  ;;  %11198 = vmatprep.subr.bf16.mxu0 %v14622_v7 }
 0x333   :  { %10156 = vmatprep.mubr.msk.f32.mxu1 %vm12824_vm1, %v17163_v31 }
 0x334   :  { %3036 = vmatmul.mubr.f32.gmra.mrb[146].mxu0 %v17267_v55 }
 0x335   :  { %3040 = vmatprep.mubr.f32.mxu0 %v14398_v14  ;;  %11200 = vmatpush3.bf16.msra.mxu0 %v14630_v22  ;;  %v17272_v22 = vld [vmem:[#allocation81_spill] sm:$0xff] }
 0x336   :  { %10157 = vmatmul.mubr.f32.gmra.mrb[182].mxu1 %v14136_v57  ;;  %11226 = vmatprep.subr.bf16.mxu0 %v17268_v40  ;;  %v2397_v40 = vadd.f32 %v17271_v3, %v17270_v46  ;;  %v14662_v7 = vmax.f32 %v17272_v22, 0.0  ;;  %v17276_v22 = vld [vmem:[#allocation50_spill] sm:$0xff]  ;;  %v14678_v46 = vmax.f32 %v2402_v62, 0.0  ;;  %v17281_v62 = vld [vmem:[#allocation56_spill] sm:$0xff] }
 0x337   :  { %10159 = vmatprep.mubr.msk.f32.mxu1 %vm12824_vm1, %v17163_v31 }
 0x338   :  { %3041 = vmatmul.mubr.f32.gmra.mrb[148].mxu0 %v14408_v39  ;;  %17273 = vst [vmem:[#allocation117_spill] sm:$0xff] %v14662_v7  ;;  %v14668_v41 = vmax.f32 %v2397_v40, 0.0  ;;  %17277 = vst [vmem:[#allocation80_spill] sm:$0xff] %v14678_v46 }
 0x339   :  { %3045 = vmatprep.mubr.f32.mxu0 %v14418_v15 }
 0x33a   :  { %10160 = vmatmul.mubr.f32.gmra.mrb[184].mxu1 %v14147_v43  ;;  %17274 = vst [vmem:[#allocation49_spill] sm:$0xff] %v14668_v41 }
 0x33b   :  { %10162 = vmatprep.mubr.msk.f32.mxu1 %vm12824_vm1, %v17163_v31 }
 0x33c   :  { %3046 = vmatmul.mubr.f32.gmra.mrb[150].mxu0 %v14426_v51 }
 0x33d   :  { %3050 = vmatprep.mubr.f32.mxu0 %v14434_v6 }
 0x33e   :  { %10163 = vmatmul.mubr.f32.gmra.mrb[186].mxu1 %v14158_v48 }
 0x33f   :  { %10165 = vmatprep.mubr.msk.f32.mxu1 %vm12824_vm1, %v17163_v31 }
 0x340   :  { %3051 = vmatmul.mubr.f32.gmra.mrb[152].mxu0 %v14441_v61 }
 0x341   :  { %3055 = vmatprep.mubr.f32.mxu0 %v14448_v42 }
 0x342   :  { %10166 = vmatmul.mubr.f32.gmra.mrb[188].mxu1 %v17269_v56 }
 0x343   :  { %10168 = vmatprep.mubr.msk.f32.mxu1 %vm12824_vm1, %v17163_v31 }
 0x344   :  { %3056 = vmatmul.mubr.f32.gmra.mrb[154].mxu0 %v14455_v10 }
 0x345   :  { %3060 = vmatprep.mubr.f32.mxu0 %v14462_v54 }
 0x346   :  { %10169 = vmatmul.mubr.f32.gmra.mrb[190].mxu1 %v14662_v7  ;;  %v17278_v7 = vld [vmem:[#allocation54_spill] sm:$0xff] }
 0x347   :  { %10203 = vmatprep.mubr.msk.f32.mxu1 %vm12824_vm1, %v17163_v31  ;;  %v2407_v40 = vadd.f32 %v17271_v3, %v17278_v7  ;;  %v17282_v7 = vld [vmem:[#allocation55_spill] sm:$0xff] }
 0x348   :  { %3061 = vmatmul.mubr.f32.gmra.mrb[156].mxu0 %v14469_v26 }
 0x349   :  { %3065 = vmatprep.mubr.f32.mxu0 %v14476_v60  ;;  %v14689_v29 = vmax.f32 %v2407_v40, 0.0  ;;  %v17284_v40 = vld [vmem:[#allocation58_spill] sm:$0xff] }
 0x34a   :  { %10204 = vmatmul.mubr.f32.vlgmr.msra.gmra.mrb[192].mxu1 %v14668_v41 }
 0x34b   :  { %10206 = vmatprep.mubr.msk.f32.mxu1 %vm12824_vm1, %v17163_v31  ;;  %11315 = vmatpush3.bf16.msra.mxu1 %v17276_v22  ;;  %17280 = vst [vmem:[#allocation81_spill] sm:$0xff] %v14689_v29  ;;  %v2412_v22 = vadd.f32 %v17271_v3, %v17281_v62  ;;  %v17285_v62 = vld [vmem:[#allocation31_spill] sm:$0xff] }
 0x34c   :  { %3066 = vmatmul.mubr.f32.gmra.mrb[158].mxu0 %v14483_v45  ;;  %11316 = vmatprep.subr.bf16.mxu1 %v17165_v25 }
 0x34d   :  { %3070 = vmatprep.mubr.f32.mxu0 %v14491_v58  ;;  %v14700_v17 = vmax.f32 %v2412_v22, 0.0  ;;  %v17287_v22 = vld [vmem:[#allocation57_spill] sm:$0xff] }
 0x34e   :  { %10207 = vmatmul.mubr.f32.gmra.mrb[194].mxu1 %v14678_v46 }
 0x34f   :  { %10209 = vmatprep.mubr.msk.f32.mxu1 %vm12824_vm1, %v17163_v31  ;;  %11318 = vmatpush3.bf16.msra.mxu1 %v17279_v49  ;;  %17283 = vst [vmem:[#allocation52_spill] sm:$0xff] %v14700_v17  ;;  %v2417_v49 = vadd.f32 %v17271_v3, %v17284_v40  ;;  %v17289_v40 = vld [vmem:[#allocation60_spill] sm:$0xff] }
 0x350   :  { %3071 = vmatmul.mubr.f32.gmra.mrb[160].mxu0 %v14500_v30  ;;  %11319 = vmatprep.subr.bf16.mxu1 %v17165_v25 }
 0x351   :  { %3329 = vmatprep.mubr.f32.mxu0 %v14259_v28 }
 0x352   :  { %10210 = vmatmul.mubr.f32.gmra.mrb[196].mxu1 %v14689_v29 }
 0x353   :  { %10212 = vmatprep.mubr.msk.f32.mxu1 %vm12824_vm1, %v17163_v31  ;;  %11321 = vmatpush3.bf16.msra.mxu1 %v17282_v7  ;;  %v14713_v7 = vmax.f32 %v2417_v49, 0.0  ;;  %v17292_v49 = vld [vmem:[#allocation59_spill] sm:$0xff] }
 0x354   :  { %3330 = vmatmul.mubr.f32.vlgmr.msra.gmra.mrb[162].mxu0 %v14270_v8  ;;  %11322 = vmatprep.subr.bf16.mxu1 %v17165_v25  ;;  %v2422_v8 = vadd.f32 %v17271_v3, %v17289_v40  ;;  %v17294_v40 = vld [vmem:[#allocation62_spill] sm:$0xff] }
 0x355   :  { %3334 = vmatprep.mubr.f32.mxu0 %v14283_v21  ;;  %11228 = vmatpush3.bf16.msra.mxu0 %v17285_v62  ;;  %17288 = vst [vmem:[#allocation54_spill] sm:$0xff] %v14713_v7  ;;  %v17290_v62 = vld [vmem:[#allocation33_spill] sm:$0xff] }
 0x356   :  { %10213 = vmatmul.mubr.f32.gmra.mrb[198].mxu1 %v14700_v17  ;;  %11230 = vmatprep.subr.bf16.mxu0 %v17286_v35  ;;  %v17291_v35 = vld [vmem:[#allocation34_spill] sm:$0xff] }
 0x357   :  { %10215 = vmatprep.mubr.msk.f32.mxu1 %vm12824_vm1, %v17163_v31  ;;  %11324 = vmatpush3.bf16.msra.mxu1 %v17287_v22  ;;  %v14726_v22 = vmax.f32 %v2422_v8, 0.0  ;;  %v17297_v8 = vld [vmem:[#allocation61_spill] sm:$0xff] }
 0x358   :  { %3335 = vmatmul.mubr.f32.gmra.mrb[164].mxu0 %v14294_v2  ;;  %11325 = vmatprep.subr.bf16.mxu1 %v17165_v25  ;;  %v2427_v2 = vadd.f32 %v17271_v3, %v17294_v40  ;;  %v17299_v40 = vld [vmem:[#allocation64_spill] sm:$0xff] }
 0x359   :  { %3339 = vmatprep.mubr.f32.mxu0 %v14307_v18  ;;  %11232 = vmatpush3.bf16.msra.mxu0 %v17290_v62  ;;  %17293 = vst [vmem:[#allocation56_spill] sm:$0xff] %v14726_v22  ;;  %v17295_v62 = vld [vmem:[#allocation35_spill] sm:$0xff] }
 0x35a   :  { %10216 = vmatmul.mubr.f32.gmra.mrb[200].mxu1 %v14713_v7  ;;  %11234 = vmatprep.subr.bf16.mxu0 %v17291_v35  ;;  %v17296_v35 = vld [vmem:[#allocation36_spill] sm:$0xff] }
 0x35b   :  { %10218 = vmatprep.mubr.msk.f32.mxu1 %vm12824_vm1, %v17163_v31  ;;  %11327 = vmatpush3.bf16.msra.mxu1 %v17292_v49  ;;  %v14739_v49 = vmax.f32 %v2427_v2, 0.0  ;;  %v17302_v2 = vld [vmem:[#allocation63_spill] sm:$0xff] }
 0x35c   :  { %3340 = vmatmul.mubr.f32.gmra.mrb[166].mxu0 %v17259_v53  ;;  %11328 = vmatprep.subr.bf16.mxu1 %v17165_v25  ;;  %v2432_v53 = vadd.f32 %v17271_v3, %v17299_v40  ;;  %v17304_v40 = vld [vmem:[#allocation67_spill] sm:$0xff] }
 0x35d   :  { %3344 = vmatprep.mubr.f32.mxu0 %v14331_v47  ;;  %11236 = vmatpush3.bf16.msra.mxu0 %v17295_v62  ;;  %17298 = vst [vmem:[#allocation58_spill] sm:$0xff] %v14739_v49  ;;  %v17300_v62 = vld [vmem:[#allocation37_spill] sm:$0xff] }
 0x35e   :  { %10219 = vmatmul.mubr.f32.gmra.mrb[202].mxu1 %v14726_v22  ;;  %11238 = vmatprep.subr.bf16.mxu0 %v17296_v35  ;;  %v17301_v35 = vld [vmem:[#allocation38_spill] sm:$0xff] }
 0x35f   :  { %10221 = vmatprep.mubr.msk.f32.mxu1 %vm12824_vm1, %v17163_v31  ;;  %11330 = vmatpush3.bf16.msra.mxu1 %v17297_v8  ;;  %v14752_v8 = vmax.f32 %v2432_v53, 0.0  ;;  %v17307_v53 = vld [vmem:[#allocation65_spill] sm:$0xff] }
 0x360   :  { %3345 = vmatmul.mubr.f32.gmra.mrb[168].mxu0 %v14342_v1  ;;  %11331 = vmatprep.subr.bf16.mxu1 %v17165_v25  ;;  %v2437_v1 = vadd.f32 %v17271_v3, %v17304_v40  ;;  %v17309_v40 = vld [vmem:[#allocation69_spill] sm:$0xff] }
 0x361   :  { %3349 = vmatprep.mubr.f32.mxu0 %v14355_v13  ;;  %11240 = vmatpush3.bf16.msra.mxu0 %v17300_v62  ;;  %17303 = vst [vmem:[#allocation60_spill] sm:$0xff] %v14752_v8  ;;  %v17305_v62 = vld [vmem:[#allocation39_spill] sm:$0xff] }
 0x362   :  { %10222 = vmatmul.mubr.f32.gmra.mrb[204].mxu1 %v14739_v49  ;;  %11242 = vmatprep.subr.bf16.mxu0 %v17301_v35  ;;  %v17306_v35 = vld [vmem:[#allocation40_spill] sm:$0xff] }
 0x363   :  { %10224 = vmatprep.mubr.msk.f32.mxu1 %vm12824_vm1, %v17163_v31  ;;  %11333 = vmatpush3.bf16.msra.mxu1 %v17302_v2  ;;  %v14765_v2 = vmax.f32 %v2437_v1, 0.0 }
 0x364   :  { %3350 = vmatmul.mubr.f32.gmra.mrb[170].mxu0 %v14366_v23  ;;  %11334 = vmatprep.subr.bf16.mxu1 %v17165_v25  ;;  %v2442_v23 = vadd.f32 %v17271_v3, %v17309_v40  ;;  %v17313_v40 = vld [vmem:[#allocation70_spill] sm:$0xff] }
 0x365   :  { %3354 = vmatprep.mubr.f32.mxu0 %v14377_v52  ;;  %11244 = vmatpush3.bf16.msra.mxu0 %v17305_v62  ;;  %17308 = vst [vmem:[#allocation62_spill] sm:$0xff] %v14765_v2  ;;  %v17310_v62 = vld [vmem:[#allocation41_spill] sm:$0xff] }
 0x366   :  { %10225 = vmatmul.mubr.f32.gmra.mrb[206].mxu1 %v14752_v8  ;;  %11246 = vmatprep.subr.bf16.mxu0 %v17306_v35  ;;  %v14779_v1 = vmax.f32 %v2442_v23, 0.0 }
 0x367   :  { %10227 = vmatprep.mubr.msk.f32.mxu1 %vm12824_vm1, %v17163_v31  ;;  %11336 = vmatpush3.bf16.msra.mxu1 %v17307_v53 }
 0x368   :  { %3355 = vmatmul.mubr.f32.gmra.mrb[172].mxu0 %v17267_v55  ;;  %11369 = vmatprep.subr.bf16.mxu1 %v17165_v25  ;;  %17312 = vst [vmem:[#allocation64_spill] sm:$0xff] %v14779_v1  ;;  %v2447_v55 = vadd.f32 %v17271_v3, %v17313_v40  ;;  %v2452_v40 = vadd.f32 %v17271_v3, %v17317_v63 }
 0x369   :  { %v14771_v44 = vpop.f32.mrb[102].mxu1  ;;  %3359 = vmatprep.mubr.f32.mxu0 %v14398_v14  ;;  %11248 = vmatpush3.bf16.msra.mxu0 %v17310_v62  ;;  %v17314_v62 = vld [vmem:[#allocation43_spill] sm:$0xff]  ;;  %v2457_v63 = vadd.f32 %v17271_v3, %v17321_v9 }
 0x36a   :  { %v9974_v35 = vpop.f32.mrb[103].mxu1  ;;  %10228 = vmatmul.mubr.f32.gmra.mrb[208].mxu1 %v14765_v2  ;;  %11250 = vmatprep.subr.bf16.mxu0 %v17311_v37  ;;  %v17315_v37 = vld [vmem:[#allocation44_spill] sm:$0xff]  ;;  %v14792_v23 = vmax.f32 %v2447_v55, 0.0  ;;  %v14805_v55 = vmax.f32 %v2452_v40, 0.0 }
 0x36b   :  { %10230 = vmatprep.mubr.msk.f32.mxu1 %vm12824_vm1, %v17163_v31 }
 0x36c   :  { %3360 = vmatmul.mubr.f32.gmra.mrb[174].mxu0 %v14408_v39  ;;  %17316 = vst [vmem:[#allocation67_spill] sm:$0xff] %v14792_v23  ;;  %17320 = vst [vmem:[#allocation69_spill] sm:$0xff] %v14805_v55 }
 0x36d   :  { %v14784_v53 = vpop.f32.mrb[104].mxu1  ;;  %3364 = vmatprep.mubr.f32.mxu0 %v14418_v15  ;;  %11252 = vmatpush3.bf16.msra.mxu0 %v17314_v62  ;;  %v17318_v62 = vld [vmem:[#allocation45_spill] sm:$0xff] }
 0x36e   :  { %v9977_v35 = vpop.f32.mrb[105].mxu1  ;;  %10231 = vmatmul.mubr.f32.gmra.mrb[210].mxu1 %v14779_v1  ;;  %11254 = vmatprep.subr.bf16.mxu0 %v17315_v37  ;;  %v17319_v37 = vld [vmem:[#allocation46_spill] sm:$0xff] }
 0x36f   :  { %10233 = vmatprep.mubr.msk.f32.mxu1 %vm12824_vm1, %v17163_v31 }
 0x370   :  { %3365 = vmatmul.mubr.f32.gmra.mrb[176].mxu0 %v14426_v51 }
 0x371   :  { %v14797_v39 = vpop.f32.mrb[106].mxu1  ;;  %3369 = vmatprep.mubr.f32.mxu0 %v14434_v6  ;;  %11256 = vmatpush3.bf16.msra.mxu0 %v17318_v62 }
 0x372   :  { %v9980_v35 = vpop.f32.mrb[107].mxu1  ;;  %10234 = vmatmul.mubr.f32.gmra.mrb[212].mxu1 %v14792_v23  ;;  %11282 = vmatprep.subr.bf16.mxu0 %v17319_v37  ;;  %v17323_v37 = vld [vmem:[#allocation75_spill] sm:$0xff] }
 0x373   :  { %10236 = vmatprep.mubr.msk.f32.mxu1 %vm12824_vm1, %v17163_v31  ;;  %v14816_v35 = vmax.f32 %v2457_v63, 0.0  ;;  %v2462_v40 = vadd.f32 %v17271_v3, %v17323_v37  ;;  %v2467_v63 = vadd.f32 %v17271_v3, %v17325_v11 }
 0x374   :  { %3370 = vmatmul.mubr.f32.gmra.mrb[178].mxu0 %v14441_v61 }
 0x375   :  { %v14810_v51 = vpop.f32.mrb[108].mxu1  ;;  %3374 = vmatprep.mubr.f32.mxu0 %v14448_v42  ;;  %17322 = vst [vmem:[#allocation70_spill] sm:$0xff] %v14816_v35 }
 0x376   :  { %v9983_v62 = vpop.f32.mrb[109].mxu1  ;;  %10237 = vmatmul.mubr.f32.gmra.mrb[214].mxu1 %v14805_v55 }
 0x377   :  { %10239 = vmatprep.mubr.msk.f32.mxu1 %vm12824_vm1, %v17163_v31  ;;  %v14827_v62 = vmax.f32 %v2462_v40, 0.0  ;;  %v14842_v40 = vmax.f32 %v2467_v63, 0.0 }
 0x378   :  { %3375 = vmatmul.mubr.f32.gmra.mrb[180].mxu0 %v14455_v10 }
 0x379   :  { %v14821_v9 = vpop.f32.mrb[110].mxu1  ;;  %3379 = vmatprep.mubr.f32.mxu0 %v14462_v54  ;;  %17324 = vst [vmem:[#allocation72_spill] sm:$0xff] %v14827_v62  ;;  %17328 = vst [vmem:[#allocation75_spill] sm:$0xff] %v14842_v40 }
 0x37a   :  { %v9986_v61 = vpop.f32.mrb[111].mxu1  ;;  %10240 = vmatmul.mubr.f32.gmra.mrb[216].mxu1 %v14816_v35 }
 0x37b   :  { %10242 = vmatprep.mubr.msk.f32.mxu1 %vm12824_vm1, %v17163_v31  ;;  %v17326_v61 = vld [vmem:[#allocation48_spill] sm:$0xff] }
 0x37c   :  { %3380 = vmatmul.mubr.f32.gmra.mrb[182].mxu0 %v14469_v26  ;;  %v14840_v32 = vadd.f32 %v17271_v3, %v17326_v61  ;;  %v17329_v61 = vld [vmem:[#allocation83_spill] sm:$0xff] }
 0x37d   :  { %v14832_v37 = vpop.f32.mrb[112].mxu1  ;;  %3384 = vmatprep.mubr.f32.mxu0 %v14476_v60 }
 0x37e   :  { %v9989_v10 = vpop.f32.mrb[113].mxu1  ;;  %10243 = vmatmul.mubr.f32.gmra.mrb[218].mxu1 %v14827_v62  ;;  %17327 = vst [vmem:[#allocation74_spill] sm:$0xff] %v14840_v32 }
 0x37f   :  { %10245 = vmatprep.mubr.msk.f32.mxu1 %vm12824_vm1, %v17163_v31  ;;  %v17011_v10 = vmax.f32 %v14840_v32, 0.0  ;;  %v17331_v32 = vld [vmem:[#allocation88_spill] sm:$0xff] }
 0x380   :  { %3385 = vmatmul.mubr.f32.gmra.mrb[184].mxu0 %v14483_v45  ;;  %v17013_v45 = vmax.f32 %v14527_v27, 0.0  ;;  %v17337_v27 = vld [vmem:[#allocation95_spill] sm:$0xff] }
 0x381   :  { %v14845_v11 = vpop.f32.mrb[114].mxu1  ;;  %3389 = vmatprep.mubr.f32.mxu0 %v14491_v58 }
 0x382   :  { %v9992_v26 = vpop.f32.mrb[115].mxu1  ;;  %10246 = vmatmul.mubr.f32.gmra.mrb[220].mxu1 %v14842_v40  ;;  %v17344_v40 = vld [vmem:[#allocation103_spill] sm:$0xff] }
 0x383   :  { %10280 = vmatprep.mubr.msk.f32.mxu1 %vm12824_vm1, %v17163_v31  ;;  %v17330_v26 = vmax.f32 %v14494_v36, 0.0 }
 0x384   :  { %3390 = vmatmul.mubr.f32.gmra.mrb[186].mxu0 %v14500_v30 }
 0x385   :  { %v14853_v3 = vpop.f32.mrb[116].mxu1  ;;  %3394 = vmatprep.mubr.f32.mxu0 %v14515_v5 }
 0x386   :  { %v9995_v63 = vpop.f32.mrb[117].mxu1  ;;  %10281 = vmatmul.mubr.f32.vlgmr.msra.gmra.mrb[222].mxu1 %v17011_v10  ;;  %v2554_v10 = vmax.f32 %v14521_v50, 0.0 }
 0x387   :  { %10283 = vmatprep.mubr.msk.f32.mxu1 %vm12824_vm1, %v17163_v31  ;;  %11371 = vmatpush3.bf16.msra.mxu1 %v17329_v61 }
 0x388   :  { %3395 = vmatmul.mubr.f32.gmra.mrb[188].mxu0 %v17330_v26  ;;  %11372 = vmatprep.subr.bf16.mxu1 %v17165_v25  ;;  %v17332_v26 = vld [vmem:[#allocation51_spill] sm:$0xff] }
 0x389   :  { %v14865_v30 = vpop.f32.mrb[118].mxu1  ;;  %3399 = vmatprep.mubr.f32.mxu0 %v17013_v45 }
 0x38a   :  { %v9998_v63 = vpop.f32.mrb[119].mxu1  ;;  %10284 = vmatmul.mubr.f32.gmra.mrb[224].mxu1 %v14668_v41  ;;  %v17336_v41 = vld [vmem:[#allocation94_spill] sm:$0xff] }
 0x38b   :  { %10286 = vmatprep.mubr.msk.f32.mxu1 %vm12824_vm1, %v17163_v31  ;;  %11374 = vmatpush3.bf16.msra.mxu1 %v17331_v32  ;;  %v17333_v63 = vld [vmem:[#allocation90_spill] sm:$0xff]  ;;  %v17340_v32 = vld [vmem:[#allocation99_spill] sm:$0xff] }
 0x38c   :  { %3400 = vmatmul.mubr.f32.gmra.mrb[190].mxu0 %v2554_v10  ;;  %11375 = vmatprep.subr.bf16.mxu1 %v17165_v25  ;;  %v17334_v10 = vld [vmem:[#allocation91_spill] sm:$0xff] }
 0x38d   :  { %v14875_v36 = vpop.f32.mrb[120].mxu1  ;;  %3661 = vmatprep.mubr.f32.mxu0 %v17332_v26 }
 0x38e   :  { %v10001_v61 = vpop.f32.mrb[121].mxu1  ;;  %10287 = vmatmul.mubr.f32.gmra.mrb[226].mxu1 %v14678_v46 }
 0x38f   :  { %10289 = vmatprep.mubr.msk.f32.mxu1 %vm12824_vm1, %v17163_v31  ;;  %11377 = vmatpush3.bf16.msra.mxu1 %v17333_v63  ;;  %v17335_v61 = vld [vmem:[#allocation93_spill] sm:$0xff] }
 0x390   :  { %3662 = vmatmul.mubr.f32.vlgmr.msra.gmra.mrb[192].mxu0 %v14238_v33  ;;  %11378 = vmatprep.subr.bf16.mxu1 %v17165_v25 }
 0x391   :  { %v14884_v50 = vpop.f32.mrb[122].mxu1  ;;  %3666 = vmatprep.mubr.f32.mxu0 %v13999_v24  ;;  %11284 = vmatpush3.bf16.msra.mxu0 %v17334_v10  ;;  %v17338_v10 = vld [vmem:[#allocation97_spill] sm:$0xff] }
 0x392   :  { %v10004_v45 = vpop.f32.mrb[123].mxu1  ;;  %10290 = vmatmul.mubr.f32.gmra.mrb[228].mxu1 %v14689_v29  ;;  %11286 = vmatprep.subr.bf16.mxu0 %v17335_v61  ;;  %v17339_v61 = vld [vmem:[#allocation98_spill] sm:$0xff] }
 0x393   :  { %10292 = vmatprep.mubr.msk.f32.mxu1 %vm12824_vm1, %v17163_v31  ;;  %11380 = vmatpush3.bf16.msra.mxu1 %v17336_v41 }
 0x394   :  { %3667 = vmatmul.mubr.f32.gmra.mrb[194].mxu0 %v14259_v28  ;;  %11381 = vmatprep.subr.bf16.mxu1 %v17165_v25 }
 0x395   :  { %v14895_v63 = vpop.f32.mrb[124].mxu1  ;;  %3671 = vmatprep.mubr.f32.mxu0 %v14014_v20  ;;  %11288 = vmatpush3.bf16.msra.mxu0 %v17337_v27  ;;  %v17341_v27 = vld [vmem:[#allocation101_spill] sm:$0xff] }
 0x396   :  { %v10007_v45 = vpop.f32.mrb[125].mxu1  ;;  %10293 = vmatmul.mubr.f32.gmra.mrb[230].mxu1 %v14700_v17  ;;  %11290 = vmatprep.subr.bf16.mxu0 %v17338_v10  ;;  %v17342_v10 = vld [vmem:[#allocation102_spill] sm:$0xff] }
 0x397   :  { %10295 = vmatprep.mubr.msk.f32.mxu1 %vm12824_vm1, %v17163_v31  ;;  %11383 = vmatpush3.bf16.msra.mxu1 %v17339_v61 }
 0x398   :  { %3672 = vmatmul.mubr.f32.gmra.mrb[196].mxu0 %v14283_v21  ;;  %11384 = vmatprep.subr.bf16.mxu1 %v17165_v25 }
 0x399   :  { %v14906_v41 = vpop.f32.mrb[126].mxu1  ;;  %3676 = vmatprep.mubr.f32.mxu0 %v14029_v59  ;;  %11292 = vmatpush3.bf16.msra.mxu0 %v17340_v32  ;;  %v17345_v32 = vld [vmem:[#allocation106_spill] sm:$0xff] }
 0x39a   :  { %v10010_v45 = vpop.f32.mrb[127].mxu1  ;;  %10296 = vmatmul.mubr.f32.gmra.mrb[232].mxu1 %v14713_v7  ;;  %11294 = vmatprep.subr.bf16.mxu0 %v17341_v27  ;;  %v17346_v27 = vld [vmem:[#allocation107_spill] sm:$0xff] }
 0x39b   :  { %10298 = vmatprep.mubr.msk.f32.mxu1 %vm12824_vm1, %v17163_v31  ;;  %11386 = vmatpush3.bf16.msra.mxu1 %v17342_v10 }
 0x39c   :  { %3677 = vmatmul.mubr.f32.gmra.mrb[198].mxu0 %v14307_v18  ;;  %11387 = vmatprep.subr.bf16.mxu1 %v17165_v25 }
 0x39d   :  { %v14917_v61 = vpop.f32.mrb[128].mxu1  ;;  %3681 = vmatprep.mubr.f32.mxu0 %v14044_v4  ;;  %11296 = vmatpush3.bf16.msra.mxu0 %v17344_v40  ;;  %v17349_v40 = vld [vmem:[#allocation110_spill] sm:$0xff] }
 0x39e   :  { %17343 = vst [vmem:[#allocation78_spill] sm:$0xff] %v14917_v61  ;;  %v10013_v45 = vpop.f32.mrb[129].mxu1  ;;  %10299 = vmatmul.mubr.f32.gmra.mrb[234].mxu1 %v14726_v22  ;;  %11298 = vmatprep.subr.bf16.mxu0 %v17345_v32  ;;  %v17348_v61 = vld [vmem:[#allocation108_spill] sm:$0xff]  ;;  %v17350_v32 = vld [vmem:[#allocation111_spill] sm:$0xff] }
 0x39f   :  { %10301 = vmatprep.mubr.msk.f32.mxu1 %vm12824_vm1, %v17163_v31  ;;  %11389 = vmatpush3.bf16.msra.mxu1 %v17346_v27 }
 0x3a0   :  { %3682 = vmatmul.mubr.f32.gmra.mrb[200].mxu0 %v14331_v47  ;;  %11390 = vmatprep.subr.bf16.mxu1 %v17165_v25 }
 0x3a1   :  { %v14928_v10 = vpop.f32.mrb[130].mxu1  ;;  %3686 = vmatprep.mubr.f32.mxu0 %v14059_v12  ;;  %11300 = vmatpush3.bf16.msra.mxu0 %v17348_v61  ;;  %v17353_v61 = vld [vmem:[#allocation114_spill] sm:$0xff] }
 0x3a2   :  { %17347 = vst [vmem:[#allocation48_spill] sm:$0xff] %v14928_v10  ;;  %v10016_v45 = vpop.f32.mrb[131].mxu1  ;;  %10302 = vmatmul.mubr.f32.gmra.mrb[236].mxu1 %v14739_v49  ;;  %11302 = vmatprep.subr.bf16.mxu0 %v17349_v40  ;;  %v17352_v10 = vld [vmem:[#allocation112_spill] sm:$0xff]  ;;  %v17355_v40 = vld [vmem:[#allocation115_spill] sm:$0xff] }
 0x3a3   :  { %10304 = vmatprep.mubr.msk.f32.mxu1 %vm12824_vm1, %v17163_v31  ;;  %11392 = vmatpush3.bf16.msra.mxu1 %v17350_v32 }
 0x3a4   :  { %3687 = vmatmul.mubr.f32.gmra.mrb[202].mxu0 %v14355_v13  ;;  %11425 = vmatprep.subr.bf16.mxu1 %v17165_v25 }
 0x3a5   :  { %v14939_v27 = vpop.f32.mrb[132].mxu1  ;;  %3691 = vmatprep.mubr.f32.mxu0 %v14074_v34  ;;  %11304 = vmatpush3.bf16.msra.mxu0 %v17352_v10  ;;  %v17356_v10 = vld [vmem:[#allocation118_spill] sm:$0xff] }
 0x3a6   :  { %17351 = vst [vmem:[#allocation149_spill] sm:$0xff] %v14939_v27  ;;  %v10051_v45 = vpop.f32.mrb[133].mxu1  ;;  %10305 = vmatmul.mubr.f32.gmra.mrb[238].mxu1 %v14752_v8  ;;  %11306 = vmatprep.subr.bf16.mxu0 %v17353_v61  ;;  %v17358_v61 = vld [vmem:[#allocation120_spill] sm:$0xff] }
 0x3a7   :  { %10307 = vmatprep.mubr.msk.f32.mxu1 %vm12824_vm1, %v17163_v31 }
 0x3a8   :  { %3692 = vmatmul.mubr.f32.gmra.mrb[204].mxu0 %v14377_v52 }
 0x3a9   :  { %v14948_v32 = vpop.f32.mrb[134].mxu1  ;;  %3696 = vmatprep.mubr.f32.mxu0 %v14089_v19  ;;  %11308 = vmatpush3.bf16.msra.mxu0 %v17355_v40  ;;  %v17359_v40 = vld [vmem:[#allocation122_spill] sm:$0xff] }
 0x3aa   :  { %17354 = vst [vmem:[#allocation150_spill] sm:$0xff] %v14948_v32  ;;  %v10054_v27 = vpop.f32.mrb[135].mxu1  ;;  %10308 = vmatmul.mubr.f32.gmra.mrb[240].mxu1 %v14765_v2  ;;  %11310 = vmatprep.subr.bf16.mxu0 %v17356_v10 }
 0x3ab   :  { %10310 = vmatprep.mubr.msk.f32.mxu1 %vm12824_vm1, %v17163_v31 }
 0x3ac   :  { %3697 = vmatmul.mubr.f32.gmra.mrb[206].mxu0 %v14398_v14 }
 0x3ad   :  { %v14957_v45 = vpop.f32.mrb[136].mxu1  ;;  %3701 = vmatprep.mubr.f32.mxu0 %v14102_v16  ;;  %11312 = vmatpush3.bf16.msra.mxu0 %v17358_v61 }
 0x3ae   :  { %17357 = vst [vmem:[#allocation151_spill] sm:$0xff] %v14957_v45  ;;  %v10057_v32 = vpop.f32.mrb[137].mxu1  ;;  %10311 = vmatmul.mubr.f32.gmra.mrb[242].mxu1 %v14779_v1  ;;  %11338 = vmatprep.subr.bf16.mxu0 %v17359_v40 }
 0x3af   :  { %v8548_v27 = vpop.f32.mrb[102].mxu0  ;;  %10313 = vmatprep.mubr.msk.f32.mxu1 %vm12824_vm1, %v17163_v31 }
 0x3b0   :  { %v8549_v10 = vpop.f32.mrb[103].mxu0  ;;  %3702 = vmatmul.mubr.f32.gmra.mrb[208].mxu0 %v14418_v15 }
 0x3b1   :  { %v8550_v19 = vadd.f32 %v8549_v10, %v8548_v27  ;;  %v14966_v14 = vpop.f32.mrb[138].mxu1  ;;  %3706 = vmatprep.mubr.f32.mxu0 %v14114_v0 }
 0x3b2   :  { %17360 = vst [vmem:[#allocation152_spill] sm:$0xff] %v14966_v14  ;;  %v10060_v45 = vpop.f32.mrb[139].mxu1  ;;  %10314 = vmatmul.mubr.f32.gmra.mrb[244].mxu1 %v14792_v23 }
 0x3b3   :  { %v8551_v32 = vpop.f32.mrb[104].mxu0  ;;  %10316 = vmatprep.mubr.msk.f32.mxu1 %vm12824_vm1, %v17163_v31  ;;  %v14973_v40 = vadd.f32 %v8550_v19, %v14771_v44 }
 0x3b4   :  { %v8552_v61 = vpop.f32.mrb[105].mxu0  ;;  %3707 = vmatmul.mubr.f32.gmra.mrb[210].mxu0 %v14434_v6 }
 0x3b5   :  { %v8553_v16 = vadd.f32 %v8552_v61, %v8551_v32  ;;  %v14976_v15 = vpop.f32.mrb[140].mxu1  ;;  %3711 = vmatprep.mubr.f32.mxu0 %v14125_v38 }
 0x3b6   :  { %17361 = vst [vmem:[#allocation153_spill] sm:$0xff] %v14976_v15  ;;  %v10063_v10 = vpop.f32.mrb[141].mxu1  ;;  %10317 = vmatmul.mubr.f32.gmra.mrb[246].mxu1 %v14805_v55 }
 0x3b7   :  { %v8554_v45 = vpop.f32.mrb[106].mxu0  ;;  %10319 = vmatprep.mubr.msk.f32.mxu1 %vm12824_vm1, %v17163_v31  ;;  %v14983_v27 = vadd.f32 %v8553_v16, %v14784_v53 }
 0x3b8   :  { %v8555_v44 = vpop.f32.mrb[107].mxu0  ;;  %3712 = vmatmul.mubr.f32.gmra.mrb[212].mxu0 %v14448_v42 }
 0x3b9   :  { %v8556_v19 = vadd.f32 %v8555_v44, %v8554_v45  ;;  %v14986_v14 = vpop.f32.mrb[142].mxu1  ;;  %3716 = vmatprep.mubr.f32.mxu0 %v14136_v57 }
 0x3ba   :  { %17362 = vst [vmem:[#allocation154_spill] sm:$0xff] %v14986_v14  ;;  %v10066_v61 = vpop.f32.mrb[143].mxu1  ;;  %10320 = vmatmul.mubr.f32.gmra.mrb[248].mxu1 %v14816_v35 }
 0x3bb   :  { %v8557_v32 = vpop.f32.mrb[108].mxu0  ;;  %10322 = vmatprep.mubr.msk.f32.mxu1 %vm12824_vm1, %v17163_v31  ;;  %v14993_v10 = vadd.f32 %v8556_v19, %v14797_v39 }
 0x3bc   :  { %v8558_v16 = vpop.f32.mrb[109].mxu0  ;;  %3717 = vmatmul.mubr.f32.gmra.mrb[214].mxu0 %v14462_v54 }
 0x3bd   :  { %v8559_v53 = vadd.f32 %v8558_v16, %v8557_v32  ;;  %v14996_v15 = vpop.f32.mrb[144].mxu1  ;;  %3721 = vmatprep.mubr.f32.mxu0 %v14147_v43 }
 0x3be   :  { %v10069_v45 = vpop.f32.mrb[145].mxu1  ;;  %10323 = vmatmul.mubr.f32.gmra.mrb[250].mxu1 %v14827_v62 }
 0x3bf   :  { %v8560_v44 = vpop.f32.mrb[110].mxu0  ;;  %10357 = vmatprep.mubr.msk.f32.mxu1 %vm12824_vm1, %v17163_v31  ;;  %v15003_v61 = vadd.f32 %v8559_v53, %v14810_v51  ;;  %v17363_v45 = vld [vmem:[#allocation22_spill] sm:$0xff] }
 0x3c0   :  { %v8561_v39 = vpop.f32.mrb[111].mxu0  ;;  %3722 = vmatmul.mubr.f32.gmra.mrb[216].mxu0 %v14476_v60 }
 0x3c1   :  { %v8562_v19 = vadd.f32 %v8561_v39, %v8560_v44  ;;  %v15006_v14 = vpop.f32.mrb[146].mxu1  ;;  %3726 = vmatprep.mubr.f32.mxu0 %v14158_v48 }
 0x3c2   :  { %v10072_v32 = vpop.f32.mrb[147].mxu1  ;;  %10358 = vmatmul.mubr.f32.vlgmr.msra.gmra.mrb[252].mxu1 %v14678_v46 }
 0x3c3   :  { %v8563_v16 = vpop.f32.mrb[112].mxu0  ;;  %10360 = vmatprep.mubr.msk.f32.mxu1 %vm12824_vm1, %v17163_v31  ;;  %11427 = vmatpush3.bf16.msra.mxu1 %v17363_v45  ;;  %v15014_v51 = vadd.f32 %v8562_v19, %v14821_v9  ;;  %v17365_v45 = vld [vmem:[#allocation23_spill] sm:$0xff] }
 0x3c4   :  { %v8564_v53 = vpop.f32.mrb[113].mxu0  ;;  %3727 = vmatmul.mubr.f32.gmra.mrb[218].mxu0 %v14491_v58  ;;  %11428 = vmatprep.subr.bf16.mxu1 %v17165_v25 }
 0x3c5   :  { %v8565_v44 = vadd.f32 %v8564_v53, %v8563_v16  ;;  %v15018_v39 = vpop.f32.mrb[148].mxu1  ;;  %3731 = vmatprep.mubr.f32.mxu0 %v17269_v56 }
 0x3c6   :  { %17364 = vst [vmem:[#allocation22_spill] sm:$0xff] %v15018_v39  ;;  %v10075_v32 = vpop.f32.mrb[149].mxu1  ;;  %10361 = vmatmul.mubr.f32.gmra.mrb[254].mxu1 %v14689_v29 }
 0x3c7   :  { %v8566_v46 = vpop.f32.mrb[114].mxu0  ;;  %10363 = vmatprep.mubr.msk.f32.mxu1 %vm12824_vm1, %v17163_v31  ;;  %11430 = vmatpush3.bf16.msra.mxu1 %v17365_v45  ;;  %v15026_v9 = vadd.f32 %v8565_v44, %v14832_v37  ;;  %v17366_v32 = vld [vmem:[#allocation84_spill] sm:$0xff] }
 0x3c8   :  { %v8567_v19 = vpop.f32.mrb[115].mxu0  ;;  %3732 = vmatmul.mubr.f32.gmra.mrb[220].mxu0 %v14515_v5  ;;  %11431 = vmatprep.subr.bf16.mxu1 %v17165_v25  ;;  %v17367_v45 = vld [vmem:[#allocation24_spill] sm:$0xff]  ;;  %v17368_v5 = vld [vmem:[#allocation130_spill] sm:$0xff] }
 0x3c9   :  { %v8568_v16 = vadd.f32 %v8567_v19, %v8566_v46  ;;  %v15030_v53 = vpop.f32.mrb[150].mxu1  ;;  %3941 = vmatprep.mubr.f32.mxu0 %v17366_v32  ;;  %v17369_v39 = vmax.f32 %v17368_v5, 0.0  ;;  %v17372_v5 = vld [vmem:[#allocation25_spill] sm:$0xff] }
 0x3ca   :  { %v10078_v29 = vpop.f32.mrb[151].mxu1  ;;  %10364 = vmatmul.mubr.f32.gmra.mrb[34].mxu1 %v14700_v17  ;;  %v17393_v17 = vld [vmem:[#allocation66_spill] sm:$0xff] }
 0x3cb   :  { %v8569_v56 = vpop.f32.mrb[116].mxu0  ;;  %10366 = vmatprep.mubr.msk.f32.mxu1 %vm12824_vm1, %v17163_v31  ;;  %11433 = vmatpush3.bf16.msra.mxu1 %v17367_v45  ;;  %v15038_v37 = vadd.f32 %v8568_v16, %v14845_v11  ;;  %v17370_v29 = vld [vmem:[#allocation135_spill] sm:$0xff]  ;;  %v17371_v45 = vld [vmem:[#allocation136_spill] sm:$0xff] }
 0x3cc   :  { %v8570_v44 = vpop.f32.mrb[117].mxu0  ;;  %3942 = vmatmul.mubr.f32.vlgmr.msra.gmra.mrb[222].mxu0 %v17369_v39  ;;  %11434 = vmatprep.subr.bf16.mxu1 %v17165_v25 }
 0x3cd   :  { %v15043_v46 = vpop.f32.mrb[152].mxu1  ;;  %3946 = vmatprep.mubr.f32.mxu0 %v17332_v26  ;;  %11340 = vmatpush3.bf16.msra.mxu0 %v17370_v29  ;;  %v8571_v19 = vadd.f32 %v8570_v44, %v8569_v56  ;;  %v17374_v29 = vld [vmem:[#allocation138_spill] sm:$0xff]  ;;  %v17397_v26 = vld [vmem:[#allocation119_spill] sm:$0xff] }
 0x3ce   :  { %v10081_v32 = vpop.f32.mrb[153].mxu1  ;;  %10367 = vmatmul.mubr.f32.gmra.mrb[36].mxu1 %v14713_v7  ;;  %11342 = vmatprep.subr.bf16.mxu0 %v17371_v45 }
 0x3cf   :  { %v8572_v11 = vpop.f32.mrb[118].mxu0  ;;  %10369 = vmatprep.mubr.msk.f32.mxu1 %vm12824_vm1, %v17163_v31  ;;  %11436 = vmatpush3.bf16.msra.mxu1 %v17372_v5  ;;  %v15053_v39 = vadd.f32 %v8571_v19, %v14853_v3  ;;  %v17373_v32 = vld [vmem:[#allocation137_spill] sm:$0xff]  ;;  %v17375_v3 = vld [vmem:[#allocation26_spill] sm:$0xff] }
 0x3d0   :  { %v8573_v16 = vpop.f32.mrb[119].mxu0  ;;  %3947 = vmatmul.mubr.f32.gmra.mrb[224].mxu0 %v14238_v33  ;;  %11437 = vmatprep.subr.bf16.mxu1 %v17165_v25 }
 0x3d1   :  { %v15057_v56 = vpop.f32.mrb[154].mxu1  ;;  %3951 = vmatprep.mubr.f32.mxu0 %v13999_v24  ;;  %11344 = vmatpush3.bf16.msra.mxu0 %v17373_v32  ;;  %v8574_v44 = vadd.f32 %v8573_v16, %v8572_v11  ;;  %v17377_v32 = vld [vmem:[#allocation140_spill] sm:$0xff] }
 0x3d2   :  { %v10084_v45 = vpop.f32.mrb[155].mxu1  ;;  %10370 = vmatmul.mubr.f32.gmra.mrb[38].mxu1 %v14726_v22  ;;  %11346 = vmatprep.subr.bf16.mxu0 %v17374_v29 }
 0x3d3   :  { %v8575_v5 = vpop.f32.mrb[120].mxu0  ;;  %10372 = vmatprep.mubr.msk.f32.mxu1 %vm12824_vm1, %v17163_v31  ;;  %11439 = vmatpush3.bf16.msra.mxu1 %v17375_v3  ;;  %v15067_v33 = vadd.f32 %v8574_v44, %v14865_v30  ;;  %v17376_v45 = vld [vmem:[#allocation139_spill] sm:$0xff] }
 0x3d4   :  { %v8576_v19 = vpop.f32.mrb[121].mxu0  ;;  %3952 = vmatmul.mubr.f32.gmra.mrb[226].mxu0 %v14259_v28  ;;  %11440 = vmatprep.subr.bf16.mxu1 %v17165_v25  ;;  %v17378_v30 = vld [vmem:[#allocation27_spill] sm:$0xff] }
 0x3d5   :  { %v15071_v11 = vpop.f32.mrb[156].mxu1  ;;  %3956 = vmatprep.mubr.f32.mxu0 %v14014_v20  ;;  %11348 = vmatpush3.bf16.msra.mxu0 %v17376_v45  ;;  %v8577_v16 = vadd.f32 %v8576_v19, %v8575_v5  ;;  %v17380_v45 = vld [vmem:[#allocation142_spill] sm:$0xff] }
 0x3d6   :  { %v10087_v29 = vpop.f32.mrb[157].mxu1  ;;  %10373 = vmatmul.mubr.f32.gmra.mrb[40].mxu1 %v14739_v49  ;;  %11350 = vmatprep.subr.bf16.mxu0 %v17377_v32 }
 0x3d7   :  { %v8578_v3 = vpop.f32.mrb[122].mxu0  ;;  %10375 = vmatprep.mubr.msk.f32.mxu1 %vm12824_vm1, %v17163_v31  ;;  %11442 = vmatpush3.bf16.msra.mxu1 %v17378_v30  ;;  %v15081_v44 = vadd.f32 %v8577_v16, %v14875_v36  ;;  %v17379_v29 = vld [vmem:[#allocation141_spill] sm:$0xff]  ;;  %v17381_v36 = vld [vmem:[#allocation28_spill] sm:$0xff] }
 0x3d8   :  { %v8579_v22 = vpop.f32.mrb[123].mxu0  ;;  %3957 = vmatmul.mubr.f32.gmra.mrb[228].mxu0 %v14283_v21  ;;  %11443 = vmatprep.subr.bf16.mxu1 %v17165_v25 }
 0x3d9   :  { %v15085_v5 = vpop.f32.mrb[158].mxu1  ;;  %3961 = vmatprep.mubr.f32.mxu0 %v14029_v59  ;;  %11352 = vmatpush3.bf16.msra.mxu0 %v17379_v29  ;;  %v8580_v19 = vadd.f32 %v8579_v22, %v8578_v3  ;;  %v17383_v29 = vld [vmem:[#allocation144_spill] sm:$0xff] }
 0x3da   :  { %v10090_v32 = vpop.f32.mrb[159].mxu1  ;;  %10376 = vmatmul.mubr.f32.gmra.mrb[42].mxu1 %v14752_v8  ;;  %11354 = vmatprep.subr.bf16.mxu0 %v17380_v45 }
 0x3db   :  { %v8581_v30 = vpop.f32.mrb[124].mxu0  ;;  %10378 = vmatprep.mubr.msk.f32.mxu1 %vm12824_vm1, %v17163_v31  ;;  %11445 = vmatpush3.bf16.msra.mxu1 %v17381_v36  ;;  %v15095_v16 = vadd.f32 %v8580_v19, %v14884_v50  ;;  %v17382_v32 = vld [vmem:[#allocation143_spill] sm:$0xff]  ;;  %v17384_v50 = vld [vmem:[#allocation29_spill] sm:$0xff] }
 0x3dc   :  { %v8582_v49 = vpop.f32.mrb[125].mxu0  ;;  %3962 = vmatmul.mubr.f32.gmra.mrb[230].mxu0 %v14307_v18  ;;  %11446 = vmatprep.subr.bf16.mxu1 %v17165_v25 }
 0x3dd   :  { %v15099_v22 = vpop.f32.mrb[160].mxu1  ;;  %3966 = vmatprep.mubr.f32.mxu0 %v14044_v4  ;;  %11356 = vmatpush3.bf16.msra.mxu0 %v17382_v32  ;;  %v8583_v3 = vadd.f32 %v8582_v49, %v8581_v30  ;;  %v17387_v32 = vld [vmem:[#allocation145_spill] sm:$0xff] }
 0x3de   :  { %v10093_v45 = vpop.f32.mrb[161].mxu1  ;;  %10379 = vmatmul.mubr.f32.gmra.mrb[44].mxu1 %v14765_v2  ;;  %11358 = vmatprep.subr.bf16.mxu0 %v17383_v29 }
 0x3df   :  { %v8584_v36 = vpop.f32.mrb[126].mxu0  ;;  %10381 = vmatprep.mubr.msk.f32.mxu1 %vm12824_vm1, %v17163_v31  ;;  %11448 = vmatpush3.bf16.msra.mxu1 %v17384_v50  ;;  %v15109_v19 = vadd.f32 %v8583_v3, %v14895_v63  ;;  %v17386_v45 = vld [vmem:[#allocation105_spill] sm:$0xff] }
 0x3e0   :  { %v8585_v8 = vpop.f32.mrb[127].mxu0  ;;  %3967 = vmatmul.mubr.f32.gmra.mrb[232].mxu0 %v14331_v47  ;;  %11481 = vmatprep.subr.bf16.mxu1 %v17165_v25 }
 0x3e1   :  { %v15113_v49 = vpop.f32.mrb[162].mxu1  ;;  %3971 = vmatprep.mubr.f32.mxu0 %v14059_v12  ;;  %11360 = vmatpush3.bf16.msra.mxu0 %v17386_v45  ;;  %v8586_v30 = vadd.f32 %v8585_v8, %v8584_v36  ;;  %v17389_v8 = vld [vmem:[#allocation146_spill] sm:$0xff] }
 0x3e2   :  { %17385 = vst [vmem:[#allocation23_spill] sm:$0xff] %v15113_v49  ;;  %v10128_v29 = vpop.f32.mrb[163].mxu1  ;;  %10382 = vmatmul.mubr.f32.gmra.mrb[46].mxu1 %v14779_v1  ;;  %11362 = vmatprep.subr.bf16.mxu0 %v17387_v32  ;;  %v17390_v32 = vld [vmem:[#allocation147_spill] sm:$0xff] }
 0x3e3   :  { %v8587_v50 = vpop.f32.mrb[128].mxu0  ;;  %10384 = vmatprep.mubr.msk.f32.mxu1 %vm12824_vm1, %v17163_v31  ;;  %v15122_v63 = vadd.f32 %v8586_v30, %v14906_v41  ;;  %v17391_v41 = vld [vmem:[#allocation78_spill] sm:$0xff]  ;;  %v17410_v49 = vld [vmem:[#allocation131_spill] sm:$0xff] }
 0x3e4   :  { %v8588_v3 = vpop.f32.mrb[129].mxu0  ;;  %3972 = vmatmul.mubr.f32.gmra.mrb[234].mxu0 %v14355_v13 }
 0x3e5   :  { %v15125_v2 = vpop.f32.mrb[164].mxu1  ;;  %3976 = vmatprep.mubr.f32.mxu0 %v14074_v34  ;;  %11364 = vmatpush3.bf16.msra.mxu0 %v17389_v8  ;;  %v8589_v29 = vadd.f32 %v8588_v3, %v8587_v50  ;;  %v17394_v50 = vld [vmem:[#allocation148_spill] sm:$0xff] }
 0x3e6   :  { %17388 = vst [vmem:[#allocation24_spill] sm:$0xff] %v15125_v2  ;;  %v10131_v36 = vpop.f32.mrb[165].mxu1  ;;  %10385 = vmatmul.mubr.f32.gmra.mrb[48].mxu1 %v14792_v23  ;;  %11366 = vmatprep.subr.bf16.mxu0 %v17390_v32  ;;  %v17395_v32 = vld [vmem:[#allocation30_spill] sm:$0xff] }
 0x3e7   :  { %v8590_v45 = vpop.f32.mrb[130].mxu0  ;;  %10387 = vmatprep.mubr.msk.f32.mxu1 %vm12824_vm1, %v17163_v31  ;;  %v15134_v30 = vadd.f32 %v8589_v29, %v17391_v41  ;;  %v17396_v29 = vld [vmem:[#allocation48_spill] sm:$0xff] }
 0x3e8   :  { %v8591_v1 = vpop.f32.mrb[131].mxu0  ;;  %3977 = vmatmul.mubr.f32.gmra.mrb[236].mxu0 %v14377_v52 }
 0x3e9   :  { %v15137_v7 = vpop.f32.mrb[166].mxu1  ;;  %3981 = vmatprep.mubr.f32.mxu0 %v17393_v17  ;;  %11368 = vmatpush3.bf16.msra.mxu0 %v17394_v50  ;;  %v8592_v3 = vadd.f32 %v8591_v1, %v8590_v45  ;;  %v17399_v50 = vld [vmem:[#allocation68_spill] sm:$0xff] }
 0x3ea   :  { %17392 = vst [vmem:[#allocation130_spill] sm:$0xff] %v15137_v7  ;;  %v10134_v36 = vpop.f32.mrb[167].mxu1  ;;  %10388 = vmatmul.mubr.f32.gmra.mrb[50].mxu1 %v14805_v55  ;;  %11394 = vmatprep.subr.bf16.mxu0 %v17395_v32 }
 0x3eb   :  { %v8656_v8 = vpop.f32.mrb[132].mxu0  ;;  %10390 = vmatprep.mubr.msk.f32.mxu1 %vm12824_vm1, %v17163_v31  ;;  %v15146_v41 = vadd.f32 %v8592_v3, %v17396_v29  ;;  %v17400_v3 = vld [vmem:[#allocation123_spill] sm:$0xff]  ;;  %v17401_v29 = vld [vmem:[#allocation149_spill] sm:$0xff] }
 0x3ec   :  { %v8657_v23 = vpop.f32.mrb[133].mxu0  ;;  %3982 = vmatmul.mubr.f32.gmra.mrb[238].mxu0 %v17397_v26 }
 0x3ed   :  { %v8658_v7 = vadd.f32 %v8657_v23, %v8656_v8  ;;  %v15149_v2 = vpop.f32.mrb[168].mxu1  ;;  %3986 = vmatprep.mubr.f32.mxu0 %v17399_v50 }
 0x3ee   :  { %17398 = vst [vmem:[#allocation25_spill] sm:$0xff] %v15149_v2  ;;  %v10137_v1 = vpop.f32.mrb[169].mxu1  ;;  %10391 = vmatmul.mubr.f32.gmra.mrb[52].mxu1 %v14816_v35  ;;  %v17404_v2 = vld [vmem:[#allocation150_spill] sm:$0xff] }
 0x3ef   :  { %v3003_v32 = vadd.f32 %v8658_v7, %v14973_v40  ;;  %v8659_v45 = vpop.f32.mrb[134].mxu0  ;;  %10393 = vmatprep.mubr.msk.f32.mxu1 %vm12824_vm1, %v17163_v31 }
 0x3f0   :  { %v8660_v36 = vpop.f32.mrb[135].mxu0  ;;  %3987 = vmatmul.mubr.f32.gmra.mrb[240].mxu0 %v17400_v3 }
 0x3f1   :  { %v15158_v55 = vadd.f32 %v17401_v29, %v3003_v32  ;;  %v8661_v23 = vadd.f32 %v8660_v36, %v8659_v45  ;;  %v15160_v8 = vpop.f32.mrb[170].mxu1  ;;  %3991 = vmatprep.mubr.f32.mxu0 %v14114_v0 }
 0x3f2   :  { %17403 = vst [vmem:[#allocation27_spill] sm:$0xff] %v15160_v8  ;;  %v10140_v1 = vpop.f32.mrb[171].mxu1  ;;  %10394 = vmatmul.mubr.f32.gmra.mrb[54].mxu1 %v14827_v62  ;;  %v17408_v62 = vld [vmem:[#allocation82_spill] sm:$0xff] }
 0x3f3   :  { %17402 = vst [vmem:[#allocation26_spill] sm:$0xff] %v15158_v55  ;;  %v3008_v7 = vadd.f32 %v8661_v23, %v14983_v27  ;;  %v8662_v40 = vpop.f32.mrb[136].mxu0  ;;  %10396 = vmatprep.mubr.msk.f32.mxu1 %vm12824_vm1, %v17163_v31  ;;  %v17407_v1 = vld [vmem:[#allocation75_spill] sm:$0xff]  ;;  %v17057_v8 = vmax.f32 %v17408_v62, 0.0  ;;  %v17409_v55 = vld [vmem:[#allocation89_spill] sm:$0xff] }
 0x3f4   :  { %v8663_v35 = vpop.f32.mrb[137].mxu0  ;;  %3992 = vmatmul.mubr.f32.gmra.mrb[242].mxu0 %v14434_v6 }
 0x3f5   :  { %v15169_v32 = vadd.f32 %v17404_v2, %v3008_v7  ;;  %v8664_v45 = vadd.f32 %v8663_v35, %v8662_v40  ;;  %v15171_v36 = vpop.f32.mrb[172].mxu1  ;;  %3996 = vmatprep.mubr.f32.mxu0 %v14125_v38  ;;  %v15181_v2 = vadd.f32 %v17410_v49, %v17409_v55  ;;  %v17411_v7 = vld [vmem:[#allocation151_spill] sm:$0xff] }
 0x3f6   :  { %17406 = vst [vmem:[#allocation29_spill] sm:$0xff] %v15171_v36  ;;  %v10143_v29 = vpop.f32.mrb[173].mxu1  ;;  %10397 = vmatmul.mubr.f32.gmra.mrb[56].mxu1 %v17407_v1 }
 0x3f7   :  { %17405 = vst [vmem:[#allocation28_spill] sm:$0xff] %v15169_v32  ;;  %v3013_v27 = vadd.f32 %v8664_v45, %v14993_v10  ;;  %v8665_v23 = vpop.f32.mrb[138].mxu0  ;;  %10399 = vmatprep.mubr.msk.f32.mxu1 %vm12824_vm1, %v17163_v31  ;;  %v17058_v55 = vmax.f32 %v15181_v2, 0.0  ;;  %v17413_v32 = vld [vmem:[#allocation92_spill] sm:$0xff] }
 0x3f8   :  { %v8666_v35 = vpop.f32.mrb[139].mxu0  ;;  %3997 = vmatmul.mubr.f32.gmra.mrb[244].mxu0 %v14448_v42 }
 0x3f9   :  { %v15185_v40 = vadd.f32 %v17411_v7, %v3013_v27  ;;  %v8667_v29 = vadd.f32 %v8666_v35, %v8665_v23  ;;  %v15187_v1 = vpop.f32.mrb[174].mxu1  ;;  %4001 = vmatprep.mubr.f32.mxu0 %v14136_v57  ;;  %v2403_v27 = vadd.f32 %v17410_v49, %v17413_v32  ;;  %v17414_v35 = vld [vmem:[#allocation152_spill] sm:$0xff]  ;;  %v17416_v32 = vld [vmem:[#allocation50_spill] sm:$0xff] }
 0x3fa   :  { %17412 = vst [vmem:[#allocation78_spill] sm:$0xff] %v15187_v1  ;;  %v10146_v10 = vpop.f32.mrb[175].mxu1  ;;  %10400 = vmatmul.mubr.f32.gmra.mrb[58].mxu1 %v17057_v8 }
 0x3fb   :  { %v3018_v45 = vadd.f32 %v8667_v29, %v15003_v61  ;;  %v8668_v36 = vpop.f32.mrb[140].mxu0  ;;  %10434 = vmatprep.mubr.msk.f32.mxu1 %vm12824_vm1, %v17163_v31  ;;  %v15211_v1 = vmax.f32 %v2403_v27, 0.0 }
 0x3fc   :  { %v8669_v23 = vpop.f32.mrb[141].mxu0  ;;  %4002 = vmatmul.mubr.f32.gmra.mrb[246].mxu0 %v14462_v54 }
 0x3fd   :  { %v15200_v7 = vadd.f32 %v17414_v35, %v3018_v45  ;;  %v8670_v10 = vadd.f32 %v8669_v23, %v8668_v36  ;;  %v15202_v62 = vpop.f32.mrb[176].mxu1  ;;  %4006 = vmatprep.mubr.f32.mxu0 %v14147_v43  ;;  %17417 = vst [vmem:[#allocation30_spill] sm:$0xff] %v15211_v1  ;;  %v17418_v45 = vld [vmem:[#allocation96_spill] sm:$0xff]  ;;  %v17419_v35 = vld [vmem:[#allocation153_spill] sm:$0xff] }
 0x3fe   :  { %17415 = vst [vmem:[#allocation66_spill] sm:$0xff] %v15202_v62  ;;  %v10149_v61 = vpop.f32.mrb[177].mxu1  ;;  %10435 = vmatmul.mubr.f32.vlgmr.msra.gmra.mrb[60].mxu1 %v17058_v55  ;;  %v2408_v36 = vadd.f32 %v17410_v49, %v17418_v45  ;;  %v17421_v45 = vld [vmem:[#allocation53_spill] sm:$0xff] }
 0x3ff   :  { %v3023_v29 = vadd.f32 %v8670_v10, %v15014_v51  ;;  %v8671_v8 = vpop.f32.mrb[142].mxu0  ;;  %10437 = vmatprep.mubr.msk.f32.mxu1 %vm12824_vm1, %v17163_v31  ;;  %11483 = vmatpush3.bf16.msra.mxu1 %v17416_v32 }
 0x400   :  { %v8672_v23 = vpop.f32.mrb[143].mxu0  ;;  %4007 = vmatmul.mubr.f32.gmra.mrb[248].mxu0 %v14476_v60  ;;  %11484 = vmatprep.subr.bf16.mxu1 %v17165_v25  ;;  %v15228_v62 = vmax.f32 %v2408_v36, 0.0 }
 0x401   :  { %v15218_v61 = vadd.f32 %v17419_v35, %v3023_v29  ;;  %v8673_v51 = vadd.f32 %v8672_v23, %v8671_v8  ;;  %v15220_v10 = vpop.f32.mrb[178].mxu1  ;;  %4011 = vmatprep.mubr.f32.mxu0 %v14158_v48  ;;  %v17422_v29 = vld [vmem:[#allocation100_spill] sm:$0xff] }
 0x402   :  { %17420 = vst [vmem:[#allocation48_spill] sm:$0xff] %v15220_v10  ;;  %v10152_v55 = vpop.f32.mrb[179].mxu1  ;;  %10438 = vmatmul.mubr.f32.gmra.mrb[62].mxu1 %v15211_v1  ;;  %v2413_v8 = vadd.f32 %v17410_v49, %v17422_v29  ;;  %v17424_v29 = vld [vmem:[#allocation55_spill] sm:$0xff] }
 0x403   :  { %v3028_v27 = vadd.f32 %v8673_v51, %v15026_v9  ;;  %v8674_v32 = vpop.f32.mrb[144].mxu0  ;;  %10440 = vmatprep.mubr.msk.f32.mxu1 %vm12824_vm1, %v17163_v31  ;;  %11486 = vmatpush3.bf16.msra.mxu1 %v17421_v45  ;;  %v17423_v55 = vld [vmem:[#allocation154_spill] sm:$0xff] }
 0x404   :  { %v8675_v23 = vpop.f32.mrb[145].mxu0  ;;  %4012 = vmatmul.mubr.f32.gmra.mrb[250].mxu0 %v14491_v58  ;;  %11487 = vmatprep.subr.bf16.mxu1 %v17165_v25  ;;  %v15245_v1 = vmax.f32 %v2413_v8, 0.0 }
 0x405   :  { %v15235_v35 = vadd.f32 %v17423_v55, %v3028_v27  ;;  %v8676_v9 = vadd.f32 %v8675_v23, %v8674_v32  ;;  %v15237_v51 = vpop.f32.mrb[180].mxu1  ;;  %4221 = vmatprep.mubr.f32.mxu0 %v13999_v24  ;;  %v17425_v27 = vld [vmem:[#allocation104_spill] sm:$0xff] }
 0x406   :  { %v10155_v10 = vpop.f32.mrb[181].mxu1  ;;  %10441 = vmatmul.mubr.f32.gmra.mrb[64].mxu1 %v15228_v62  ;;  %v2418_v32 = vadd.f32 %v17410_v49, %v17425_v27 }
 0x407   :  { %v3033_v36 = vadd.f32 %v8676_v9, %v15038_v37  ;;  %v8677_v45 = vpop.f32.mrb[146].mxu0  ;;  %10443 = vmatprep.mubr.msk.f32.mxu1 %vm12824_vm1, %v17163_v31  ;;  %11489 = vmatpush3.bf16.msra.mxu1 %v17424_v29  ;;  %v17427_v9 = vld [vmem:[#allocation31_spill] sm:$0xff]  ;;  %v17428_v29 = vld [vmem:[#allocation32_spill] sm:$0xff] }
 0x408   :  { %v8678_v23 = vpop.f32.mrb[147].mxu0  ;;  %4222 = vmatmul.mubr.f32.vlgmr.msra.gmra.mrb[252].mxu0 %v14259_v28  ;;  %11490 = vmatprep.subr.bf16.mxu1 %v17165_v25 }
 0x409   :  { %v15252_v10 = vadd.f32 %v14996_v15, %v3033_v36  ;;  %v8679_v37 = vadd.f32 %v8678_v23, %v8677_v45  ;;  %v15254_v55 = vpop.f32.mrb[182].mxu1  ;;  %4226 = vmatprep.mubr.f32.mxu0 %v14014_v20  ;;  %11396 = vmatpush3.bf16.msra.mxu0 %v17427_v9  ;;  %v17429_v15 = vld [vmem:[#allocation57_spill] sm:$0xff]  ;;  %v15264_v36 = vmax.f32 %v2418_v32, 0.0 }
 0x40a   :  { %17426 = vst [vmem:[#allocation119_spill] sm:$0xff] %v15254_v55  ;;  %v10158_v8 = vpop.f32.mrb[183].mxu1  ;;  %10444 = vmatmul.mubr.f32.gmra.mrb[66].mxu1 %v15245_v1  ;;  %11398 = vmatprep.subr.bf16.mxu0 %v17428_v29  ;;  %v17430_v45 = vld [vmem:[#allocation109_spill] sm:$0xff]  ;;  %v17432_v29 = vld [vmem:[#allocation34_spill] sm:$0xff] }
 0x40b   :  { %v3038_v27 = vadd.f32 %v8679_v37, %v15053_v39  ;;  %v8680_v28 = vpop.f32.mrb[148].mxu0  ;;  %10446 = vmatprep.mubr.msk.f32.mxu1 %vm12824_vm1, %v17163_v31  ;;  %11492 = vmatpush3.bf16.msra.mxu1 %v17429_v15  ;;  %v2423_v23 = vadd.f32 %v17410_v49, %v17430_v45  ;;  %v17431_v8 = vld [vmem:[#allocation33_spill] sm:$0xff] }
 0x40c   :  { %v8681_v55 = vpop.f32.mrb[149].mxu0  ;;  %4227 = vmatmul.mubr.f32.gmra.mrb[254].mxu0 %v14283_v21  ;;  %11493 = vmatprep.subr.bf16.mxu1 %v17165_v25 }
 0x40d   :  { %v15271_v9 = vadd.f32 %v15006_v14, %v3038_v27  ;;  %v8682_v39 = vadd.f32 %v8681_v55, %v8680_v28  ;;  %v15273_v37 = vpop.f32.mrb[184].mxu1  ;;  %4231 = vmatprep.mubr.f32.mxu0 %v14029_v59  ;;  %11400 = vmatpush3.bf16.msra.mxu0 %v17431_v8  ;;  %v17433_v14 = vld [vmem:[#allocation59_spill] sm:$0xff]  ;;  %v15283_v55 = vmax.f32 %v2423_v23, 0.0  ;;  %v17434_v27 = vld [vmem:[#allocation113_spill] sm:$0xff]  ;;  %v17435_v8 = vld [vmem:[#allocation22_spill] sm:$0xff] }
 0x40e   :  { %v10161_v32 = vpop.f32.mrb[185].mxu1  ;;  %10447 = vmatmul.mubr.f32.gmra.mrb[0].mxu1 %v15264_v36  ;;  %11402 = vmatprep.subr.bf16.mxu0 %v17432_v29  ;;  %v2428_v28 = vadd.f32 %v17410_v49, %v17434_v27  ;;  %v17437_v29 = vld [vmem:[#allocation35_spill] sm:$0xff] }
 0x40f   :  { %v3043_v15 = vadd.f32 %v8682_v39, %v15067_v33  ;;  %v8683_v21 = vpop.f32.mrb[150].mxu0  ;;  %10449 = vmatprep.mubr.msk.f32.mxu1 %vm12824_vm1, %v17163_v31  ;;  %11495 = vmatpush3.bf16.msra.mxu1 %v17433_v14  ;;  %v17438_v14 = vld [vmem:[#allocation36_spill] sm:$0xff] }
 0x410   :  { %v8684_v45 = vpop.f32.mrb[151].mxu0  ;;  %4232 = vmatmul.mubr.f32.gmra.mrb[34].mxu0 %v14307_v18  ;;  %11496 = vmatprep.subr.bf16.mxu1 %v17165_v25 }
 0x411   :  { %v15290_v32 = vadd.f32 %v17435_v8, %v3043_v15  ;;  %v8685_v33 = vadd.f32 %v8684_v45, %v8683_v21  ;;  %v15292_v39 = vpop.f32.mrb[186].mxu1  ;;  %4236 = vmatprep.mubr.f32.mxu0 %v14044_v4  ;;  %11404 = vmatpush3.bf16.msra.mxu0 %v17437_v29  ;;  %v17439_v15 = vld [vmem:[#allocation61_spill] sm:$0xff]  ;;  %v15302_v21 = vmax.f32 %v2428_v28, 0.0  ;;  %v17440_v45 = vld [vmem:[#allocation116_spill] sm:$0xff] }
 0x412   :  { %17436 = vst [vmem:[#allocation68_spill] sm:$0xff] %v15292_v39  ;;  %v10164_v23 = vpop.f32.mrb[187].mxu1  ;;  %10450 = vmatmul.mubr.f32.gmra.mrb[2].mxu1 %v15283_v55  ;;  %11406 = vmatprep.subr.bf16.mxu0 %v17438_v14  ;;  %v2433_v8 = vadd.f32 %v17410_v49, %v17440_v45  ;;  %v17442_v14 = vld [vmem:[#allocation38_spill] sm:$0xff] }
 0x413   :  { %v3048_v27 = vadd.f32 %v8685_v33, %v15081_v44  ;;  %v8686_v18 = vpop.f32.mrb[152].mxu0  ;;  %10452 = vmatprep.mubr.msk.f32.mxu1 %vm12824_vm1, %v17163_v31  ;;  %11498 = vmatpush3.bf16.msra.mxu1 %v17439_v15  ;;  %v17441_v23 = vld [vmem:[#allocation37_spill] sm:$0xff] }
 0x414   :  { %v8687_v39 = vpop.f32.mrb[153].mxu0  ;;  %4237 = vmatmul.mubr.f32.gmra.mrb[36].mxu0 %v14331_v47  ;;  %11499 = vmatprep.subr.bf16.mxu1 %v17165_v25 }
 0x415   :  { %v15309_v29 = vadd.f32 %v15030_v53, %v3048_v27  ;;  %v8688_v44 = vadd.f32 %v8687_v39, %v8686_v18  ;;  %v15311_v33 = vpop.f32.mrb[188].mxu1  ;;  %4241 = vmatprep.mubr.f32.mxu0 %v14059_v12  ;;  %11408 = vmatpush3.bf16.msra.mxu0 %v17441_v23  ;;  %v17443_v53 = vld [vmem:[#allocation63_spill] sm:$0xff]  ;;  %v15321_v39 = vmax.f32 %v2433_v8, 0.0  ;;  %v17444_v27 = vld [vmem:[#allocation121_spill] sm:$0xff] }
 0x416   :  { %v10167_v28 = vpop.f32.mrb[189].mxu1  ;;  %10453 = vmatmul.mubr.f32.gmra.mrb[4].mxu1 %v15302_v21  ;;  %11410 = vmatprep.subr.bf16.mxu0 %v17442_v14  ;;  %v2438_v18 = vadd.f32 %v17410_v49, %v17444_v27  ;;  %v17446_v14 = vld [vmem:[#allocation40_spill] sm:$0xff] }
 0x417   :  { %v3053_v15 = vadd.f32 %v8688_v44, %v15095_v16  ;;  %v8689_v47 = vpop.f32.mrb[154].mxu0  ;;  %10455 = vmatprep.mubr.msk.f32.mxu1 %vm12824_vm1, %v17163_v31  ;;  %11501 = vmatpush3.bf16.msra.mxu1 %v17443_v53  ;;  %v17445_v28 = vld [vmem:[#allocation39_spill] sm:$0xff] }
 0x418   :  { %v8690_v45 = vpop.f32.mrb[155].mxu0  ;;  %4242 = vmatmul.mubr.f32.gmra.mrb[38].mxu0 %v14355_v13  ;;  %11502 = vmatprep.subr.bf16.mxu1 %v17165_v25 }
 0x419   :  { %v15328_v23 = vadd.f32 %v15043_v46, %v3053_v15  ;;  %v8691_v16 = vadd.f32 %v8690_v45, %v8689_v47  ;;  %v15330_v44 = vpop.f32.mrb[190].mxu1  ;;  %4246 = vmatprep.mubr.f32.mxu0 %v14074_v34  ;;  %11412 = vmatpush3.bf16.msra.mxu0 %v17445_v28  ;;  %v17447_v46 = vld [vmem:[#allocation65_spill] sm:$0xff]  ;;  %v15340_v15 = vmax.f32 %v2438_v18, 0.0  ;;  %v17448_v47 = vld [vmem:[#allocation124_spill] sm:$0xff] }
 0x41a   :  { %v10170_v8 = vpop.f32.mrb[191].mxu1  ;;  %10456 = vmatmul.mubr.f32.gmra.mrb[6].mxu1 %v15321_v39  ;;  %11414 = vmatprep.subr.bf16.mxu0 %v17446_v14  ;;  %v2443_v27 = vadd.f32 %v17410_v49, %v17448_v47  ;;  %v17450_v14 = vld [vmem:[#allocation42_spill] sm:$0xff] }
 0x41b   :  { %v3058_v53 = vadd.f32 %v8691_v16, %v15109_v19  ;;  %v8692_v13 = vpop.f32.mrb[156].mxu0  ;;  %10458 = vmatprep.mubr.msk.f32.mxu1 %vm12824_vm1, %v17163_v31  ;;  %11504 = vmatpush3.bf16.msra.mxu1 %v17447_v46  ;;  %v17449_v8 = vld [vmem:[#allocation41_spill] sm:$0xff] }
 0x41c   :  { %v8693_v45 = vpop.f32.mrb[157].mxu0  ;;  %4247 = vmatmul.mubr.f32.gmra.mrb[40].mxu0 %v14377_v52  ;;  %11537 = vmatprep.subr.bf16.mxu1 %v17165_v25 }
 0x41d   :  { %v15347_v28 = vadd.f32 %v15057_v56, %v3058_v53  ;;  %v8694_v19 = vadd.f32 %v8693_v45, %v8692_v13  ;;  %v15349_v16 = vpop.f32.mrb[192].mxu1  ;;  %4251 = vmatprep.mubr.f32.mxu0 %v17393_v17  ;;  %11416 = vmatpush3.bf16.msra.mxu0 %v17449_v8  ;;  %v15358_v56 = vmax.f32 %v2443_v27, 0.0  ;;  %v17451_v53 = vld [vmem:[#allocation125_spill] sm:$0xff]  ;;  %v17453_v27 = vld [vmem:[#allocation44_spill] sm:$0xff] }
 0x41e   :  { %v10205_v18 = vpop.f32.mrb[193].mxu1  ;;  %10459 = vmatmul.mubr.f32.gmra.mrb[8].mxu1 %v15340_v15  ;;  %11418 = vmatprep.subr.bf16.mxu0 %v17450_v14  ;;  %v2448_v13 = vadd.f32 %v17410_v49, %v17451_v53 }
 0x41f   :  { %v3063_v46 = vadd.f32 %v8694_v19, %v15122_v63  ;;  %v8695_v52 = vpop.f32.mrb[158].mxu0  ;;  %10461 = vmatprep.mubr.msk.f32.mxu1 %vm12824_vm1, %v17163_v31  ;;  %v17452_v63 = vld [vmem:[#allocation43_spill] sm:$0xff] }
 0x420   :  { %v8696_v47 = vpop.f32.mrb[159].mxu0  ;;  %4252 = vmatmul.mubr.f32.gmra.mrb[42].mxu0 %v17397_v26  ;;  %v15375_v26 = vmax.f32 %v2448_v13, 0.0  ;;  %v17457_v13 = vld [vmem:[#allocation46_spill] sm:$0xff] }
 0x421   :  { %v15364_v45 = vadd.f32 %v15071_v11, %v3063_v46  ;;  %v8697_v8 = vadd.f32 %v8696_v47, %v8695_v52  ;;  %v15366_v18 = vpop.f32.mrb[194].mxu1  ;;  %4256 = vmatprep.mubr.f32.mxu0 %v17399_v50  ;;  %11420 = vmatpush3.bf16.msra.mxu0 %v17452_v63  ;;  %v17454_v11 = vld [vmem:[#allocation126_spill] sm:$0xff] }
 0x422   :  { %v10208_v19 = vpop.f32.mrb[195].mxu1  ;;  %10462 = vmatmul.mubr.f32.gmra.mrb[10].mxu1 %v15358_v56  ;;  %11422 = vmatprep.subr.bf16.mxu0 %v17453_v27  ;;  %v2453_v46 = vadd.f32 %v17410_v49, %v17454_v11 }
 0x423   :  { %v3068_v14 = vadd.f32 %v8697_v8, %v15134_v30  ;;  %v8698_v53 = vpop.f32.mrb[160].mxu0  ;;  %10464 = vmatprep.mubr.msk.f32.mxu1 %vm12824_vm1, %v17163_v31  ;;  %v17456_v30 = vld [vmem:[#allocation45_spill] sm:$0xff] }
 0x424   :  { %v8699_v52 = vpop.f32.mrb[161].mxu0  ;;  %4257 = vmatmul.mubr.f32.gmra.mrb[44].mxu0 %v17400_v3  ;;  %v17458_v3 = vld [vmem:[#allocation127_spill] sm:$0xff] }
 0x425   :  { %v15381_v47 = vadd.f32 %v15085_v5, %v3068_v14  ;;  %v8700_v63 = vadd.f32 %v8699_v52, %v8698_v53  ;;  %v15383_v19 = vpop.f32.mrb[196].mxu1  ;;  %4261 = vmatprep.mubr.f32.mxu0 %v14114_v0  ;;  %11424 = vmatpush3.bf16.msra.mxu0 %v17456_v30  ;;  %v15392_v5 = vmax.f32 %v2453_v46, 0.0  ;;  %v2458_v14 = vadd.f32 %v17410_v49, %v17458_v3 }
 0x426   :  { %17455 = vst [vmem:[#allocation123_spill] sm:$0xff] %v15383_v19  ;;  %v10211_v8 = vpop.f32.mrb[197].mxu1  ;;  %10465 = vmatmul.mubr.f32.gmra.mrb[12].mxu1 %v15375_v26  ;;  %11450 = vmatprep.subr.bf16.mxu0 %v17457_v13 }
 0x427   :  { %v3073_v27 = vadd.f32 %v8700_v63, %v15146_v41  ;;  %v8764_v11 = vpop.f32.mrb[162].mxu0  ;;  %10467 = vmatprep.mubr.msk.f32.mxu1 %vm12824_vm1, %v17163_v31  ;;  %v17460_v63 = vld [vmem:[#allocation23_spill] sm:$0xff]  ;;  %v15407_v3 = vmax.f32 %v2458_v14, 0.0 }
 0x428   :  { %v8765_v53 = vpop.f32.mrb[163].mxu0  ;;  %4262 = vmatmul.mubr.f32.gmra.mrb[46].mxu0 %v14434_v6  ;;  %v17461_v6 = vld [vmem:[#allocation128_spill] sm:$0xff] }
 0x429   :  { %v15398_v52 = vadd.f32 %v15099_v22, %v3073_v27  ;;  %v8766_v30 = vadd.f32 %v8765_v53, %v8764_v11  ;;  %v15400_v8 = vpop.f32.mrb[198].mxu1  ;;  %4266 = vmatprep.mubr.f32.mxu0 %v14125_v38  ;;  %v2463_v22 = vadd.f32 %v17410_v49, %v17461_v6  ;;  %v17462_v11 = vld [vmem:[#allocation26_spill] sm:$0xff] }
 0x42a   :  { %17459 = vst [vmem:[#allocation149_spill] sm:$0xff] %v15400_v8  ;;  %v10214_v41 = vpop.f32.mrb[199].mxu1  ;;  %10468 = vmatmul.mubr.f32.gmra.mrb[14].mxu1 %v15392_v5 }
 0x42b   :  { %v3472_v46 = vadd.f32 %v8766_v30, %v17460_v63  ;;  %v8767_v13 = vpop.f32.mrb[164].mxu0  ;;  %10470 = vmatprep.mubr.msk.f32.mxu1 %vm12824_vm1, %v17163_v31  ;;  %v17465_v63 = vld [vmem:[#allocation24_spill] sm:$0xff]  ;;  %v15422_v6 = vmax.f32 %v2463_v22, 0.0  ;;  %v17470_v22 = vld [vmem:[#allocation130_spill] sm:$0xff] }
 0x42c   :  { %v8768_v27 = vpop.f32.mrb[165].mxu0  ;;  %4267 = vmatmul.mubr.f32.gmra.mrb[48].mxu0 %v14448_v42  ;;  %v17466_v42 = vld [vmem:[#allocation129_spill] sm:$0xff] }
 0x42d   :  { %v15413_v53 = vadd.f32 %v3472_v46, %v17462_v11  ;;  %v8769_v41 = vadd.f32 %v8768_v27, %v8767_v13  ;;  %v15415_v8 = vpop.f32.mrb[200].mxu1  ;;  %4271 = vmatprep.mubr.f32.mxu0 %v14136_v57  ;;  %v15426_v46 = vadd.f32 %v17410_v49, %v17466_v42  ;;  %v17468_v27 = vld [vmem:[#allocation28_spill] sm:$0xff]  ;;  %v17471_v42 = vld [vmem:[#allocation87_spill] sm:$0xff] }
 0x42e   :  { %17464 = vst [vmem:[#allocation89_spill] sm:$0xff] %v15415_v8  ;;  %v10217_v30 = vpop.f32.mrb[201].mxu1  ;;  %10471 = vmatmul.mubr.f32.gmra.mrb[16].mxu1 %v15407_v3 }
 0x42f   :  { %17463 = vst [vmem:[#allocation150_spill] sm:$0xff] %v15413_v53  ;;  %v3477_v14 = vadd.f32 %v8769_v41, %v17465_v63  ;;  %v8770_v19 = vpop.f32.mrb[166].mxu0  ;;  %10473 = vmatprep.mubr.msk.f32.mxu1 %vm12824_vm1, %v17163_v31  ;;  %17467 = vst [vmem:[#allocation131_spill] sm:$0xff] %v15426_v46 }
 0x430   :  { %v8771_v13 = vpop.f32.mrb[167].mxu0  ;;  %4272 = vmatmul.mubr.f32.gmra.mrb[50].mxu0 %v14462_v54  ;;  %v2393_v54 = vadd.f32 %v17410_v49, %v17471_v42 }
 0x431   :  { %v15430_v11 = vadd.f32 %v3477_v14, %v17468_v27  ;;  %v8772_v30 = vadd.f32 %v8771_v13, %v8770_v19  ;;  %v15432_v53 = vpop.f32.mrb[202].mxu1  ;;  %4276 = vmatprep.mubr.f32.mxu0 %v14147_v43  ;;  %v17061_v14 = vmax.f32 %v15426_v46, 0.0 }
 0x432   :  { %v10220_v41 = vpop.f32.mrb[203].mxu1  ;;  %10474 = vmatmul.mubr.f32.gmra.mrb[18].mxu1 %v15422_v6  ;;  %v2478_v42 = vmax.f32 %v2393_v54, 0.0  ;;  %v17477_v54 = vld [vmem:[#allocation83_spill] sm:$0xff] }
 0x433   :  { %17469 = vst [vmem:[#allocation151_spill] sm:$0xff] %v15430_v11  ;;  %v3482_v63 = vadd.f32 %v8772_v30, %v17470_v22  ;;  %v8773_v8 = vpop.f32.mrb[168].mxu0  ;;  %10476 = vmatprep.mubr.msk.f32.mxu1 %vm12824_vm1, %v17163_v31  ;;  %v17473_v22 = vld [vmem:[#allocation25_spill] sm:$0xff] }
 0x434   :  { %v8774_v27 = vpop.f32.mrb[169].mxu0  ;;  %4277 = vmatmul.mubr.f32.gmra.mrb[52].mxu0 %v14476_v60 }
 0x435   :  { %v15444_v19 = vadd.f32 %v3482_v63, %v15185_v40  ;;  %v8775_v13 = vadd.f32 %v8774_v27, %v8773_v8  ;;  %v15446_v41 = vpop.f32.mrb[204].mxu1  ;;  %4281 = vmatprep.mubr.f32.mxu0 %v14158_v48  ;;  %v17475_v27 = vld [vmem:[#allocation79_spill] sm:$0xff] }
 0x436   :  { %v10223_v30 = vpop.f32.mrb[205].mxu1  ;;  %10477 = vmatmul.mubr.f32.gmra.mrb[20].mxu1 %v17061_v14  ;;  %v17476_v14 = vld [vmem:[#allocation27_spill] sm:$0xff] }
 0x437   :  { %17472 = vst [vmem:[#allocation92_spill] sm:$0xff] %v15444_v19  ;;  %v3487_v11 = vadd.f32 %v8775_v13, %v17473_v22  ;;  %v8776_v49 = vpop.f32.mrb[170].mxu0  ;;  %10511 = vmatprep.mubr.msk.f32.mxu1 %vm12824_vm1, %v17163_v31 }
 0x438   :  { %v8777_v60 = vpop.f32.mrb[171].mxu0  ;;  %4282 = vmatmul.mubr.f32.gmra.mrb[54].mxu0 %v14491_v58  ;;  %v17478_v58 = vld [vmem:[#allocation132_spill] sm:$0xff] }
 0x439   :  { %v15456_v40 = vadd.f32 %v3487_v11, %v15200_v7  ;;  %v8778_v8 = vadd.f32 %v8777_v60, %v8776_v49  ;;  %v15458_v63 = vpop.f32.mrb[206].mxu1  ;;  %4286 = vmatprep.mubr.f32.mxu0 %v17475_v27  ;;  %v17481_v60 = vmax.f32 %v15181_v2, 0.0 }
 0x43a   :  { %v10226_v30 = vpop.f32.mrb[207].mxu1  ;;  %10512 = vmatmul.mubr.f32.vlgmr.msra.gmra.mrb[22].mxu1 %v2478_v42  ;;  %v17480_v42 = vld [vmem:[#allocation117_spill] sm:$0xff] }
 0x43b   :  { %17474 = vst [vmem:[#allocation152_spill] sm:$0xff] %v15456_v40  ;;  %v3492_v13 = vadd.f32 %v8778_v8, %v17476_v14  ;;  %v8779_v22 = vpop.f32.mrb[172].mxu0  ;;  %10514 = vmatprep.mubr.msk.f32.mxu1 %vm12824_vm1, %v17163_v31  ;;  %11539 = vmatpush3.bf16.msra.mxu1 %v17477_v54  ;;  %v17482_v8 = vld [vmem:[#allocation29_spill] sm:$0xff] }
 0x43c   :  { %v8780_v19 = vpop.f32.mrb[173].mxu0  ;;  %4287 = vmatmul.mubr.f32.gmra.mrb[56].mxu0 %v17478_v58  ;;  %11540 = vmatprep.subr.bf16.mxu1 %v17165_v25  ;;  %v17483_v58 = vld [vmem:[#allocation88_spill] sm:$0xff] }
 0x43d   :  { %v15468_v7 = vadd.f32 %v3492_v13, %v15218_v61  ;;  %v8781_v11 = vadd.f32 %v8780_v19, %v8779_v22  ;;  %v15470_v49 = vpop.f32.mrb[208].mxu1  ;;  %4291 = vmatprep.mubr.f32.mxu0 %v17480_v42  ;;  %v17484_v61 = vld [vmem:[#allocation133_spill] sm:$0xff]  ;;  %v17491_v42 = vld [vmem:[#allocation51_spill] sm:$0xff] }
 0x43e   :  { %v10229_v14 = vpop.f32.mrb[209].mxu1  ;;  %10515 = vmatmul.mubr.f32.gmra.mrb[24].mxu1 %v17481_v60  ;;  %v17485_v13 = vmax.f32 %v17484_v61, 0.0  ;;  %v17488_v60 = vld [vmem:[#allocation30_spill] sm:$0xff] }
 0x43f   :  { %17479 = vst [vmem:[#allocation50_spill] sm:$0xff] %v15468_v7  ;;  %v3497_v30 = vadd.f32 %v8781_v11, %v17482_v8  ;;  %v8782_v54 = vpop.f32.mrb[174].mxu0  ;;  %10517 = vmatprep.mubr.msk.f32.mxu1 %vm12824_vm1, %v17163_v31  ;;  %11542 = vmatpush3.bf16.msra.mxu1 %v17483_v58  ;;  %v17487_v14 = vld [vmem:[#allocation49_spill] sm:$0xff]  ;;  %v17489_v8 = vld [vmem:[#allocation78_spill] sm:$0xff] }
 0x440   :  { %v8783_v40 = vpop.f32.mrb[175].mxu0  ;;  %4292 = vmatmul.mubr.f32.gmra.mrb[58].mxu0 %v17485_v13  ;;  %11543 = vmatprep.subr.bf16.mxu1 %v17165_v25  ;;  %v17490_v61 = vld [vmem:[#allocation90_spill] sm:$0xff] }
 0x441   :  { %v15483_v19 = vadd.f32 %v3497_v30, %v15235_v35  ;;  %v8784_v22 = vadd.f32 %v8783_v40, %v8782_v54  ;;  %v15485_v2 = vpop.f32.mrb[210].mxu1  ;;  %4546 = vmatprep.mubr.f32.mxu0 %v17487_v14  ;;  %v17494_v54 = vld [vmem:[#allocation80_spill] sm:$0xff] }
 0x442   :  { %v10232_v11 = vpop.f32.mrb[211].mxu1  ;;  %10518 = vmatmul.mubr.f32.gmra.mrb[26].mxu1 %v17488_v60 }
 0x443   :  { %17486 = vst [vmem:[#allocation96_spill] sm:$0xff] %v15483_v19  ;;  %v3502_v7 = vadd.f32 %v8784_v22, %v17489_v8  ;;  %v8785_v58 = vpop.f32.mrb[176].mxu0  ;;  %10520 = vmatprep.mubr.msk.f32.mxu1 %vm12824_vm1, %v17163_v31  ;;  %11545 = vmatpush3.bf16.msra.mxu1 %v17490_v61  ;;  %v17495_v22 = vld [vmem:[#allocation91_spill] sm:$0xff]  ;;  %v17496_v8 = vld [vmem:[#allocation93_spill] sm:$0xff]  ;;  %v17497_v61 = vld [vmem:[#allocation66_spill] sm:$0xff] }
 0x444   :  { %v8786_v13 = vpop.f32.mrb[177].mxu0  ;;  %4547 = vmatmul.mubr.f32.vlgmr.msra.gmra.mrb[60].mxu0 %v17491_v42  ;;  %11546 = vmatprep.subr.bf16.mxu1 %v17165_v25 }
 0x445   :  { %v15496_v35 = vadd.f32 %v3502_v7, %v15252_v10  ;;  %v8787_v40 = vadd.f32 %v8786_v13, %v8785_v58  ;;  %v15498_v30 = vpop.f32.mrb[212].mxu1  ;;  %4551 = vmatprep.mubr.f32.mxu0 %v17494_v54  ;;  %11452 = vmatpush3.bf16.msra.mxu0 %v17495_v22  ;;  %v17498_v10 = vld [vmem:[#allocation94_spill] sm:$0xff] }
 0x446   :  { %17493 = vst [vmem:[#allocation53_spill] sm:$0xff] %v15498_v30  ;;  %v10235_v11 = vpop.f32.mrb[213].mxu1  ;;  %10521 = vmatmul.mubr.f32.gmra.mrb[28].mxu1 %v15228_v62  ;;  %11454 = vmatprep.subr.bf16.mxu0 %v17496_v8 }
 0x447   :  { %17492 = vst [vmem:[#allocation153_spill] sm:$0xff] %v15496_v35  ;;  %v3507_v19 = vadd.f32 %v8787_v40, %v17497_v61  ;;  %v8788_v46 = vpop.f32.mrb[178].mxu0  ;;  %10523 = vmatprep.mubr.msk.f32.mxu1 %vm12824_vm1, %v17163_v31  ;;  %11548 = vmatpush3.bf16.msra.mxu1 %v17498_v10  ;;  %v17500_v11 = vld [vmem:[#allocation81_spill] sm:$0xff]  ;;  %v17501_v40 = vld [vmem:[#allocation95_spill] sm:$0xff]  ;;  %v17503_v10 = vld [vmem:[#allocation48_spill] sm:$0xff] }
 0x448   :  { %v8789_v7 = vpop.f32.mrb[179].mxu0  ;;  %4552 = vmatmul.mubr.f32.gmra.mrb[62].mxu0 %v13999_v24  ;;  %11549 = vmatprep.subr.bf16.mxu1 %v17165_v25  ;;  %v17502_v61 = vld [vmem:[#allocation97_spill] sm:$0xff] }
 0x449   :  { %v15511_v58 = vadd.f32 %v3507_v19, %v15271_v9  ;;  %v8790_v13 = vadd.f32 %v8789_v7, %v8788_v46  ;;  %v15513_v22 = vpop.f32.mrb[214].mxu1  ;;  %4556 = vmatprep.mubr.f32.mxu0 %v17500_v11  ;;  %11456 = vmatpush3.bf16.msra.mxu0 %v17501_v40  ;;  %v17504_v9 = vld [vmem:[#allocation98_spill] sm:$0xff] }
 0x44a   :  { %v10238_v8 = vpop.f32.mrb[215].mxu1  ;;  %10524 = vmatmul.mubr.f32.gmra.mrb[30].mxu1 %v15245_v1  ;;  %11458 = vmatprep.subr.bf16.mxu0 %v17502_v61 }
 0x44b   :  { %17499 = vst [vmem:[#allocation100_spill] sm:$0xff] %v15511_v58  ;;  %v3512_v35 = vadd.f32 %v8790_v13, %v17503_v10  ;;  %v8791_v30 = vpop.f32.mrb[180].mxu0  ;;  %10526 = vmatprep.mubr.msk.f32.mxu1 %vm12824_vm1, %v17163_v31  ;;  %11551 = vmatpush3.bf16.msra.mxu1 %v17504_v9  ;;  %v17507_v8 = vld [vmem:[#allocation52_spill] sm:$0xff]  ;;  %v17508_v13 = vld [vmem:[#allocation99_spill] sm:$0xff]  ;;  %v17509_v10 = vld [vmem:[#allocation101_spill] sm:$0xff] }
 0x44c   :  { %v8792_v46 = vpop.f32.mrb[181].mxu0  ;;  %4557 = vmatmul.mubr.f32.gmra.mrb[64].mxu0 %v14014_v20  ;;  %11552 = vmatprep.subr.bf16.mxu1 %v17165_v25 }
 0x44d   :  { %v15526_v19 = vadd.f32 %v3512_v35, %v15290_v32  ;;  %v8793_v7 = vadd.f32 %v8792_v46, %v8791_v30  ;;  %v15528_v40 = vpop.f32.mrb[216].mxu1  ;;  %4561 = vmatprep.mubr.f32.mxu0 %v17507_v8  ;;  %11460 = vmatpush3.bf16.msra.mxu0 %v17508_v13  ;;  %v17510_v32 = vld [vmem:[#allocation102_spill] sm:$0xff] }
 0x44e   :  { %17506 = vst [vmem:[#allocation55_spill] sm:$0xff] %v15528_v40  ;;  %v10241_v61 = vpop.f32.mrb[217].mxu1  ;;  %10527 = vmatmul.mubr.f32.gmra.mrb[32].mxu1 %v15264_v36  ;;  %11462 = vmatprep.subr.bf16.mxu0 %v17509_v10  ;;  %v17515_v10 = vld [vmem:[#allocation106_spill] sm:$0xff] }
 0x44f   :  { %17505 = vst [vmem:[#allocation154_spill] sm:$0xff] %v15526_v19  ;;  %v3517_v9 = vadd.f32 %v8793_v7, %v15237_v51  ;;  %v8794_v58 = vpop.f32.mrb[182].mxu0  ;;  %10529 = vmatprep.mubr.msk.f32.mxu1 %vm12824_vm1, %v17163_v31  ;;  %11554 = vmatpush3.bf16.msra.mxu1 %v17510_v32  ;;  %v17513_v61 = vld [vmem:[#allocation54_spill] sm:$0xff]  ;;  %v17514_v51 = vld [vmem:[#allocation103_spill] sm:$0xff] }
 0x450   :  { %v8795_v35 = vpop.f32.mrb[183].mxu0  ;;  %4562 = vmatmul.mubr.f32.gmra.mrb[66].mxu0 %v14029_v59  ;;  %11555 = vmatprep.subr.bf16.mxu1 %v17165_v25  ;;  %v17516_v32 = vld [vmem:[#allocation119_spill] sm:$0xff] }
 0x451   :  { %v15541_v30 = vadd.f32 %v3517_v9, %v15309_v29  ;;  %v8796_v46 = vadd.f32 %v8795_v35, %v8794_v58  ;;  %v15543_v13 = vpop.f32.mrb[218].mxu1  ;;  %4566 = vmatprep.mubr.f32.mxu0 %v17513_v61  ;;  %11464 = vmatpush3.bf16.msra.mxu0 %v17514_v51  ;;  %v17517_v29 = vld [vmem:[#allocation107_spill] sm:$0xff] }
 0x452   :  { %17512 = vst [vmem:[#allocation31_spill] sm:$0xff] %v15543_v13  ;;  %v10244_v7 = vpop.f32.mrb[219].mxu1  ;;  %10530 = vmatmul.mubr.f32.gmra.mrb[68].mxu1 %v15283_v55  ;;  %11466 = vmatprep.subr.bf16.mxu0 %v17515_v10  ;;  %v5384_v10 = vld [vmem:[#allocation10 + $0x80] sm:$0xff] }
 0x453   :  { %17511 = vst [vmem:[#allocation104_spill] sm:$0xff] %v15541_v30  ;;  %v3522_v19 = vadd.f32 %v8796_v46, %v17516_v32  ;;  %v8797_v40 = vpop.f32.mrb[184].mxu0  ;;  %10532 = vmatprep.mubr.msk.f32.mxu1 %vm12824_vm1, %v17163_v31  ;;  %11557 = vmatpush3.bf16.msra.mxu1 %v17517_v29  ;;  %v17519_v7 = vld [vmem:[#allocation56_spill] sm:$0xff]  ;;  %v5385_v32 = vld [vmem:[#allocation10 + $0x88] sm:$0xff] }
 0x454   :  { %v8798_v58 = vpop.f32.mrb[185].mxu0  ;;  %4567 = vmatmul.mubr.f32.gmra.mrb[68].mxu0 %v14044_v4  ;;  %11558 = vmatprep.subr.bf16.mxu1 %v17165_v25  ;;  %v17520_v46 = vld [vmem:[#allocation108_spill] sm:$0xff]  ;;  %v17521_v29 = vld [vmem:[#allocation110_spill] sm:$0xff]  ;;  %v15564_v13 = vpack.c.bf16 %v5385_v32, %v5384_v10 }
 0x455   :  { %v15556_v9 = vadd.f32 %v3522_v19, %v15328_v23  ;;  %v8799_v35 = vadd.f32 %v8798_v58, %v8797_v40  ;;  %v15558_v51 = vpop.f32.mrb[220].mxu1  ;;  %4571 = vmatprep.mubr.f32.mxu0 %v17519_v7  ;;  %11468 = vmatpush3.bf16.msra.mxu0 %v17520_v46  ;;  %v17522_v19 = vld [vmem:[#allocation111_spill] sm:$0xff]  ;;  %v17524_v10 = vld [vmem:[#allocation58_spill] sm:$0xff] }
 0x456   :  { %v10247_v30 = vpop.f32.mrb[221].mxu1  ;;  %10533 = vmatmul.mubr.f32.gmra.mrb[70].mxu1 %v15302_v21  ;;  %11470 = vmatprep.subr.bf16.mxu0 %v17521_v29  ;;  %v17526_v32 = vld [vmem:[#allocation114_spill] sm:$0xff]  ;;  %v17527_v29 = vld [vmem:[#allocation68_spill] sm:$0xff] }
 0x457   :  { %17518 = vst [vmem:[#allocation32_spill] sm:$0xff] %v15556_v9  ;;  %v3527_v25 = vadd.f32 %v8799_v35, %v15273_v37  ;;  %v8800_v23 = vpop.f32.mrb[186].mxu0  ;;  %10535 = vmatprep.mubr.msk.f32.mxu1 %vm12824_vm1, %v17163_v31  ;;  %11560 = vmatpush3.bf16.msra.mxu1 %v17522_v19  ;;  %v17525_v37 = vld [vmem:[#allocation112_spill] sm:$0xff] }
 0x458   :  { %v8801_v40 = vpop.f32.mrb[187].mxu0  ;;  %4572 = vmatmul.mubr.f32.gmra.mrb[70].mxu0 %v14059_v12  ;;  %11690 = vmatprep.subr.bf16.mxu1 %v15564_v13 }
 0x459   :  { %v15573_v30 = vadd.f32 %v3527_v25, %v15347_v28  ;;  %v8802_v58 = vadd.f32 %v8801_v40, %v8800_v23  ;;  %v15575_v46 = vpop.f32.mrb[222].mxu1  ;;  %4576 = vmatprep.mubr.f32.mxu0 %v17524_v10  ;;  %11472 = vmatpush3.bf16.msra.mxu0 %v17525_v37  ;;  %v17529_v37 = vld [vmem:[#allocation60_spill] sm:$0xff] }
 0x45a   :  { %v10282_v35 = vpop.f32.mrb[223].mxu1  ;;  %10536 = vmatmul.mubr.f32.gmra.mrb[72].mxu1 %v15321_v39  ;;  %11474 = vmatprep.subr.bf16.mxu0 %v17526_v32 }
 0x45b   :  { %17523 = vst [vmem:[#allocation57_spill] sm:$0xff] %v15573_v30  ;;  %v3532_v19 = vadd.f32 %v8802_v58, %v17527_v29  ;;  %v8803_v9 = vpop.f32.mrb[188].mxu0  ;;  %10538 = vmatprep.mubr.msk.f32.mxu1 %vm12824_vm1, %v17163_v31  ;;  %v17530_v35 = vld [vmem:[#allocation115_spill] sm:$0xff]  ;;  %v17531_v58 = vld [vmem:[#allocation118_spill] sm:$0xff] }
 0x45c   :  { %v8804_v28 = vpop.f32.mrb[189].mxu0  ;;  %4577 = vmatmul.mubr.f32.gmra.mrb[72].mxu0 %v14074_v34 }
 0x45d   :  { %v15586_v25 = vadd.f32 %v3532_v19, %v15364_v45  ;;  %v8805_v23 = vadd.f32 %v8804_v28, %v8803_v9  ;;  %v15588_v40 = vpop.f32.mrb[224].mxu1  ;;  %4581 = vmatprep.mubr.f32.mxu0 %v17529_v37  ;;  %11476 = vmatpush3.bf16.msra.mxu0 %v17530_v35  ;;  %v17534_v35 = vld [vmem:[#allocation62_spill] sm:$0xff] }
 0x45e   :  { %v10285_v32 = vpop.f32.mrb[225].mxu1  ;;  %10539 = vmatmul.mubr.f32.gmra.mrb[74].mxu1 %v15340_v15  ;;  %11478 = vmatprep.subr.bf16.mxu0 %v17531_v58 }
 0x45f   :  { %17528 = vst [vmem:[#allocation109_spill] sm:$0xff] %v15586_v25  ;;  %v3537_v29 = vadd.f32 %v8805_v23, %v15311_v33  ;;  %v8806_v30 = vpop.f32.mrb[190].mxu0  ;;  %10541 = vmatprep.mubr.msk.f32.mxu1 %vm12824_vm1, %v17163_v31  ;;  %v17535_v32 = vld [vmem:[#allocation120_spill] sm:$0xff]  ;;  %v17536_v33 = vld [vmem:[#allocation122_spill] sm:$0xff] }
 0x460   :  { %v8807_v45 = vpop.f32.mrb[191].mxu0  ;;  %4582 = vmatmul.mubr.f32.gmra.mrb[74].mxu0 %v17393_v17 }
 0x461   :  { %v15599_v9 = vadd.f32 %v3537_v29, %v15381_v47  ;;  %v8808_v19 = vadd.f32 %v8807_v45, %v8806_v30  ;;  %v15601_v28 = vpop.f32.mrb[226].mxu1  ;;  %4586 = vmatprep.mubr.f32.mxu0 %v17534_v35  ;;  %11480 = vmatpush3.bf16.msra.mxu0 %v17535_v32  ;;  %v17539_v32 = vld [vmem:[#allocation64_spill] sm:$0xff] }
 0x462   :  { %17533 = vst [vmem:[#allocation34_spill] sm:$0xff] %v15601_v28  ;;  %v10288_v58 = vpop.f32.mrb[227].mxu1  ;;  %10542 = vmatmul.mubr.f32.gmra.mrb[76].mxu1 %v15358_v56  ;;  %11506 = vmatprep.subr.bf16.mxu0 %v17536_v33 }
 0x463   :  { %17532 = vst [vmem:[#allocation33_spill] sm:$0xff] %v15599_v9  ;;  %v3542_v23 = vadd.f32 %v8808_v19, %v15330_v44  ;;  %v8872_v25 = vpop.f32.mrb[192].mxu0  ;;  %10544 = vmatprep.mubr.msk.f32.mxu1 %vm12824_vm1, %v17163_v31 }
 0x464   :  { %v8873_v47 = vpop.f32.mrb[193].mxu0  ;;  %4587 = vmatmul.mubr.f32.gmra.mrb[76].mxu0 %v17399_v50 }
 0x465   :  { %v15612_v30 = vadd.f32 %v3542_v23, %v15398_v52  ;;  %v8874_v29 = vadd.f32 %v8873_v47, %v8872_v25  ;;  %v15614_v45 = vpop.f32.mrb[228].mxu1  ;;  %4591 = vmatprep.mubr.f32.mxu0 %v17539_v32  ;;  %v17541_v25 = vld [vmem:[#allocation67_spill] sm:$0xff] }
 0x466   :  { %17538 = vst [vmem:[#allocation113_spill] sm:$0xff] %v15614_v45  ;;  %v10291_v58 = vpop.f32.mrb[229].mxu1  ;;  %10545 = vmatmul.mubr.f32.gmra.mrb[78].mxu1 %v15375_v26 }
 0x467   :  { %17537 = vst [vmem:[#allocation59_spill] sm:$0xff] %v15612_v30  ;;  %v15619_v44 = vadd.f32 %v8874_v29, %v15349_v16  ;;  %v8875_v19 = vpop.f32.mrb[194].mxu0  ;;  %10547 = vmatprep.mubr.msk.f32.mxu1 %vm12824_vm1, %v17163_v31 }
 0x468   :  { %v8876_v33 = vpop.f32.mrb[195].mxu0  ;;  %4592 = vmatmul.mubr.f32.gmra.mrb[78].mxu0 %v14114_v0 }
 0x469   :  { %v8877_v52 = vadd.f32 %v8876_v33, %v8875_v19  ;;  %v15624_v23 = vpop.f32.mrb[230].mxu1  ;;  %4596 = vmatprep.mubr.f32.mxu0 %v17541_v25  ;;  %v17543_v19 = vld [vmem:[#allocation69_spill] sm:$0xff] }
 0x46a   :  { %17540 = vst [vmem:[#allocation22_spill] sm:$0xff] %v15624_v23  ;;  %v10294_v47 = vpop.f32.mrb[231].mxu1  ;;  %10548 = vmatmul.mubr.f32.gmra.mrb[80].mxu1 %v15392_v5 }
 0x46b   :  { %v15629_v58 = vadd.f32 %v8877_v52, %v15366_v18  ;;  %v8878_v16 = vpop.f32.mrb[196].mxu0  ;;  %10550 = vmatprep.mubr.msk.f32.mxu1 %vm12824_vm1, %v17163_v31  ;;  %v17544_v47 = vld [vmem:[#allocation123_spill] sm:$0xff] }
 0x46c   :  { %v8879_v29 = vpop.f32.mrb[197].mxu0  ;;  %4597 = vmatmul.mubr.f32.gmra.mrb[80].mxu0 %v14125_v38 }
 0x46d   :  { %v8880_v30 = vadd.f32 %v8879_v29, %v8878_v16  ;;  %v15634_v9 = vpop.f32.mrb[232].mxu1  ;;  %4601 = vmatprep.mubr.f32.mxu0 %v17543_v19  ;;  %v17547_v16 = vld [vmem:[#allocation70_spill] sm:$0xff]  ;;  %v5387_v19 = vld [vmem:[#allocation10 + $0x98] sm:$0xff] }
 0x46e   :  { %17542 = vst [vmem:[#allocation35_spill] sm:$0xff] %v15634_v9  ;;  %v10297_v33 = vpop.f32.mrb[233].mxu1  ;;  %10551 = vmatmul.mubr.f32.gmra.mrb[82].mxu1 %v15407_v3 }
 0x46f   :  { %v15639_v23 = vadd.f32 %v8880_v30, %v17544_v47  ;;  %v8881_v18 = vpop.f32.mrb[198].mxu0  ;;  %10553 = vmatprep.mubr.msk.f32.mxu1 %vm12824_vm1, %v17163_v31  ;;  %v17548_v33 = vld [vmem:[#allocation149_spill] sm:$0xff]  ;;  %v5386_v47 = vld [vmem:[#allocation10 + $0x90] sm:$0xff] }
 0x470   :  { %v8882_v52 = vpop.f32.mrb[199].mxu0  ;;  %4602 = vmatmul.mubr.f32.gmra.mrb[82].mxu0 %v14136_v57 }
 0x471   :  { %17545 = vst [vmem:[#allocation36_spill] sm:$0xff] %v15639_v23  ;;  %v8883_v45 = vadd.f32 %v8882_v52, %v8881_v18  ;;  %v15644_v28 = vpop.f32.mrb[234].mxu1  ;;  %4606 = vmatprep.mubr.f32.mxu0 %v17547_v16  ;;  %v15658_v16 = vpack.c.bf16 %v5387_v19, %v5386_v47  ;;  %v5389_v23 = vld [vmem:[#allocation10 + $0xa8] sm:$0xff]  ;;  %v17554_v19 = vld [vmem:[#allocation75_spill] sm:$0xff] }
 0x472   :  { %17546 = vst [vmem:[#allocation61_spill] sm:$0xff] %v15644_v28  ;;  %v10300_v29 = vpop.f32.mrb[235].mxu1  ;;  %10554 = vmatmul.mubr.f32.gmra.mrb[84].mxu1 %v15422_v6  ;;  %v17551_v28 = vld [vmem:[#allocation72_spill] sm:$0xff] }
 0x473   :  { %v15649_v9 = vadd.f32 %v8883_v45, %v17548_v33  ;;  %v8884_v30 = vpop.f32.mrb[200].mxu0  ;;  %10588 = vmatprep.mubr.msk.f32.mxu1 %vm12824_vm1, %v17163_v31  ;;  %v17552_v45 = vld [vmem:[#allocation89_spill] sm:$0xff] }
 0x474   :  { %v8885_v38 = vpop.f32.mrb[201].mxu0  ;;  %4607 = vmatmul.mubr.f32.gmra.mrb[84].mxu0 %v14147_v43 }
 0x475   :  { %17549 = vst [vmem:[#allocation116_spill] sm:$0xff] %v15649_v9  ;;  %v8886_v18 = vadd.f32 %v8885_v38, %v8884_v30  ;;  %v15654_v52 = vpop.f32.mrb[236].mxu1  ;;  %4611 = vmatprep.mubr.f32.mxu0 %v17551_v28  ;;  %v5388_v9 = vld [vmem:[#allocation10 + $0xa0] sm:$0xff] }
 0x476   :  { %17550 = vst [vmem:[#allocation37_spill] sm:$0xff] %v15654_v52  ;;  %v10303_v29 = vpop.f32.mrb[237].mxu1  ;;  %10589 = vmatmul.mubr.f32.vlgmr.msra.gmra.mrb[86].mxu1 %v17488_v60  ;;  %v5390_v52 = vld [vmem:[#allocation10 + $0xb0] sm:$0xff] }
 0x477   :  { %v15661_v33 = vadd.f32 %v8886_v18, %v17552_v45  ;;  %v8887_v57 = vpop.f32.mrb[202].mxu0  ;;  %10591 = vmatprep.mubr.msk.f32.mxu1 %vm12824_vm1, %v17163_v31  ;;  %11692 = vmatpush3.bf16.msra.mxu1 %v15564_v13  ;;  %v15672_v18 = vpack.c.bf16 %v5389_v23, %v5388_v9  ;;  %v17555_v9 = vld [vmem:[#allocation74_spill] sm:$0xff] }
 0x478   :  { %v8888_v38 = vpop.f32.mrb[203].mxu0  ;;  %4612 = vmatmul.mubr.f32.gmra.mrb[86].mxu0 %v14158_v48  ;;  %11694 = vmatprep.subr.bf16.mxu1 %v15658_v16  ;;  %v5391_v48 = vld [vmem:[#allocation10 + $0xb8] sm:$0xff]  ;;  %v17556_v23 = vmax.f32 %v17555_v9, 0.0 }
 0x479   :  { %v8889_v30 = vadd.f32 %v8888_v38, %v8887_v57  ;;  %v15668_v60 = vpop.f32.mrb[238].mxu1  ;;  %4616 = vmatprep.mubr.f32.mxu0 %v17554_v19 }
 0x47a   :  { %17553 = vst [vmem:[#allocation38_spill] sm:$0xff] %v15668_v60  ;;  %v10306_v47 = vpop.f32.mrb[239].mxu1  ;;  %10592 = vmatmul.mubr.f32.gmra.mrb[88].mxu1 %v15228_v62  ;;  %v5393_v60 = vld [vmem:[#allocation10 + $0xc8] sm:$0xff] }
 0x47b   :  { %v15675_v29 = vadd.f32 %v8889_v30, %v15432_v53  ;;  %v8890_v45 = vpop.f32.mrb[204].mxu0  ;;  %10594 = vmatprep.mubr.msk.f32.mxu1 %vm12824_vm1, %v17163_v31  ;;  %11696 = vmatpush3.bf16.msra.mxu1 %v15658_v16  ;;  %v15687_v30 = vpack.c.bf16 %v5391_v48, %v5390_v52  ;;  %v17558_v48 = vld [vmem:[#allocation135_spill] sm:$0xff]  ;;  %v17559_v52 = vld [vmem:[#allocation136_spill] sm:$0xff] }
 0x47c   :  { %v8891_v57 = vpop.f32.mrb[205].mxu0  ;;  %4617 = vmatmul.mubr.f32.gmra.mrb[88].mxu0 %v17475_v27  ;;  %11698 = vmatprep.subr.bf16.mxu1 %v15672_v18  ;;  %v5392_v27 = vld [vmem:[#allocation10 + $0xc0] sm:$0xff] }
 0x47d   :  { %v8892_v38 = vadd.f32 %v8891_v57, %v8890_v45  ;;  %v15682_v62 = vpop.f32.mrb[240].mxu1  ;;  %4826 = vmatprep.mubr.f32.mxu0 %v17556_v23  ;;  %v17557_v57 = vld [vmem:[#allocation84_spill] sm:$0xff] }
 0x47e   :  { %v10309_v53 = vpop.f32.mrb[241].mxu1  ;;  %10595 = vmatmul.mubr.f32.gmra.mrb[90].mxu1 %v15245_v1 }
 0x47f   :  { %v15690_v47 = vadd.f32 %v8892_v38, %v15446_v41  ;;  %v8893_v19 = vpop.f32.mrb[206].mxu0  ;;  %10597 = vmatprep.mubr.msk.f32.mxu1 %vm12824_vm1, %v17163_v31  ;;  %11700 = vmatpush3.bf16.msra.mxu1 %v15672_v18  ;;  %v15703_v38 = vpack.c.bf16 %v5393_v60, %v5392_v27  ;;  %v17561_v60 = vld [vmem:[#allocation138_spill] sm:$0xff] }
 0x480   :  { %v8894_v45 = vpop.f32.mrb[207].mxu0  ;;  %4827 = vmatmul.mubr.f32.vlgmr.msra.gmra.mrb[90].mxu0 %v17557_v57  ;;  %11702 = vmatprep.subr.bf16.mxu1 %v15687_v30 }
 0x481   :  { %v8895_v9 = vadd.f32 %v8894_v45, %v8893_v19  ;;  %v15697_v1 = vpop.f32.mrb[242].mxu1  ;;  %4831 = vmatprep.mubr.f32.mxu0 %v17487_v14  ;;  %11508 = vmatpush3.bf16.msra.mxu0 %v17558_v48  ;;  %v5394_v19 = vld [vmem:[#allocation10 + $0xd0] sm:$0xff]  ;;  %v5395_v45 = vld [vmem:[#allocation10 + $0xd8] sm:$0xff] }
 0x482   :  { %v10312_v41 = vpop.f32.mrb[243].mxu1  ;;  %10598 = vmatmul.mubr.f32.gmra.mrb[92].mxu1 %v15264_v36  ;;  %11510 = vmatprep.subr.bf16.mxu0 %v17559_v52  ;;  %v5397_v52 = vld [vmem:[#allocation10 + $0xe8] sm:$0xff] }
 0x483   :  { %v15706_v23 = vadd.f32 %v8895_v9, %v15458_v63  ;;  %v8896_v53 = vpop.f32.mrb[208].mxu0  ;;  %10600 = vmatprep.mubr.msk.f32.mxu1 %vm12824_vm1, %v17163_v31  ;;  %11704 = vmatpush3.bf16.msra.mxu1 %v15687_v30  ;;  %v17560_v63 = vld [vmem:[#allocation137_spill] sm:$0xff]  ;;  %v15719_v9 = vpack.c.bf16 %v5395_v45, %v5394_v19  ;;  %v17564_v45 = vld [vmem:[#allocation140_spill] sm:$0xff] }
 0x484   :  { %v8897_v14 = vpop.f32.mrb[209].mxu0  ;;  %4832 = vmatmul.mubr.f32.gmra.mrb[92].mxu0 %v17491_v42  ;;  %11706 = vmatprep.subr.bf16.mxu1 %v15703_v38  ;;  %v5396_v41 = vld [vmem:[#allocation10 + $0xe0] sm:$0xff] }
 0x485   :  { %v8898_v36 = vadd.f32 %v8897_v14, %v8896_v53  ;;  %v15713_v57 = vpop.f32.mrb[244].mxu1  ;;  %4836 = vmatprep.mubr.f32.mxu0 %v17494_v54  ;;  %11512 = vmatpush3.bf16.msra.mxu0 %v17560_v63 }
 0x486   :  { %v10315_v27 = vpop.f32.mrb[245].mxu1  ;;  %10601 = vmatmul.mubr.f32.gmra.mrb[94].mxu1 %v15283_v55  ;;  %11514 = vmatprep.subr.bf16.mxu0 %v17561_v60  ;;  %v5398_v60 = vld [vmem:[#allocation10 + $0xf0] sm:$0xff] }
 0x487   :  { %v15722_v48 = vadd.f32 %v8898_v36, %v15470_v49  ;;  %v8899_v42 = vpop.f32.mrb[210].mxu0  ;;  %10603 = vmatprep.mubr.msk.f32.mxu1 %vm12824_vm1, %v17163_v31  ;;  %11708 = vmatpush3.bf16.msra.mxu1 %v15703_v38  ;;  %v17563_v49 = vld [vmem:[#allocation139_spill] sm:$0xff]  ;;  %v15735_v36 = vpack.c.bf16 %v5397_v52, %v5396_v41  ;;  %v17567_v52 = vld [vmem:[#allocation142_spill] sm:$0xff] }
 0x488   :  { %v8900_v53 = vpop.f32.mrb[211].mxu0  ;;  %4837 = vmatmul.mubr.f32.gmra.mrb[94].mxu0 %v13999_v24  ;;  %11710 = vmatprep.subr.bf16.mxu1 %v15719_v9 }
 0x489   :  { %v8901_v55 = vadd.f32 %v8900_v53, %v8899_v42  ;;  %v15729_v14 = vpop.f32.mrb[246].mxu1  ;;  %4841 = vmatprep.mubr.f32.mxu0 %v17500_v11  ;;  %11516 = vmatpush3.bf16.msra.mxu0 %v17563_v49  ;;  %v5399_v42 = vld [vmem:[#allocation10 + $0xf8] sm:$0xff] }
 0x48a   :  { %17562 = vst [vmem:[#allocation63_spill] sm:$0xff] %v15729_v14  ;;  %v10318_v19 = vpop.f32.mrb[247].mxu1  ;;  %10604 = vmatmul.mubr.f32.gmra.mrb[96].mxu1 %v15302_v21  ;;  %11518 = vmatprep.subr.bf16.mxu0 %v17564_v45 }
 0x48b   :  { %v15738_v63 = vadd.f32 %v8901_v55, %v15485_v2  ;;  %v8902_v27 = vpop.f32.mrb[212].mxu0  ;;  %10606 = vmatprep.mubr.msk.f32.mxu1 %vm12824_vm1, %v17163_v31  ;;  %11712 = vmatpush3.bf16.msra.mxu1 %v15719_v9  ;;  %v17566_v2 = vld [vmem:[#allocation141_spill] sm:$0xff]  ;;  %v15751_v55 = vpack.c.bf16 %v5399_v42, %v5398_v60  ;;  %v17569_v60 = vld [vmem:[#allocation143_spill] sm:$0xff] }
 0x48c   :  { %v8903_v53 = vpop.f32.mrb[213].mxu0  ;;  %4842 = vmatmul.mubr.f32.gmra.mrb[96].mxu0 %v14014_v20  ;;  %11714 = vmatprep.subr.bf16.mxu1 %v15735_v36  ;;  %v17568_v19 = vld [vmem:[#allocation53_spill] sm:$0xff] }
 0x48d   :  { %v8904_v21 = vadd.f32 %v8903_v53, %v8902_v27  ;;  %v15745_v49 = vpop.f32.mrb[248].mxu1  ;;  %4846 = vmatprep.mubr.f32.mxu0 %v17507_v8  ;;  %11520 = vmatpush3.bf16.msra.mxu0 %v17566_v2  ;;  %v5367_v27 = vld [vmem:[#allocation10] sm:$0xff]  ;;  %v5368_v53 = vld [vmem:[#allocation10 + $0x8] sm:$0xff] }
 0x48e   :  { %17565 = vst [vmem:[#allocation121_spill] sm:$0xff] %v15745_v49  ;;  %v10321_v41 = vpop.f32.mrb[249].mxu1  ;;  %10607 = vmatmul.mubr.f32.gmra.mrb[98].mxu1 %v15321_v39  ;;  %11522 = vmatprep.subr.bf16.mxu0 %v17567_v52 }
 0x48f   :  { %v15754_v45 = vadd.f32 %v8904_v21, %v17568_v19  ;;  %v8905_v14 = vpop.f32.mrb[214].mxu0  ;;  %10609 = vmatprep.mubr.msk.f32.mxu1 %vm12824_vm1, %v17163_v31  ;;  %11716 = vmatpush3.bf16.msra.mxu1 %v15735_v36  ;;  %v17570_v21 = vld [vmem:[#allocation144_spill] sm:$0xff]  ;;  %v15767_v41 = vpack.c.bf16 %v5368_v53, %v5367_v27  ;;  %v17573_v27 = vld [vmem:[#allocation105_spill] sm:$0xff] }
 0x490   :  { %v8906_v49 = vpop.f32.mrb[215].mxu0  ;;  %4847 = vmatmul.mubr.f32.gmra.mrb[98].mxu0 %v14029_v59  ;;  %11718 = vmatprep.subr.bf16.mxu1 %v15751_v55  ;;  %v17574_v53 = vld [vmem:[#allocation145_spill] sm:$0xff] }
 0x491   :  { %v8907_v39 = vadd.f32 %v8906_v49, %v8905_v14  ;;  %v15761_v2 = vpop.f32.mrb[250].mxu1  ;;  %4851 = vmatprep.mubr.f32.mxu0 %v17513_v61  ;;  %11524 = vmatpush3.bf16.msra.mxu0 %v17569_v60  ;;  %17571 = vst [vmem:[#allocation39_spill] sm:$0xff] %v15767_v41 }
 0x492   :  { %v10324_v42 = vpop.f32.mrb[251].mxu1  ;;  %10610 = vmatmul.mubr.f32.gmra.mrb[100].mxu1 %v15340_v15  ;;  %11526 = vmatprep.subr.bf16.mxu0 %v17570_v21 }
 0x493   :  { %v15770_v52 = vadd.f32 %v8907_v39, %v15513_v22  ;;  %v8908_v19 = vpop.f32.mrb[216].mxu0  ;;  %10612 = vmatprep.mubr.msk.f32.mxu1 %vm12824_vm1, %v17163_v31  ;;  %11720 = vmatpush3.bf16.msra.mxu1 %v15751_v55  ;;  %v17575_v39 = vld [vmem:[#allocation55_spill] sm:$0xff] }
 0x494   :  { %v8909_v14 = vpop.f32.mrb[217].mxu0  ;;  %4852 = vmatmul.mubr.f32.gmra.mrb[100].mxu0 %v14044_v4  ;;  %11722 = vmatprep.subr.bf16.mxu1 %v15767_v41 }
 0x495   :  { %v8910_v49 = vadd.f32 %v8909_v14, %v8908_v19  ;;  %v15777_v15 = vpop.f32.mrb[252].mxu1  ;;  %4856 = vmatprep.mubr.f32.mxu0 %v17519_v7  ;;  %11528 = vmatpush3.bf16.msra.mxu0 %v17573_v27  ;;  %v17577_v27 = vld [vmem:[#allocation146_spill] sm:$0xff] }
 0x496   :  { %17572 = vst [vmem:[#allocation40_spill] sm:$0xff] %v15777_v15  ;;  %v10359_v22 = vpop.f32.mrb[253].mxu1  ;;  %10613 = vmatmul.mubr.f32.gmra.mrb[102].mxu1 %v15358_v56  ;;  %11530 = vmatprep.subr.bf16.mxu0 %v17574_v53 }
 0x497   :  { %v15784_v60 = vadd.f32 %v8910_v49, %v17575_v39  ;;  %v8911_v42 = vpop.f32.mrb[218].mxu0  ;;  %10615 = vmatprep.mubr.msk.f32.mxu1 %vm12824_vm1, %v17163_v31  ;;  %v17578_v22 = vld [vmem:[#allocation147_spill] sm:$0xff] }
 0x498   :  { %v8912_v21 = vpop.f32.mrb[219].mxu0  ;;  %4857 = vmatmul.mubr.f32.gmra.mrb[0].mxu0 %v14059_v12  ;;  %v17579_v49 = vld [vmem:[#allocation31_spill] sm:$0xff] }
 0x499   :  { %v8913_v19 = vadd.f32 %v8912_v21, %v8911_v42  ;;  %v15789_v14 = vpop.f32.mrb[254].mxu1  ;;  %4861 = vmatprep.mubr.f32.mxu0 %v17524_v10  ;;  %11532 = vmatpush3.bf16.msra.mxu0 %v17577_v27  ;;  %v17581_v27 = vld [vmem:[#allocation148_spill] sm:$0xff] }
 0x49a   :  { %17576 = vst [vmem:[#allocation65_spill] sm:$0xff] %v15789_v14  ;;  %v10362_v56 = vpop.f32.mrb[255].mxu1  ;;  %10616 = vmatmul.mubr.f32.gmra.mrb[104].mxu1 %v15375_v26  ;;  %11534 = vmatprep.subr.bf16.mxu0 %v17578_v22 }
 0x49b   :  { %v15796_v53 = vadd.f32 %v8913_v19, %v17579_v49  ;;  %v8914_v39 = vpop.f32.mrb[220].mxu0  ;;  %10618 = vmatprep.mubr.msk.f32.mxu1 %vm12824_vm1, %v17163_v31 }
 0x49c   :  { %v8915_v15 = vpop.f32.mrb[221].mxu0  ;;  %4862 = vmatmul.mubr.f32.gmra.mrb[2].mxu0 %v14074_v34 }
 0x49d   :  { %v8916_v42 = vadd.f32 %v8915_v15, %v8914_v39  ;;  %v15801_v21 = vpop.f32.mrb[34].mxu1  ;;  %4866 = vmatprep.mubr.f32.mxu0 %v17529_v37  ;;  %11536 = vmatpush3.bf16.msra.mxu0 %v17581_v27 }
 0x49e   :  { %17580 = vst [vmem:[#allocation124_spill] sm:$0xff] %v15801_v21  ;;  %v10365_v26 = vpop.f32.mrb[35].mxu1  ;;  %10619 = vmatmul.mubr.f32.gmra.mrb[106].mxu1 %v15392_v5  ;;  %11562 = vmatprep.subr.bf16.mxu0 %v15564_v13 }
 0x49f   :  { %v15808_v19 = vadd.f32 %v8916_v42, %v15558_v51  ;;  %v8980_v56 = vpop.f32.mrb[222].mxu0  ;;  %10621 = vmatprep.mubr.msk.f32.mxu1 %vm12824_vm1, %v17163_v31 }
 0x4a0   :  { %v8981_v22 = vpop.f32.mrb[223].mxu0  ;;  %4867 = vmatmul.mubr.f32.gmra.mrb[4].mxu0 %v17393_v17 }
 0x4a1   :  { %v8982_v15 = vadd.f32 %v8981_v22, %v8980_v56  ;;  %v15813_v49 = vpop.f32.mrb[36].mxu1  ;;  %4871 = vmatprep.mubr.f32.mxu0 %v17534_v35 }
 0x4a2   :  { %17582 = vst [vmem:[#allocation41_spill] sm:$0xff] %v15813_v49  ;;  %v10368_v39 = vpop.f32.mrb[37].mxu1  ;;  %10622 = vmatmul.mubr.f32.gmra.mrb[108].mxu1 %v15407_v3 }
 0x4a3   :  { %v3944_v5 = vadd.f32 %v8982_v15, %v15619_v44  ;;  %v8983_v27 = vpop.f32.mrb[224].mxu0  ;;  %10624 = vmatprep.mubr.msk.f32.mxu1 %vm12824_vm1, %v17163_v31 }
 0x4a4   :  { %v8984_v51 = vpop.f32.mrb[225].mxu0  ;;  %4872 = vmatmul.mubr.f32.gmra.mrb[6].mxu0 %v17399_v50 }
 0x4a5   :  { %v15822_v42 = vadd.f32 %v15575_v46, %v3944_v5  ;;  %v8985_v26 = vadd.f32 %v8984_v51, %v8983_v27  ;;  %v15824_v56 = vpop.f32.mrb[38].mxu1  ;;  %4876 = vmatprep.mubr.f32.mxu0 %v17539_v32  ;;  %v17587_v51 = vld [vmem:[#allocation131_spill] sm:$0xff] }
 0x4a6   :  { %17584 = vst [vmem:[#allocation125_spill] sm:$0xff] %v15824_v56  ;;  %v10371_v22 = vpop.f32.mrb[39].mxu1  ;;  %10625 = vmatmul.mubr.f32.gmra.mrb[110].mxu1 %v15422_v6  ;;  %v17588_v6 = vmax.f32 %v17587_v51, 0.0  ;;  %v17590_v56 = vld [vmem:[#allocation134_spill] sm:$0xff] }
 0x4a7   :  { %17583 = vst [vmem:[#allocation42_spill] sm:$0xff] %v15822_v42  ;;  %v3949_v3 = vadd.f32 %v8985_v26, %v15629_v58  ;;  %v8986_v44 = vpop.f32.mrb[226].mxu0  ;;  %10627 = vmatprep.mubr.msk.f32.mxu1 %vm12824_vm1, %v17163_v31  ;;  %v17589_v58 = vld [vmem:[#allocation36_spill] sm:$0xff]  ;;  %v2558_v49 = vmax.f32 %v17590_v56, 0.0  ;;  %v17597_v56 = vld [vmem:[#allocation113_spill] sm:$0xff] }
 0x4a8   :  { %v8987_v15 = vpop.f32.mrb[227].mxu0  ;;  %4877 = vmatmul.mubr.f32.gmra.mrb[8].mxu0 %v14114_v0 }
 0x4a9   :  { %v15833_v46 = vadd.f32 %v15588_v40, %v3949_v3  ;;  %v8988_v39 = vadd.f32 %v8987_v15, %v8986_v44  ;;  %v15835_v5 = vpop.f32.mrb[40].mxu1  ;;  %4881 = vmatprep.mubr.f32.mxu0 %v17541_v25  ;;  %v17591_v40 = vld [vmem:[#allocation71_spill] sm:$0xff]  ;;  %v17592_v3 = vld [vmem:[#allocation34_spill] sm:$0xff] }
 0x4aa   :  { %17586 = vst [vmem:[#allocation44_spill] sm:$0xff] %v15835_v5  ;;  %v10374_v27 = vpop.f32.mrb[41].mxu1  ;;  %10628 = vmatmul.mubr.f32.gmra.mrb[112].mxu1 %v17588_v6 }
 0x4ab   :  { %17585 = vst [vmem:[#allocation43_spill] sm:$0xff] %v15833_v46  ;;  %v3954_v26 = vadd.f32 %v8988_v39, %v17589_v58  ;;  %v8989_v22 = vpop.f32.mrb[228].mxu0  ;;  %10630 = vmatprep.mubr.msk.f32.mxu1 %vm12824_vm1, %v17163_v31  ;;  %v17594_v27 = vld [vmem:[#allocation69_spill] sm:$0xff]  ;;  %v17595_v39 = vld [vmem:[#allocation116_spill] sm:$0xff] }
 0x4ac   :  { %v8990_v21 = vpop.f32.mrb[229].mxu0  ;;  %4882 = vmatmul.mubr.f32.gmra.mrb[10].mxu0 %v17591_v40  ;;  %v17596_v31 = vld [vmem:[#allocation73_spill] sm:$0xff] }
 0x4ad   :  { %v15846_v44 = vadd.f32 %v17592_v3, %v3954_v26  ;;  %v8991_v15 = vadd.f32 %v8990_v21, %v8989_v22  ;;  %v15848_v5 = vpop.f32.mrb[42].mxu1  ;;  %4886 = vmatprep.mubr.f32.mxu0 %v17594_v27  ;;  %v17600_v26 = vld [vmem:[#allocation70_spill] sm:$0xff] }
 0x4ae   :  { %17593 = vst [vmem:[#allocation126_spill] sm:$0xff] %v15848_v5  ;;  %v10377_v51 = vpop.f32.mrb[43].mxu1  ;;  %10631 = vmatmul.mubr.f32.gmra.mrb[114].mxu1 %v2558_v49  ;;  %v17601_v49 = vld [vmem:[#allocation22_spill] sm:$0xff] }
 0x4af   :  { %v3959_v6 = vadd.f32 %v8991_v15, %v17595_v39  ;;  %v8992_v58 = vpop.f32.mrb[230].mxu0 }
 0x4b0   :  { %v8993_v46 = vpop.f32.mrb[231].mxu0  ;;  %4887 = vmatmul.mubr.f32.gmra.mrb[12].mxu0 %v17596_v31 }
 0x4b1   :  { %v15854_v14 = vadd.f32 %v17597_v56, %v3959_v6  ;;  %v8994_v42 = vadd.f32 %v8993_v46, %v8992_v58  ;;  %v15856_v40 = vpop.f32.mrb[44].mxu1  ;;  %4891 = vmatprep.mubr.f32.mxu0 %v17600_v26 }
 0x4b2   :  { %17599 = vst [vmem:[#allocation46_spill] sm:$0xff] %v15856_v40  ;;  %v10380_v21 = vpop.f32.mrb[45].mxu1 }
 0x4b3   :  { %17598 = vst [vmem:[#allocation45_spill] sm:$0xff] %v15854_v14  ;;  %v3964_v22 = vadd.f32 %v8994_v42, %v15661_v33  ;;  %v8995_v3 = vpop.f32.mrb[232].mxu0  ;;  %v17603_v21 = vld [vmem:[#allocation76_spill] sm:$0xff]  ;;  %v17604_v33 = vld [vmem:[#allocation35_spill] sm:$0xff] }
 0x4b4   :  { %v8996_v51 = vpop.f32.mrb[233].mxu0  ;;  %4892 = vmatmul.mubr.f32.gmra.mrb[14].mxu0 %v14147_v43 }
 0x4b5   :  { %v15862_v15 = vadd.f32 %v17601_v49, %v3964_v22  ;;  %v8997_v39 = vadd.f32 %v8996_v51, %v8995_v3  ;;  %v15864_v5 = vpop.f32.mrb[46].mxu1  ;;  %4896 = vmatprep.mubr.f32.mxu0 %v17551_v28 }
 0x4b6   :  { %17602 = vst [vmem:[#allocation127_spill] sm:$0xff] %v15864_v5  ;;  %v10383_v46 = vpop.f32.mrb[47].mxu1 }
 0x4b7   :  { %v3969_v6 = vadd.f32 %v8997_v39, %v15675_v29  ;;  %v8998_v58 = vpop.f32.mrb[234].mxu0  ;;  %v17605_v29 = vld [vmem:[#allocation61_spill] sm:$0xff] }
 0x4b8   :  { %v8999_v56 = vpop.f32.mrb[235].mxu0  ;;  %4897 = vmatmul.mubr.f32.gmra.mrb[16].mxu0 %v17603_v21 }
 0x4b9   :  { %v15870_v42 = vadd.f32 %v17604_v33, %v3969_v6  ;;  %v9000_v40 = vadd.f32 %v8999_v56, %v8998_v58  ;;  %v15872_v14 = vpop.f32.mrb[48].mxu1  ;;  %5106 = vmatprep.mubr.f32.mxu0 %v17494_v54 }
 0x4ba   :  { %v10386_v22 = vpop.f32.mrb[49].mxu1 }
 0x4bb   :  { %v3974_v3 = vadd.f32 %v9000_v40, %v15690_v47  ;;  %v9001_v51 = vpop.f32.mrb[236].mxu0 }
 0x4bc   :  { %v9002_v49 = vpop.f32.mrb[237].mxu0  ;;  %5107 = vmatmul.mubr.f32.vlgmr.msra.gmra.mrb[18].mxu0 %v13999_v24  ;;  %v17606_v24 = vld [vmem:[#allocation37_spill] sm:$0xff] }
 0x4bd   :  { %v15878_v39 = vadd.f32 %v17605_v29, %v3974_v3  ;;  %v9003_v46 = vadd.f32 %v9002_v49, %v9001_v51  ;;  %v15880_v5 = vpop.f32.mrb[50].mxu1  ;;  %5111 = vmatprep.mubr.f32.mxu0 %v17500_v11  ;;  %11564 = vmatpush3.bf16.msra.mxu0 %v15564_v13 }
 0x4be   :  { %v10389_v6 = vpop.f32.mrb[51].mxu1  ;;  %11566 = vmatprep.subr.bf16.mxu0 %v15658_v16 }
 0x4bf   :  { %v3979_v54 = vadd.f32 %v9003_v46, %v15706_v23  ;;  %v9004_v47 = vpop.f32.mrb[238].mxu0 }
 0x4c0   :  { %v9005_v40 = vpop.f32.mrb[239].mxu0  ;;  %5112 = vmatmul.mubr.f32.gmra.mrb[20].mxu0 %v14014_v20  ;;  %v17607_v20 = vld [vmem:[#allocation38_spill] sm:$0xff] }
 0x4c1   :  { %v15888_v58 = vadd.f32 %v17606_v24, %v3979_v54  ;;  %v9006_v56 = vadd.f32 %v9005_v40, %v9004_v47  ;;  %v15890_v33 = vpop.f32.mrb[52].mxu1  ;;  %5116 = vmatprep.mubr.f32.mxu0 %v17507_v8  ;;  %11568 = vmatpush3.bf16.msra.mxu0 %v15658_v16 }
 0x4c2   :  { %v10392_v11 = vpop.f32.mrb[53].mxu1  ;;  %11570 = vmatprep.subr.bf16.mxu0 %v15672_v18 }
 0x4c3   :  { %v3984_v13 = vadd.f32 %v9006_v56, %v15722_v48  ;;  %v9007_v23 = vpop.f32.mrb[240].mxu0 }
 0x4c4   :  { %v9008_v22 = vpop.f32.mrb[241].mxu0  ;;  %5117 = vmatmul.mubr.f32.gmra.mrb[22].mxu0 %v14029_v59 }
 0x4c5   :  { %v15898_v3 = vadd.f32 %v17607_v20, %v3984_v13  ;;  %v9009_v51 = vadd.f32 %v9008_v22, %v9007_v23  ;;  %v15900_v49 = vpop.f32.mrb[54].mxu1  ;;  %5121 = vmatprep.mubr.f32.mxu0 %v17513_v61  ;;  %11572 = vmatpush3.bf16.msra.mxu0 %v15672_v18 }
 0x4c6   :  { %v10395_v8 = vpop.f32.mrb[55].mxu1  ;;  %11574 = vmatprep.subr.bf16.mxu0 %v15687_v30 }
 0x4c7   :  { %v3989_v16 = vadd.f32 %v9009_v51, %v15738_v63  ;;  %v9010_v48 = vpop.f32.mrb[242].mxu0 }
 0x4c8   :  { %v9011_v29 = vpop.f32.mrb[243].mxu0  ;;  %5122 = vmatmul.mubr.f32.gmra.mrb[24].mxu0 %v14044_v4 }
 0x4c9   :  { %v15908_v59 = vadd.f32 %v15682_v62, %v3989_v16  ;;  %v9012_v46 = vadd.f32 %v9011_v29, %v9010_v48  ;;  %v15910_v6 = vpop.f32.mrb[56].mxu1  ;;  %5126 = vmatprep.mubr.f32.mxu0 %v17519_v7  ;;  %11576 = vmatpush3.bf16.msra.mxu0 %v15687_v30  ;;  %v17610_v29 = vld [vmem:[#allocation40_spill] sm:$0xff] }
 0x4ca   :  { %v10398_v61 = vpop.f32.mrb[57].mxu1  ;;  %11578 = vmatprep.subr.bf16.mxu0 %v15703_v38 }
 0x4cb   :  { %v3994_v18 = vadd.f32 %v9012_v46, %v15754_v45  ;;  %v9013_v63 = vpop.f32.mrb[244].mxu0 }
 0x4cc   :  { %v9014_v54 = vpop.f32.mrb[245].mxu0  ;;  %5127 = vmatmul.mubr.f32.gmra.mrb[26].mxu0 %v14059_v12 }
 0x4cd   :  { %v15918_v4 = vadd.f32 %v15697_v1, %v3994_v18  ;;  %v9015_v62 = vadd.f32 %v9014_v54, %v9013_v63  ;;  %v15920_v47 = vpop.f32.mrb[58].mxu1  ;;  %5131 = vmatprep.mubr.f32.mxu0 %v17524_v10  ;;  %11580 = vmatpush3.bf16.msra.mxu0 %v15703_v38  ;;  %v17611_v18 = vld [vmem:[#allocation71_spill] sm:$0xff] }
 0x4ce   :  { %v10401_v7 = vpop.f32.mrb[59].mxu1  ;;  %11582 = vmatprep.subr.bf16.mxu0 %v15719_v9 }
 0x4cf   :  { %v3999_v30 = vadd.f32 %v9015_v62, %v15770_v52  ;;  %v9016_v45 = vpop.f32.mrb[246].mxu0 }
 0x4d0   :  { %v9017_v40 = vpop.f32.mrb[247].mxu0  ;;  %5132 = vmatmul.mubr.f32.gmra.mrb[28].mxu0 %v14074_v34  ;;  %v17608_v34 = vld [vmem:[#allocation63_spill] sm:$0xff] }
 0x4d1   :  { %v15928_v12 = vadd.f32 %v15713_v57, %v3999_v30  ;;  %v9018_v1 = vadd.f32 %v9017_v40, %v9016_v45  ;;  %v15930_v24 = vpop.f32.mrb[60].mxu1  ;;  %5136 = vmatprep.mubr.f32.mxu0 %v17529_v37  ;;  %11584 = vmatpush3.bf16.msra.mxu0 %v15719_v9 }
 0x4d2   :  { %v10436_v10 = vpop.f32.mrb[61].mxu1  ;;  %11586 = vmatprep.subr.bf16.mxu0 %v15735_v36 }
 0x4d3   :  { %v4004_v38 = vadd.f32 %v9018_v1, %v15784_v60  ;;  %v9019_v52 = vpop.f32.mrb[248].mxu0 }
 0x4d4   :  { %v9020_v56 = vpop.f32.mrb[249].mxu0  ;;  %5137 = vmatmul.mubr.f32.gmra.mrb[30].mxu0 %v17393_v17  ;;  %v17609_v17 = vld [vmem:[#allocation121_spill] sm:$0xff] }
 0x4d5   :  { %v15938_v11 = vadd.f32 %v17608_v34, %v4004_v38  ;;  %v9021_v57 = vadd.f32 %v9020_v56, %v9019_v52  ;;  %v15940_v13 = vpop.f32.mrb[62].mxu1  ;;  %5141 = vmatprep.mubr.f32.mxu0 %v17534_v35  ;;  %11588 = vmatpush3.bf16.msra.mxu0 %v15735_v36  ;;  %v17615_v52 = vld [vmem:[#allocation124_spill] sm:$0xff] }
 0x4d6   :  { %v10439_v37 = vpop.f32.mrb[63].mxu1  ;;  %11590 = vmatprep.subr.bf16.mxu0 %v15751_v55 }
 0x4d7   :  { %v4009_v9 = vadd.f32 %v9021_v57, %v15796_v53  ;;  %v9022_v60 = vpop.f32.mrb[250].mxu0 }
 0x4d8   :  { %v9023_v23 = vpop.f32.mrb[251].mxu0  ;;  %5142 = vmatmul.mubr.f32.gmra.mrb[32].mxu0 %v17399_v50 }
 0x4d9   :  { %v15948_v22 = vadd.f32 %v17609_v17, %v4009_v9  ;;  %v9024_v20 = vadd.f32 %v9023_v23, %v9022_v60  ;;  %v15950_v51 = vpop.f32.mrb[64].mxu1  ;;  %5146 = vmatprep.mubr.f32.mxu0 %v17539_v32  ;;  %11592 = vmatpush3.bf16.msra.mxu0 %v15751_v55  ;;  %v17616_v60 = vld [vmem:[#allocation41_spill] sm:$0xff] }
 0x4da   :  { %v10442_v35 = vpop.f32.mrb[65].mxu1  ;;  %11594 = vmatprep.subr.bf16.mxu0 %v15767_v41 }
 0x4db   :  { %v4014_v36 = vadd.f32 %v9024_v20, %v15808_v19  ;;  %v9088_v53 = vpop.f32.mrb[252].mxu0  ;;  %v17612_v19 = vld [vmem:[#allocation42_spill] sm:$0xff] }
 0x4dc   :  { %v9089_v8 = vpop.f32.mrb[253].mxu0  ;;  %5147 = vmatmul.mubr.f32.gmra.mrb[102].mxu0 %v14114_v0 }
 0x4dd   :  { %v15958_v50 = vadd.f32 %v15761_v2, %v4014_v36  ;;  %v9090_v16 = vadd.f32 %v9089_v8, %v9088_v53  ;;  %v15960_v48 = vpop.f32.mrb[66].mxu1  ;;  %5151 = vmatprep.mubr.f32.mxu0 %v17541_v25  ;;  %v17613_v2 = vld [vmem:[#allocation65_spill] sm:$0xff]  ;;  %v17614_v25 = vld [vmem:[#allocation43_spill] sm:$0xff] }
 0x4de   :  { %v10445_v32 = vpop.f32.mrb[67].mxu1 }
 0x4df   :  { %v4364_v55 = vadd.f32 %v9090_v16, %v17610_v29  ;;  %v9091_v46 = vpop.f32.mrb[254].mxu0  ;;  %v17619_v16 = vld [vmem:[#allocation125_spill] sm:$0xff] }
 0x4e0   :  { %v9092_v61 = vpop.f32.mrb[255].mxu0  ;;  %5152 = vmatmul.mubr.f32.gmra.mrb[104].mxu0 %v17611_v18 }
 0x4e1   :  { %v4437_v63 = vadd.f32 %v4364_v55, %v17612_v19  ;;  %v9093_v54 = vadd.f32 %v9092_v61, %v9091_v46  ;;  %v15966_v62 = vpop.f32.mrb[0].mxu1  ;;  %5156 = vmatprep.mubr.f32.mxu0 %v17594_v27  ;;  %v17621_v46 = vld [vmem:[#allocation79_spill] sm:$0xff]  ;;  %v17622_v19 = vld [vmem:[#allocation82_spill] sm:$0xff] }
 0x4e2   :  { %v10448_v0 = vpop.f32.mrb[1].mxu1 }
 0x4e3   :  { %v4369_v7 = vadd.f32 %v9093_v54, %v17613_v2  ;;  %v9094_v30 = vpop.f32.mrb[34].mxu0  ;;  %v17623_v54 = vmax.f32 %v17622_v19, 0.0 }
 0x4e4   :  { %v9095_v45 = vpop.f32.mrb[35].mxu0  ;;  %5157 = vmatmul.mubr.f32.gmra.mrb[106].mxu0 %v17596_v31 }
 0x4e5   :  { %v4438_v40 = vadd.f32 %v4369_v7, %v17614_v25  ;;  %v9096_v1 = vadd.f32 %v9095_v45, %v9094_v30  ;;  %v15972_v10 = vpop.f32.mrb[2].mxu1  ;;  %5161 = vmatprep.mubr.f32.mxu0 %v17600_v26  ;;  %v17617_v26 = vld [vmem:[#allocation45_spill] sm:$0xff]  ;;  %v17624_v30 = vld [vmem:[#allocation44_spill] sm:$0xff] }
 0x4e6   :  { %v10451_v38 = vpop.f32.mrb[3].mxu1 }
 0x4e7   :  { %v4374_v56 = vadd.f32 %v9096_v1, %v17615_v52  ;;  %v9097_v34 = vpop.f32.mrb[36].mxu0  ;;  %v5369_v1 = vld [vmem:[#allocation10 + $0x10] sm:$0xff]  ;;  %v5370_v38 = vld [vmem:[#allocation10 + $0x18] sm:$0xff] }
 0x4e8   :  { %v9098_v57 = vpop.f32.mrb[37].mxu0  ;;  %5162 = vmatmul.mubr.f32.gmra.mrb[108].mxu0 %v14147_v43  ;;  %v17618_v43 = vld [vmem:[#allocation75_spill] sm:$0xff] }
 0x4e9   :  { %v4439_v27 = vadd.f32 %v4374_v56, %v15846_v44  ;;  %v9099_v37 = vadd.f32 %v9098_v57, %v9097_v34  ;;  %v15978_v9 = vpop.f32.mrb[4].mxu1  ;;  %5166 = vmatprep.mubr.f32.mxu0 %v17551_v28  ;;  %v15987_v44 = vld [vmem:[#allocation8] ss:$0 sm:$0xff] }
 0x4ea   :  { %v10454_v31 = vpop.f32.mrb[5].mxu1  ;;  %v15991_v29 = vadd.f32 %v15987_v44, %v4437_v63  ;;  %v4453_v0 = vadd.f32 %v15987_v44, %v4438_v40 }
 0x4eb   :  { %v4379_v23 = vadd.f32 %v9099_v37, %v17616_v60  ;;  %v9100_v17 = vpop.f32.mrb[38].mxu0  ;;  %v4454_v7 = vadd.f32 %v15987_v44, %v4439_v27  ;;  %v16012_v31 = vpack.c.bf16 %v5370_v38, %v5369_v1 }
 0x4ec   :  { %v9101_v20 = vpop.f32.mrb[39].mxu0  ;;  %5167 = vmatmul.mubr.f32.gmra.mrb[110].mxu0 %v17603_v21  ;;  %17620 = vst [vmem:[#allocation23_spill] sm:$0xff] %v15991_v29  ;;  %v17071_v25 = vmax.f32 %v15991_v29, 0.0  ;;  %v16009_v40 = vmax.f32 %v4453_v0, 0.0  ;;  %v5373_v0 = vld [vmem:[#allocation10 + $0x30] sm:$0xff] }
 0x4ed   :  { %v4440_v35 = vadd.f32 %v4379_v23, %v17617_v26  ;;  %v9102_v36 = vadd.f32 %v9101_v20, %v9100_v17  ;;  %v15984_v53 = vpop.f32.mrb[6].mxu1  ;;  %5171 = vmatprep.mubr.f32.mxu0 %v17618_v43  ;;  %17626 = vst [vmem:[#allocation128_spill] sm:$0xff] %v16012_v31  ;;  %v16014_v60 = vmax.f32 %v4454_v7, 0.0  ;;  %v17627_v17 = vld [vmem:[#allocation126_spill] sm:$0xff]  ;;  %v5371_v26 = vld [vmem:[#allocation10 + $0x20] sm:$0xff] }
 0x4ee   :  { %v10457_v8 = vpop.f32.mrb[7].mxu1 }
 0x4ef   :  { %v4384_v32 = vadd.f32 %v9102_v36, %v17619_v16  ;;  %v9103_v28 = vpop.f32.mrb[40].mxu0  ;;  %v4455_v27 = vadd.f32 %v15987_v44, %v4440_v35  ;;  %v5372_v36 = vld [vmem:[#allocation10 + $0x28] sm:$0xff] }
 0x4f0   :  { %v9104_v55 = vpop.f32.mrb[41].mxu0  ;;  %5172 = vmatmul.mubr.f32.gmra.mrb[112].mxu0 %v17621_v46  ;;  %v16028_v46 = vpack.c.bf16 %v5372_v36, %v5371_v26 }
 0x4f1   :  { %v4441_v21 = vadd.f32 %v4384_v32, %v15862_v15  ;;  %v9105_v61 = vadd.f32 %v9104_v55, %v9103_v28  ;;  %v15995_v18 = vpop.f32.mrb[8].mxu1  ;;  %5176 = vmatprep.mubr.f32.mxu0 %v17623_v54  ;;  %v17625_v15 = vld [vmem:[#allocation117_spill] sm:$0xff]  ;;  %v16024_v35 = vmax.f32 %v4455_v27, 0.0 }
 0x4f2   :  { %v10460_v2 = vpop.f32.mrb[9].mxu1  ;;  %17628 = vst [vmem:[#allocation26_spill] sm:$0xff] %v16028_v46 }
 0x4f3   :  { %v4389_v45 = vadd.f32 %v9105_v61, %v17624_v30  ;;  %v9106_v63 = vpop.f32.mrb[42].mxu0  ;;  %v4456_v23 = vadd.f32 %v15987_v44, %v4441_v21  ;;  %v17629_v61 = vld [vmem:[#allocation46_spill] sm:$0xff]  ;;  %v5374_v2 = vld [vmem:[#allocation10 + $0x38] sm:$0xff] }
 0x4f4   :  { %v9107_v52 = vpop.f32.mrb[43].mxu0  ;;  %5177 = vmatmul.mubr.f32.gmra.mrb[114].mxu0 %v17625_v15 }
 0x4f5   :  { %v4442_v56 = vadd.f32 %v4389_v45, %v15870_v42  ;;  %v9108_v34 = vadd.f32 %v9107_v52, %v9106_v63  ;;  %v16005_v57 = vpop.f32.mrb[10].mxu1  ;;  %10665 = vmatprep.mubr.f32.mxu0 %v17071_v25  ;;  %v16030_v21 = vmax.f32 %v4456_v23, 0.0  ;;  %v16043_v52 = vpack.c.bf16 %v5374_v2, %v5373_v0  ;;  %v5376_v23 = vld [vmem:[#allocation10 + $0x48] sm:$0xff] }
 0x4f6   :  { %v10463_v37 = vpop.f32.mrb[11].mxu1 }
 0x4f7   :  { %v4394_v20 = vadd.f32 %v9108_v34, %v17627_v17  ;;  %v9109_v42 = vpop.f32.mrb[44].mxu0  ;;  %v4457_v28 = vadd.f32 %v15987_v44, %v4442_v56  ;;  %17630 = vst [vmem:[#allocation24_spill] sm:$0xff] %v16043_v52  ;;  %v17631_v34 = vld [vmem:[#allocation127_spill] sm:$0xff]  ;;  %v5375_v37 = vld [vmem:[#allocation10 + $0x40] sm:$0xff] }
 0x4f8   :  { %v9110_v43 = vpop.f32.mrb[45].mxu0  ;;  %10666 = vmatmul.mubr.f32.vlgmr.msra.gmra.mrb[116].mxu0 %v16009_v40 }
 0x4f9   :  { %v4443_v8 = vadd.f32 %v4394_v20, %v15878_v39  ;;  %v9111_v16 = vadd.f32 %v9110_v43, %v9109_v42  ;;  %v16020_v32 = vpop.f32.mrb[12].mxu1  ;;  %10668 = vmatprep.mubr.f32.mxu0 %v16014_v60  ;;  %11596 = vmatpush3.bf16.msra.mxu0 %v15767_v41  ;;  %v16040_v1 = vmax.f32 %v4457_v28, 0.0 }
 0x4fa   :  { %v10466_v55 = vpop.f32.mrb[13].mxu1  ;;  %11598 = vmatprep.subr.bf16.mxu0 %v16012_v31 }
 0x4fb   :  { %v4458_v39 = vadd.f32 %v15987_v44, %v4443_v8  ;;  %v4399_v19 = vadd.f32 %v9111_v16, %v17629_v61  ;;  %v9112_v54 = vpop.f32.mrb[46].mxu0  ;;  %v16058_v8 = vpack.c.bf16 %v5376_v23, %v5375_v37  ;;  %v5378_v61 = vld [vmem:[#allocation10 + $0x58] sm:$0xff] }
 0x4fc   :  { %v9113_v7 = vpop.f32.mrb[47].mxu0  ;;  %10669 = vmatmul.mubr.f32.gmra.mrb[118].mxu0 %v16024_v35 }
 0x4fd   :  { %v4444_v30 = vadd.f32 %v4399_v19, %v15888_v58  ;;  %v9114_v45 = vadd.f32 %v9113_v7, %v9112_v54  ;;  %v16036_v63 = vpop.f32.mrb[14].mxu1  ;;  %10671 = vmatprep.mubr.f32.mxu0 %v16030_v21  ;;  %11600 = vmatpush3.bf16.msra.mxu0 %v16012_v31  ;;  %v16045_v15 = vmax.f32 %v4458_v39, 0.0  ;;  %17632 = vst [vmem:[#allocation129_spill] sm:$0xff] %v16058_v8  ;;  %v5377_v39 = vld [vmem:[#allocation10 + $0x50] sm:$0xff] }
 0x4fe   :  { %v10469_v38 = vpop.f32.mrb[15].mxu1  ;;  %11602 = vmatprep.subr.bf16.mxu0 %v16028_v46 }
 0x4ff   :  { %v4459_v56 = vadd.f32 %v15987_v44, %v4444_v30  ;;  %v4404_v58 = vadd.f32 %v9114_v45, %v17631_v34  ;;  %v9115_v27 = vpop.f32.mrb[48].mxu0  ;;  %v16070_v30 = vpack.c.bf16 %v5378_v61, %v5377_v39  ;;  %v5380_v34 = vld [vmem:[#allocation10 + $0x68] sm:$0xff] }
 0x500   :  { %v9116_v17 = vpop.f32.mrb[49].mxu0  ;;  %10672 = vmatmul.mubr.f32.gmra.mrb[120].mxu0 %v16040_v1 }
 0x501   :  { %v16050_v20 = vmax.f32 %v4459_v56, 0.0  ;;  %v4445_v42 = vadd.f32 %v4404_v58, %v15898_v3  ;;  %v9117_v26 = vadd.f32 %v9116_v17, %v9115_v27  ;;  %v16053_v36 = vpop.f32.mrb[16].mxu1  ;;  %10674 = vmatprep.mubr.f32.mxu0 %v16045_v15  ;;  %11604 = vmatpush3.bf16.msra.mxu0 %v16028_v46  ;;  %17633 = vst [vmem:[#allocation28_spill] sm:$0xff] %v16070_v30  ;;  %v5379_v56 = vld [vmem:[#allocation10 + $0x60] sm:$0xff] }
 0x502   :  { %v10472_v43 = vpop.f32.mrb[17].mxu1  ;;  %11606 = vmatprep.subr.bf16.mxu0 %v16043_v52 }
 0x503   :  { %v4460_v16 = vadd.f32 %v15987_v44, %v4445_v42  ;;  %v4409_v28 = vadd.f32 %v9117_v26, %v15872_v14  ;;  %v9118_v55 = vpop.f32.mrb[50].mxu0  ;;  %v16082_v42 = vpack.c.bf16 %v5380_v34, %v5379_v56 }
 0x504   :  { %v9119_v3 = vpop.f32.mrb[51].mxu0  ;;  %10675 = vmatmul.mubr.f32.gmra.mrb[122].mxu0 %v16050_v20 }
 0x505   :  { %v16063_v19 = vmax.f32 %v4460_v16, 0.0  ;;  %v4446_v54 = vadd.f32 %v4409_v28, %v15908_v59  ;;  %v9120_v0 = vadd.f32 %v9119_v3, %v9118_v55  ;;  %v16066_v2 = vpop.f32.mrb[18].mxu1  ;;  %11608 = vmatpush3.bf16.msra.mxu0 %v16043_v52  ;;  %17634 = vst [vmem:[#allocation130_spill] sm:$0xff] %v16082_v42  ;;  %v5381_v16 = vld [vmem:[#allocation10 + $0x70] sm:$0xff]  ;;  %v5382_v28 = vld [vmem:[#allocation10 + $0x78] sm:$0xff] }
 0x506   :  { %v10475_v7 = vpop.f32.mrb[19].mxu1  ;;  %11610 = vmatprep.subr.bf16.mxu0 %v16058_v8 }
 0x507   :  { %v4461_v14 = vadd.f32 %v15987_v44, %v4446_v54  ;;  %v4414_v45 = vadd.f32 %v9120_v0, %v15880_v5  ;;  %v9121_v38 = vpop.f32.mrb[52].mxu0  ;;  %10677 = vmatprep.mubr.f32.mxu0 %v16063_v19  ;;  %v16094_v0 = vpack.c.bf16 %v5382_v28, %v5381_v16 }
 0x508   :  { %v9122_v59 = vpop.f32.mrb[53].mxu0 }
 0x509   :  { %v16075_v58 = vmax.f32 %v4461_v14, 0.0  ;;  %v4447_v27 = vadd.f32 %v4414_v45, %v15918_v4  ;;  %v9123_v37 = vadd.f32 %v9122_v59, %v9121_v38  ;;  %v16078_v23 = vpop.f32.mrb[20].mxu1  ;;  %11612 = vmatpush3.bf16.msra.mxu0 %v16058_v8  ;;  %17635 = vst [vmem:[#allocation87_spill] sm:$0xff] %v16094_v0  ;;  %v5671_v45 = vld [vmem:[#allocation10 + $0x100] sm:$0xff]  ;;  %v5672_v38 = vld [vmem:[#allocation10 + $0x108] sm:$0xff] }
 0x50a   :  { %v10478_v17 = vpop.f32.mrb[21].mxu1  ;;  %11614 = vmatprep.subr.bf16.mxu0 %v16070_v30 }
 0x50b   :  { %v4462_v5 = vadd.f32 %v15987_v44, %v4447_v27  ;;  %v4419_v26 = vadd.f32 %v9123_v37, %v15890_v33  ;;  %v9124_v43 = vpop.f32.mrb[54].mxu0  ;;  %10678 = vmatmul.mubr.f32.gmra.mrb[124].mxu0 %v16075_v58  ;;  %v16106_v17 = vpack.c.bf16 %v5672_v38, %v5671_v45 }
 0x50c   :  { %v9125_v4 = vpop.f32.mrb[55].mxu0 }
 0x50d   :  { %v16087_v55 = vmax.f32 %v4462_v5, 0.0  ;;  %v4448_v39 = vadd.f32 %v4419_v26, %v15928_v12  ;;  %v9126_v61 = vadd.f32 %v9125_v4, %v9124_v43  ;;  %v16090_v3 = vpop.f32.mrb[22].mxu1  ;;  %11616 = vmatpush3.bf16.msra.mxu0 %v16070_v30  ;;  %17636 = vst [vmem:[#allocation25_spill] sm:$0xff] %v16106_v17 }
 0x50e   :  { %v10513_v54 = vpop.f32.mrb[23].mxu1  ;;  %11618 = vmatprep.subr.bf16.mxu0 %v16082_v42 }
 0x50f   :  { %v4463_v33 = vadd.f32 %v15987_v44, %v4448_v39  ;;  %v4424_v7 = vadd.f32 %v9126_v61, %v15900_v49  ;;  %v9127_v14 = vpop.f32.mrb[56].mxu0  ;;  %10680 = vmatprep.mubr.f32.mxu0 %v16087_v55  ;;  %v17638_v61 = vld [vmem:[#allocation150_spill] sm:$0xff] }
 0x510   :  { %v9128_v12 = vpop.f32.mrb[57].mxu0  ;;  %v3567_v54 = vadd.f32 %v15987_v44, %v17638_v61  ;;  %v17642_v61 = vld [vmem:[#allocation152_spill] sm:$0xff] }
 0x511   :  { %v16099_v56 = vmax.f32 %v4463_v33, 0.0  ;;  %v4449_v34 = vadd.f32 %v4424_v7, %v15938_v11  ;;  %v9129_v59 = vadd.f32 %v9128_v12, %v9127_v14  ;;  %v16102_v27 = vpop.f32.mrb[24].mxu1  ;;  %11620 = vmatpush3.bf16.msra.mxu0 %v16082_v42 }
 0x512   :  { %v10516_v37 = vpop.f32.mrb[25].mxu1  ;;  %11622 = vmatprep.subr.bf16.mxu0 %v16094_v0 }
 0x513   :  { %v4464_v49 = vadd.f32 %v15987_v44, %v4449_v34  ;;  %v4429_v5 = vadd.f32 %v9129_v59, %v15910_v6  ;;  %v9130_v26 = vpop.f32.mrb[58].mxu0  ;;  %10681 = vmatmul.mubr.f32.gmra.mrb[126].mxu0 %v16099_v56 }
 0x514   :  { %v9131_v43 = vpop.f32.mrb[59].mxu0 }
 0x515   :  { %v16111_v16 = vmax.f32 %v4464_v49, 0.0  ;;  %v4450_v11 = vadd.f32 %v4429_v5, %v15948_v22  ;;  %v9132_v28 = vadd.f32 %v9131_v43, %v9130_v26  ;;  %v16114_v4 = vpop.f32.mrb[26].mxu1  ;;  %11624 = vmatpush3.bf16.msra.mxu0 %v16094_v0  ;;  %v17639_v22 = vld [vmem:[#allocation151_spill] sm:$0xff]  ;;  %v3582_v49 = vmax.f32 %v3567_v54, 0.0  ;;  %v17641_v5 = vld [vmem:[#allocation92_spill] sm:$0xff] }
 0x516   :  { %v10519_v39 = vpop.f32.mrb[27].mxu1  ;;  %11626 = vmatprep.subr.bf16.mxu0 %v16106_v17  ;;  %v16125_v45 = vadd.f32 %v15987_v44, %v17639_v22  ;;  %v5673_v26 = vld [vmem:[#allocation10 + $0x110] sm:$0xff]  ;;  %v5674_v43 = vld [vmem:[#allocation10 + $0x118] sm:$0xff] }
 0x517   :  { %17637 = vst [vmem:[#allocation27_spill] sm:$0xff] %v16111_v16  ;;  %v4465_v6 = vadd.f32 %v15987_v44, %v4450_v11  ;;  %v4434_v33 = vadd.f32 %v9132_v28, %v15920_v47  ;;  %v9196_v7 = vpop.f32.mrb[60].mxu0  ;;  %10683 = vmatprep.mubr.f32.mxu0 %v16111_v16  ;;  %v16136_v47 = vadd.f32 %v15987_v44, %v17641_v5  ;;  %v17644_v22 = vld [vmem:[#allocation50_spill] sm:$0xff] }
 0x518   :  { %v9197_v14 = vpop.f32.mrb[61].mxu0 }
 0x519   :  { %v16127_v38 = vmax.f32 %v4465_v6, 0.0  ;;  %v16130_v12 = vadd.f32 %v4434_v33, %v15958_v50  ;;  %v9198_v34 = vadd.f32 %v9197_v14, %v9196_v7  ;;  %v16132_v59 = vpop.f32.mrb[28].mxu1  ;;  %v17072_v50 = vmax.f32 %v16125_v45, 0.0 }
 0x51a   :  { %v10522_v37 = vpop.f32.mrb[29].mxu1  ;;  %v16145_v6 = vadd.f32 %v15987_v44, %v17642_v61  ;;  %v16149_v7 = vpack.c.bf16 %v5674_v43, %v5673_v26  ;;  %v5678_v43 = vld [vmem:[#allocation10 + $0x138] sm:$0xff] }
 0x51b   :  { %17640 = vst [vmem:[#allocation83_spill] sm:$0xff] %v16127_v38  ;;  %v16139_v11 = vadd.f32 %v9198_v34, %v15930_v24  ;;  %v9199_v28 = vpop.f32.mrb[62].mxu0  ;;  %10684 = vmatmul.mubr.f32.gmra.mrb[128].mxu0 %v16127_v38  ;;  %v17074_v24 = vmax.f32 %v16136_v47, 0.0  ;;  %v16154_v34 = vadd.f32 %v15987_v44, %v17644_v22  ;;  %v5675_v37 = vld [vmem:[#allocation10 + $0x120] sm:$0xff]  ;;  %v5686_v38 = vld [vmem:[#allocation10 + $0x178] sm:$0xff] }
 0x51c   :  { %v9200_v39 = vpop.f32.mrb[63].mxu0  ;;  %10718 = vmatprep.mubr.f32.mxu0 %v3582_v49  ;;  %17643 = vst [vmem:[#allocation132_spill] sm:$0xff] %v16149_v7  ;;  %v5676_v49 = vld [vmem:[#allocation10 + $0x128] sm:$0xff] }
 0x51d   :  { %v9201_v54 = vadd.f32 %v9200_v39, %v9199_v28  ;;  %v16147_v33 = vpop.f32.mrb[30].mxu1  ;;  %v17645_v28 = vld [vmem:[#allocation96_spill] sm:$0xff]  ;;  %v17083_v22 = vmax.f32 %v16154_v34, 0.0 }
 0x51e   :  { %v10525_v14 = vpop.f32.mrb[31].mxu1  ;;  %v16167_v39 = vadd.f32 %v15987_v44, %v17645_v28 }
 0x51f   :  { %v16157_v5 = vadd.f32 %v9201_v54, %v15940_v13  ;;  %v9202_v25 = vpop.f32.mrb[64].mxu0  ;;  %10719 = vmatmul.mubr.f32.vlgmr.msra.gmra.mrb[116].mxu0 %v17072_v50  ;;  %v16172_v13 = vpack.c.bf16 %v5676_v49, %v5675_v37  ;;  %v17647_v50 = vld [vmem:[#allocation153_spill] sm:$0xff] }
 0x520   :  { %11628 = vmatpush3.bf16.msra.mxu0 %v16106_v17  ;;  %v9203_v26 = vpop.f32.mrb[65].mxu0  ;;  %10721 = vmatprep.mubr.f32.mxu0 %v17074_v24  ;;  %v16177_v29 = vadd.f32 %v15987_v44, %v17647_v50  ;;  %v5677_v24 = vld [vmem:[#allocation10 + $0x130] sm:$0xff]  ;;  %v5680_v49 = vld [vmem:[#allocation10 + $0x148] sm:$0xff] }
 0x521   :  { %v9204_v61 = vadd.f32 %v9203_v26, %v9202_v25  ;;  %v16169_v14 = vpop.f32.mrb[32].mxu1  ;;  %11630 = vmatprep.subr.bf16.mxu0 %v16149_v7  ;;  %17646 = vst [vmem:[#allocation29_spill] sm:$0xff] %v16172_v13  ;;  %v17648_v25 = vmax.f32 %v16145_v6, 0.0  ;;  %v17649_v26 = vld [vmem:[#allocation100_spill] sm:$0xff] }
 0x522   :  { %v10528_v54 = vpop.f32.mrb[33].mxu1  ;;  %v16190_v50 = vadd.f32 %v15987_v44, %v17649_v26 }
 0x523   :  { %v16180_v17 = vadd.f32 %v9204_v61, %v15950_v51  ;;  %v9205_v28 = vpop.f32.mrb[66].mxu0  ;;  %10722 = vmatmul.mubr.f32.gmra.mrb[118].mxu0 %v17648_v25  ;;  %v16195_v51 = vpack.c.bf16 %v5678_v43, %v5677_v24  ;;  %v17092_v25 = vmax.f32 %v16177_v29, 0.0  ;;  %v5682_v43 = vld [vmem:[#allocation10 + $0x158] sm:$0xff] }
 0x524   :  { %11632 = vmatpush3.bf16.msra.mxu0 %v16149_v7  ;;  %v9206_v37 = vpop.f32.mrb[67].mxu0  ;;  %10724 = vmatprep.mubr.f32.mxu0 %v17083_v22  ;;  %v17651_v7 = vld [vmem:[#allocation154_spill] sm:$0xff]  ;;  %v5679_v22 = vld [vmem:[#allocation10 + $0x140] sm:$0xff] }
 0x525   :  { %v9207_v54 = vadd.f32 %v9206_v37, %v9205_v28  ;;  %v16192_v0 = vpop.f32.mrb[68].mxu1  ;;  %11634 = vmatprep.subr.bf16.mxu0 %v16172_v13  ;;  %17650 = vst [vmem:[#allocation88_spill] sm:$0xff] %v16195_v51  ;;  %v16200_v42 = vadd.f32 %v15987_v44, %v17651_v7  ;;  %v17652_v28 = vmax.f32 %v16167_v39, 0.0  ;;  %v17653_v37 = vld [vmem:[#allocation104_spill] sm:$0xff] }
 0x526   :  { %v10531_v61 = vpop.f32.mrb[69].mxu1  ;;  %v16213_v7 = vadd.f32 %v15987_v44, %v17653_v37 }
 0x527   :  { %v16203_v30 = vadd.f32 %v9207_v54, %v15960_v48  ;;  %v9208_v26 = vpop.f32.mrb[68].mxu0  ;;  %10725 = vmatmul.mubr.f32.gmra.mrb[120].mxu0 %v17652_v28  ;;  %v16218_v48 = vpack.c.bf16 %v5680_v49, %v5679_v22  ;;  %v17100_v28 = vmax.f32 %v16200_v42, 0.0  ;;  %v5684_v49 = vld [vmem:[#allocation10 + $0x168] sm:$0xff] }
 0x528   :  { %11636 = vmatpush3.bf16.msra.mxu0 %v16172_v13  ;;  %v9209_v24 = vpop.f32.mrb[69].mxu0  ;;  %10727 = vmatprep.mubr.f32.mxu0 %v17092_v25  ;;  %v17656_v13 = vld [vmem:[#allocation32_spill] sm:$0xff]  ;;  %v5681_v25 = vld [vmem:[#allocation10 + $0x150] sm:$0xff] }
 0x529   :  { %v9210_v61 = vadd.f32 %v9209_v24, %v9208_v26  ;;  %v16215_v8 = vpop.f32.mrb[70].mxu1  ;;  %11638 = vmatprep.subr.bf16.mxu0 %v16195_v51  ;;  %17655 = vst [vmem:[#allocation49_spill] sm:$0xff] %v16218_v48  ;;  %v16223_v52 = vadd.f32 %v15987_v44, %v17656_v13  ;;  %v17657_v26 = vmax.f32 %v16190_v50, 0.0  ;;  %v17658_v24 = vld [vmem:[#allocation57_spill] sm:$0xff] }
 0x52a   :  { %17654 = vst [vmem:[#allocation133_spill] sm:$0xff] %v16215_v8  ;;  %v10534_v54 = vpop.f32.mrb[71].mxu1  ;;  %v16236_v13 = vadd.f32 %v15987_v44, %v17658_v24 }
 0x52b   :  { %v16226_v46 = vadd.f32 %v9210_v61, %v15966_v62  ;;  %v9211_v37 = vpop.f32.mrb[70].mxu0  ;;  %10728 = vmatmul.mubr.f32.gmra.mrb[122].mxu0 %v17657_v26  ;;  %v16241_v62 = vpack.c.bf16 %v5682_v43, %v5681_v25  ;;  %v17105_v26 = vmax.f32 %v16223_v52, 0.0 }
 0x52c   :  { %11640 = vmatpush3.bf16.msra.mxu0 %v16195_v51  ;;  %v9212_v22 = vpop.f32.mrb[71].mxu0  ;;  %10730 = vmatprep.mubr.f32.mxu0 %v17100_v28  ;;  %v17661_v51 = vld [vmem:[#allocation109_spill] sm:$0xff]  ;;  %v17666_v16 = vmax.f32 %v16236_v13, 0.0 }
 0x52d   :  { %v9213_v54 = vadd.f32 %v9212_v22, %v9211_v37  ;;  %v16238_v31 = vpop.f32.mrb[72].mxu1  ;;  %11642 = vmatprep.subr.bf16.mxu0 %v16218_v48  ;;  %17660 = vst [vmem:[#allocation78_spill] sm:$0xff] %v16241_v62  ;;  %v16246_v41 = vadd.f32 %v15987_v44, %v17661_v51  ;;  %v5683_v28 = vld [vmem:[#allocation10 + $0x160] sm:$0xff]  ;;  %v17662_v37 = vmax.f32 %v16213_v7, 0.0 }
 0x52e   :  { %17659 = vst [vmem:[#allocation30_spill] sm:$0xff] %v16238_v31  ;;  %v10537_v61 = vpop.f32.mrb[73].mxu1  ;;  %v17663_v22 = vld [vmem:[#allocation33_spill] sm:$0xff] }
 0x52f   :  { %v16249_v8 = vadd.f32 %v9213_v54, %v15972_v10  ;;  %v9214_v24 = vpop.f32.mrb[72].mxu0  ;;  %10731 = vmatmul.mubr.f32.gmra.mrb[124].mxu0 %v17662_v37  ;;  %v16259_v51 = vadd.f32 %v15987_v44, %v17663_v22  ;;  %v16264_v10 = vpack.c.bf16 %v5684_v49, %v5683_v28  ;;  %v17110_v37 = vmax.f32 %v16246_v41, 0.0 }
 0x530   :  { %11644 = vmatpush3.bf16.msra.mxu0 %v16218_v48  ;;  %v9215_v25 = vpop.f32.mrb[73].mxu0  ;;  %10733 = vmatprep.mubr.f32.mxu0 %v17105_v26  ;;  %v5685_v48 = vld [vmem:[#allocation10 + $0x170] sm:$0xff] }
 0x531   :  { %v9216_v61 = vadd.f32 %v9215_v25, %v9214_v24  ;;  %v16261_v31 = vpop.f32.mrb[74].mxu1  ;;  %11646 = vmatprep.subr.bf16.mxu0 %v16241_v62  ;;  %17665 = vst [vmem:[#allocation51_spill] sm:$0xff] %v16264_v10  ;;  %v17111_v28 = vmax.f32 %v16259_v51, 0.0  ;;  %v16279_v22 = vpack.c.bf16 %v5686_v38, %v5685_v48 }
 0x532   :  { %17664 = vst [vmem:[#allocation90_spill] sm:$0xff] %v16261_v31  ;;  %v10540_v54 = vpop.f32.mrb[75].mxu1 }
 0x533   :  { %v16268_v26 = vadd.f32 %v9216_v61, %v15978_v9  ;;  %v9217_v43 = vpop.f32.mrb[74].mxu0  ;;  %10734 = vmatmul.mubr.f32.gmra.mrb[126].mxu0 %v17666_v16  ;;  %17668 = vst [vmem:[#allocation91_spill] sm:$0xff] %v16279_v22  ;;  %v5837_v61 = vld [vmem:[#allocation10 + $0x180] sm:$0xff]  ;;  %v5838_v54 = vld [vmem:[#allocation10 + $0x188] sm:$0xff] }
 0x534   :  { %11648 = vmatpush3.bf16.msra.mxu0 %v16241_v62  ;;  %v9218_v24 = vpop.f32.mrb[75].mxu0  ;;  %10736 = vmatprep.mubr.f32.mxu0 %v17110_v37  ;;  %v16292_v38 = vpack.c.bf16 %v5838_v54, %v5837_v61  ;;  %v5841_v61 = vld [vmem:[#allocation10 + $0x1a0] sm:$0xff]  ;;  %v5842_v54 = vld [vmem:[#allocation10 + $0x1a8] sm:$0xff] }
 0x535   :  { %v9219_v49 = vadd.f32 %v9218_v24, %v9217_v43  ;;  %v16276_v25 = vpop.f32.mrb[76].mxu1  ;;  %11650 = vmatprep.subr.bf16.mxu0 %v16264_v10  ;;  %v17669_v43 = vmax.f32 %v16125_v45, 0.0 }
 0x536   :  { %17667 = vst [vmem:[#allocation80_spill] sm:$0xff] %v16276_v25  ;;  %v10543_v9 = vpop.f32.mrb[77].mxu1 }
 0x537   :  { %v16282_v16 = vadd.f32 %v9219_v49, %v15984_v53  ;;  %v9220_v62 = vpop.f32.mrb[76].mxu0  ;;  %10737 = vmatmul.mubr.f32.gmra.mrb[128].mxu0 %v17111_v28  ;;  %v5839_v53 = vld [vmem:[#allocation10 + $0x190] sm:$0xff]  ;;  %v5840_v49 = vld [vmem:[#allocation10 + $0x198] sm:$0xff] }
 0x538   :  { %11652 = vmatpush3.bf16.msra.mxu0 %v16264_v10  ;;  %v9221_v37 = vpop.f32.mrb[77].mxu0  ;;  %10771 = vmatprep.mubr.f32.mxu0 %v17669_v43 }
 0x539   :  { %v9222_v24 = vadd.f32 %v9221_v37, %v9220_v62  ;;  %v16289_v25 = vpop.f32.mrb[78].mxu1  ;;  %11654 = vmatprep.subr.bf16.mxu0 %v16279_v22  ;;  %v16301_v62 = vpack.c.bf16 %v5840_v49, %v5839_v53  ;;  %v16314_v53 = vpack.c.bf16 %v5842_v54, %v5841_v61 }
 0x53a   :  { %v10546_v48 = vpop.f32.mrb[79].mxu1 }
 0x53b   :  { %v16295_v9 = vadd.f32 %v9222_v24, %v15995_v18  ;;  %v9223_v28 = vpop.f32.mrb[78].mxu0  ;;  %17670 = vst [vmem:[#allocation93_spill] sm:$0xff] %v16301_v62  ;;  %v17671_v18 = vmax.f32 %v16136_v47, 0.0  ;;  %v17672_v48 = vmax.f32 %v16145_v6, 0.0  ;;  %17673 = vst [vmem:[#allocation66_spill] sm:$0xff] %v16314_v53 }
 0x53c   :  { %11656 = vmatpush3.bf16.msra.mxu0 %v16279_v22  ;;  %v9224_v10 = vpop.f32.mrb[79].mxu0 }
 0x53d   :  { %v9225_v31 = vadd.f32 %v9224_v10, %v9223_v28  ;;  %v16298_v45 = vpop.f32.mrb[80].mxu1  ;;  %11658 = vmatprep.subr.bf16.mxu0 %v16292_v38 }
 0x53e   :  { %v10549_v37 = vpop.f32.mrb[81].mxu1 }
 0x53f   :  { %v16304_v43 = vadd.f32 %v9225_v31, %v16005_v57  ;;  %10772 = vmatmul.mubr.f32.vlgmr.msra.gmra.mrb[116].mxu0 %v17671_v18  ;;  %v9226_v24 = vpop.f32.mrb[80].mxu0  ;;  %v5843_v57 = vld [vmem:[#allocation10 + $0x1b0] sm:$0xff]  ;;  %v5844_v31 = vld [vmem:[#allocation10 + $0x1b8] sm:$0xff]  ;;  %v17674_v37 = vmax.f32 %v16154_v34, 0.0  ;;  %v17675_v18 = vmax.f32 %v16167_v39, 0.0 }
 0x540   :  { %10774 = vmatprep.mubr.f32.mxu0 %v17672_v48  ;;  %11660 = vmatpush3.bf16.msra.mxu0 %v16292_v38  ;;  %v9227_v10 = vpop.f32.mrb[81].mxu0  ;;  %v16327_v61 = vpack.c.bf16 %v5844_v31, %v5843_v57 }
 0x541   :  { %v9228_v28 = vadd.f32 %v9227_v10, %v9226_v24  ;;  %v16311_v22 = vpop.f32.mrb[82].mxu1  ;;  %11662 = vmatprep.subr.bf16.mxu0 %v16301_v62 }
 0x542   :  { %v10552_v49 = vpop.f32.mrb[83].mxu1  ;;  %17676 = vst [vmem:[#allocation94_spill] sm:$0xff] %v16327_v61 }
 0x543   :  { %v16317_v47 = vadd.f32 %v9228_v28, %v16020_v32  ;;  %10775 = vmatmul.mubr.f32.gmra.mrb[118].mxu0 %v17674_v37  ;;  %v9229_v6 = vpop.f32.mrb[82].mxu0  ;;  %v5845_v32 = vld [vmem:[#allocation10 + $0x1c0] sm:$0xff]  ;;  %v5846_v28 = vld [vmem:[#allocation10 + $0x1c8] sm:$0xff]  ;;  %v17677_v49 = vmax.f32 %v16177_v29, 0.0  ;;  %v17678_v37 = vmax.f32 %v16190_v50, 0.0 }
 0x544   :  { %10777 = vmatprep.mubr.f32.mxu0 %v17675_v18  ;;  %11664 = vmatpush3.bf16.msra.mxu0 %v16301_v62  ;;  %v9230_v24 = vpop.f32.mrb[83].mxu0  ;;  %v16340_v57 = vpack.c.bf16 %v5846_v28, %v5845_v32 }
 0x545   :  { %v9231_v48 = vadd.f32 %v9230_v24, %v9229_v6  ;;  %v16324_v10 = vpop.f32.mrb[84].mxu1  ;;  %11666 = vmatprep.subr.bf16.mxu0 %v16314_v53 }
 0x546   :  { %v10555_v54 = vpop.f32.mrb[85].mxu1  ;;  %17679 = vst [vmem:[#allocation81_spill] sm:$0xff] %v16340_v57 }
 0x547   :  { %v16330_v34 = vadd.f32 %v9231_v48, %v16036_v63  ;;  %10778 = vmatmul.mubr.f32.gmra.mrb[120].mxu0 %v17677_v49  ;;  %v9232_v39 = vpop.f32.mrb[84].mxu0  ;;  %v5847_v63 = vld [vmem:[#allocation10 + $0x1d0] sm:$0xff]  ;;  %v5848_v48 = vld [vmem:[#allocation10 + $0x1d8] sm:$0xff]  ;;  %v17680_v54 = vmax.f32 %v16200_v42, 0.0  ;;  %v17681_v49 = vmax.f32 %v16213_v7, 0.0 }
 0x548   :  { %10780 = vmatprep.mubr.f32.mxu0 %v17678_v37  ;;  %11668 = vmatpush3.bf16.msra.mxu0 %v16314_v53  ;;  %v9233_v6 = vpop.f32.mrb[85].mxu0  ;;  %v16353_v32 = vpack.c.bf16 %v5848_v48, %v5847_v63 }
 0x549   :  { %v9234_v18 = vadd.f32 %v9233_v6, %v9232_v39  ;;  %v16337_v24 = vpop.f32.mrb[86].mxu1  ;;  %11670 = vmatprep.subr.bf16.mxu0 %v16327_v61 }
 0x54a   :  { %v10590_v31 = vpop.f32.mrb[87].mxu1  ;;  %17682 = vst [vmem:[#allocation95_spill] sm:$0xff] %v16353_v32 }
 0x54b   :  { %v16343_v29 = vadd.f32 %v9234_v18, %v16053_v36  ;;  %10781 = vmatmul.mubr.f32.gmra.mrb[122].mxu0 %v17680_v54  ;;  %v9235_v50 = vpop.f32.mrb[86].mxu0  ;;  %v5849_v36 = vld [vmem:[#allocation10 + $0x1e0] sm:$0xff]  ;;  %v5850_v18 = vld [vmem:[#allocation10 + $0x1e8] sm:$0xff]  ;;  %v17683_v31 = vmax.f32 %v16223_v52, 0.0  ;;  %v17684_v54 = vmax.f32 %v16236_v13, 0.0  ;;  %v5851_v52 = vld [vmem:[#allocation10 + $0x1f0] sm:$0xff] }
 0x54c   :  { %10783 = vmatprep.mubr.f32.mxu0 %v17681_v49  ;;  %11672 = vmatpush3.bf16.msra.mxu0 %v16327_v61  ;;  %v9236_v39 = vpop.f32.mrb[87].mxu0  ;;  %v17685_v49 = vld [vmem:[#allocation59_spill] sm:$0xff]  ;;  %v17687_v13 = vmax.f32 %v16246_v41, 0.0 }
 0x54d   :  { %v9237_v37 = vadd.f32 %v9236_v39, %v9235_v50  ;;  %v16350_v6 = vpop.f32.mrb[88].mxu1  ;;  %11674 = vmatprep.subr.bf16.mxu0 %v16340_v57  ;;  %v3581_v63 = vadd.f32 %v15987_v44, %v17685_v49 }
 0x54e   :  { %v10593_v28 = vpop.f32.mrb[89].mxu1 }
 0x54f   :  { %v16356_v42 = vadd.f32 %v9237_v37, %v16066_v2  ;;  %10784 = vmatmul.mubr.f32.gmra.mrb[124].mxu0 %v17683_v31  ;;  %v9238_v7 = vpop.f32.mrb[88].mxu0  ;;  %v16368_v2 = vpack.c.bf16 %v5850_v18, %v5849_v36  ;;  %v5852_v28 = vld [vmem:[#allocation10 + $0x1f8] sm:$0xff] }
 0x550   :  { %10786 = vmatprep.mubr.f32.mxu0 %v17684_v54  ;;  %11676 = vmatpush3.bf16.msra.mxu0 %v16340_v57  ;;  %v9239_v50 = vpop.f32.mrb[89].mxu0  ;;  %v17688_v57 = vmax.f32 %v16259_v51, 0.0  ;;  %v16381_v18 = vpack.c.bf16 %v5852_v28, %v5851_v52 }
 0x551   :  { %v9240_v48 = vadd.f32 %v9239_v50, %v9238_v7  ;;  %v16365_v39 = vpop.f32.mrb[90].mxu1  ;;  %11678 = vmatprep.subr.bf16.mxu0 %v16353_v32  ;;  %17686 = vst [vmem:[#allocation97_spill] sm:$0xff] %v16368_v2  ;;  %v3596_v50 = vmax.f32 %v3581_v63, 0.0 }
 0x552   :  { %v10596_v37 = vpop.f32.mrb[91].mxu1  ;;  %17689 = vst [vmem:[#allocation48_spill] sm:$0xff] %v16381_v18 }
 0x553   :  { %v16371_v31 = vadd.f32 %v9240_v48, %v16078_v23  ;;  %10787 = vmatmul.mubr.f32.gmra.mrb[126].mxu0 %v17687_v13  ;;  %v9304_v54 = vpop.f32.mrb[90].mxu0 }
 0x554   :  { %10789 = vmatprep.mubr.f32.mxu0 %v17688_v57  ;;  %11680 = vmatpush3.bf16.msra.mxu0 %v16353_v32  ;;  %v9305_v7 = vpop.f32.mrb[91].mxu0 }
 0x555   :  { %v9306_v49 = vadd.f32 %v9305_v7, %v9304_v54  ;;  %v16378_v36 = vpop.f32.mrb[92].mxu1  ;;  %11682 = vmatprep.subr.bf16.mxu0 %v16368_v2 }
 0x556   :  { %v10599_v23 = vpop.f32.mrb[93].mxu1 }
 0x557   :  { %v4829_v48 = vadd.f32 %v9306_v49, %v16139_v11  ;;  %10790 = vmatmul.mubr.f32.gmra.mrb[128].mxu0 %v3596_v50  ;;  %v9307_v41 = vpop.f32.mrb[92].mxu0 }
 0x558   :  { %11684 = vmatpush3.bf16.msra.mxu0 %v16368_v2  ;;  %10824 = vmatprep.mubr.f32.mxu0 %v16009_v40  ;;  %v9308_v51 = vpop.f32.mrb[93].mxu0 }
 0x559   :  { %v16387_v57 = vadd.f32 %v16090_v3, %v4829_v48  ;;  %v9309_v63 = vadd.f32 %v9308_v51, %v9307_v41  ;;  %v16389_v37 = vpop.f32.mrb[94].mxu1  ;;  %11686 = vmatprep.subr.bf16.mxu0 %v16381_v18 }
 0x55a   :  { %v10602_v52 = vpop.f32.mrb[95].mxu1 }
 0x55b   :  { %v4834_v28 = vadd.f32 %v9309_v63, %v16157_v5  ;;  %v9310_v13 = vpop.f32.mrb[94].mxu0 }
 0x55c   :  { %11688 = vmatpush3.bf16.msra.mxu0 %v16381_v18  ;;  %v9311_v11 = vpop.f32.mrb[95].mxu0 }
 0x55d   :  { %v16395_v54 = vadd.f32 %v16102_v27, %v4834_v28  ;;  %v9312_v7 = vadd.f32 %v9311_v11, %v9310_v13  ;;  %v16397_v50 = vpop.f32.mrb[96].mxu1 }
 0x55e   :  { %v10605_v3 = vpop.f32.mrb[97].mxu1 }
 0x55f   :  { %v4839_v49 = vadd.f32 %v9312_v7, %v16180_v17  ;;  %10825 = vmatmul.mubr.f32.vlgmr.msra.gmra.mrb[116].mxu0 %v16014_v60  ;;  %v9313_v23 = vpop.f32.mrb[96].mxu0 }
 0x560   :  { %10827 = vmatprep.mubr.f32.mxu0 %v16024_v35  ;;  %v9314_v48 = vpop.f32.mrb[97].mxu0 }
 0x561   :  { %v16403_v5 = vadd.f32 %v16114_v4, %v4839_v49  ;;  %v9315_v41 = vadd.f32 %v9314_v48, %v9313_v23  ;;  %v16405_v51 = vpop.f32.mrb[98].mxu1 }
 0x562   :  { %v10608_v27 = vpop.f32.mrb[99].mxu1 }
 0x563   :  { %v4844_v63 = vadd.f32 %v9315_v41, %v16203_v30  ;;  %10828 = vmatmul.mubr.f32.gmra.mrb[118].mxu0 %v16030_v21  ;;  %v9316_v52 = vpop.f32.mrb[98].mxu0 }
 0x564   :  { %10830 = vmatprep.mubr.f32.mxu0 %v16040_v1  ;;  %v9317_v17 = vpop.f32.mrb[99].mxu0 }
 0x565   :  { %v16411_v28 = vadd.f32 %v16132_v59, %v4844_v63  ;;  %v9318_v13 = vadd.f32 %v9317_v17, %v9316_v52  ;;  %v16413_v11 = vpop.f32.mrb[100].mxu1 }
 0x566   :  { %v10611_v4 = vpop.f32.mrb[101].mxu1 }
 0x567   :  { %v4849_v7 = vadd.f32 %v9318_v13, %v16226_v46  ;;  %10831 = vmatmul.mubr.f32.gmra.mrb[120].mxu0 %v16045_v15  ;;  %v9319_v3 = vpop.f32.mrb[100].mxu0 }
 0x568   :  { %10833 = vmatprep.mubr.f32.mxu0 %v16050_v20  ;;  %v9320_v30 = vpop.f32.mrb[101].mxu0 }
 0x569   :  { %v16419_v49 = vadd.f32 %v16147_v33, %v4849_v7  ;;  %v9321_v23 = vadd.f32 %v9320_v30, %v9319_v3  ;;  %v16421_v48 = vpop.f32.mrb[102].mxu1  ;;  %v16436_v7 = vadd.f32 %v15987_v44, %v16130_v12 }
 0x56a   :  { %v10614_v59 = vpop.f32.mrb[103].mxu1 }
 0x56b   :  { %v4854_v41 = vadd.f32 %v9321_v23, %v16249_v8  ;;  %10834 = vmatmul.mubr.f32.gmra.mrb[122].mxu0 %v16063_v19  ;;  %v9322_v27 = vpop.f32.mrb[0].mxu0  ;;  %17690 = vst [vmem:[#allocation98_spill] sm:$0xff] %v16436_v7 }
 0x56c   :  { %10836 = vmatprep.mubr.f32.mxu0 %v16075_v58  ;;  %v9323_v46 = vpop.f32.mrb[1].mxu0 }
 0x56d   :  { %v16427_v63 = vadd.f32 %v16169_v14, %v4854_v41  ;;  %v9324_v52 = vadd.f32 %v9323_v46, %v9322_v27  ;;  %v16429_v17 = vpop.f32.mrb[104].mxu1  ;;  %v17692_v27 = vld [vmem:[#allocation83_spill] sm:$0xff] }
 0x56e   :  { %v10617_v33 = vpop.f32.mrb[105].mxu1 }
 0x56f   :  { %v4859_v13 = vadd.f32 %v9324_v52, %v16268_v26  ;;  %10837 = vmatmul.mubr.f32.gmra.mrb[124].mxu0 %v16087_v55  ;;  %v9325_v4 = vpop.f32.mrb[2].mxu0  ;;  %v17691_v26 = vld [vmem:[#allocation27_spill] sm:$0xff]  ;;  %v17126_v52 = vmax.f32 %v16436_v7, 0.0  ;;  %v17693_v33 = vld [vmem:[#allocation133_spill] sm:$0xff] }
 0x570   :  { %10839 = vmatprep.mubr.f32.mxu0 %v16099_v56  ;;  %v9326_v8 = vpop.f32.mrb[3].mxu0 }
 0x571   :  { %v16439_v3 = vadd.f32 %v16192_v0, %v4859_v13  ;;  %v9327_v14 = vadd.f32 %v9326_v8, %v9325_v4  ;;  %v16441_v30 = vpop.f32.mrb[106].mxu1 }
 0x572   :  { %v10620_v23 = vpop.f32.mrb[107].mxu1 }
 0x573   :  { %v4864_v59 = vadd.f32 %v9327_v14, %v16282_v16  ;;  %10840 = vmatmul.mubr.f32.gmra.mrb[126].mxu0 %v17691_v26  ;;  %v9328_v41 = vpop.f32.mrb[4].mxu0  ;;  %v17694_v14 = vmov 0.0   ;;  %v17695_v23 = vld [vmem:[#allocation30_spill] sm:$0xff] }
 0x574   :  { %10842 = vmatprep.mubr.f32.mxu0 %v17692_v27  ;;  %v9329_v46 = vpop.f32.mrb[5].mxu0 }
 0x575   :  { %v16448_v12 = vadd.f32 %v17693_v33, %v4864_v59  ;;  %v9330_v18 = vadd.f32 %v9329_v46, %v9328_v41  ;;  %v16450_v0 = vpop.f32.mrb[108].mxu1 }
 0x576   :  { %v10623_v13 = vpop.f32.mrb[109].mxu1 }
 0x577   :  { %v4869_v4 = vadd.f32 %v9330_v18, %v16295_v9  ;;  %10843 = vmatmul.mubr.f32.gmra.mrb[128].mxu0 %v17126_v52  ;;  %v9331_v16 = vpop.f32.mrb[6].mxu0  ;;  %v17696_v13 = vld [vmem:[#allocation90_spill] sm:$0xff] }
 0x578   :  { %v9332_v8 = vpop.f32.mrb[7].mxu0  ;;  %6842 = vmatprep.mubr.f32.mxu0 %v17694_v14 }
 0x579   :  { %v16457_v2 = vadd.f32 %v17695_v23, %v4869_v4  ;;  %v9333_v32 = vadd.f32 %v9332_v8, %v9331_v16  ;;  %v16459_v61 = vpop.f32.mrb[110].mxu1  ;;  %v17697_v23 = vld [vmem:[#allocation80_spill] sm:$0xff] }
 0x57a   :  { %v10626_v59 = vpop.f32.mrb[111].mxu1 }
 0x57b   :  { %v4874_v41 = vadd.f32 %v9333_v32, %v16304_v43  ;;  %v9334_v46 = vpop.f32.mrb[8].mxu0 }
 0x57c   :  { %v9335_v33 = vpop.f32.mrb[9].mxu0 }
 0x57d   :  { %v16463_v9 = vadd.f32 %v17696_v13, %v4874_v41  ;;  %v9336_v18 = vadd.f32 %v9335_v33, %v9334_v46  ;;  %v16465_v52 = vpop.f32.mrb[112].mxu1 }
 0x57e   :  { %v10629_v7 = vpop.f32.mrb[113].mxu1 }
 0x57f   :  { %v4879_v14 = vadd.f32 %v9336_v18, %v16317_v47  ;;  %v9337_v53 = vpop.f32.mrb[10].mxu0 }
 0x580   :  { %v9338_v4 = vpop.f32.mrb[11].mxu0 }
 0x581   :  { %v16469_v16 = vadd.f32 %v17697_v23, %v4879_v14  ;;  %v9339_v8 = vadd.f32 %v9338_v4, %v9337_v53  ;;  %v16471_v59 = vpop.f32.mrb[114].mxu1 }
 0x582   :  { %v10632_v43 = vpop.f32.mrb[115].mxu1 }
 0x583   :  { %v4884_v32 = vadd.f32 %v9339_v8, %v16330_v34  ;;  %v9340_v62 = vpop.f32.mrb[12].mxu0 }
 0x584   :  { %v9341_v41 = vpop.f32.mrb[13].mxu0 }
 0x585   :  { %v16475_v46 = vadd.f32 %v16289_v25, %v4884_v32  ;;  %v9342_v33 = vadd.f32 %v9341_v41, %v9340_v62 }
 0x587   :  { %v4889_v7 = vadd.f32 %v9342_v33, %v16343_v29  ;;  %v9343_v47 = vpop.f32.mrb[14].mxu0 }
 0x588   :  { %v9344_v13 = vpop.f32.mrb[15].mxu0 }
 0x589   :  { %v16479_v18 = vadd.f32 %v16298_v45, %v4889_v7  ;;  %v9345_v14 = vadd.f32 %v9344_v13, %v9343_v47 }
 0x58b   :  { %v4894_v53 = vadd.f32 %v9345_v14, %v16356_v42  ;;  %v9346_v4 = vpop.f32.mrb[16].mxu0 }
 0x58c   :  { %v9347_v23 = vpop.f32.mrb[17].mxu0 }
 0x58d   :  { %v16483_v34 = vadd.f32 %v16311_v22, %v4894_v53  ;;  %v9348_v8 = vadd.f32 %v9347_v23, %v9346_v4 }
 0x58f   :  { %v4899_v25 = vadd.f32 %v9348_v8, %v16371_v31  ;;  %v9412_v43 = vpop.f32.mrb[18].mxu0 }
 0x590   :  { %v9413_v62 = vpop.f32.mrb[19].mxu0 }
 0x591   :  { %v16487_v29 = vadd.f32 %v16324_v10, %v4899_v25  ;;  %v9414_v32 = vadd.f32 %v9413_v62, %v9412_v43  ;;  %v16494_v10 = vld [vmem:[#allocation8] ss:$0 sm:$0xff] }
 0x593   :  { %v5249_v45 = vadd.f32 %v9414_v32, %v16337_v24  ;;  %v9415_v41 = vpop.f32.mrb[20].mxu0 }
 0x594   :  { %v9416_v33 = vpop.f32.mrb[21].mxu0 }
 0x595   :  { %v5322_v42 = vadd.f32 %v5249_v45, %v16387_v57  ;;  %v9417_v7 = vadd.f32 %v9416_v33, %v9415_v41  ;;  %v17698_v45 = vld [vmem:[#allocation39_spill] sm:$0xff] }
 0x597   :  { %v5254_v47 = vadd.f32 %v9417_v7, %v16350_v6  ;;  %v9418_v22 = vpop.f32.mrb[22].mxu0  ;;  %v5337_v13 = vadd.f32 %v15987_v44, %v5322_v42  ;;  %v17699_v42 = vld [vmem:[#allocation128_spill] sm:$0xff] }
 0x598   :  { %v9419_v14 = vpop.f32.mrb[23].mxu0 }
 0x599   :  { %v5323_v31 = vadd.f32 %v5254_v47, %v16395_v54  ;;  %v9420_v53 = vadd.f32 %v9419_v14, %v9418_v22  ;;  %v5352_v4 = vmax.f32 %v5337_v13, 0.0  ;;  %v17700_v14 = vld [vmem:[#allocation26_spill] sm:$0xff] }
 0x59b   :  { %v16497_v23 = vadd.f32 %v16494_v10, %v5323_v31  ;;  %v5259_v24 = vadd.f32 %v9420_v53, %v16365_v39  ;;  %v9421_v8 = vpop.f32.mrb[24].mxu0  ;;  %10877 = vmatprep.mubr.f32.mxu1 %v5352_v4 }
 0x59c   :  { %v9422_v57 = vpop.f32.mrb[25].mxu0 }
 0x59d   :  { %v5353_v6 = vmax.f32 %v16497_v23, 0.0  ;;  %v5324_v25 = vadd.f32 %v5259_v24, %v16403_v5  ;;  %v9423_v44 = vadd.f32 %v9422_v57, %v9421_v8  ;;  %v17701_v57 = vld [vmem:[#allocation24_spill] sm:$0xff] }
 0x59f   :  { %v5264_v43 = vadd.f32 %v9423_v44, %v16378_v36  ;;  %v9424_v54 = vpop.f32.mrb[26].mxu0  ;;  %10878 = vmatmul.mubr.f32.vlgmr.msra.gmra.mrb[116].mxu1 %v5353_v6  ;;  %v16506_v62 = vadd.f32 %v16494_v10, %v5324_v25 }
 0x5a0   :  { %v9425_v32 = vpop.f32.mrb[27].mxu0  ;;  %11724 = vmatpush3.bf16.msra.mxu1 %v17698_v45  ;;  %v17702_v45 = vld [vmem:[#allocation129_spill] sm:$0xff] }
 0x5a1   :  { %v5325_v39 = vadd.f32 %v5264_v43, %v16411_v28  ;;  %v9426_v41 = vadd.f32 %v9425_v32, %v9424_v54  ;;  %v5354_v33 = vmax.f32 %v16506_v62, 0.0  ;;  %11726 = vmatprep.subr.bf16.mxu1 %v17699_v42 }
 0x5a3   :  { %v16513_v5 = vadd.f32 %v16494_v10, %v5325_v39  ;;  %v5269_v36 = vadd.f32 %v9426_v41, %v16389_v37  ;;  %v9427_v7 = vpop.f32.mrb[28].mxu0  ;;  %10880 = vmatprep.mubr.f32.mxu1 %v5354_v33 }
 0x5a4   :  { %v9428_v47 = vpop.f32.mrb[29].mxu0  ;;  %11728 = vmatpush3.bf16.msra.mxu1 %v17699_v42 }
 0x5a5   :  { %v5355_v22 = vmax.f32 %v16513_v5, 0.0  ;;  %v5326_v28 = vadd.f32 %v5269_v36, %v16419_v49  ;;  %v9429_v13 = vadd.f32 %v9428_v47, %v9427_v7  ;;  %11730 = vmatprep.subr.bf16.mxu1 %v17700_v14  ;;  %v17703_v47 = vld [vmem:[#allocation28_spill] sm:$0xff]  ;;  %v6740_v5 = vld [vmem:[#allocation13 + $0x2d0] sm:$0xff] }
 0x5a7   :  { %v5274_v31 = vadd.f32 %v9429_v13, %v16397_v50  ;;  %v9430_v53 = vpop.f32.mrb[30].mxu0  ;;  %10881 = vmatmul.mubr.f32.gmra.mrb[118].mxu1 %v5355_v22  ;;  %v16526_v37 = vadd.f32 %v16494_v10, %v5326_v28 }
 0x5a8   :  { %v9431_v4 = vpop.f32.mrb[31].mxu0  ;;  %11732 = vmatpush3.bf16.msra.mxu1 %v17700_v14 }
 0x5a9   :  { %v5327_v24 = vadd.f32 %v5274_v31, %v16427_v63  ;;  %v9432_v8 = vadd.f32 %v9431_v4, %v9430_v53  ;;  %v5356_v49 = vmax.f32 %v16526_v37, 0.0  ;;  %11734 = vmatprep.subr.bf16.mxu1 %v17701_v57  ;;  %v17704_v4 = vld [vmem:[#allocation130_spill] sm:$0xff] }
 0x5ab   :  { %v16533_v25 = vadd.f32 %v16494_v10, %v5327_v24  ;;  %v5279_v50 = vadd.f32 %v9432_v8, %v16405_v51  ;;  %v9433_v44 = vpop.f32.mrb[32].mxu0  ;;  %10883 = vmatprep.mubr.f32.mxu1 %v5356_v49 }
 0x5ac   :  { %v9434_v43 = vpop.f32.mrb[33].mxu0  ;;  %11736 = vmatpush3.bf16.msra.mxu1 %v17701_v57 }
 0x5ad   :  { %v5357_v54 = vmax.f32 %v16533_v25, 0.0  ;;  %v5328_v63 = vadd.f32 %v5279_v50, %v16439_v3  ;;  %v9435_v32 = vadd.f32 %v9434_v43, %v9433_v44  ;;  %11738 = vmatprep.subr.bf16.mxu1 %v17702_v45  ;;  %v17705_v43 = vld [vmem:[#allocation87_spill] sm:$0xff] }
 0x5ae   :  { %v6748_v25 = vld [vmem:[#allocation13 + $0x310] sm:$0xff] }
 0x5af   :  { %v5284_v39 = vadd.f32 %v9435_v32, %v16413_v11  ;;  %v9436_v41 = vpop.f32.mrb[102].mxu0  ;;  %10884 = vmatmul.mubr.f32.gmra.mrb[120].mxu1 %v5357_v54  ;;  %v16546_v51 = vadd.f32 %v16494_v10, %v5328_v63 }
 0x5b0   :  { %v9437_v42 = vpop.f32.mrb[103].mxu0  ;;  %11740 = vmatpush3.bf16.msra.mxu1 %v17702_v45 }
 0x5b1   :  { %v5329_v36 = vadd.f32 %v5284_v39, %v16448_v12  ;;  %v9438_v7 = vadd.f32 %v9437_v42, %v9436_v41  ;;  %v5358_v3 = vmax.f32 %v16546_v51, 0.0  ;;  %11742 = vmatprep.subr.bf16.mxu1 %v17703_v47  ;;  %v17706_v42 = vld [vmem:[#allocation25_spill] sm:$0xff] }
 0x5b3   :  { %v16553_v28 = vadd.f32 %v16494_v10, %v5329_v36  ;;  %v5289_v11 = vadd.f32 %v9438_v7, %v16421_v48  ;;  %v9439_v13 = vpop.f32.mrb[104].mxu0  ;;  %10886 = vmatprep.mubr.f32.mxu1 %v5358_v3 }
 0x5b4   :  { %v9440_v14 = vpop.f32.mrb[105].mxu0  ;;  %11744 = vmatpush3.bf16.msra.mxu1 %v17703_v47 }
 0x5b5   :  { %v5359_v31 = vmax.f32 %v16553_v28, 0.0  ;;  %v5330_v12 = vadd.f32 %v5289_v11, %v16457_v2  ;;  %v9441_v53 = vadd.f32 %v9440_v14, %v9439_v13  ;;  %11746 = vmatprep.subr.bf16.mxu1 %v17704_v4  ;;  %v17725_v28 = vmov 0.0  }
 0x5b7   :  { %v5294_v24 = vadd.f32 %v9441_v53, %v16429_v17  ;;  %v9442_v8 = vpop.f32.mrb[106].mxu0  ;;  %10887 = vmatmul.mubr.f32.gmra.mrb[122].mxu1 %v5359_v31  ;;  %v16566_v48 = vadd.f32 %v16494_v10, %v5330_v12 }
 0x5b8   :  { %v9443_v57 = vpop.f32.mrb[107].mxu0  ;;  %11748 = vmatpush3.bf16.msra.mxu1 %v17704_v4 }
 0x5b9   :  { %v5331_v50 = vadd.f32 %v5294_v24, %v16463_v9  ;;  %v9444_v44 = vadd.f32 %v9443_v57, %v9442_v8  ;;  %v5360_v2 = vmax.f32 %v16566_v48, 0.0  ;;  %11750 = vmatprep.subr.bf16.mxu1 %v17705_v43 }
 0x5bb   :  { %v16573_v63 = vadd.f32 %v16494_v10, %v5331_v50  ;;  %v5299_v17 = vadd.f32 %v9444_v44, %v16441_v30  ;;  %v9445_v32 = vpop.f32.mrb[108].mxu0  ;;  %10889 = vmatprep.mubr.f32.mxu1 %v5360_v2 }
 0x5bc   :  { %v9446_v45 = vpop.f32.mrb[109].mxu0  ;;  %11752 = vmatpush3.bf16.msra.mxu1 %v17705_v43 }
 0x5bd   :  { %v5361_v39 = vmax.f32 %v16573_v63, 0.0  ;;  %v5332_v9 = vadd.f32 %v5299_v17, %v16469_v16  ;;  %v9447_v41 = vadd.f32 %v9446_v45, %v9445_v32  ;;  %11754 = vmatprep.subr.bf16.mxu1 %v17706_v42 }
 0x5bf   :  { %v5304_v36 = vadd.f32 %v9447_v41, %v16450_v0  ;;  %v9448_v7 = vpop.f32.mrb[110].mxu0  ;;  %10890 = vmatmul.mubr.f32.gmra.mrb[124].mxu1 %v5361_v39  ;;  %v16586_v30 = vadd.f32 %v16494_v10, %v5332_v9  ;;  %v6715_v9 = vld [vmem:[#allocation13 + $0x208] sm:$0xff] }
 0x5c0   :  { %v9449_v47 = vpop.f32.mrb[111].mxu0  ;;  %v6719_v41 = vld [vmem:[#allocation13 + $0x228] sm:$0xff] }
 0x5c1   :  { %v5333_v11 = vadd.f32 %v5304_v36, %v16475_v46  ;;  %v9450_v13 = vadd.f32 %v9449_v47, %v9448_v7  ;;  %v5362_v14 = vmax.f32 %v16586_v30, 0.0  ;;  %v6714_v36 = vld [vmem:[#allocation13 + $0x200] sm:$0xff]  ;;  %v17707_v47 = vld [vmem:[#allocation23_spill] sm:$0xff] }
 0x5c2   :  { %v6718_v7 = vld [vmem:[#allocation13 + $0x220] sm:$0xff] }
 0x5c3   :  { %v16591_v16 = vadd.f32 %v16494_v10, %v5333_v11  ;;  %v5309_v12 = vadd.f32 %v9450_v13, %v16459_v61  ;;  %v9451_v53 = vpop.f32.mrb[112].mxu0  ;;  %10892 = vmatprep.mubr.f32.mxu1 %v5362_v14  ;;  %v17708_v11 = vmax.f32 %v17707_v47, 0.0  ;;  %v6723_v13 = vld [vmem:[#allocation13 + $0x248] sm:$0xff]  ;;  %v17710_v47 = vld [vmem:[#allocation29_spill] sm:$0xff] }
 0x5c4   :  { %v9452_v0 = vpop.f32.mrb[113].mxu0 }
 0x5c5   :  { %v5363_v4 = vmax.f32 %v16591_v16, 0.0  ;;  %v5334_v24 = vadd.f32 %v5309_v12, %v16479_v18  ;;  %v9453_v8 = vadd.f32 %v9452_v0, %v9451_v53  ;;  %v6727_v12 = vld [vmem:[#allocation13 + $0x268] sm:$0xff]  ;;  %v6722_v0 = vld [vmem:[#allocation13 + $0x240] sm:$0xff] }
 0x5c6   :  { %v11821_v53 = vpack.c.bf16 %v6727_v12, %v6723_v13  ;;  %v6746_v12 = vld [vmem:[#allocation13 + $0x300] sm:$0xff] }
 0x5c7   :  { %v5314_v46 = vadd.f32 %v9453_v8, %v16465_v52  ;;  %v9454_v57 = vpop.f32.mrb[114].mxu0  ;;  %10893 = vmatmul.mubr.f32.gmra.mrb[126].mxu1 %v5363_v4  ;;  %v16602_v50 = vadd.f32 %v16494_v10, %v5334_v24  ;;  %v6731_v8 = vld [vmem:[#allocation13 + $0x288] sm:$0xff] }
 0x5c8   :  { %v9455_v61 = vpop.f32.mrb[115].mxu0 }
 0x5c9   :  { %v5335_v44 = vadd.f32 %v5314_v46, %v16483_v34  ;;  %v9456_v43 = vadd.f32 %v9455_v61, %v9454_v57  ;;  %v5364_v17 = vmax.f32 %v16602_v50, 0.0  ;;  %v11817_v34 = vpack.c.bf16 %v6719_v41, %v6715_v9  ;;  %v6735_v46 = vld [vmem:[#allocation13 + $0x2a8] sm:$0xff]  ;;  %v6730_v61 = vld [vmem:[#allocation13 + $0x280] sm:$0xff] }
 0x5ca   :  { %v11825_v57 = vpack.c.bf16 %v6735_v46, %v6731_v8  ;;  %v6739_v9 = vld [vmem:[#allocation13 + $0x2c8] sm:$0xff]  ;;  %v17714_v46 = vld [vmem:[#allocation51_spill] sm:$0xff] }
 0x5cb   :  { %v16607_v32 = vadd.f32 %v16494_v10, %v5335_v44  ;;  %v5319_v18 = vadd.f32 %v9456_v43, %v16471_v59  ;;  %10895 = vmatprep.mubr.f32.mxu1 %v5364_v17  ;;  %v11819_v59 = vpack.c.bf16 %v6718_v7, %v6714_v36  ;;  %11818 = vmatprep.subr.bf16.mxu0 %v11817_v34  ;;  %v17709_v44 = vld [vmem:[#allocation132_spill] sm:$0xff]  ;;  %v6734_v43 = vld [vmem:[#allocation13 + $0x2a0] sm:$0xff]  ;;  %v6743_v41 = vld [vmem:[#allocation13 + $0x2e8] sm:$0xff] }
 0x5cc   :  { %v11829_v34 = vpack.c.bf16 %v6743_v41, %v6739_v9  ;;  %v6738_v36 = vld [vmem:[#allocation13 + $0x2c0] sm:$0xff]  ;;  %v17713_v8 = vld [vmem:[#allocation78_spill] sm:$0xff]  ;;  %v6724_v9 = vld [vmem:[#allocation13 + $0x250] sm:$0xff] }
 0x5cd   :  { %v5365_v52 = vmax.f32 %v16607_v32, 0.0  ;;  %v16614_v45 = vadd.f32 %v5319_v18, %v16487_v29  ;;  %11820 = vmatpush1.bf16.msra.mxu0 %v11819_v59  ;;  %v6726_v29 = vld [vmem:[#allocation13 + $0x260] sm:$0xff]  ;;  %v11827_v18 = vpack.c.bf16 %v6734_v43, %v6730_v61  ;;  %v6728_v41 = vld [vmem:[#allocation13 + $0x270] sm:$0xff] }
 0x5ce   :  { %v11823_v24 = vpack.c.bf16 %v6726_v29, %v6722_v0  ;;  %11822 = vmatprep.subr.bf16.mxu0 %v11821_v53  ;;  %v6742_v7 = vld [vmem:[#allocation13 + $0x2e0] sm:$0xff]  ;;  %v17711_v0 = vld [vmem:[#allocation88_spill] sm:$0xff]  ;;  %v11855_v23 = vpack.c.bf16 %v6728_v41, %v6724_v9 }
 0x5cf   :  { %10896 = vmatmul.mubr.f32.gmra.mrb[128].mxu1 %v5365_v52  ;;  %v11831_v59 = vpack.c.bf16 %v6742_v7, %v6738_v36  ;;  %v6750_v53 = vld [vmem:[#allocation13 + $0x320] sm:$0xff]  ;;  %v6737_v36 = vld [vmem:[#allocation13 + $0x2b8] sm:$0xff]  ;;  %v6732_v7 = vld [vmem:[#allocation13 + $0x290] sm:$0xff]  ;;  %v5351_v51 = vadd.f32 %v16494_v10, %v16614_v45 }
 0x5d0   :  { %10930 = vmatprep.mubr.f32.mxu1 %v17708_v11  ;;  %v6751_v11 = vld [vmem:[#allocation13 + $0x328] sm:$0xff]  ;;  %v11835_v29 = vpack.c.bf16 %v6750_v53, %v6746_v12  ;;  %v17716_v61 = vld [vmem:[#allocation93_spill] sm:$0xff]  ;;  %v6773_v9 = vld [vmem:[#allocation13 + $0x3d8] sm:$0xff] }
 0x5d1   :  { %11824 = vmatpush1.bf16.msra.mxu0 %v11823_v24  ;;  %v17712_v24 = vld [vmem:[#allocation49_spill] sm:$0xff]  ;;  %v6755_v45 = vld [vmem:[#allocation13 + $0x348] sm:$0xff] }
 0x5d2   :  { %11826 = vmatprep.subr.bf16.mxu0 %v11825_v57  ;;  %v17715_v57 = vld [vmem:[#allocation91_spill] sm:$0xff]  ;;  %v6759_v53 = vld [vmem:[#allocation13 + $0x368] sm:$0xff] }
 0x5d3   :  { %10931 = vmatmul.mubr.f32.vlgmr.msra.gmra.mrb[116].mxu1 %v16009_v40 }
 0x5d4   :  { %11756 = vmatpush3.bf16.msra.mxu1 %v17706_v42  ;;  %10933 = vmatprep.mubr.f32.mxu1 %v16014_v60  ;;  %v6747_v42 = vld [vmem:[#allocation13 + $0x308] sm:$0xff] }
 0x5d5   :  { %11758 = vmatprep.subr.bf16.mxu1 %v17709_v44  ;;  %11828 = vmatpush1.bf16.msra.mxu0 %v11827_v18  ;;  %v11833_v13 = vpack.c.bf16 %v6751_v11, %v6747_v42  ;;  %v6736_v42 = vld [vmem:[#allocation13 + $0x2b0] sm:$0xff]  ;;  %v6745_v11 = vld [vmem:[#allocation13 + $0x2f8] sm:$0xff] }
 0x5d6   :  { %11830 = vmatprep.subr.bf16.mxu0 %v11829_v34  ;;  %v6733_v34 = vld [vmem:[#allocation13 + $0x298] sm:$0xff]  ;;  %v11859_v62 = vpack.c.bf16 %v6736_v42, %v6732_v7  ;;  %v6772_v42 = vld [vmem:[#allocation13 + $0x3d0] sm:$0xff] }
 0x5d7   :  { %10934 = vmatmul.mubr.f32.gmra.mrb[118].mxu1 %v16024_v35 }
 0x5d8   :  { %11760 = vmatpush3.bf16.msra.mxu1 %v17709_v44  ;;  %10936 = vmatprep.mubr.f32.mxu1 %v16030_v21  ;;  %v6729_v44 = vld [vmem:[#allocation13 + $0x278] sm:$0xff] }
 0x5d9   :  { %11762 = vmatprep.subr.bf16.mxu1 %v17710_v47  ;;  %11832 = vmatpush1.bf16.msra.mxu0 %v11831_v59  ;;  %v6749_v59 = vld [vmem:[#allocation13 + $0x318] sm:$0xff] }
 0x5da   :  { %11834 = vmatprep.subr.bf16.mxu0 %v11833_v13  ;;  %v6753_v13 = vld [vmem:[#allocation13 + $0x338] sm:$0xff] }
 0x5db   :  { %10937 = vmatmul.mubr.f32.gmra.mrb[120].mxu1 %v16040_v1 }
 0x5dc   :  { %11764 = vmatpush3.bf16.msra.mxu1 %v17710_v47  ;;  %10939 = vmatprep.mubr.f32.mxu1 %v16045_v15  ;;  %v6741_v47 = vld [vmem:[#allocation13 + $0x2d8] sm:$0xff] }
 0x5dd   :  { %11766 = vmatprep.subr.bf16.mxu1 %v17711_v0  ;;  %11836 = vmatpush1.bf16.msra.mxu0 %v11835_v29  ;;  %v11837_v29 = vpack.c.bf16 %v6759_v53, %v6755_v45 }
 0x5df   :  { %10940 = vmatmul.mubr.f32.gmra.mrb[122].mxu1 %v16050_v20  ;;  %11838 = vmatprep.subr.bf16.mxu0 %v11837_v29 }
 0x5e0   :  { %11768 = vmatpush3.bf16.msra.mxu1 %v17711_v0  ;;  %10942 = vmatprep.mubr.f32.mxu1 %v16063_v19  ;;  %v6757_v0 = vld [vmem:[#allocation13 + $0x358] sm:$0xff] }
 0x5e1   :  { %11770 = vmatprep.subr.bf16.mxu1 %v17712_v24 }
 0x5e3   :  { %10943 = vmatmul.mubr.f32.gmra.mrb[124].mxu1 %v16075_v58 }
 0x5e4   :  { %11772 = vmatpush3.bf16.msra.mxu1 %v17712_v24  ;;  %10945 = vmatprep.mubr.f32.mxu1 %v16087_v55  ;;  %v6761_v24 = vld [vmem:[#allocation13 + $0x378] sm:$0xff] }
 0x5e5   :  { %11774 = vmatprep.subr.bf16.mxu1 %v17713_v8 }
 0x5e7   :  { %10946 = vmatmul.mubr.f32.gmra.mrb[126].mxu1 %v16099_v56 }
 0x5e8   :  { %11776 = vmatpush3.bf16.msra.mxu1 %v17713_v8  ;;  %10948 = vmatprep.mubr.f32.mxu1 %v17691_v26  ;;  %v6754_v8 = vld [vmem:[#allocation13 + $0x340] sm:$0xff] }
 0x5e9   :  { %11778 = vmatprep.subr.bf16.mxu1 %v17714_v46 }
 0x5eb   :  { %10949 = vmatmul.mubr.f32.gmra.mrb[128].mxu1 %v17692_v27 }
 0x5ec   :  { %11780 = vmatpush3.bf16.msra.mxu1 %v17714_v46  ;;  %10983 = vmatprep.mubr.f32.mxu1 %v16009_v40  ;;  %v17717_v40 = vld [vmem:[#allocation66_spill] sm:$0xff]  ;;  %v6758_v46 = vld [vmem:[#allocation13 + $0x360] sm:$0xff] }
 0x5ed   :  { %11782 = vmatprep.subr.bf16.mxu1 %v17715_v57 }
 0x5f0   :  { %11784 = vmatpush3.bf16.msra.mxu1 %v17715_v57  ;;  %v11869_v57 = vpack.c.bf16 %v6761_v24, %v6757_v0 }
 0x5f1   :  { %11786 = vmatprep.subr.bf16.mxu1 %v16292_v38 }
 0x5f3   :  { %10984 = vmatmul.mubr.f32.vlgmr.msra.gmra.mrb[116].mxu1 %v16014_v60  ;;  %v17718_v60 = vld [vmem:[#allocation94_spill] sm:$0xff] }
 0x5f4   :  { %10986 = vmatprep.mubr.f32.mxu1 %v16024_v35  ;;  %11788 = vmatpush3.bf16.msra.mxu1 %v16292_v38  ;;  %v17719_v35 = vld [vmem:[#allocation81_spill] sm:$0xff]  ;;  %v6716_v38 = vld [vmem:[#allocation13 + $0x210] sm:$0xff] }
 0x5f5   :  { %11790 = vmatprep.subr.bf16.mxu1 %v17716_v61 }
 0x5f7   :  { %10987 = vmatmul.mubr.f32.gmra.mrb[118].mxu1 %v16030_v21  ;;  %v17720_v21 = vld [vmem:[#allocation95_spill] sm:$0xff] }
 0x5f8   :  { %10989 = vmatprep.mubr.f32.mxu1 %v16040_v1  ;;  %11792 = vmatpush3.bf16.msra.mxu1 %v17716_v61  ;;  %v17721_v1 = vld [vmem:[#allocation97_spill] sm:$0xff]  ;;  %v11839_v61 = vpack.c.bf16 %v6758_v46, %v6754_v8 }
 0x5f9   :  { %11794 = vmatprep.subr.bf16.mxu1 %v17717_v40 }
 0x5fa   :  { %11840 = vmatpush1.bf16.msra.mxu0 %v11839_v61 }
 0x5fb   :  { %10990 = vmatmul.mubr.f32.gmra.mrb[120].mxu1 %v16045_v15  ;;  %v6717_v15 = vld [vmem:[#allocation13 + $0x218] sm:$0xff] }
 0x5fc   :  { %10992 = vmatprep.mubr.f32.mxu1 %v16050_v20  ;;  %11796 = vmatpush3.bf16.msra.mxu1 %v17717_v40  ;;  %v6721_v20 = vld [vmem:[#allocation13 + $0x238] sm:$0xff]  ;;  %v6756_v40 = vld [vmem:[#allocation13 + $0x350] sm:$0xff] }
 0x5fd   :  { %11798 = vmatprep.subr.bf16.mxu1 %v17718_v60 }
 0x5ff   :  { %10993 = vmatmul.mubr.f32.gmra.mrb[122].mxu1 %v16063_v19  ;;  %v17722_v19 = vld [vmem:[#allocation98_spill] sm:$0xff] }
 0x600   :  { %10995 = vmatprep.mubr.f32.mxu1 %v16075_v58  ;;  %11800 = vmatpush3.bf16.msra.mxu1 %v17718_v60  ;;  %v17723_v58 = vmax.f32 %v17722_v19, 0.0  ;;  %v6760_v60 = vld [vmem:[#allocation13 + $0x370] sm:$0xff]  ;;  %v6769_v19 = vld [vmem:[#allocation13 + $0x3b8] sm:$0xff] }
 0x601   :  { %11802 = vmatprep.subr.bf16.mxu1 %v17719_v35 }
 0x603   :  { %10996 = vmatmul.mubr.f32.gmra.mrb[124].mxu1 %v16087_v55  ;;  %v17724_v55 = vld [vmem:[#allocation48_spill] sm:$0xff] }
 0x604   :  { %10998 = vmatprep.mubr.f32.mxu1 %v16099_v56  ;;  %11804 = vmatpush3.bf16.msra.mxu1 %v17719_v35  ;;  %v11849_v56 = vpack.c.bf16 %v6721_v20, %v6717_v15  ;;  %v11871_v35 = vpack.c.bf16 %v6760_v60, %v6756_v40  ;;  %v6765_v15 = vld [vmem:[#allocation13 + $0x398] sm:$0xff] }
 0x605   :  { %11806 = vmatprep.subr.bf16.mxu1 %v17720_v21 }
 0x607   :  { %10999 = vmatmul.mubr.f32.gmra.mrb[126].mxu1 %v17691_v26  ;;  %v6720_v26 = vld [vmem:[#allocation13 + $0x230] sm:$0xff] }
 0x608   :  { %11001 = vmatprep.mubr.f32.mxu1 %v17692_v27  ;;  %11808 = vmatpush3.bf16.msra.mxu1 %v17720_v21  ;;  %v6725_v27 = vld [vmem:[#allocation13 + $0x258] sm:$0xff]  ;;  %v11851_v43 = vpack.c.bf16 %v6720_v26, %v6716_v38  ;;  %v6763_v21 = vld [vmem:[#allocation13 + $0x388] sm:$0xff]  ;;  %v6764_v26 = vld [vmem:[#allocation13 + $0x390] sm:$0xff] }
 0x609   :  { %11810 = vmatprep.subr.bf16.mxu1 %v17721_v1  ;;  %v11853_v18 = vpack.c.bf16 %v6729_v44, %v6725_v27  ;;  %v6768_v27 = vld [vmem:[#allocation13 + $0x3b0] sm:$0xff] }
 0x60a   :  { %v11875_v44 = vpack.c.bf16 %v6768_v27, %v6764_v26 }
 0x60b   :  { %11002 = vmatmul.mubr.f32.gmra.mrb[128].mxu1 %v17723_v58  ;;  %v6762_v58 = vld [vmem:[#allocation13 + $0x380] sm:$0xff] }
 0x60c   :  { %11812 = vmatpush3.bf16.msra.mxu1 %v17721_v1  ;;  %11036 = vmatprep.mubr.f32.mxu1 %v5353_v6  ;;  %v11857_v6 = vpack.c.bf16 %v6737_v36, %v6733_v34  ;;  %v6767_v1 = vld [vmem:[#allocation13 + $0x3a8] sm:$0xff]  ;;  %v6777_v34 = vld [vmem:[#allocation13 + $0x3f8] sm:$0xff]  ;;  %v6770_v36 = vld [vmem:[#allocation13 + $0x3c0] sm:$0xff] }
 0x60d   :  { %11814 = vmatprep.subr.bf16.mxu1 %v17724_v55  ;;  %v11841_v20 = vpack.c.bf16 %v6767_v1, %v6763_v21  ;;  %v6648_v1 = vld [vmem:[#allocation13] sm:$0xff] }
 0x60f   :  { %11842 = vmatprep.subr.bf16.mxu0 %v11841_v20 }
 0x610   :  { %11816 = vmatpush3.bf16.msra.mxu1 %v17724_v55  ;;  %v6766_v55 = vld [vmem:[#allocation13 + $0x3a0] sm:$0xff] }
 0x611   :  { %11850 = vmatprep.subr.bf16.mxu1 %v11849_v56  ;;  %v11873_v56 = vpack.c.bf16 %v6769_v19, %v6765_v15  ;;  %v11843_v38 = vpack.c.bf16 %v6766_v55, %v6762_v58  ;;  %v6652_v15 = vld [vmem:[#allocation13 + $0x20] sm:$0xff]  ;;  %v6650_v55 = vld [vmem:[#allocation13 + $0x10] sm:$0xff] }
 0x613   :  { %11037 = vmatmul.mubr.f32.vlgmr.msra.gmra.mrb[116].mxu1 %v5354_v33  ;;  %v11861_v33 = vpack.c.bf16 %v6745_v11, %v6741_v47  ;;  %11844 = vmatpush1.bf16.msra.mxu0 %v11843_v38  ;;  %v6776_v47 = vld [vmem:[#allocation13 + $0x3f0] sm:$0xff]  ;;  %v6657_v38 = vld [vmem:[#allocation13 + $0x48] sm:$0xff] }
 0x614   :  { %11039 = vmatprep.mubr.f32.mxu1 %v5355_v22  ;;  %11852 = vmatpush1.bf16.msra.mxu1 %v11851_v43  ;;  %v6744_v22 = vld [vmem:[#allocation13 + $0x2f0] sm:$0xff]  ;;  %v6771_v43 = vld [vmem:[#allocation13 + $0x3c8] sm:$0xff]  ;;  %v11879_v11 = vpack.c.bf16 %v6776_v47, %v6772_v42  ;;  %v6656_v47 = vld [vmem:[#allocation13 + $0x40] sm:$0xff] }
 0x615   :  { %11854 = vmatprep.subr.bf16.mxu1 %v11853_v18  ;;  %v11863_v37 = vpack.c.bf16 %v6744_v22, %v6740_v5  ;;  %v6775_v18 = vld [vmem:[#allocation13 + $0x3e8] sm:$0xff]  ;;  %v6651_v5 = vld [vmem:[#allocation13 + $0x18] sm:$0xff] }
 0x616   :  { %v11845_v41 = vpack.c.bf16 %v6775_v18, %v6771_v43  ;;  %v6661_v43 = vld [vmem:[#allocation13 + $0x68] sm:$0xff]  ;;  %v6663_v18 = vld [vmem:[#allocation13 + $0x78] sm:$0xff] }
 0x617   :  { %11040 = vmatmul.mubr.f32.gmra.mrb[118].mxu1 %v5356_v49  ;;  %v11865_v49 = vpack.c.bf16 %v6753_v13, %v6749_v59  ;;  %v6655_v59 = vld [vmem:[#allocation13 + $0x38] sm:$0xff] }
 0x618   :  { %11042 = vmatprep.mubr.f32.mxu1 %v5357_v54  ;;  %11856 = vmatpush1.bf16.msra.mxu1 %v11855_v23  ;;  %v6752_v54 = vld [vmem:[#allocation13 + $0x330] sm:$0xff]  ;;  %v6774_v23 = vld [vmem:[#allocation13 + $0x3e0] sm:$0xff]  ;;  %v11913_v13 = vpack.c.bf16 %v6655_v59, %v6651_v5  ;;  %v11885_v5 = vpack.c.bf16 %v6661_v43, %v6657_v38  ;;  %v6679_v38 = vld [vmem:[#allocation13 + $0xf8] sm:$0xff] }
 0x619   :  { %11858 = vmatprep.subr.bf16.mxu1 %v11857_v6  ;;  %v11867_v12 = vpack.c.bf16 %v6752_v54, %v6748_v25  ;;  %v11877_v6 = vpack.c.bf16 %v6777_v34, %v6773_v9  ;;  %v11847_v7 = vpack.c.bf16 %v6774_v23, %v6770_v36  ;;  %11846 = vmatprep.subr.bf16.mxu0 %v11845_v41  ;;  %v6658_v59 = vld [vmem:[#allocation13 + $0x50] sm:$0xff] }
 0x61b   :  { %11043 = vmatmul.mubr.f32.gmra.mrb[120].mxu1 %v5358_v3  ;;  %v5366_v3 = vmax.f32 %v5351_v51, 0.0  ;;  %11848 = vmatpush1.bf16.msra.mxu0 %v11847_v7  ;;  %v11883_v7 = vpack.c.bf16 %v6652_v15, %v6648_v1  ;;  %v6670_v1 = vld [vmem:[#allocation13 + $0xb0] sm:$0xff]  ;;  %v6673_v15 = vld [vmem:[#allocation13 + $0xc8] sm:$0xff] }
 0x61c   :  { %11045 = vmatprep.mubr.f32.mxu1 %v5359_v31  ;;  %11860 = vmatpush1.bf16.msra.mxu1 %v11859_v62  ;;  %v6649_v62 = vld [vmem:[#allocation13 + $0x8] sm:$0xff] }
 0x61d   :  { %11862 = vmatprep.subr.bf16.mxu1 %v11861_v33  ;;  %v6653_v33 = vld [vmem:[#allocation13 + $0x28] sm:$0xff] }
 0x61e   :  { %v11881_v22 = vpack.c.bf16 %v6653_v33, %v6649_v62 }
 0x61f   :  { %11046 = vmatmul.mubr.f32.gmra.mrb[122].mxu1 %v5360_v2 }
 0x620   :  { %11048 = vmatprep.mubr.f32.mxu1 %v5361_v39  ;;  %11864 = vmatpush1.bf16.msra.mxu1 %v11863_v37  ;;  %v16736_v37 = vld [vmem:[#allocation11] ss:$0 sm:$0xff] }
 0x621   :  { %11866 = vmatprep.subr.bf16.mxu1 %v11865_v49  ;;  %11882 = vmatprep.subr.bf16.mxu0 %v11881_v22 }
 0x623   :  { %11049 = vmatmul.mubr.f32.gmra.mrb[124].mxu1 %v5362_v14 }
 0x624   :  { %11051 = vmatprep.mubr.f32.mxu1 %v5363_v4  ;;  %11868 = vmatpush1.bf16.msra.mxu1 %v11867_v12 }
 0x625   :  { %11870 = vmatprep.subr.bf16.mxu1 %v11869_v57 }
 0x627   :  { %11052 = vmatmul.mubr.f32.gmra.mrb[126].mxu1 %v5364_v17 }
 0x628   :  { %11054 = vmatprep.mubr.f32.mxu1 %v5365_v52  ;;  %11872 = vmatpush1.bf16.msra.mxu1 %v11871_v35 }
 0x629   :  { %11874 = vmatprep.subr.bf16.mxu1 %v11873_v56  ;;  %v6654_v56 = vld [vmem:[#allocation13 + $0x30] sm:$0xff] }
 0x62a   :  { %v11915_v42 = vpack.c.bf16 %v6654_v56, %v6650_v55  ;;  %v6677_v55 = vld [vmem:[#allocation13 + $0xe8] sm:$0xff]  ;;  %v6675_v56 = vld [vmem:[#allocation13 + $0xd8] sm:$0xff] }
 0x62b   :  { %11055 = vmatmul.mubr.f32.gmra.mrb[128].mxu1 %v5366_v3 }
 0x62c   :  { %6913 = vmatprep.mubr.f32.mxu1 %v17725_v28  ;;  %11876 = vmatpush1.bf16.msra.mxu1 %v11875_v44 }
 0x62d   :  { %11878 = vmatprep.subr.bf16.mxu1 %v11877_v6 }
 0x630   :  { %11880 = vmatpush1.bf16.msra.mxu1 %v11879_v11 }
 0x631   :  { %11914 = vmatprep.subr.bf16.mxu1 %v11913_v13  ;;  %v6662_v13 = vld [vmem:[#allocation13 + $0x70] sm:$0xff] }
 0x632   :  { %v16708_v31 = vpop.f32.mrb[116].mxu0 }
 0x633   :  { %v16710_v48 = vpop.f32.mrb[117].mxu0  ;;  %v6010_v49 = vadd.f32 %v16708_v31, %v16736_v37 }
 0x634   :  { %v6009_v25 = vadd.f32 %v16736_v37, %v16710_v48 }
 0x635   :  { %v6024_v45 = vmax.f32 %v6010_v49, 0.0  ;;  %v6665_v49 = vld [vmem:[#allocation13 + $0x88] sm:$0xff] }
 0x636   :  { %v16712_v2 = vpop.f32.mrb[118].mxu0  ;;  %v6023_v29 = vmax.f32 %v6009_v25, 0.0 }
 0x637   :  { %v16714_v63 = vpop.f32.mrb[119].mxu0  ;;  %v6012_v53 = vadd.f32 %v16712_v2, %v16736_v37 }
 0x638   :  { %v6011_v24 = vadd.f32 %v16736_v37, %v16714_v63 }
 0x639   :  { %v6026_v35 = vmax.f32 %v6012_v53, 0.0 }
 0x63a   :  { %v16716_v39 = vpop.f32.mrb[120].mxu0  ;;  %v6025_v63 = vmax.f32 %v6011_v24, 0.0 }
 0x63b   :  { %v16718_v10 = vpop.f32.mrb[121].mxu0  ;;  %v6014_v61 = vadd.f32 %v16716_v39, %v16736_v37 }
 0x63c   :  { %v6013_v2 = vadd.f32 %v16736_v37, %v16718_v10  ;;  %v6659_v10 = vld [vmem:[#allocation13 + $0x58] sm:$0xff] }
 0x63d   :  { %v6028_v9 = vmax.f32 %v6014_v61, 0.0  ;;  %v11917_v22 = vpack.c.bf16 %v6663_v18, %v6659_v10  ;;  %v6668_v61 = vld [vmem:[#allocation13 + $0xa0] sm:$0xff] }
 0x63e   :  { %v16720_v30 = vpop.f32.mrb[122].mxu0  ;;  %v6027_v23 = vmax.f32 %v6013_v2, 0.0 }
 0x63f   :  { %v16722_v14 = vpop.f32.mrb[123].mxu0  ;;  %v6016_v39 = vadd.f32 %v16720_v30, %v16736_v37  ;;  %v6660_v30 = vld [vmem:[#allocation13 + $0x60] sm:$0xff] }
 0x640   :  { %v6015_v41 = vadd.f32 %v16736_v37, %v16722_v14 }
 0x641   :  { %v6030_v25 = vmax.f32 %v6016_v39, 0.0 }
 0x642   :  { %v16724_v16 = vpop.f32.mrb[124].mxu0  ;;  %v6029_v53 = vmax.f32 %v6015_v41, 0.0  ;;  %v6676_v41 = vld [vmem:[#allocation13 + $0xe0] sm:$0xff] }
 0x643   :  { %v16726_v4 = vpop.f32.mrb[125].mxu0 }
 0x646   :  { %v16728_v50 = vpop.f32.mrb[126].mxu0 }
 0x647   :  { %v16730_v17 = vpop.f32.mrb[127].mxu0 }
 0x64a   :  { %v16732_v32 = vpop.f32.mrb[128].mxu0 }
 0x64b   :  { %v16734_v52 = vpop.f32.mrb[129].mxu0 }
 0x6e6   :  { %v11038_v54 = vpop.f32.mrb[116].mxu1 }
 0x6e7   :  { %v6606_v12 = vadd.f32 %v11038_v54, %v16736_v37  ;;  %v6522_v51 = vpop.f32.mrb[117].mxu1 }
 0x6e8   :  { %v6605_v3 = vadd.f32 %v16736_v37, %v6522_v51  ;;  %v6669_v51 = vld [vmem:[#allocation13 + $0xa8] sm:$0xff] }
 0x6e9   :  { %v6620_v0 = vmax.f32 %v6606_v12, 0.0 }
 0x6ea   :  { %v6619_v8 = vmax.f32 %v6605_v3, 0.0  ;;  %v11041_v31 = vpop.f32.mrb[118].mxu1  ;;  %v6667_v3 = vld [vmem:[#allocation13 + $0x98] sm:$0xff] }
 0x6eb   :  { %v6634_v46 = vmax.f32 %v6024_v45, %v6620_v0  ;;  %v6608_v48 = vadd.f32 %v11041_v31, %v16736_v37  ;;  %v6532_v57 = vpop.f32.mrb[119].mxu1  ;;  %v6671_v45 = vld [vmem:[#allocation13 + $0xb8] sm:$0xff]  ;;  %v6018_v0 = vadd.f32 %v16724_v16, %v16736_v37  ;;  %v11889_v16 = vpack.c.bf16 %v6669_v51, %v6665_v49 }
 0x6ec   :  { %v6633_v40 = vmax.f32 %v6023_v29, %v6619_v8  ;;  %v6607_v60 = vadd.f32 %v16736_v37, %v6532_v57  ;;  %v6017_v8 = vadd.f32 %v16736_v37, %v16726_v4  ;;  %v6664_v57 = vld [vmem:[#allocation13 + $0x80] sm:$0xff]  ;;  %v11921_v2 = vpack.c.bf16 %v6671_v45, %v6667_v3 }
 0x6ed   :  { %v6622_v21 = vmax.f32 %v6608_v48, 0.0  ;;  %v11919_v48 = vpack.c.bf16 %v6662_v13, %v6658_v59  ;;  %v6020_v4 = vadd.f32 %v16728_v50, %v16736_v37  ;;  %v6032_v39 = vmax.f32 %v6018_v0, 0.0  ;;  %v6687_v59 = vld [vmem:[#allocation13 + $0x138] sm:$0xff]  ;;  %v6680_v45 = vld [vmem:[#allocation13 + $0x100] sm:$0xff] }
 0x6ee   :  { %v16754_v20 = vmax.f32 %v6633_v40, %v6634_v46  ;;  %v6621_v19 = vmax.f32 %v6607_v60, 0.0  ;;  %v11044_v58 = vpop.f32.mrb[120].mxu1  ;;  %v11887_v46 = vpack.c.bf16 %v6660_v30, %v6656_v47  ;;  %v6031_v43 = vmax.f32 %v6017_v8, 0.0  ;;  %v6681_v47 = vld [vmem:[#allocation13 + $0x108] sm:$0xff] }
 0x6ef   :  { %v6636_v26 = vmax.f32 %v6026_v35, %v6622_v21  ;;  %v6610_v27 = vadd.f32 %v11044_v58, %v16736_v37  ;;  %v6542_v44 = vpop.f32.mrb[121].mxu1  ;;  %v6666_v21 = vld [vmem:[#allocation13 + $0x90] sm:$0xff]  ;;  %v11891_v10 = vpack.c.bf16 %v6668_v61, %v6664_v57  ;;  %v6034_v30 = vmax.f32 %v6020_v4, 0.0 }
 0x6f0   :  { %v6635_v34 = vmax.f32 %v6025_v63, %v6621_v19  ;;  %v6609_v36 = vadd.f32 %v16736_v37, %v6542_v44  ;;  %v11923_v18 = vpack.c.bf16 %v6670_v1, %v6666_v21  ;;  %v6022_v49 = vadd.f32 %v16732_v32, %v16736_v37 }
 0x6f1   :  { %v6624_v6 = vmax.f32 %v6610_v27, 0.0 }
 0x6f2   :  { %v6712_v11 = vmax.f32 %v6635_v34, %v6636_v26  ;;  %v6623_v62 = vmax.f32 %v6609_v36, 0.0  ;;  %v11047_v33 = vpop.f32.mrb[122].mxu1  ;;  %v6019_v26 = vadd.f32 %v16736_v37, %v16730_v17  ;;  %v6674_v17 = vld [vmem:[#allocation13 + $0xd0] sm:$0xff] }
 0x6f3   :  { %v6638_v54 = vmax.f32 %v6028_v9, %v6624_v6  ;;  %v6612_v14 = vadd.f32 %v11047_v33, %v16736_v37  ;;  %v6552_v12 = vpop.f32.mrb[123].mxu1  ;;  %v6672_v9 = vld [vmem:[#allocation13 + $0xc0] sm:$0xff]  ;;  %v11893_v6 = vpack.c.bf16 %v6677_v55, %v6673_v15 }
 0x6f4   :  { %v6637_v29 = vmax.f32 %v6027_v23, %v6623_v62  ;;  %v6611_v24 = vadd.f32 %v16736_v37, %v6552_v12  ;;  %6843 = vmatmul.mubr.f32.vlgmr.msra.gmra.mrb[130].mxu0 %v6712_v11  ;;  %6914 = vmatmul.mubr.f32.vlgmr.msra.gmra.mrb[130].mxu1 %v6712_v11  ;;  %v6033_v13 = vmax.f32 %v6019_v26, 0.0  ;;  %v11895_v51 = vpack.c.bf16 %v6676_v41, %v6672_v9  ;;  %v6692_v55 = vld [vmem:[#allocation13 + $0x160] sm:$0xff] }
 0x6f5   :  { %v6626_v31 = vmax.f32 %v6612_v14, 0.0  ;;  %11884 = vmatpush1.bf16.msra.mxu0 %v11883_v7  ;;  %11916 = vmatpush1.bf16.msra.mxu1 %v11915_v42  ;;  %v11925_v7 = vpack.c.bf16 %v6679_v38, %v6675_v56  ;;  %v6678_v42 = vld [vmem:[#allocation13 + $0xf0] sm:$0xff]  ;;  %v6021_v14 = vadd.f32 %v16736_v37, %v16734_v52 }
 0x6f6   :  { %v16768_v40 = vmax.f32 %v6637_v29, %v6638_v54  ;;  %v6625_v60 = vmax.f32 %v6611_v24, 0.0  ;;  %v11050_v35 = vpop.f32.mrb[124].mxu1  ;;  %11886 = vmatprep.subr.bf16.mxu0 %v11885_v5  ;;  %11918 = vmatprep.subr.bf16.mxu1 %v11917_v22  ;;  %v6685_v5 = vld [vmem:[#allocation13 + $0x128] sm:$0xff]  ;;  %v6683_v22 = vld [vmem:[#allocation13 + $0x118] sm:$0xff]  ;;  %v11927_v3 = vpack.c.bf16 %v6678_v42, %v6674_v17 }
 0x6f7   :  { %v6640_v63 = vmax.f32 %v6030_v25, %v6626_v31  ;;  %v6614_v19 = vadd.f32 %v11050_v35, %v16736_v37  ;;  %v6562_v58 = vpop.f32.mrb[125].mxu1  ;;  %6984 = vmatprep.mubr.f32.mxu0 %v17725_v28  ;;  %7055 = vmatprep.mubr.f32.mxu1 %v17725_v28  ;;  %v11897_v32 = vpack.c.bf16 %v6685_v5, %v6681_v47  ;;  %v6682_v31 = vld [vmem:[#allocation13 + $0x110] sm:$0xff]  ;;  %v6691_v35 = vld [vmem:[#allocation13 + $0x158] sm:$0xff]  ;;  %v6035_v15 = vmax.f32 %v6021_v14, 0.0 }
 0x6f8   :  { %v6639_v27 = vmax.f32 %v6029_v53, %v6625_v60  ;;  %v6613_v44 = vadd.f32 %v16736_v37, %v6562_v58  ;;  %v6684_v53 = vld [vmem:[#allocation13 + $0x120] sm:$0xff]  ;;  %v11929_v8 = vpack.c.bf16 %v6687_v59, %v6683_v22  ;;  %v6693_v60 = vld [vmem:[#allocation13 + $0x168] sm:$0xff]  ;;  %v6698_v47 = vld [vmem:[#allocation13 + $0x190] sm:$0xff] }
 0x6f9   :  { %v6628_v50 = vmax.f32 %v6614_v19, 0.0  ;;  %11888 = vmatpush1.bf16.msra.mxu0 %v11887_v46  ;;  %11920 = vmatpush1.bf16.msra.mxu1 %v11919_v48  ;;  %v6686_v46 = vld [vmem:[#allocation13 + $0x130] sm:$0xff]  ;;  %v6689_v48 = vld [vmem:[#allocation13 + $0x148] sm:$0xff]  ;;  %v6688_v58 = vld [vmem:[#allocation13 + $0x140] sm:$0xff] }
 0x6fa   :  { %v16778_v34 = vmax.f32 %v6639_v27, %v6640_v63  ;;  %v6627_v36 = vmax.f32 %v6613_v44, 0.0  ;;  %v11053_v23 = vpop.f32.mrb[126].mxu1  ;;  %11890 = vmatprep.subr.bf16.mxu0 %v11889_v16  ;;  %11922 = vmatprep.subr.bf16.mxu1 %v11921_v2  ;;  %v6695_v16 = vld [vmem:[#allocation13 + $0x178] sm:$0xff]  ;;  %v6036_v2 = vmax.f32 %v6022_v49, 0.0  ;;  %v11899_v63 = vpack.c.bf16 %v6684_v53, %v6680_v45  ;;  %v6690_v27 = vld [vmem:[#allocation13 + $0x150] sm:$0xff]  ;;  %v6708_v49 = vld [vmem:[#allocation13 + $0x1e0] sm:$0xff] }
 0x6fb   :  { %v6642_v11 = vmax.f32 %v6032_v39, %v6628_v50  ;;  %v6616_v62 = vadd.f32 %v11053_v23, %v16736_v37  ;;  %v6572_v33 = vpop.f32.mrb[127].mxu1  ;;  %v11931_v19 = vpack.c.bf16 %v6686_v46, %v6682_v31  ;;  %v11901_v39 = vpack.c.bf16 %v6693_v60, %v6689_v48  ;;  %v6694_v44 = vld [vmem:[#allocation13 + $0x170] sm:$0xff]  ;;  %v6696_v23 = vld [vmem:[#allocation13 + $0x180] sm:$0xff]  ;;  %v6711_v5 = vld [vmem:[#allocation13 + $0x1f8] sm:$0xff] }
 0x6fc   :  { %v6641_v25 = vmax.f32 %v6031_v43, %v6627_v36  ;;  %v6615_v54 = vadd.f32 %v16736_v37, %v6572_v33  ;;  %v11933_v26 = vpack.c.bf16 %v6695_v16, %v6691_v35  ;;  %v6697_v43 = vld [vmem:[#allocation13 + $0x188] sm:$0xff]  ;;  %v11903_v41 = vpack.c.bf16 %v6692_v55, %v6688_v58  ;;  %v6707_v33 = vld [vmem:[#allocation13 + $0x1d8] sm:$0xff]  ;;  %v6706_v14 = vld [vmem:[#allocation13 + $0x1d0] sm:$0xff] }
 0x6fd   :  { %v6630_v12 = vmax.f32 %v6616_v62, 0.0  ;;  %11892 = vmatpush1.bf16.msra.mxu0 %v11891_v10  ;;  %11924 = vmatpush1.bf16.msra.mxu1 %v11923_v18  ;;  %v6699_v10 = vld [vmem:[#allocation13 + $0x198] sm:$0xff]  ;;  %v11935_v36 = vpack.c.bf16 %v6694_v44, %v6690_v27  ;;  %v6709_v62 = vld [vmem:[#allocation13 + $0x1e8] sm:$0xff]  ;;  %v7066_v48 = vld [vmem:[#allocation13 + $0x410] sm:$0xff] }
 0x6fe   :  { %v16786_v0 = vmax.f32 %v6641_v25, %v6642_v11  ;;  %v6629_v29 = vmax.f32 %v6615_v54, 0.0  ;;  %v11056_v24 = vpop.f32.mrb[128].mxu1  ;;  %11894 = vmatprep.subr.bf16.mxu0 %v11893_v6  ;;  %11926 = vmatprep.subr.bf16.mxu1 %v11925_v7  ;;  %v6703_v18 = vld [vmem:[#allocation13 + $0x1b8] sm:$0xff]  ;;  %v6700_v6 = vld [vmem:[#allocation13 + $0x1a0] sm:$0xff]  ;;  %v6705_v11 = vld [vmem:[#allocation13 + $0x1c8] sm:$0xff]  ;;  %v11941_v54 = vpack.c.bf16 %v6711_v5, %v6707_v33 }
 0x6ff   :  { %v6644_v57 = vmax.f32 %v6034_v30, %v6630_v12  ;;  %v6618_v52 = vadd.f32 %v11056_v24, %v16736_v37  ;;  %v6582_v61 = vpop.f32.mrb[129].mxu1  ;;  %v11937_v42 = vpack.c.bf16 %v6703_v18, %v6699_v10  ;;  %v6702_v30 = vld [vmem:[#allocation13 + $0x1b0] sm:$0xff]  ;;  %v11907_v22 = vpack.c.bf16 %v6700_v6, %v6696_v23  ;;  %v7067_v45 = vld [vmem:[#allocation13 + $0x418] sm:$0xff]  ;;  %v7081_v58 = vld [vmem:[#allocation13 + $0x488] sm:$0xff] }
 0x700   :  { %v6643_v21 = vmax.f32 %v6033_v13, %v6629_v29  ;;  %v6617_v1 = vadd.f32 %v16736_v37, %v6582_v61  ;;  %v6701_v37 = vld [vmem:[#allocation13 + $0x1a8] sm:$0xff]  ;;  %v11939_v59 = vpack.c.bf16 %v6702_v30, %v6698_v47  ;;  %v6704_v13 = vld [vmem:[#allocation13 + $0x1c0] sm:$0xff]  ;;  %v11909_v25 = vpack.c.bf16 %v6709_v62, %v6705_v11  ;;  %v6710_v12 = vld [vmem:[#allocation13 + $0x1f0] sm:$0xff] }
 0x701   :  { %v6632_v4 = vmax.f32 %v6618_v52, 0.0  ;;  %11896 = vmatpush1.bf16.msra.mxu0 %v11895_v51  ;;  %11928 = vmatpush1.bf16.msra.mxu1 %v11927_v3  ;;  %v11905_v17 = vpack.c.bf16 %v6701_v37, %v6697_v43  ;;  %v7065_v51 = vld [vmem:[#allocation13 + $0x408] sm:$0xff]  ;;  %v7071_v53 = vld [vmem:[#allocation13 + $0x438] sm:$0xff]  ;;  %v11911_v29 = vpack.c.bf16 %v6708_v49, %v6704_v13  ;;  %v11943_v24 = vpack.c.bf16 %v6710_v12, %v6706_v14  ;;  %v7080_v44 = vld [vmem:[#allocation13 + $0x480] sm:$0xff] }
 0x702   :  { %v16790_v56 = vmax.f32 %v6643_v21, %v6644_v57  ;;  %v6631_v38 = vmax.f32 %v6617_v1, 0.0  ;;  %11898 = vmatprep.subr.bf16.mxu0 %v11897_v32  ;;  %11930 = vmatprep.subr.bf16.mxu1 %v11929_v8  ;;  %v7069_v3 = vld [vmem:[#allocation13 + $0x428] sm:$0xff]  ;;  %v7064_v32 = vld [vmem:[#allocation13 + $0x400] sm:$0xff]  ;;  %v11977_v46 = vpack.c.bf16 %v7071_v53, %v7067_v45  ;;  %v7070_v57 = vld [vmem:[#allocation13 + $0x430] sm:$0xff] }
 0x703   :  { %v6646_v50 = vmax.f32 %v6036_v2, %v6632_v4  ;;  %v7068_v8 = vld [vmem:[#allocation13 + $0x420] sm:$0xff]  ;;  %v11945_v31 = vpack.c.bf16 %v7069_v3, %v7065_v51  ;;  %v7073_v52 = vld [vmem:[#allocation13 + $0x448] sm:$0xff]  ;;  %v7075_v60 = vld [vmem:[#allocation13 + $0x458] sm:$0xff]  ;;  %v11979_v2 = vpack.c.bf16 %v7070_v57, %v7066_v48 }
 0x704   :  { %v6645_v9 = vmax.f32 %v6035_v15, %v6631_v38  ;;  %v7077_v61 = vld [vmem:[#allocation13 + $0x468] sm:$0xff]  ;;  %v7079_v35 = vld [vmem:[#allocation13 + $0x478] sm:$0xff]  ;;  %v11947_v16 = vpack.c.bf16 %v7068_v8, %v7064_v32  ;;  %v7072_v21 = vld [vmem:[#allocation13 + $0x440] sm:$0xff] }
 0x705   :  { %11900 = vmatpush1.bf16.msra.mxu0 %v11899_v63  ;;  %11932 = vmatpush1.bf16.msra.mxu1 %v11931_v19  ;;  %v7076_v1 = vld [vmem:[#allocation13 + $0x460] sm:$0xff]  ;;  %v11949_v15 = vpack.c.bf16 %v7077_v61, %v7073_v52  ;;  %v11981_v4 = vpack.c.bf16 %v7079_v35, %v7075_v60  ;;  %v7074_v63 = vld [vmem:[#allocation13 + $0x450] sm:$0xff]  ;;  %v7085_v55 = vld [vmem:[#allocation13 + $0x4a8] sm:$0xff] }
 0x706   :  { %v16792_v7 = vmax.f32 %v6645_v9, %v6646_v50  ;;  %11902 = vmatprep.subr.bf16.mxu0 %v11901_v39  ;;  %11934 = vmatprep.subr.bf16.mxu1 %v11933_v26  ;;  %v7078_v19 = vld [vmem:[#allocation13 + $0x470] sm:$0xff]  ;;  %v7083_v38 = vld [vmem:[#allocation13 + $0x498] sm:$0xff]  ;;  %v11951_v26 = vpack.c.bf16 %v7076_v1, %v7072_v21  ;;  %v7084_v43 = vld [vmem:[#allocation13 + $0x4a0] sm:$0xff]  ;;  %v11953_v50 = vpack.c.bf16 %v7085_v55, %v7081_v58 }
 0x707   :  { %v7087_v39 = vld [vmem:[#allocation13 + $0x4b8] sm:$0xff]  ;;  %v11983_v27 = vpack.c.bf16 %v7078_v19, %v7074_v63  ;;  %v7082_v10 = vld [vmem:[#allocation13 + $0x490] sm:$0xff]  ;;  %v7089_v9 = vld [vmem:[#allocation13 + $0x4c8] sm:$0xff] }
 0x708   :  { %v11985_v37 = vpack.c.bf16 %v7087_v39, %v7083_v38  ;;  %v7086_v18 = vld [vmem:[#allocation13 + $0x4b0] sm:$0xff]  ;;  %v7095_v23 = vld [vmem:[#allocation13 + $0x4f8] sm:$0xff]  ;;  %v7097_v33 = vld [vmem:[#allocation13 + $0x508] sm:$0xff] }
 0x709   :  { %11904 = vmatpush1.bf16.msra.mxu0 %v11903_v41  ;;  %11936 = vmatpush1.bf16.msra.mxu1 %v11935_v36  ;;  %v7093_v41 = vld [vmem:[#allocation13 + $0x4e8] sm:$0xff]  ;;  %v7091_v36 = vld [vmem:[#allocation13 + $0x4d8] sm:$0xff]  ;;  %v11987_v6 = vpack.c.bf16 %v7086_v18, %v7082_v10  ;;  %v7090_v11 = vld [vmem:[#allocation13 + $0x4d0] sm:$0xff] }
 0x70a   :  { %11906 = vmatprep.subr.bf16.mxu0 %v11905_v17  ;;  %11938 = vmatprep.subr.bf16.mxu1 %v11937_v42  ;;  %v7088_v17 = vld [vmem:[#allocation13 + $0x4c0] sm:$0xff]  ;;  %v11957_v47 = vpack.c.bf16 %v7093_v41, %v7089_v9  ;;  %v11989_v30 = vpack.c.bf16 %v7095_v23, %v7091_v36  ;;  %v7094_v62 = vld [vmem:[#allocation13 + $0x4f0] sm:$0xff]  ;;  %v7101_v5 = vld [vmem:[#allocation13 + $0x528] sm:$0xff] }
 0x70b   :  { %v7092_v42 = vld [vmem:[#allocation13 + $0x4e0] sm:$0xff]  ;;  %v11991_v49 = vpack.c.bf16 %v7094_v62, %v7090_v11  ;;  %v11961_v14 = vpack.c.bf16 %v7101_v5, %v7097_v33  ;;  %v7098_v51 = vld [vmem:[#allocation13 + $0x510] sm:$0xff]  ;;  %v7105_v45 = vld [vmem:[#allocation13 + $0x548] sm:$0xff] }
 0x70c   :  { %v11959_v13 = vpack.c.bf16 %v7092_v42, %v7088_v17  ;;  %v7102_v3 = vld [vmem:[#allocation13 + $0x530] sm:$0xff]  ;;  %v7109_v53 = vld [vmem:[#allocation13 + $0x568] sm:$0xff] }
 0x70d   :  { %11908 = vmatpush1.bf16.msra.mxu0 %v11907_v22  ;;  %11940 = vmatpush1.bf16.msra.mxu1 %v11939_v59  ;;  %v7099_v22 = vld [vmem:[#allocation13 + $0x518] sm:$0xff]  ;;  %v11995_v8 = vpack.c.bf16 %v7102_v3, %v7098_v51  ;;  %v11965_v48 = vpack.c.bf16 %v7109_v53, %v7105_v45  ;;  %v7106_v52 = vld [vmem:[#allocation13 + $0x550] sm:$0xff]  ;;  %v7113_v60 = vld [vmem:[#allocation13 + $0x588] sm:$0xff] }
 0x70e   :  { %11910 = vmatprep.subr.bf16.mxu0 %v11909_v25  ;;  %11942 = vmatprep.subr.bf16.mxu1 %v11941_v54  ;;  %v7103_v59 = vld [vmem:[#allocation13 + $0x538] sm:$0xff]  ;;  %v7096_v25 = vld [vmem:[#allocation13 + $0x500] sm:$0xff]  ;;  %v7110_v61 = vld [vmem:[#allocation13 + $0x570] sm:$0xff] }
 0x70f   :  { %v7100_v54 = vld [vmem:[#allocation13 + $0x520] sm:$0xff]  ;;  %v11993_v12 = vpack.c.bf16 %v7103_v59, %v7099_v22  ;;  %v7117_v35 = vld [vmem:[#allocation13 + $0x5a8] sm:$0xff]  ;;  %v11999_v1 = vpack.c.bf16 %v7110_v61, %v7106_v52  ;;  %v7114_v58 = vld [vmem:[#allocation13 + $0x590] sm:$0xff] }
 0x710   :  { %v11963_v32 = vpack.c.bf16 %v7100_v54, %v7096_v25  ;;  %v11969_v63 = vpack.c.bf16 %v7117_v35, %v7113_v60  ;;  %v7118_v55 = vld [vmem:[#allocation13 + $0x5b0] sm:$0xff]  ;;  %v7121_v38 = vld [vmem:[#allocation13 + $0x5c8] sm:$0xff] }
 0x711   :  { %11912 = vmatpush1.bf16.msra.mxu0 %v11911_v29  ;;  %11944 = vmatpush1.bf16.msra.mxu1 %v11943_v24  ;;  %v7107_v29 = vld [vmem:[#allocation13 + $0x558] sm:$0xff]  ;;  %v7125_v39 = vld [vmem:[#allocation13 + $0x5e8] sm:$0xff]  ;;  %v7122_v9 = vld [vmem:[#allocation13 + $0x5d0] sm:$0xff] }
 0x712   :  { %11946 = vmatprep.subr.bf16.mxu0 %v11945_v31  ;;  %11978 = vmatprep.subr.bf16.mxu1 %v11977_v46  ;;  %v7111_v24 = vld [vmem:[#allocation13 + $0x578] sm:$0xff]  ;;  %v7104_v31 = vld [vmem:[#allocation13 + $0x540] sm:$0xff]  ;;  %v11973_v10 = vpack.c.bf16 %v7125_v39, %v7121_v38  ;;  %v7126_v41 = vld [vmem:[#allocation13 + $0x5f0] sm:$0xff] }
 0x713   :  { %v7108_v46 = vld [vmem:[#allocation13 + $0x560] sm:$0xff]  ;;  %v11997_v57 = vpack.c.bf16 %v7111_v24, %v7107_v29  ;;  %v7277_v36 = vld [vmem:[#allocation13 + $0x608] sm:$0xff]  ;;  %v12007_v42 = vpack.c.bf16 %v7126_v41, %v7122_v9  ;;  %v7278_v33 = vld [vmem:[#allocation13 + $0x610] sm:$0xff] }
 0x714   :  { %6985 = vmatmul.mubr.f32.vlgmr.msra.gmra.mrb[130].mxu0 %v16754_v20  ;;  %7056 = vmatmul.mubr.f32.vlgmr.msra.gmra.mrb[130].mxu1 %v16754_v20  ;;  %v11955_v20 = vpack.c.bf16 %v7084_v43, %v7080_v44  ;;  %v11967_v21 = vpack.c.bf16 %v7108_v46, %v7104_v31  ;;  %v12003_v43 = vpack.c.bf16 %v7118_v55, %v7114_v58  ;;  %v7281_v23 = vld [vmem:[#allocation13 + $0x628] sm:$0xff]  ;;  %v7282_v5 = vld [vmem:[#allocation13 + $0x630] sm:$0xff] }
 0x715   :  { %11948 = vmatpush1.bf16.msra.mxu0 %v11947_v16  ;;  %11980 = vmatpush1.bf16.msra.mxu1 %v11979_v2  ;;  %v7115_v16 = vld [vmem:[#allocation13 + $0x598] sm:$0xff]  ;;  %v12009_v11 = vpack.c.bf16 %v7281_v23, %v7277_v36  ;;  %v7285_v22 = vld [vmem:[#allocation13 + $0x648] sm:$0xff]  ;;  %v12043_v54 = vpack.c.bf16 %v7282_v5, %v7278_v33  ;;  %v7286_v45 = vld [vmem:[#allocation13 + $0x650] sm:$0xff] }
 0x716   :  { %11950 = vmatprep.subr.bf16.mxu0 %v11949_v15  ;;  %11982 = vmatprep.subr.bf16.mxu1 %v11981_v4  ;;  %v7119_v2 = vld [vmem:[#allocation13 + $0x5b8] sm:$0xff]  ;;  %v7112_v15 = vld [vmem:[#allocation13 + $0x580] sm:$0xff]  ;;  %v7289_v59 = vld [vmem:[#allocation13 + $0x668] sm:$0xff] }
 0x717   :  { %7192 = vmatprep.mubr.f32.mxu0 %v17725_v28  ;;  %7263 = vmatprep.mubr.f32.mxu1 %v17725_v28  ;;  %v7116_v4 = vld [vmem:[#allocation13 + $0x5a0] sm:$0xff]  ;;  %v12001_v19 = vpack.c.bf16 %v7119_v2, %v7115_v16  ;;  %v12013_v51 = vpack.c.bf16 %v7289_v59, %v7285_v22  ;;  %v7290_v53 = vld [vmem:[#allocation13 + $0x670] sm:$0xff]  ;;  %v7293_v29 = vld [vmem:[#allocation13 + $0x688] sm:$0xff] }
 0x718   :  { %v11971_v44 = vpack.c.bf16 %v7116_v4, %v7112_v15  ;;  %v7297_v24 = vld [vmem:[#allocation13 + $0x6a8] sm:$0xff]  ;;  %v12047_v46 = vpack.c.bf16 %v7290_v53, %v7286_v45  ;;  %v7294_v60 = vld [vmem:[#allocation13 + $0x690] sm:$0xff]  ;;  %v7300_v4 = vld [vmem:[#allocation13 + $0x6c0] sm:$0xff] }
 0x719   :  { %11952 = vmatpush1.bf16.msra.mxu0 %v11951_v26  ;;  %11984 = vmatpush1.bf16.msra.mxu1 %v11983_v27  ;;  %v7123_v26 = vld [vmem:[#allocation13 + $0x5d8] sm:$0xff]  ;;  %v12017_v52 = vpack.c.bf16 %v7297_v24, %v7293_v29  ;;  %v7298_v35 = vld [vmem:[#allocation13 + $0x6b0] sm:$0xff]  ;;  %v7301_v16 = vld [vmem:[#allocation13 + $0x6c8] sm:$0xff] }
 0x71a   :  { %11954 = vmatprep.subr.bf16.mxu0 %v11953_v50  ;;  %11986 = vmatprep.subr.bf16.mxu1 %v11985_v37  ;;  %v7127_v27 = vld [vmem:[#allocation13 + $0x5f8] sm:$0xff]  ;;  %v7120_v50 = vld [vmem:[#allocation13 + $0x5c0] sm:$0xff]  ;;  %v7305_v2 = vld [vmem:[#allocation13 + $0x6e8] sm:$0xff]  ;;  %v12051_v15 = vpack.c.bf16 %v7298_v35, %v7294_v60 }
 0x71b   :  { %v7124_v37 = vld [vmem:[#allocation13 + $0x5e0] sm:$0xff]  ;;  %v12005_v18 = vpack.c.bf16 %v7127_v27, %v7123_v26  ;;  %v7302_v55 = vld [vmem:[#allocation13 + $0x6d0] sm:$0xff]  ;;  %v7309_v39 = vld [vmem:[#allocation13 + $0x708] sm:$0xff] }
 0x71c   :  { %v11975_v17 = vpack.c.bf16 %v7124_v37, %v7120_v50  ;;  %v7306_v38 = vld [vmem:[#allocation13 + $0x6f0] sm:$0xff]  ;;  %v7313_v26 = vld [vmem:[#allocation13 + $0x728] sm:$0xff]  ;;  %v7311_v27 = vld [vmem:[#allocation13 + $0x718] sm:$0xff] }
 0x71d   :  { %11956 = vmatpush1.bf16.msra.mxu0 %v11955_v20  ;;  %11988 = vmatpush1.bf16.msra.mxu1 %v11987_v6  ;;  %v7279_v20 = vld [vmem:[#allocation13 + $0x618] sm:$0xff]  ;;  %v12055_v50 = vpack.c.bf16 %v7306_v38, %v7302_v55  ;;  %v7308_v37 = vld [vmem:[#allocation13 + $0x700] sm:$0xff]  ;;  %v7310_v41 = vld [vmem:[#allocation13 + $0x710] sm:$0xff] }
 0x71e   :  { %11958 = vmatprep.subr.bf16.mxu0 %v11957_v47  ;;  %11990 = vmatprep.subr.bf16.mxu1 %v11989_v30  ;;  %v7283_v6 = vld [vmem:[#allocation13 + $0x638] sm:$0xff]  ;;  %v7276_v47 = vld [vmem:[#allocation13 + $0x600] sm:$0xff]  ;;  %v7314_v36 = vld [vmem:[#allocation13 + $0x730] sm:$0xff] }
 0x71f   :  { %v7280_v30 = vld [vmem:[#allocation13 + $0x620] sm:$0xff]  ;;  %v12041_v62 = vpack.c.bf16 %v7283_v6, %v7279_v20  ;;  %v7317_v23 = vld [vmem:[#allocation13 + $0x748] sm:$0xff]  ;;  %v7319_v6 = vld [vmem:[#allocation13 + $0x758] sm:$0xff] }
 0x720   :  { %v12011_v25 = vpack.c.bf16 %v7280_v30, %v7276_v47  ;;  %v7321_v20 = vld [vmem:[#allocation13 + $0x768] sm:$0xff]  ;;  %v12059_v47 = vpack.c.bf16 %v7314_v36, %v7310_v41  ;;  %v7316_v30 = vld [vmem:[#allocation13 + $0x740] sm:$0xff]  ;;  %v7318_v5 = vld [vmem:[#allocation13 + $0x750] sm:$0xff] }
 0x721   :  { %11960 = vmatpush1.bf16.msra.mxu0 %v11959_v13  ;;  %11992 = vmatpush1.bf16.msra.mxu1 %v11991_v49  ;;  %v7287_v13 = vld [vmem:[#allocation13 + $0x658] sm:$0xff]  ;;  %v7322_v22 = vld [vmem:[#allocation13 + $0x770] sm:$0xff]  ;;  %v7325_v59 = vld [vmem:[#allocation13 + $0x788] sm:$0xff] }
 0x722   :  { %11962 = vmatprep.subr.bf16.mxu0 %v11961_v14  ;;  %11994 = vmatprep.subr.bf16.mxu1 %v11993_v12  ;;  %v7291_v49 = vld [vmem:[#allocation13 + $0x678] sm:$0xff]  ;;  %v7284_v14 = vld [vmem:[#allocation13 + $0x640] sm:$0xff]  ;;  %v7326_v53 = vld [vmem:[#allocation13 + $0x790] sm:$0xff] }
 0x723   :  { %v7288_v12 = vld [vmem:[#allocation13 + $0x660] sm:$0xff]  ;;  %v12045_v3 = vpack.c.bf16 %v7291_v49, %v7287_v13  ;;  %v7329_v13 = vld [vmem:[#allocation13 + $0x7a8] sm:$0xff]  ;;  %v7327_v49 = vld [vmem:[#allocation13 + $0x798] sm:$0xff] }
 0x724   :  { %v12015_v31 = vpack.c.bf16 %v7288_v12, %v7284_v14  ;;  %v12063_v14 = vpack.c.bf16 %v7322_v22, %v7318_v5  ;;  %v7324_v12 = vld [vmem:[#allocation13 + $0x780] sm:$0xff]  ;;  %v7330_v29 = vld [vmem:[#allocation13 + $0x7b0] sm:$0xff]  ;;  %v7333_v24 = vld [vmem:[#allocation13 + $0x7c8] sm:$0xff] }
 0x725   :  { %11964 = vmatpush1.bf16.msra.mxu0 %v11963_v32  ;;  %11996 = vmatpush1.bf16.msra.mxu1 %v11995_v8  ;;  %v7295_v32 = vld [vmem:[#allocation13 + $0x698] sm:$0xff]  ;;  %v7334_v35 = vld [vmem:[#allocation13 + $0x7d0] sm:$0xff] }
 0x726   :  { %11966 = vmatprep.subr.bf16.mxu0 %v11965_v48  ;;  %11998 = vmatprep.subr.bf16.mxu1 %v11997_v57  ;;  %v7299_v8 = vld [vmem:[#allocation13 + $0x6b8] sm:$0xff]  ;;  %v7292_v48 = vld [vmem:[#allocation13 + $0x680] sm:$0xff]  ;;  %v7490_v38 = vld [vmem:[#allocation13 + $0x810] sm:$0xff] }
 0x727   :  { %v7296_v57 = vld [vmem:[#allocation13 + $0x6a0] sm:$0xff]  ;;  %v12049_v61 = vpack.c.bf16 %v7299_v8, %v7295_v32  ;;  %v7337_v32 = vld [vmem:[#allocation13 + $0x7e8] sm:$0xff]  ;;  %v7335_v8 = vld [vmem:[#allocation13 + $0x7d8] sm:$0xff] }
 0x728   :  { %v7498_v36 = vld [vmem:[#allocation13 + $0x850] sm:$0xff] }
 0x729   :  { %11968 = vmatpush1.bf16.msra.mxu0 %v11967_v21  ;;  %12000 = vmatpush1.bf16.msra.mxu1 %v11999_v1  ;;  %v7303_v21 = vld [vmem:[#allocation13 + $0x6d8] sm:$0xff]  ;;  %v7506_v22 = vld [vmem:[#allocation13 + $0x890] sm:$0xff] }
 0x72a   :  { %11970 = vmatprep.subr.bf16.mxu0 %v11969_v63  ;;  %12002 = vmatprep.subr.bf16.mxu1 %v12001_v19  ;;  %v7307_v1 = vld [vmem:[#allocation13 + $0x6f8] sm:$0xff]  ;;  %v7304_v63 = vld [vmem:[#allocation13 + $0x6e0] sm:$0xff]  ;;  %v12021_v19 = vpack.c.bf16 %v7305_v2, %v7301_v16  ;;  %v7338_v16 = vld [vmem:[#allocation13 + $0x7f0] sm:$0xff] }
 0x72b   :  { %v12053_v58 = vpack.c.bf16 %v7307_v1, %v7303_v21  ;;  %v7489_v2 = vld [vmem:[#allocation13 + $0x808] sm:$0xff]  ;;  %v7491_v1 = vld [vmem:[#allocation13 + $0x818] sm:$0xff] }
 0x72c   :  { %v7493_v21 = vld [vmem:[#allocation13 + $0x828] sm:$0xff] }
 0x72d   :  { %11972 = vmatpush1.bf16.msra.mxu0 %v11971_v44  ;;  %12004 = vmatpush1.bf16.msra.mxu1 %v12003_v43  ;;  %v7315_v44 = vld [vmem:[#allocation13 + $0x738] sm:$0xff]  ;;  %v12023_v43 = vpack.c.bf16 %v7304_v63, %v7300_v4  ;;  %v12071_v4 = vpack.c.bf16 %v7338_v16, %v7334_v35  ;;  %v7488_v63 = vld [vmem:[#allocation13 + $0x800] sm:$0xff]  ;;  %v7522_v35 = vld [vmem:[#allocation13 + $0x910] sm:$0xff] }
 0x72e   :  { %11974 = vmatprep.subr.bf16.mxu0 %v11973_v10  ;;  %12006 = vmatprep.subr.bf16.mxu1 %v12005_v18  ;;  %v7312_v10 = vld [vmem:[#allocation13 + $0x720] sm:$0xff]  ;;  %v12025_v18 = vpack.c.bf16 %v7313_v26, %v7309_v39  ;;  %v12057_v9 = vpack.c.bf16 %v7315_v44, %v7311_v27  ;;  %v7494_v39 = vld [vmem:[#allocation13 + $0x830] sm:$0xff]  ;;  %v7497_v26 = vld [vmem:[#allocation13 + $0x848] sm:$0xff] }
 0x72f   :  { %v7501_v27 = vld [vmem:[#allocation13 + $0x868] sm:$0xff]  ;;  %v7499_v44 = vld [vmem:[#allocation13 + $0x858] sm:$0xff]  ;;  %v7526_v16 = vld [vmem:[#allocation13 + $0x930] sm:$0xff] }
 0x731   :  { %11976 = vmatpush1.bf16.msra.mxu0 %v11975_v17  ;;  %12008 = vmatpush1.bf16.msra.mxu1 %v12007_v42  ;;  %v7323_v17 = vld [vmem:[#allocation13 + $0x778] sm:$0xff]  ;;  %v12027_v42 = vpack.c.bf16 %v7312_v10, %v7308_v37  ;;  %v12107_v37 = vpack.c.bf16 %v7494_v39, %v7490_v38  ;;  %v7496_v10 = vld [vmem:[#allocation13 + $0x840] sm:$0xff]  ;;  %v7530_v38 = vld [vmem:[#allocation13 + $0x950] sm:$0xff] }
 0x732   :  { %12010 = vmatprep.subr.bf16.mxu0 %v12009_v11  ;;  %12042 = vmatprep.subr.bf16.mxu1 %v12041_v62  ;;  %v7320_v11 = vld [vmem:[#allocation13 + $0x760] sm:$0xff]  ;;  %v12029_v62 = vpack.c.bf16 %v7321_v20, %v7317_v23  ;;  %v12061_v33 = vpack.c.bf16 %v7323_v17, %v7319_v6  ;;  %v7502_v23 = vld [vmem:[#allocation13 + $0x870] sm:$0xff]  ;;  %v7505_v20 = vld [vmem:[#allocation13 + $0x888] sm:$0xff] }
 0x733   :  { %v7509_v6 = vld [vmem:[#allocation13 + $0x8a8] sm:$0xff]  ;;  %v7507_v17 = vld [vmem:[#allocation13 + $0x898] sm:$0xff]  ;;  %v7534_v39 = vld [vmem:[#allocation13 + $0x970] sm:$0xff] }
 0x734   :  { %7193 = vmatmul.mubr.f32.vlgmr.msra.gmra.mrb[130].mxu0 %v16768_v40  ;;  %7264 = vmatmul.mubr.f32.vlgmr.msra.gmra.mrb[130].mxu1 %v16768_v40  ;;  %v12019_v40 = vpack.c.bf16 %v7296_v57, %v7292_v48  ;;  %v12067_v48 = vpack.c.bf16 %v7330_v29, %v7326_v53  ;;  %v7332_v57 = vld [vmem:[#allocation13 + $0x7c0] sm:$0xff]  ;;  %v7514_v53 = vld [vmem:[#allocation13 + $0x8d0] sm:$0xff] }
 0x735   :  { %12012 = vmatpush1.bf16.msra.mxu0 %v12011_v25  ;;  %12044 = vmatpush1.bf16.msra.mxu1 %v12043_v54  ;;  %v7331_v25 = vld [vmem:[#allocation13 + $0x7b8] sm:$0xff]  ;;  %v12031_v54 = vpack.c.bf16 %v7320_v11, %v7316_v30  ;;  %v12111_v30 = vpack.c.bf16 %v7502_v23, %v7498_v36  ;;  %v7504_v11 = vld [vmem:[#allocation13 + $0x880] sm:$0xff]  ;;  %v7518_v29 = vld [vmem:[#allocation13 + $0x8f0] sm:$0xff] }
 0x736   :  { %12014 = vmatprep.subr.bf16.mxu0 %v12013_v51  ;;  %12046 = vmatprep.subr.bf16.mxu1 %v12045_v3  ;;  %v7328_v51 = vld [vmem:[#allocation13 + $0x7a0] sm:$0xff]  ;;  %v12033_v3 = vpack.c.bf16 %v7329_v13, %v7325_v59  ;;  %v12065_v45 = vpack.c.bf16 %v7331_v25, %v7327_v49  ;;  %v7510_v59 = vld [vmem:[#allocation13 + $0x8b0] sm:$0xff]  ;;  %v7513_v13 = vld [vmem:[#allocation13 + $0x8c8] sm:$0xff] }
 0x737   :  { %7404 = vmatprep.mubr.f32.mxu0 %v17725_v28  ;;  %7475 = vmatprep.mubr.f32.mxu1 %v17725_v28  ;;  %v7517_v49 = vld [vmem:[#allocation13 + $0x8e8] sm:$0xff]  ;;  %v7515_v25 = vld [vmem:[#allocation13 + $0x8d8] sm:$0xff]  ;;  %v7538_v36 = vld [vmem:[#allocation13 + $0x990] sm:$0xff] }
 0x738   :  { %v7542_v23 = vld [vmem:[#allocation13 + $0x9b0] sm:$0xff] }
 0x739   :  { %12016 = vmatpush1.bf16.msra.mxu0 %v12015_v31  ;;  %12048 = vmatpush1.bf16.msra.mxu1 %v12047_v46  ;;  %v7339_v31 = vld [vmem:[#allocation13 + $0x7f8] sm:$0xff]  ;;  %v12035_v46 = vpack.c.bf16 %v7328_v51, %v7324_v12  ;;  %v7512_v12 = vld [vmem:[#allocation13 + $0x8c0] sm:$0xff] }
 0x73a   :  { %12018 = vmatprep.subr.bf16.mxu0 %v12017_v52  ;;  %12050 = vmatprep.subr.bf16.mxu1 %v12049_v61  ;;  %v7336_v52 = vld [vmem:[#allocation13 + $0x7e0] sm:$0xff]  ;;  %v12037_v61 = vpack.c.bf16 %v7337_v32, %v7333_v24  ;;  %v12069_v60 = vpack.c.bf16 %v7339_v31, %v7335_v8  ;;  %v7521_v24 = vld [vmem:[#allocation13 + $0x908] sm:$0xff]  ;;  %v7523_v8 = vld [vmem:[#allocation13 + $0x918] sm:$0xff] }
 0x73b   :  { %v7516_v51 = vld [vmem:[#allocation13 + $0x8e0] sm:$0xff]  ;;  %v7525_v32 = vld [vmem:[#allocation13 + $0x928] sm:$0xff]  ;;  %v7527_v31 = vld [vmem:[#allocation13 + $0x938] sm:$0xff] }
 0x73d   :  { %12020 = vmatpush1.bf16.msra.mxu0 %v12019_v40  ;;  %12052 = vmatpush1.bf16.msra.mxu1 %v12051_v15  ;;  %v7495_v40 = vld [vmem:[#allocation13 + $0x838] sm:$0xff]  ;;  %v12039_v15 = vpack.c.bf16 %v7336_v52, %v7332_v57  ;;  %v7520_v57 = vld [vmem:[#allocation13 + $0x900] sm:$0xff] }
 0x73e   :  { %12022 = vmatprep.subr.bf16.mxu0 %v12021_v19  ;;  %12054 = vmatprep.subr.bf16.mxu1 %v12053_v58  ;;  %v7492_v19 = vld [vmem:[#allocation13 + $0x820] sm:$0xff]  ;;  %v12073_v58 = vpack.c.bf16 %v7493_v21, %v7489_v2  ;;  %v12105_v55 = vpack.c.bf16 %v7495_v40, %v7491_v1  ;;  %v7529_v2 = vld [vmem:[#allocation13 + $0x948] sm:$0xff]  ;;  %v7531_v1 = vld [vmem:[#allocation13 + $0x958] sm:$0xff] }
 0x73f   :  { %v7524_v52 = vld [vmem:[#allocation13 + $0x920] sm:$0xff]  ;;  %v7533_v21 = vld [vmem:[#allocation13 + $0x968] sm:$0xff]  ;;  %v7535_v40 = vld [vmem:[#allocation13 + $0x978] sm:$0xff] }
 0x741   :  { %12024 = vmatpush1.bf16.msra.mxu0 %v12023_v43  ;;  %12056 = vmatpush1.bf16.msra.mxu1 %v12055_v50  ;;  %v7503_v43 = vld [vmem:[#allocation13 + $0x878] sm:$0xff]  ;;  %v12075_v50 = vpack.c.bf16 %v7492_v19, %v7488_v63  ;;  %v7528_v63 = vld [vmem:[#allocation13 + $0x940] sm:$0xff] }
 0x742   :  { %12026 = vmatprep.subr.bf16.mxu0 %v12025_v18  ;;  %12058 = vmatprep.subr.bf16.mxu1 %v12057_v9  ;;  %v7500_v18 = vld [vmem:[#allocation13 + $0x860] sm:$0xff]  ;;  %v12077_v9 = vpack.c.bf16 %v7501_v27, %v7497_v26  ;;  %v12109_v41 = vpack.c.bf16 %v7503_v43, %v7499_v44  ;;  %v7537_v26 = vld [vmem:[#allocation13 + $0x988] sm:$0xff]  ;;  %v7539_v44 = vld [vmem:[#allocation13 + $0x998] sm:$0xff] }
 0x743   :  { %v7532_v19 = vld [vmem:[#allocation13 + $0x960] sm:$0xff]  ;;  %v7541_v27 = vld [vmem:[#allocation13 + $0x9a8] sm:$0xff]  ;;  %v7543_v43 = vld [vmem:[#allocation13 + $0x9b8] sm:$0xff] }
 0x745   :  { %12028 = vmatpush1.bf16.msra.mxu0 %v12027_v42  ;;  %12060 = vmatpush1.bf16.msra.mxu1 %v12059_v47  ;;  %v7511_v42 = vld [vmem:[#allocation13 + $0x8b8] sm:$0xff]  ;;  %v12079_v47 = vpack.c.bf16 %v7500_v18, %v7496_v10  ;;  %v7536_v10 = vld [vmem:[#allocation13 + $0x980] sm:$0xff] }
 0x746   :  { %12030 = vmatprep.subr.bf16.mxu0 %v12029_v62  ;;  %12062 = vmatprep.subr.bf16.mxu1 %v12061_v33  ;;  %v7508_v62 = vld [vmem:[#allocation13 + $0x8a0] sm:$0xff]  ;;  %v12081_v33 = vpack.c.bf16 %v7509_v6, %v7505_v20  ;;  %v12113_v5 = vpack.c.bf16 %v7511_v42, %v7507_v17  ;;  %v7545_v20 = vld [vmem:[#allocation13 + $0x9c8] sm:$0xff]  ;;  %v7547_v17 = vld [vmem:[#allocation13 + $0x9d8] sm:$0xff] }
 0x747   :  { %v7540_v18 = vld [vmem:[#allocation13 + $0x9a0] sm:$0xff]  ;;  %v7549_v6 = vld [vmem:[#allocation13 + $0x9e8] sm:$0xff]  ;;  %v7551_v42 = vld [vmem:[#allocation13 + $0x9f8] sm:$0xff] }
 0x749   :  { %12032 = vmatpush1.bf16.msra.mxu0 %v12031_v54  ;;  %12064 = vmatpush1.bf16.msra.mxu1 %v12063_v14  ;;  %v7519_v54 = vld [vmem:[#allocation13 + $0x8f8] sm:$0xff]  ;;  %v12115_v14 = vpack.c.bf16 %v7510_v59, %v7506_v22  ;;  %v7546_v22 = vld [vmem:[#allocation13 + $0x9d0] sm:$0xff] }
 0x74a   :  { %12034 = vmatprep.subr.bf16.mxu0 %v12033_v3  ;;  %12066 = vmatprep.subr.bf16.mxu1 %v12065_v45  ;;  %v12085_v3 = vpack.c.bf16 %v7517_v49, %v7513_v13  ;;  %v12117_v45 = vpack.c.bf16 %v7519_v54, %v7515_v25  ;;  %v7550_v59 = vld [vmem:[#allocation13 + $0x9f0] sm:$0xff]  ;;  %v7701_v13 = vld [vmem:[#allocation13 + $0xa08] sm:$0xff]  ;;  %v7703_v25 = vld [vmem:[#allocation13 + $0xa18] sm:$0xff] }
 0x74b   :  { %v7705_v49 = vld [vmem:[#allocation13 + $0xa28] sm:$0xff]  ;;  %v7707_v54 = vld [vmem:[#allocation13 + $0xa38] sm:$0xff] }
 0x74d   :  { %12036 = vmatpush1.bf16.msra.mxu0 %v12035_v46  ;;  %12068 = vmatpush1.bf16.msra.mxu1 %v12067_v48  ;;  %v12087_v46 = vpack.c.bf16 %v7516_v51, %v7512_v12  ;;  %v12119_v48 = vpack.c.bf16 %v7518_v29, %v7514_v53  ;;  %v7700_v12 = vld [vmem:[#allocation13 + $0xa00] sm:$0xff]  ;;  %v7702_v53 = vld [vmem:[#allocation13 + $0xa10] sm:$0xff] }
 0x74e   :  { %12038 = vmatprep.subr.bf16.mxu0 %v12037_v61  ;;  %12070 = vmatprep.subr.bf16.mxu1 %v12069_v60  ;;  %v12089_v61 = vpack.c.bf16 %v7525_v32, %v7521_v24  ;;  %v12121_v60 = vpack.c.bf16 %v7527_v31, %v7523_v8  ;;  %v7704_v51 = vld [vmem:[#allocation13 + $0xa20] sm:$0xff]  ;;  %v7706_v29 = vld [vmem:[#allocation13 + $0xa30] sm:$0xff]  ;;  %v7709_v24 = vld [vmem:[#allocation13 + $0xa48] sm:$0xff] }
 0x74f   :  { %v7713_v32 = vld [vmem:[#allocation13 + $0xa68] sm:$0xff]  ;;  %v7711_v8 = vld [vmem:[#allocation13 + $0xa58] sm:$0xff] }
 0x750   :  { %v7715_v31 = vld [vmem:[#allocation13 + $0xa78] sm:$0xff] }
 0x751   :  { %12040 = vmatpush1.bf16.msra.mxu0 %v12039_v15  ;;  %12072 = vmatpush1.bf16.msra.mxu1 %v12071_v4  ;;  %v12091_v15 = vpack.c.bf16 %v7524_v52, %v7520_v57  ;;  %v12123_v4 = vpack.c.bf16 %v7526_v16, %v7522_v35  ;;  %v7708_v57 = vld [vmem:[#allocation13 + $0xa40] sm:$0xff]  ;;  %v7710_v35 = vld [vmem:[#allocation13 + $0xa50] sm:$0xff] }
 0x752   :  { %12074 = vmatprep.subr.bf16.mxu0 %v12073_v58  ;;  %12106 = vmatprep.subr.bf16.mxu1 %v12105_v55  ;;  %v12093_v58 = vpack.c.bf16 %v7533_v21, %v7529_v2  ;;  %v12125_v55 = vpack.c.bf16 %v7535_v40, %v7531_v1  ;;  %v7712_v52 = vld [vmem:[#allocation13 + $0xa60] sm:$0xff]  ;;  %v7714_v16 = vld [vmem:[#allocation13 + $0xa70] sm:$0xff]  ;;  %v7717_v2 = vld [vmem:[#allocation13 + $0xa88] sm:$0xff] }
 0x753   :  { %v7721_v21 = vld [vmem:[#allocation13 + $0xaa8] sm:$0xff]  ;;  %v7719_v1 = vld [vmem:[#allocation13 + $0xa98] sm:$0xff] }
 0x754   :  { %7405 = vmatmul.mubr.f32.vlgmr.msra.gmra.mrb[130].mxu0 %v16778_v34  ;;  %7476 = vmatmul.mubr.f32.vlgmr.msra.gmra.mrb[130].mxu1 %v16778_v34  ;;  %v12083_v34 = vpack.c.bf16 %v7508_v62, %v7504_v11  ;;  %v7544_v11 = vld [vmem:[#allocation13 + $0x9c0] sm:$0xff]  ;;  %v7723_v40 = vld [vmem:[#allocation13 + $0xab8] sm:$0xff] }
 0x755   :  { %12076 = vmatpush1.bf16.msra.mxu0 %v12075_v50  ;;  %12108 = vmatpush1.bf16.msra.mxu1 %v12107_v37  ;;  %v12095_v50 = vpack.c.bf16 %v7532_v19, %v7528_v63  ;;  %v12127_v37 = vpack.c.bf16 %v7534_v39, %v7530_v38  ;;  %v7548_v62 = vld [vmem:[#allocation13 + $0x9e0] sm:$0xff]  ;;  %v7718_v38 = vld [vmem:[#allocation13 + $0xa90] sm:$0xff] }
 0x756   :  { %12078 = vmatprep.subr.bf16.mxu0 %v12077_v9  ;;  %12110 = vmatprep.subr.bf16.mxu1 %v12109_v41  ;;  %v12097_v9 = vpack.c.bf16 %v7541_v27, %v7537_v26  ;;  %v12129_v41 = vpack.c.bf16 %v7543_v43, %v7539_v44  ;;  %v7716_v63 = vld [vmem:[#allocation13 + $0xa80] sm:$0xff]  ;;  %v7722_v39 = vld [vmem:[#allocation13 + $0xab0] sm:$0xff]  ;;  %v7725_v26 = vld [vmem:[#allocation13 + $0xac8] sm:$0xff] }
 0x757   :  { %7616 = vmatprep.mubr.f32.mxu0 %v17725_v28  ;;  %7687 = vmatprep.mubr.f32.mxu1 %v17725_v28  ;;  %v7720_v19 = vld [vmem:[#allocation13 + $0xaa0] sm:$0xff]  ;;  %v7729_v27 = vld [vmem:[#allocation13 + $0xae8] sm:$0xff]  ;;  %v7727_v44 = vld [vmem:[#allocation13 + $0xad8] sm:$0xff] }
 0x758   :  { %v7731_v43 = vld [vmem:[#allocation13 + $0xaf8] sm:$0xff] }
 0x759   :  { %12080 = vmatpush1.bf16.msra.mxu0 %v12079_v47  ;;  %12112 = vmatpush1.bf16.msra.mxu1 %v12111_v30  ;;  %v12099_v47 = vpack.c.bf16 %v7540_v18, %v7536_v10  ;;  %v12131_v30 = vpack.c.bf16 %v7542_v23, %v7538_v36  ;;  %v7728_v10 = vld [vmem:[#allocation13 + $0xae0] sm:$0xff]  ;;  %v12149_v18 = vpack.c.bf16 %v7729_v27, %v7725_v26  ;;  %v7730_v36 = vld [vmem:[#allocation13 + $0xaf0] sm:$0xff]  ;;  %v7733_v23 = vld [vmem:[#allocation13 + $0xb08] sm:$0xff] }
 0x75a   :  { %12082 = vmatprep.subr.bf16.mxu0 %v12081_v33  ;;  %12114 = vmatprep.subr.bf16.mxu1 %v12113_v5  ;;  %v12101_v33 = vpack.c.bf16 %v7549_v6, %v7545_v20  ;;  %v12133_v5 = vpack.c.bf16 %v7551_v42, %v7547_v17  ;;  %v7737_v20 = vld [vmem:[#allocation13 + $0xb28] sm:$0xff]  ;;  %v7735_v6 = vld [vmem:[#allocation13 + $0xb18] sm:$0xff] }
 0x75b   :  { %v7739_v17 = vld [vmem:[#allocation13 + $0xb38] sm:$0xff]  ;;  %v7917_v26 = vld [vmem:[#allocation13 + $0xc28] sm:$0xff] }
 0x75c   :  { %v7915_v27 = vld [vmem:[#allocation13 + $0xc18] sm:$0xff] }
 0x75d   :  { %12084 = vmatpush1.bf16.msra.mxu0 %v12083_v34  ;;  %12116 = vmatpush1.bf16.msra.mxu1 %v12115_v14  ;;  %v12103_v34 = vpack.c.bf16 %v7548_v62, %v7544_v11  ;;  %v12135_v14 = vpack.c.bf16 %v7550_v59, %v7546_v22  ;;  %v7736_v11 = vld [vmem:[#allocation13 + $0xb20] sm:$0xff]  ;;  %v12153_v62 = vpack.c.bf16 %v7737_v20, %v7733_v23  ;;  %v7738_v22 = vld [vmem:[#allocation13 + $0xb30] sm:$0xff]  ;;  %v7741_v59 = vld [vmem:[#allocation13 + $0xb48] sm:$0xff] }
 0x75e   :  { %12086 = vmatprep.subr.bf16.mxu0 %v12085_v3  ;;  %12118 = vmatprep.subr.bf16.mxu1 %v12117_v45  ;;  %v12137_v3 = vpack.c.bf16 %v7705_v49, %v7701_v13  ;;  %v12169_v45 = vpack.c.bf16 %v7707_v54, %v7703_v25  ;;  %v7745_v13 = vld [vmem:[#allocation13 + $0xb68] sm:$0xff]  ;;  %v7743_v49 = vld [vmem:[#allocation13 + $0xb58] sm:$0xff] }
 0x75f   :  { %v7747_v25 = vld [vmem:[#allocation13 + $0xb78] sm:$0xff]  ;;  %v7925_v23 = vld [vmem:[#allocation13 + $0xc68] sm:$0xff] }
 0x760   :  { %v7923_v20 = vld [vmem:[#allocation13 + $0xc58] sm:$0xff] }
 0x761   :  { %12088 = vmatpush1.bf16.msra.mxu0 %v12087_v46  ;;  %12120 = vmatpush1.bf16.msra.mxu1 %v12119_v48  ;;  %v12139_v46 = vpack.c.bf16 %v7704_v51, %v7700_v12  ;;  %v12171_v48 = vpack.c.bf16 %v7706_v29, %v7702_v53  ;;  %v7744_v12 = vld [vmem:[#allocation13 + $0xb60] sm:$0xff]  ;;  %v12157_v51 = vpack.c.bf16 %v7745_v13, %v7741_v59  ;;  %v7746_v53 = vld [vmem:[#allocation13 + $0xb70] sm:$0xff]  ;;  %v7749_v29 = vld [vmem:[#allocation13 + $0xb88] sm:$0xff] }
 0x762   :  { %12090 = vmatprep.subr.bf16.mxu0 %v12089_v61  ;;  %12122 = vmatprep.subr.bf16.mxu1 %v12121_v60  ;;  %v12141_v61 = vpack.c.bf16 %v7713_v32, %v7709_v24  ;;  %v12173_v60 = vpack.c.bf16 %v7715_v31, %v7711_v8  ;;  %v7753_v24 = vld [vmem:[#allocation13 + $0xba8] sm:$0xff]  ;;  %v7751_v32 = vld [vmem:[#allocation13 + $0xb98] sm:$0xff] }
 0x763   :  { %v7755_v8 = vld [vmem:[#allocation13 + $0xbb8] sm:$0xff]  ;;  %v7933_v59 = vld [vmem:[#allocation13 + $0xca8] sm:$0xff] }
 0x764   :  { %v7931_v13 = vld [vmem:[#allocation13 + $0xc98] sm:$0xff] }
 0x765   :  { %12092 = vmatpush1.bf16.msra.mxu0 %v12091_v15  ;;  %12124 = vmatpush1.bf16.msra.mxu1 %v12123_v4  ;;  %v12143_v15 = vpack.c.bf16 %v7712_v52, %v7708_v57  ;;  %v12175_v4 = vpack.c.bf16 %v7714_v16, %v7710_v35  ;;  %v7752_v57 = vld [vmem:[#allocation13 + $0xba0] sm:$0xff]  ;;  %v12161_v52 = vpack.c.bf16 %v7753_v24, %v7749_v29  ;;  %v7754_v35 = vld [vmem:[#allocation13 + $0xbb0] sm:$0xff]  ;;  %v7757_v16 = vld [vmem:[#allocation13 + $0xbc8] sm:$0xff] }
 0x766   :  { %12094 = vmatprep.subr.bf16.mxu0 %v12093_v58  ;;  %12126 = vmatprep.subr.bf16.mxu1 %v12125_v55  ;;  %v12145_v58 = vpack.c.bf16 %v7721_v21, %v7717_v2  ;;  %v12177_v55 = vpack.c.bf16 %v7723_v40, %v7719_v1  ;;  %v7761_v2 = vld [vmem:[#allocation13 + $0xbe8] sm:$0xff]  ;;  %v7759_v21 = vld [vmem:[#allocation13 + $0xbd8] sm:$0xff] }
 0x767   :  { %v7763_v1 = vld [vmem:[#allocation13 + $0xbf8] sm:$0xff]  ;;  %v7941_v29 = vld [vmem:[#allocation13 + $0xce8] sm:$0xff] }
 0x768   :  { %v7939_v24 = vld [vmem:[#allocation13 + $0xcd8] sm:$0xff] }
 0x769   :  { %12096 = vmatpush1.bf16.msra.mxu0 %v12095_v50  ;;  %12128 = vmatpush1.bf16.msra.mxu1 %v12127_v37  ;;  %v12179_v50 = vpack.c.bf16 %v7722_v39, %v7718_v38  ;;  %v7724_v37 = vld [vmem:[#allocation13 + $0xac0] sm:$0xff]  ;;  %v7762_v38 = vld [vmem:[#allocation13 + $0xbf0] sm:$0xff]  ;;  %v7913_v39 = vld [vmem:[#allocation13 + $0xc08] sm:$0xff] }
 0x76a   :  { %12098 = vmatprep.subr.bf16.mxu0 %v12097_v9  ;;  %12130 = vmatprep.subr.bf16.mxu1 %v12129_v41  ;;  %v12181_v9 = vpack.c.bf16 %v7731_v43, %v7727_v44  ;;  %v7726_v41 = vld [vmem:[#allocation13 + $0xad0] sm:$0xff]  ;;  %v12151_v42 = vpack.c.bf16 %v7728_v10, %v7724_v37  ;;  %v7919_v44 = vld [vmem:[#allocation13 + $0xc38] sm:$0xff]  ;;  %v7916_v37 = vld [vmem:[#allocation13 + $0xc20] sm:$0xff]  ;;  %v12201_v10 = vpack.c.bf16 %v7917_v26, %v7913_v39 }
 0x76b   :  { %v7959_v39 = vld [vmem:[#allocation13 + $0xd78] sm:$0xff] }
 0x76d   :  { %12100 = vmatpush1.bf16.msra.mxu0 %v12099_v47  ;;  %12132 = vmatpush1.bf16.msra.mxu1 %v12131_v30  ;;  %v12183_v47 = vpack.c.bf16 %v7730_v36, %v7726_v41  ;;  %v7732_v30 = vld [vmem:[#allocation13 + $0xb00] sm:$0xff]  ;;  %v7918_v41 = vld [vmem:[#allocation13 + $0xc30] sm:$0xff]  ;;  %v7921_v36 = vld [vmem:[#allocation13 + $0xc48] sm:$0xff] }
 0x76e   :  { %12102 = vmatprep.subr.bf16.mxu0 %v12101_v33  ;;  %12134 = vmatprep.subr.bf16.mxu1 %v12133_v5  ;;  %v12185_v33 = vpack.c.bf16 %v7739_v17, %v7735_v6  ;;  %v7734_v5 = vld [vmem:[#allocation13 + $0xb10] sm:$0xff]  ;;  %v12155_v54 = vpack.c.bf16 %v7736_v11, %v7732_v30  ;;  %v7927_v6 = vld [vmem:[#allocation13 + $0xc78] sm:$0xff]  ;;  %v7924_v30 = vld [vmem:[#allocation13 + $0xc60] sm:$0xff]  ;;  %v12205_v11 = vpack.c.bf16 %v7925_v23, %v7921_v36 }
 0x76f   :  { %v7967_v36 = vld [vmem:[#allocation13 + $0xdb8] sm:$0xff] }
 0x771   :  { %12104 = vmatpush1.bf16.msra.mxu0 %v12103_v34  ;;  %12136 = vmatpush1.bf16.msra.mxu1 %v12135_v14  ;;  %v12187_v34 = vpack.c.bf16 %v7738_v22, %v7734_v5  ;;  %v7740_v14 = vld [vmem:[#allocation13 + $0xb40] sm:$0xff]  ;;  %v7926_v5 = vld [vmem:[#allocation13 + $0xc70] sm:$0xff]  ;;  %v7929_v22 = vld [vmem:[#allocation13 + $0xc88] sm:$0xff] }
 0x772   :  { %12138 = vmatprep.subr.bf16.mxu0 %v12137_v3  ;;  %12170 = vmatprep.subr.bf16.mxu1 %v12169_v45  ;;  %v12189_v3 = vpack.c.bf16 %v7747_v25, %v7743_v49  ;;  %v7742_v45 = vld [vmem:[#allocation13 + $0xb50] sm:$0xff]  ;;  %v12159_v31 = vpack.c.bf16 %v7744_v12, %v7740_v14  ;;  %v7935_v49 = vld [vmem:[#allocation13 + $0xcb8] sm:$0xff]  ;;  %v7932_v14 = vld [vmem:[#allocation13 + $0xca0] sm:$0xff]  ;;  %v12209_v12 = vpack.c.bf16 %v7933_v59, %v7929_v22 }
 0x773   :  { %v7975_v22 = vld [vmem:[#allocation13 + $0xdf8] sm:$0xff] }
 0x774   :  { %7617 = vmatmul.mubr.f32.vlgmr.msra.gmra.mrb[130].mxu0 %v16786_v0  ;;  %7688 = vmatmul.mubr.f32.vlgmr.msra.gmra.mrb[130].mxu1 %v16786_v0  ;;  %v12147_v0 = vpack.c.bf16 %v7720_v19, %v7716_v63  ;;  %v7760_v63 = vld [vmem:[#allocation13 + $0xbe0] sm:$0xff]  ;;  %v12165_v19 = vpack.c.bf16 %v7761_v2, %v7757_v16  ;;  %v7947_v16 = vld [vmem:[#allocation13 + $0xd18] sm:$0xff] }
 0x775   :  { %12140 = vmatpush1.bf16.msra.mxu0 %v12139_v46  ;;  %12172 = vmatpush1.bf16.msra.mxu1 %v12171_v48  ;;  %v12191_v46 = vpack.c.bf16 %v7746_v53, %v7742_v45  ;;  %v7748_v48 = vld [vmem:[#allocation13 + $0xb80] sm:$0xff]  ;;  %v7934_v45 = vld [vmem:[#allocation13 + $0xcb0] sm:$0xff]  ;;  %v7937_v53 = vld [vmem:[#allocation13 + $0xcc8] sm:$0xff] }
 0x776   :  { %12142 = vmatprep.subr.bf16.mxu0 %v12141_v61  ;;  %12174 = vmatprep.subr.bf16.mxu1 %v12173_v60  ;;  %v12193_v61 = vpack.c.bf16 %v7755_v8, %v7751_v32  ;;  %v7750_v60 = vld [vmem:[#allocation13 + $0xb90] sm:$0xff]  ;;  %v12163_v40 = vpack.c.bf16 %v7752_v57, %v7748_v48  ;;  %v7943_v32 = vld [vmem:[#allocation13 + $0xcf8] sm:$0xff]  ;;  %v12213_v48 = vpack.c.bf16 %v7941_v29, %v7937_v53  ;;  %v17726_v53 = vld [vmem:[#allocation85_spill] sm:$0xff] }
 0x777   :  { %7828 = vmatprep.mubr.f32.mxu0 %v17725_v28  ;;  %7899 = vmatprep.mubr.f32.mxu1 %v17725_v28  ;;  %v12245_v57 = vpack.c.bf16 %v7943_v32, %v7939_v24  ;;  %v7951_v2 = vld [vmem:[#allocation13 + $0xd38] sm:$0xff]  ;;  %v17727_v24 = vld [vmem:[#allocation47_spill] sm:$0xff] }
 0x779   :  { %12144 = vmatpush1.bf16.msra.mxu0 %v12143_v15  ;;  %12176 = vmatpush1.bf16.msra.mxu1 %v12175_v4  ;;  %v12195_v15 = vpack.c.bf16 %v7754_v35, %v7750_v60  ;;  %v7756_v4 = vld [vmem:[#allocation13 + $0xbc0] sm:$0xff]  ;;  %v7945_v60 = vld [vmem:[#allocation13 + $0xd08] sm:$0xff] }
 0x77a   :  { %12146 = vmatprep.subr.bf16.mxu0 %v12145_v58  ;;  %12178 = vmatprep.subr.bf16.mxu1 %v12177_v55  ;;  %v12197_v58 = vpack.c.bf16 %v7763_v1, %v7759_v21  ;;  %v7758_v55 = vld [vmem:[#allocation13 + $0xbd0] sm:$0xff]  ;;  %v12167_v43 = vpack.c.bf16 %v7760_v63, %v7756_v4  ;;  %v7949_v35 = vld [vmem:[#allocation13 + $0xd28] sm:$0xff]  ;;  %v7944_v1 = vld [vmem:[#allocation13 + $0xd00] sm:$0xff]  ;;  %v12249_v4 = vpack.c.bf16 %v7951_v2, %v7947_v16 }
 0x77b   :  { %v7946_v63 = vld [vmem:[#allocation13 + $0xd10] sm:$0xff] }
 0x77d   :  { %12148 = vmatpush1.bf16.msra.mxu0 %v12147_v0  ;;  %12180 = vmatpush1.bf16.msra.mxu1 %v12179_v50  ;;  %v12199_v0 = vpack.c.bf16 %v7762_v38, %v7758_v55  ;;  %v7912_v50 = vld [vmem:[#allocation13 + $0xc00] sm:$0xff]  ;;  %v7957_v55 = vld [vmem:[#allocation13 + $0xd68] sm:$0xff]  ;;  %v7955_v38 = vld [vmem:[#allocation13 + $0xd58] sm:$0xff] }
 0x77e   :  { %12150 = vmatprep.subr.bf16.mxu0 %v12149_v18  ;;  %12182 = vmatprep.subr.bf16.mxu1 %v12181_v9  ;;  %v12233_v18 = vpack.c.bf16 %v7919_v44, %v7915_v27  ;;  %v7914_v9 = vld [vmem:[#allocation13 + $0xc10] sm:$0xff]  ;;  %v12203_v17 = vpack.c.bf16 %v7916_v37, %v7912_v50  ;;  %v7952_v44 = vld [vmem:[#allocation13 + $0xd40] sm:$0xff]  ;;  %v12253_v50 = vpack.c.bf16 %v7959_v39, %v7955_v38 }
 0x77f   :  { %v7954_v37 = vld [vmem:[#allocation13 + $0xd50] sm:$0xff] }
 0x781   :  { %12152 = vmatpush1.bf16.msra.mxu0 %v12151_v42  ;;  %12184 = vmatpush1.bf16.msra.mxu1 %v12183_v47  ;;  %v12235_v42 = vpack.c.bf16 %v7918_v41, %v7914_v9  ;;  %v7920_v47 = vld [vmem:[#allocation13 + $0xc40] sm:$0xff]  ;;  %v7965_v9 = vld [vmem:[#allocation13 + $0xda8] sm:$0xff]  ;;  %v7963_v41 = vld [vmem:[#allocation13 + $0xd98] sm:$0xff] }
 0x782   :  { %12154 = vmatprep.subr.bf16.mxu0 %v12153_v62  ;;  %12186 = vmatprep.subr.bf16.mxu1 %v12185_v33  ;;  %v12237_v62 = vpack.c.bf16 %v7927_v6, %v7923_v20  ;;  %v7922_v33 = vld [vmem:[#allocation13 + $0xc50] sm:$0xff]  ;;  %v12207_v25 = vpack.c.bf16 %v7924_v30, %v7920_v47  ;;  %v7960_v6 = vld [vmem:[#allocation13 + $0xd80] sm:$0xff]  ;;  %v12257_v47 = vpack.c.bf16 %v7967_v36, %v7963_v41 }
 0x783   :  { %v7962_v30 = vld [vmem:[#allocation13 + $0xd90] sm:$0xff] }
 0x785   :  { %12156 = vmatpush1.bf16.msra.mxu0 %v12155_v54  ;;  %12188 = vmatpush1.bf16.msra.mxu1 %v12187_v34  ;;  %v12239_v54 = vpack.c.bf16 %v7926_v5, %v7922_v33  ;;  %v7928_v34 = vld [vmem:[#allocation13 + $0xc80] sm:$0xff]  ;;  %v7973_v33 = vld [vmem:[#allocation13 + $0xde8] sm:$0xff]  ;;  %v7971_v5 = vld [vmem:[#allocation13 + $0xdd8] sm:$0xff] }
 0x786   :  { %12158 = vmatprep.subr.bf16.mxu0 %v12157_v51  ;;  %12190 = vmatprep.subr.bf16.mxu1 %v12189_v3  ;;  %v12241_v51 = vpack.c.bf16 %v7935_v49, %v7931_v13  ;;  %v7930_v3 = vld [vmem:[#allocation13 + $0xc90] sm:$0xff]  ;;  %v7968_v49 = vld [vmem:[#allocation13 + $0xdc0] sm:$0xff] }
 0x787   :  { %v12243_v8 = vpack.c.bf16 %v7934_v45, %v7930_v3  ;;  %v8122_v45 = vld [vmem:[#allocation14] sm:$0xf] }
 0x788   :  { %v8127_v29 = vrot.slane %v8122_v45, %v17726_v53  ;;  %v8135_v32 = vrot.slane %v8122_v45, %v17727_v24 }
 0x789   :  { %12160 = vmatpush1.bf16.msra.mxu0 %v12159_v31  ;;  %12192 = vmatpush1.bf16.msra.mxu1 %v12191_v46  ;;  %v7936_v31 = vld [vmem:[#allocation13 + $0xcc0] sm:$0xff] }
 0x78a   :  { %12162 = vmatprep.subr.bf16.mxu0 %v12161_v52  ;;  %12194 = vmatprep.subr.bf16.mxu1 %v12193_v61  ;;  %v7940_v46 = vld [vmem:[#allocation13 + $0xce0] sm:$0xff]  ;;  %v7938_v52 = vld [vmem:[#allocation13 + $0xcd0] sm:$0xff] }
 0x78b   :  { %v7942_v61 = vld [vmem:[#allocation13 + $0xcf0] sm:$0xff]  ;;  %v12215_v21 = vpack.c.bf16 %v7940_v46, %v7936_v31  ;;  %v17729_v31 = vld [vmem:[#allocation77_spill] sm:$0xff] }
 0x78c   :  { %v8139_v46 = vrot.slane %v8122_v45, %v17729_v31 }
 0x78d   :  { %12164 = vmatpush1.bf16.msra.mxu0 %v12163_v40  ;;  %12196 = vmatpush1.bf16.msra.mxu1 %v12195_v15  ;;  %v7948_v40 = vld [vmem:[#allocation13 + $0xd20] sm:$0xff]  ;;  %v12217_v15 = vpack.c.bf16 %v7949_v35, %v7945_v60 }
 0x78e   :  { %12166 = vmatprep.subr.bf16.mxu0 %v12165_v19  ;;  %12198 = vmatprep.subr.bf16.mxu1 %v12197_v58  ;;  %v7950_v19 = vld [vmem:[#allocation13 + $0xd30] sm:$0xff]  ;;  %v7953_v58 = vld [vmem:[#allocation13 + $0xd48] sm:$0xff]  ;;  %v12219_v26 = vpack.c.bf16 %v7948_v40, %v7944_v1 }
 0x78f   :  { %v12251_v27 = vpack.c.bf16 %v7950_v19, %v7946_v63 }
 0x791   :  { %12168 = vmatpush1.bf16.msra.mxu0 %v12167_v43  ;;  %12200 = vmatpush1.bf16.msra.mxu1 %v12199_v0  ;;  %v7956_v43 = vld [vmem:[#allocation13 + $0xd60] sm:$0xff]  ;;  %v12221_v0 = vpack.c.bf16 %v7957_v55, %v7953_v58 }
 0x792   :  { %12202 = vmatprep.subr.bf16.mxu0 %v12201_v10  ;;  %12234 = vmatprep.subr.bf16.mxu1 %v12233_v18  ;;  %v7958_v10 = vld [vmem:[#allocation13 + $0xd70] sm:$0xff]  ;;  %v7961_v18 = vld [vmem:[#allocation13 + $0xd88] sm:$0xff]  ;;  %v12223_v23 = vpack.c.bf16 %v7956_v43, %v7952_v44 }
 0x793   :  { %v12255_v20 = vpack.c.bf16 %v7958_v10, %v7954_v37 }
 0x794   :  { %7829 = vmatmul.mubr.f32.vlgmr.msra.gmra.mrb[130].mxu0 %v16790_v56  ;;  %7900 = vmatmul.mubr.f32.vlgmr.msra.gmra.mrb[130].mxu1 %v16790_v56  ;;  %v12211_v56 = vpack.c.bf16 %v7932_v14, %v7928_v34  ;;  %v7972_v34 = vld [vmem:[#allocation13 + $0xde0] sm:$0xff]  ;;  %v7970_v14 = vld [vmem:[#allocation13 + $0xdd0] sm:$0xff] }
 0x795   :  { %12204 = vmatpush1.bf16.msra.mxu0 %v12203_v17  ;;  %12236 = vmatpush1.bf16.msra.mxu1 %v12235_v42  ;;  %v7964_v17 = vld [vmem:[#allocation13 + $0xda0] sm:$0xff]  ;;  %v12225_v42 = vpack.c.bf16 %v7965_v9, %v7961_v18 }
 0x796   :  { %12206 = vmatprep.subr.bf16.mxu0 %v12205_v11  ;;  %12238 = vmatprep.subr.bf16.mxu1 %v12237_v62  ;;  %v7966_v11 = vld [vmem:[#allocation13 + $0xdb0] sm:$0xff]  ;;  %v7969_v62 = vld [vmem:[#allocation13 + $0xdc8] sm:$0xff]  ;;  %v12227_v59 = vpack.c.bf16 %v7964_v17, %v7960_v6 }
 0x797   :  { %8040 = vmatprep.mubr.f32.mxu0 %v17725_v28  ;;  %8111 = vmatprep.mubr.f32.mxu1 %v17725_v28  ;;  %v12247_v28 = vpack.c.bf16 %v7942_v61, %v7938_v52  ;;  %v12259_v13 = vpack.c.bf16 %v7966_v11, %v7962_v30  ;;  %v8443_v11 = vld [vmem:[#allocation2] ss:$0 sm:$0xff] }
 0x799   :  { %12208 = vmatpush1.bf16.msra.mxu0 %v12207_v25  ;;  %12240 = vmatpush1.bf16.msra.mxu1 %v12239_v54  ;;  %v12229_v25 = vpack.c.bf16 %v7973_v33, %v7969_v62  ;;  %v12261_v54 = vpack.c.bf16 %v7975_v22, %v7971_v5 }
 0x79a   :  { %12210 = vmatprep.subr.bf16.mxu0 %v12209_v12  ;;  %12242 = vmatprep.subr.bf16.mxu1 %v12241_v51  ;;  %v7974_v12 = vld [vmem:[#allocation13 + $0xdf0] sm:$0xff]  ;;  %v12231_v51 = vpack.c.bf16 %v7972_v34, %v7968_v49 }
 0x79b   :  { %v12263_v3 = vpack.c.bf16 %v7974_v12, %v7970_v14 }
 0x79d   :  { %12212 = vmatpush1.bf16.msra.mxu0 %v12211_v56  ;;  %12244 = vmatpush1.bf16.msra.mxu1 %v12243_v8  ;;  %v17728_v56 = vld [vmem:[#allocation86_spill] sm:$0xff] }
 0x79e   :  { %12214 = vmatprep.subr.bf16.mxu0 %v12213_v48  ;;  %12246 = vmatprep.subr.bf16.mxu1 %v12245_v57  ;;  %v8131_v8 = vrot.slane %v8122_v45, %v17728_v56 }
 0x7a1   :  { %12216 = vmatpush1.bf16.msra.mxu0 %v12215_v21  ;;  %12248 = vmatpush1.bf16.msra.mxu1 %v12247_v28 }
 0x7a2   :  { %12218 = vmatprep.subr.bf16.mxu0 %v12217_v15  ;;  %12250 = vmatprep.subr.bf16.mxu1 %v12249_v4 }
 0x7a5   :  { %12220 = vmatpush1.bf16.msra.mxu0 %v12219_v26  ;;  %12252 = vmatpush1.bf16.msra.mxu1 %v12251_v27 }
 0x7a6   :  { %12222 = vmatprep.subr.bf16.mxu0 %v12221_v0  ;;  %12254 = vmatprep.subr.bf16.mxu1 %v12253_v50 }
 0x7a9   :  { %12224 = vmatpush1.bf16.msra.mxu0 %v12223_v23  ;;  %12256 = vmatpush1.bf16.msra.mxu1 %v12255_v20 }
 0x7aa   :  { %12226 = vmatprep.subr.bf16.mxu0 %v12225_v42  ;;  %12258 = vmatprep.subr.bf16.mxu1 %v12257_v47 }
 0x7ad   :  { %12228 = vmatpush1.bf16.msra.mxu0 %v12227_v59  ;;  %12260 = vmatpush1.bf16.msra.mxu1 %v12259_v13 }
 0x7ae   :  { %12230 = vmatprep.subr.bf16.mxu0 %v12229_v25  ;;  %12262 = vmatprep.subr.bf16.mxu1 %v12261_v54 }
 0x7b1   :  { %12232 = vmatpush1.bf16.msra.mxu0 %v12231_v51  ;;  %12264 = vmatpush1.bf16.msra.mxu1 %v12263_v3 }
 0x7b4   :  { %8041 = vmatmul.mubr.f32.vlgmr.msra.gmra.mrb[130].mxu0 %v16792_v7  ;;  %8112 = vmatmul.mubr.f32.vlgmr.msra.gmra.mrb[130].mxu1 %v16792_v7  ;;  %v8172_v7 = vld [vmem:[#allocation16] sm:$0xf] }
 0x7b5   :  { %v8177_v55 = vrot.slane %v8172_v7, %v17726_v53  ;;  %v8181_v26 = vrot.slane %v8172_v7, %v17728_v56  ;;  %v8185_v44 = vrot.slane %v8172_v7, %v17727_v24  ;;  %v8189_v10 = vrot.slane %v8172_v7, %v17729_v31 }
 0x887   :  { %v8042_v48 = vpop.f32.mrb[130].mxu0  ;;  %v8113_v57 = vpop.f32.mrb[130].mxu1 }
 0x888   :  { %v8144_v52 = vadd.f32 %v8127_v29, %v8042_v48  ;;  %v8146_v61 = vadd.f32 %v8135_v32, %v8113_v57  ;;  %v8044_v60 = vpop.f32.mrb[131].mxu0  ;;  %v8115_v35 = vpop.f32.mrb[131].mxu1 }
 0x889   :  { %v8145_v16 = vadd.f32 %v8131_v8, %v8044_v60  ;;  %v8147_v2 = vadd.f32 %v8139_v46, %v8115_v35 }
 0x88a   :  { %v8148_v21 = vmax.f32 %v8144_v52, 0.0  ;;  %v8150_v28 = vmax.f32 %v8146_v61, 0.0 }
 0x88b   :  { %v8149_v1 = vmax.f32 %v8145_v16, 0.0  ;;  %v8151_v40 = vmax.f32 %v8147_v2, 0.0 }
 0x88c   :  { %v8156_v15 = vrot.slane %v8148_v21, 6  ;;  %v8158_v4 = vrot.slane %v8150_v28, 6 }
 0x88d   :  { %v8157_v63 = vrot.slane %v8149_v1, 6  ;;  %v8159_v19 = vrot.slane %v8151_v40, 6 }
 0x88e   :  { %v8164_v58 = vsub.f32 %v8148_v21, %v8156_v15  ;;  %v8166_v38 = vsub.f32 %v8150_v28, %v8158_v4 }
 0x88f   :  { %v8165_v39 = vsub.f32 %v8149_v1, %v8157_v63  ;;  %v8167_v27 = vsub.f32 %v8151_v40, %v8159_v19 }
 0x890   :  { %v8168_v43 = vand.u32 2147483647, %v8164_v58  ;;  %v8170_v0 = vand.u32 2147483647, %v8166_v38 }
 0x891   :  { %v8169_v50 = vand.u32 2147483647, %v8165_v39  ;;  %v8171_v37 = vand.u32 2147483647, %v8167_v27 }
 0x892   :  { %v8194_v18 = vmul.f32 %v8177_v55, %v8168_v43  ;;  %v8196_v41 = vmul.f32 %v8185_v44, %v8170_v0 }
 0x893   :  { %v8195_v9 = vmul.f32 %v8181_v26, %v8169_v50  ;;  %v8197_v23 = vmul.f32 %v8189_v10, %v8171_v37 }
 0x894   :  { %v8199_v36 = vsel %vm8198_vm2, %v8194_v18, 0.0  ;;  %v8202_v17 = vsel %vm8198_vm2, %v8196_v41, 0.0 }
 0x895   :  { %v8200_v20 = vsel %vm8198_vm2, %v8195_v9, 0.0  ;;  %v8204_v47 = vsel %vm8198_vm2, %v8197_v23, 0.0 }
 0x896   :  { %v8201_v6 = vadd.f32 %v8200_v20, %v8199_v36 }
 0x898   :  { %v8203_v42 = vadd.f32 %v8202_v17, %v8201_v6 }
 0x89a   :  { %v8205_v30 = vadd.f32 %v8204_v47, %v8203_v42 }
 0x89c   :  { %8206 = vadd.xlane.f32.xlu0 %v8205_v30 }
 0x929   :  { %v8207_v62 = vpop.xlane.xlu0 %8206 }
 0x92a   :  { %v8215_v33 = vadd.f32 %v8443_v11, %v8207_v62 }
 0x92c   :  { %v8216_v5 = vand.u32 2147483647, %v8215_v33  ;;  %vm8220_vm4 = vcmp.ge.f32.partialorder %v8215_v33, 0.0 }
 0x92e   :  { %v8217_v22 = vsub.f32 0.0, %v8216_v5 }
 0x930   :  { %v8218_v59 = vmul.f32 1.442695, %v8217_v22 }
 0x932   :  { %12595 = vpow2.f32 %v8218_v59 }
 0x93c   :  { %v12596_v13 = vpop.eup %12595 }
 0x93d   :  { %v8221_v49 = vadd.f32 1.0, %v12596_v13 }
 0x93f   :  { %12597 = vrcp.f32 %v8221_v49 }
 0x949   :  { %v12598_v25 = vpop.eup %12597 }
 0x94a   :  { %v8224_v54 = vmul.f32 %v12598_v25, %v12596_v13 }
 0x94c   :  { %v8225_v34 = vsel %vm8220_vm4, %v12598_v25, %v8224_v54 }
 0x94d   :  { %8227 = vst.msk [vmem:[%s16838_s11 - $0x2] sm:$0xc] %vm8226_vm3, %v8225_v34 }
 0x94e   :  { %8232 = vsyncpa [#allocation4], 1 }
 0x94f   :  { %8233 = vsyncpa [#allocation6], 1 }
 0x950   :  { %8234 = vsyncpa [#allocation9], 1 }
 0x951   :  { %8235 = vsyncpa [#allocation12], 1 }
 0x952   :  { %8236 = vsyncpa [#allocation15], 1 }

</bundles_post_ra>
